<compile_context>
chip_gen: v5e
topology: v5e:2x2
jax: 0.10.0
libtpu: 0.0.40
codegen_flags: <defaults>
</compile_context>

<pallas_src>
import jax
import jax.numpy as jnp
from jax.experimental import pallas as pl
from jax.experimental.pallas import tpu as pltpu

# ----- static configuration (mirrors the args the PyTorch __init__ consumes) -----
T = 8                  # args.time_intervals
NW = 6                 # args.num_weather_vars
NS = 4                 # args.num_soil_vars
SD = 6                 # args.soil_depths (6 -> conv branch without AvgPool)
ZDIM = 32              # args.z_dim (LSTM hidden size)
N_EXTRA_VARS = 5       # args.num_extra_vars
OUT_DIM = 1            # len(args.output_names)

N_W = T * NW                           # 48
N_S = SD * NS                          # 24
N_M = 14
N_EXTRA = N_EXTRA_VARS + OUT_DIM       # 6
N_FEAT = N_W + N_S + N_M + N_EXTRA     # 92
REG_IN = 80 + 40 + N_EXTRA             # 126

P1 = SD - 2                            # 4 positions after conv1 (k=3, valid)
P2 = P1 - 2                            # 2 positions after conv2 (k=3, valid)
H4 = 4 * ZDIM                          # 128 fused-gate width (one full lane pass)
OUT_PAD = 128                          # lane-dense output width

TB = 128                               # batch tile (rows per grid step); multiple of 8
ACT_W = NS * 3                         # 12: lane width of the packed activation slab
R_ACT = T + P1 + 1                     # 13: weather rows | patch rows | extra row

# ----- packed parameter-slab layout (every segment row offset is 8-aligned) -----
_SEG_SHAPES = (
    ("wx",     (12, H4)),        # fused LSTM input weights (rows NW:12 zero); sigmoid cols *0.5
    ("wh",     (ZDIM, H4)),      # fused LSTM hidden weights; sigmoid cols *0.5
    ("b4",     (1, H4)),         # fused LSTM bias (b_ih + b_hh); sigmoid cols *0.5
    ("wm_w",   (ZDIM, 80)),
    ("wm_b",   (1, 80)),
    ("c1w",    (NS * 3, 16)),    # conv1 im2col weights (Cin*K, Cout), flat index c*K+k
    ("c1b",    (1, 16)),
    ("c2w",    (3 * 16, 32)),    # conv2 per-tap matrices stacked along rows
    ("c2b",    (1, 32)),
    ("c3w",    (2 * 32, 64)),    # conv3 per-tap matrices stacked along rows
    ("c3b",    (1, 64)),
    ("sf_w",   (64, 40)),
    ("sf_b",   (1, 40)),
    ("r1wm_w", (80, ZDIM)),      # regressor-1 rows for the wm features
    ("r1s_w",  (40, ZDIM)),      # regressor-1 rows for the soil features
    ("r1e_w",  (12, ZDIM)),      # regressor-1 rows for the extra features (rows 6:12 zero)
    ("r1_b",   (1, ZDIM)),
    ("r2_w",   (ZDIM, OUT_PAD)),  # zero-padded to 128 lanes for a lane-dense output store
    ("r2_b",   (1, OUT_PAD)),
)


def _build_offsets():
    offs, r = {}, 0
    for name, (h, w) in _SEG_SHAPES:
        offs[name] = (r, h, w)
        r += ((h + 7) // 8) * 8          # round each segment up to an 8-row boundary
    return offs, r


_OFFS, _SLAB_ROWS = _build_offsets()


# =========================== the Pallas kernel ===========================
def single_year_rnn_kernel(act_ref, p_ref, out_ref, xproj_ref):
    # act_ref : (R_ACT, TB, 12)  packed activations for this batch tile
    # p_ref   : (_SLAB_ROWS, 128) resident parameter slab
    # out_ref : (TB, 128)        lane-dense output (column 0 real)
    # xproj_ref: VMEM (T*TB, 128) scratch for the hoisted LSTM input projection
    f32 = jnp.float32
    H = ZDIM

    def mm(a, b):
        return jnp.dot(a, b, preferred_element_type=f32)

    def seg(name):
        r0, h, w = _OFFS[name]
        return p_ref[r0:r0 + h, 0:w]

    def relu(v):
        return jnp.maximum(v, 0.0)

    # ---- LSTM input projection, hoisted out of the recurrence (per-t, TB-aligned rows) ----
    wx = seg("wx")                                   # (12, 128)
    b4 = seg("b4")                                   # (1, 128)
    for t in range(T):
        xproj_ref[t * TB:(t + 1) * TB, :] = mm(act_ref[t], wx) + b4

    # ---- fused-gate LSTM recurrence (serial; statically unrolled) ----
    # sigmoid(x) = 0.5*tanh(x/2) + 0.5; the x/2 is pre-folded into wx/wh/b4 columns, so each
    # step needs ONE full-tile tanh plus a masked affine (the g-gate lanes stay pure tanh).
    wh = seg("wh")                                   # (32, 128)
    lane = jax.lax.broadcasted_iota(jnp.int32, (1, H4), 1)
    g_sel = (lane >= 2 * H) & (lane < 3 * H)         # tanh (cell-candidate) lanes
    a_post = jnp.where(g_sel, 1.0, 0.5).astype(f32)  # (1, 128)
    b_post = jnp.where(g_sel, 0.0, 0.5).astype(f32)  # (1, 128)

    h = jnp.zeros((TB, H), f32)
    c = jnp.zeros((TB, H), f32)
    for t in range(T):
        gates = xproj_ref[t * TB:(t + 1) * TB, :] + mm(h, wh)   # (TB, 128)
        act = jnp.tanh(gates) * a_post + b_post                 # i|f|o sigmoid, g tanh
        i_g = act[:, 0:H]
        f_g = act[:, H:2 * H]
        g_g = act[:, 2 * H:3 * H]
        o_g = act[:, 3 * H:4 * H]
        c = f_g * c + i_g * g_g
        h = o_g * jnp.tanh(c)
    # X_wm[:, -1, :] of a 1-layer batch_first LSTM == final hidden state h

    wm = relu(mm(h, seg("wm_w")) + seg("wm_b"))                  # wm_fc -> (TB, 80)

    # ---- soil conv stack (independent of the recurrence; scheduler overlaps it) ----
    c1w, c1b = seg("c1w"), seg("c1b")
    y1 = [relu(mm(act_ref[T + p], c1w) + c1b) for p in range(P1)]    # P1 x (TB, 16)
    r2c = _OFFS["c2w"][0]
    y2 = []
    for q in range(P2):
        acc2 = seg("c2b")                                            # (1, 32) broadcasts
        for k in range(3):
            acc2 = acc2 + mm(y1[q + k], p_ref[r2c + 16 * k:r2c + 16 * (k + 1), 0:32])
        y2.append(relu(acc2))                                        # (TB, 32)
    r3c = _OFFS["c3w"][0]
    acc3 = seg("c3b")                                                # (1, 64) broadcasts
    for k in range(2):
        acc3 = acc3 + mm(y2[k], p_ref[r3c + 32 * k:r3c + 32 * (k + 1), 0:64])
    y3 = relu(acc3)                                                  # (TB, 64) (== squeeze(-1))
    soil = relu(mm(y3, seg("sf_w")) + seg("sf_b"))                   # s_fc -> (TB, 40)

    # ---- regressor: r1 split into block matmuls summed into one accumulator ----
    x_extra = act_ref[T + P1]                                        # (TB, 12); lanes 6:12 zero
    hid = relu(mm(wm, seg("r1wm_w")) + mm(soil, seg("r1s_w"))
               + mm(x_extra, seg("r1e_w")) + seg("r1_b"))            # (TB, 32)
    out_ref[...] = mm(hid, seg("r2_w")) + seg("r2_b")                # (TB, 128), full-vreg store


# ------------------------ parameter init (deterministic, PyTorch layouts) ---------------
def init_params(key):
    H = ZDIM

    def uni(k, shape, bound):
        return jax.random.uniform(k, shape, jnp.float32, -bound, bound)

    ks = jax.random.split(key, 18)
    kb = 1.0 / (H ** 0.5)
    p = {}
    p['lstm_w_ih'] = uni(ks[0], (4 * H, NW), kb)
    p['lstm_w_hh'] = uni(ks[1], (4 * H, H), kb)
    p['lstm_b_ih'] = uni(ks[2], (4 * H,), kb)
    p['lstm_b_hh'] = uni(ks[3], (4 * H,), kb)
    p['wm_w'] = uni(ks[4], (80, H), 1.0 / (H ** 0.5))
    p['wm_b'] = uni(ks[5], (80,), 1.0 / (H ** 0.5))
    p['c1_w'] = uni(ks[6], (16, NS, 3), 1.0 / ((NS * 3) ** 0.5))
    p['c1_b'] = uni(ks[7], (16,), 1.0 / ((NS * 3) ** 0.5))
    p['c2_w'] = uni(ks[8], (32, 16, 3), 1.0 / ((16 * 3) ** 0.5))
    p['c2_b'] = uni(ks[9], (32,), 1.0 / ((16 * 3) ** 0.5))
    p['c3_w'] = uni(ks[10], (64, 32, 2), 1.0 / ((32 * 2) ** 0.5))
    p['c3_b'] = uni(ks[11], (64,), 1.0 / ((32 * 2) ** 0.5))
    p['sf_w'] = uni(ks[12], (40, 64), 1.0 / (64 ** 0.5))
    p['sf_b'] = uni(ks[13], (40,), 1.0 / (64 ** 0.5))
    p['r1_w'] = uni(ks[14], (H, REG_IN), 1.0 / (REG_IN ** 0.5))
    p['r1_b'] = uni(ks[15], (H,), 1.0 / (REG_IN ** 0.5))
    p['r2_w'] = uni(ks[16], (OUT_DIM, H), 1.0 / (H ** 0.5))
    p['r2_b'] = uni(ks[17], (OUT_DIM,), 1.0 / (H ** 0.5))
    return p


def prepare_kernel_params(p):
    """Re-layout + pack PyTorch-convention params into ONE lane-dense (rows,128) f32 slab.
    Sigmoid-gate (i|f|o) columns of the LSTM weights/bias are pre-scaled by 0.5 so the kernel
    can use sigmoid(x)=0.5*tanh(x/2)+0.5 with a single tanh per step. Call once, not per call."""
    H = ZDIM
    gate_scale = jnp.concatenate([
        jnp.full((2 * H,), 0.5, jnp.float32),   # i, f -> sigmoid
        jnp.ones((H,), jnp.float32),            # g    -> tanh
        jnp.full((H,), 0.5, jnp.float32),       # o    -> sigmoid
    ])                                           # (4H,)

    segs = {}
    wx = p['lstm_w_ih'].T * gate_scale[None, :]                    # (NW, 4H), gates i|f|g|o
    segs['wx'] = jnp.zeros((12, H4), jnp.float32).at[:NW, :].set(wx)
    segs['wh'] = p['lstm_w_hh'].T * gate_scale[None, :]            # (H, 4H)
    segs['b4'] = ((p['lstm_b_ih'] + p['lstm_b_hh']) * gate_scale).reshape(1, H4)
    segs['wm_w'] = p['wm_w'].T
    segs['wm_b'] = p['wm_b'].reshape(1, -1)
    segs['c1w'] = p['c1_w'].reshape(16, NS * 3).T                  # (12, 16), patch index c*K+k
    segs['c1b'] = p['c1_b'].reshape(1, -1)
    segs['c2w'] = jnp.concatenate([p['c2_w'][:, :, k].T for k in range(3)], axis=0)   # (48, 32)
    segs['c2b'] = p['c2_b'].reshape(1, -1)
    segs['c3w'] = jnp.concatenate([p['c3_w'][:, :, k].T for k in range(2)], axis=0)   # (64, 64)
    segs['c3b'] = p['c3_b'].reshape(1, -1)
    segs['sf_w'] = p['sf_w'].T
    segs['sf_b'] = p['sf_b'].reshape(1, -1)
    r1wT = p['r1_w'].T                                             # (126, 32): wm | soil | extra
    segs['r1wm_w'] = r1wT[0:80, :]
    segs['r1s_w'] = r1wT[80:120, :]
    segs['r1e_w'] = jnp.zeros((12, H), jnp.float32).at[:N_EXTRA, :].set(r1wT[120:REG_IN, :])
    segs['r1_b'] = p['r1_b'].reshape(1, -1)
    segs['r2_w'] = jnp.zeros((H, OUT_PAD), jnp.float32).at[:, :OUT_DIM].set(p['r2_w'].T)
    segs['r2_b'] = jnp.zeros((1, OUT_PAD), jnp.float32).at[:, :OUT_DIM].set(
        p['r2_b'].reshape(1, -1))

    blocks = []
    for name, (h, w) in _SEG_SHAPES:
        a = jnp.asarray(segs[name], jnp.float32)
        assert a.shape == (h, w), (name, a.shape, (h, w))
        blocks.append(jnp.pad(a, ((0, (-h) % 8), (0, 128 - w))))
    slab = jnp.concatenate(blocks, axis=0)
    assert slab.shape == (_SLAB_ROWS, 128), slab.shape
    return slab


# =========================== wrapper ===========================
@jax.jit
def single_year_rnn_forward(X, param_slab):
    n = X.shape[0]
    n_pad = ((n + TB - 1) // TB) * TB
    Xp = jnp.pad(X.astype(jnp.float32), ((0, n_pad - n), (0, 0)))

    # Pack all activations into ONE (R_ACT, n_pad, 12) slab:
    #   rows 0:T      -> weather, time-major, lanes 0:NW
    #   rows T:T+P1   -> conv1 im2col patches, lanes 0:12 (column order c*K + k)
    #   row  T+P1     -> extra vars, lanes 0:6
    x_w = Xp[:, :N_W].reshape(n_pad, NW, T)
    x_tm = jnp.transpose(x_w, (2, 0, 1))                               # (T, n_pad, NW)
    x_s = Xp[:, N_W:N_W + N_S].reshape(n_pad, NS, SD)
    patches = jnp.stack([x_s[:, :, q:q + 3].reshape(n_pad, NS * 3) for q in range(P1)],
                        axis=0)                                        # (P1, n_pad, 12)
    x_extra = Xp[:, N_W + N_S + N_M:]                                  # (n_pad, 6)

    act = jnp.zeros((R_ACT, n_pad, ACT_W), jnp.float32)
    act = act.at[0:T, :, 0:NW].set(x_tm)
    act = act.at[T:T + P1, :, :].set(patches)
    act = act.at[T + P1, :, 0:N_EXTRA].set(x_extra)

    grid = (n_pad // TB,)
    out = pl.pallas_call(
        single_year_rnn_kernel,
        out_shape=jax.ShapeDtypeStruct((n_pad, OUT_PAD), jnp.float32),
        grid_spec=pltpu.PrefetchScalarGridSpec(
            num_scalar_prefetch=0,
            grid=grid,
            in_specs=[
                pl.BlockSpec((R_ACT, TB, ACT_W), lambda i: (0, i, 0)),        # per-tile activations
                pl.BlockSpec((_SLAB_ROWS, 128), lambda i: (0, 0)),            # resident param slab
            ],
            out_specs=pl.BlockSpec((TB, OUT_PAD), lambda i: (i, 0)),
            scratch_shapes=[pltpu.VMEM((T * TB, H4), jnp.float32)],
        ),
        compiler_params=pltpu.CompilerParams(
            dimension_semantics=("parallel",)),   # batch tiles split across cores (v7x: 2 TCs)
    )(act, param_slab)
    return out[:n, :OUT_DIM]


# ------------------------ pure-JAX reference (mirrors the PyTorch forward) ---------------
def reference_forward(X, p):
    H = ZDIM
    x_w = X[:, :N_W].reshape(-1, NW, T)
    x_wm = jnp.transpose(x_w, (0, 2, 1))                          # (B, T, NW)
    bias = p['lstm_b_ih'] + p['lstm_b_hh']
    h = jnp.zeros((X.shape[0], H), jnp.float32)
    c = jnp.zeros((X.shape[0], H), jnp.float32)
    for t in range(T):
        gates = x_wm[:, t, :] @ p['lstm_w_ih'].T + h @ p['lstm_w_hh'].T + bias
        i = jax.nn.sigmoid(gates[:, 0:H])
        f = jax.nn.sigmoid(gates[:, H:2 * H])
        g = jnp.tanh(gates[:, 2 * H:3 * H])
        o = jax.nn.sigmoid(gates[:, 3 * H:4 * H])
        c = f * c + i * g
        h = o * jnp.tanh(c)
    x_wm = jax.nn.relu(h @ p['wm_w'].T + p['wm_b'])

    def conv1d(x, w, b_):
        O, C, K = w.shape
        L = x.shape[2]
        ys = [x[:, :, q:q + K].reshape(x.shape[0], C * K) @ w.reshape(O, C * K).T + b_
              for q in range(L - K + 1)]
        return jnp.stack(ys, axis=2)

    x_s = X[:, N_W:N_W + N_S].reshape(-1, NS, SD)
    x_s = jax.nn.relu(conv1d(x_s, p['c1_w'], p['c1_b']))
    x_s = jax.nn.relu(conv1d(x_s, p['c2_w'], p['c2_b']))
    x_s = jax.nn.relu(conv1d(x_s, p['c3_w'], p['c3_b']))[:, :, 0]
    x_s = jax.nn.relu(x_s @ p['sf_w'].T + p['sf_b'])

    x_extra = X[:, N_W + N_M + N_S:]
    feat = jnp.concatenate([x_wm, x_s, x_extra], axis=1)
    hid = jax.nn.relu(feat @ p['r1_w'].T + p['r1_b'])
    return hid @ p['r2_w'].T + p['r2_b']


if __name__ == "__main__":
    key = jax.random.PRNGKey(0)
    kx, kparam = jax.random.split(key)
    params = init_params(kparam)
    param_slab = prepare_kernel_params(params)   # host-side re-layout done ONCE, not per call

    # Small-batch check (module-scale example: batch=2, 92 features).
    X = jax.random.normal(kx, (2, N_FEAT), jnp.float32)
    out = jax.block_until_ready(single_year_rnn_forward(X, param_slab))
    ref = reference_forward(X, params)
    assert out.shape == (2, OUT_DIM), out.shape
    assert jnp.allclose(out, ref, rtol=1e-4, atol=1e-4), (out, ref)

    # Multi-tile check: exercises the parallel batch grid axis (3 grid steps at TB=128).
    Xb = jax.random.normal(jax.random.PRNGKey(1), (300, N_FEAT), jnp.float32)
    outb = jax.block_until_ready(single_year_rnn_forward(Xb, param_slab))
    refb = reference_forward(Xb, params)
    assert outb.shape == (300, OUT_DIM), outb.shape
    assert jnp.allclose(outb, refb, rtol=1e-4, atol=1e-4)

    print("KERNEL_OK")
</pallas_src>

<mosaic_0001>
module attributes {stable_mosaic.version = 11 : i64} {
  func.func @single_year_rnn_kernel(%arg0: i32, %arg1: memref<13x128x12xf32, #tpu.memory_space<vmem>>, %arg2: memref<504x128xf32, #tpu.memory_space<vmem>>, %arg3: memref<128x128xf32, #tpu.memory_space<vmem>>, %arg4: memref<1024x128xf32, #tpu.memory_space<vmem>>) attributes {dimension_semantics = [#tpu.dimension_semantics<parallel>], iteration_bounds = array<i64: 1>, scalar_prefetch = 0 : i64, scratch_operands = 1 : i64, tpu.core_type = #tpu.core_type<tc>, window_params = [{transform_indices = @transform_0, window_bounds = array<i64: 13, 128, 12>}, {pipeline_mode = #tpu.pipeline_mode<synchronous>, transform_indices = @transform_1, window_bounds = array<i64: 504, 128>}, {transform_indices = @transform_2, window_bounds = array<i64: 128, 128>}]} {
    %c0 = arith.constant 0 : index
    %c0_0 = arith.constant 0 : index
    %0 = vector.load %arg2[%c0, %c0_0] : memref<504x128xf32, #tpu.memory_space<vmem>>, vector<12x128xf32>
    %c48 = arith.constant 48 : index
    %c0_1 = arith.constant 0 : index
    %1 = vector.load %arg2[%c48, %c0_1] : memref<504x128xf32, #tpu.memory_space<vmem>>, vector<1x128xf32>
    %c0_2 = arith.constant 0 : index
    %c0_3 = arith.constant 0 : index
    %c0_4 = arith.constant 0 : index
    %2 = vector.load %arg1[%c0_2, %c0_3, %c0_4] : memref<13x128x12xf32, #tpu.memory_space<vmem>>, vector<1x128x12xf32>
    %3 = vector.shape_cast %2 : vector<1x128x12xf32> to vector<128x12xf32>
    %cst = arith.constant dense<0.000000e+00> : vector<128x128xf32>
    %4 = tpu.matmul %3, %0, %cst {dimension_numbers = #tpu.dot_dimension_numbers<[1], [0], [0], [1], [0, 0, 1, 1], [], []>} : vector<128x12xf32>, vector<12x128xf32>, vector<128x128xf32> -> vector<128x128xf32>
    %5 = vector.broadcast %1 : vector<1x128xf32> to vector<128x128xf32>
    %6 = arith.addf %4, %5 : vector<128x128xf32>
    %c0_5 = arith.constant 0 : index
    %c0_6 = arith.constant 0 : index
    %7 = vector.load %arg4[%c0_5, %c0_6] : memref<1024x128xf32, #tpu.memory_space<vmem>>, vector<128x128xf32>
    tpu.vector_store %arg4[%c0_5, %c0_6], %6 {strides = array<i32>} : memref<1024x128xf32, #tpu.memory_space<vmem>>, vector<128x128xf32>,
    %c1 = arith.constant 1 : index
    %c0_7 = arith.constant 0 : index
    %c0_8 = arith.constant 0 : index
    %8 = vector.load %arg1[%c1, %c0_7, %c0_8] : memref<13x128x12xf32, #tpu.memory_space<vmem>>, vector<1x128x12xf32>
    %9 = vector.shape_cast %8 : vector<1x128x12xf32> to vector<128x12xf32>
    %cst_9 = arith.constant dense<0.000000e+00> : vector<128x128xf32>
    %10 = tpu.matmul %9, %0, %cst_9 {dimension_numbers = #tpu.dot_dimension_numbers<[1], [0], [0], [1], [0, 0, 1, 1], [], []>} : vector<128x12xf32>, vector<12x128xf32>, vector<128x128xf32> -> vector<128x128xf32>
    %11 = vector.broadcast %1 : vector<1x128xf32> to vector<128x128xf32>
    %12 = arith.addf %10, %11 : vector<128x128xf32>
    %c128 = arith.constant 128 : index
    %c0_10 = arith.constant 0 : index
    %13 = vector.load %arg4[%c128, %c0_10] : memref<1024x128xf32, #tpu.memory_space<vmem>>, vector<128x128xf32>
    tpu.vector_store %arg4[%c128, %c0_10], %12 {strides = array<i32>} : memref<1024x128xf32, #tpu.memory_space<vmem>>, vector<128x128xf32>,
    %c2 = arith.constant 2 : index
    %c0_11 = arith.constant 0 : index
    %c0_12 = arith.constant 0 : index
    %14 = vector.load %arg1[%c2, %c0_11, %c0_12] : memref<13x128x12xf32, #tpu.memory_space<vmem>>, vector<1x128x12xf32>
    %15 = vector.shape_cast %14 : vector<1x128x12xf32> to vector<128x12xf32>
    %cst_13 = arith.constant dense<0.000000e+00> : vector<128x128xf32>
    %16 = tpu.matmul %15, %0, %cst_13 {dimension_numbers = #tpu.dot_dimension_numbers<[1], [0], [0], [1], [0, 0, 1, 1], [], []>} : vector<128x12xf32>, vector<12x128xf32>, vector<128x128xf32> -> vector<128x128xf32>
    %17 = vector.broadcast %1 : vector<1x128xf32> to vector<128x128xf32>
    %18 = arith.addf %16, %17 : vector<128x128xf32>
    %c256 = arith.constant 256 : index
    %c0_14 = arith.constant 0 : index
    %19 = vector.load %arg4[%c256, %c0_14] : memref<1024x128xf32, #tpu.memory_space<vmem>>, vector<128x128xf32>
    tpu.vector_store %arg4[%c256, %c0_14], %18 {strides = array<i32>} : memref<1024x128xf32, #tpu.memory_space<vmem>>, vector<128x128xf32>,
    %c3 = arith.constant 3 : index
    %c0_15 = arith.constant 0 : index
    %c0_16 = arith.constant 0 : index
    %20 = vector.load %arg1[%c3, %c0_15, %c0_16] : memref<13x128x12xf32, #tpu.memory_space<vmem>>, vector<1x128x12xf32>
    %21 = vector.shape_cast %20 : vector<1x128x12xf32> to vector<128x12xf32>
    %cst_17 = arith.constant dense<0.000000e+00> : vector<128x128xf32>
    %22 = tpu.matmul %21, %0, %cst_17 {dimension_numbers = #tpu.dot_dimension_numbers<[1], [0], [0], [1], [0, 0, 1, 1], [], []>} : vector<128x12xf32>, vector<12x128xf32>, vector<128x128xf32> -> vector<128x128xf32>
    %23 = vector.broadcast %1 : vector<1x128xf32> to vector<128x128xf32>
    %24 = arith.addf %22, %23 : vector<128x128xf32>
    %c384 = arith.constant 384 : index
    %c0_18 = arith.constant 0 : index
    %25 = vector.load %arg4[%c384, %c0_18] : memref<1024x128xf32, #tpu.memory_space<vmem>>, vector<128x128xf32>
    tpu.vector_store %arg4[%c384, %c0_18], %24 {strides = array<i32>} : memref<1024x128xf32, #tpu.memory_space<vmem>>, vector<128x128xf32>,
    %c4 = arith.constant 4 : index
    %c0_19 = arith.constant 0 : index
    %c0_20 = arith.constant 0 : index
    %26 = vector.load %arg1[%c4, %c0_19, %c0_20] : memref<13x128x12xf32, #tpu.memory_space<vmem>>, vector<1x128x12xf32>
    %27 = vector.shape_cast %26 : vector<1x128x12xf32> to vector<128x12xf32>
    %cst_21 = arith.constant dense<0.000000e+00> : vector<128x128xf32>
    %28 = tpu.matmul %27, %0, %cst_21 {dimension_numbers = #tpu.dot_dimension_numbers<[1], [0], [0], [1], [0, 0, 1, 1], [], []>} : vector<128x12xf32>, vector<12x128xf32>, vector<128x128xf32> -> vector<128x128xf32>
    %29 = vector.broadcast %1 : vector<1x128xf32> to vector<128x128xf32>
    %30 = arith.addf %28, %29 : vector<128x128xf32>
    %c512 = arith.constant 512 : index
    %c0_22 = arith.constant 0 : index
    %31 = vector.load %arg4[%c512, %c0_22] : memref<1024x128xf32, #tpu.memory_space<vmem>>, vector<128x128xf32>
    tpu.vector_store %arg4[%c512, %c0_22], %30 {strides = array<i32>} : memref<1024x128xf32, #tpu.memory_space<vmem>>, vector<128x128xf32>,
    %c5 = arith.constant 5 : index
    %c0_23 = arith.constant 0 : index
    %c0_24 = arith.constant 0 : index
    %32 = vector.load %arg1[%c5, %c0_23, %c0_24] : memref<13x128x12xf32, #tpu.memory_space<vmem>>, vector<1x128x12xf32>
    %33 = vector.shape_cast %32 : vector<1x128x12xf32> to vector<128x12xf32>
    %cst_25 = arith.constant dense<0.000000e+00> : vector<128x128xf32>
    %34 = tpu.matmul %33, %0, %cst_25 {dimension_numbers = #tpu.dot_dimension_numbers<[1], [0], [0], [1], [0, 0, 1, 1], [], []>} : vector<128x12xf32>, vector<12x128xf32>, vector<128x128xf32> -> vector<128x128xf32>
    %35 = vector.broadcast %1 : vector<1x128xf32> to vector<128x128xf32>
    %36 = arith.addf %34, %35 : vector<128x128xf32>
    %c640 = arith.constant 640 : index
    %c0_26 = arith.constant 0 : index
    %37 = vector.load %arg4[%c640, %c0_26] : memref<1024x128xf32, #tpu.memory_space<vmem>>, vector<128x128xf32>
    tpu.vector_store %arg4[%c640, %c0_26], %36 {strides = array<i32>} : memref<1024x128xf32, #tpu.memory_space<vmem>>, vector<128x128xf32>,
    %c6 = arith.constant 6 : index
    %c0_27 = arith.constant 0 : index
    %c0_28 = arith.constant 0 : index
    %38 = vector.load %arg1[%c6, %c0_27, %c0_28] : memref<13x128x12xf32, #tpu.memory_space<vmem>>, vector<1x128x12xf32>
    %39 = vector.shape_cast %38 : vector<1x128x12xf32> to vector<128x12xf32>
    %cst_29 = arith.constant dense<0.000000e+00> : vector<128x128xf32>
    %40 = tpu.matmul %39, %0, %cst_29 {dimension_numbers = #tpu.dot_dimension_numbers<[1], [0], [0], [1], [0, 0, 1, 1], [], []>} : vector<128x12xf32>, vector<12x128xf32>, vector<128x128xf32> -> vector<128x128xf32>
    %41 = vector.broadcast %1 : vector<1x128xf32> to vector<128x128xf32>
    %42 = arith.addf %40, %41 : vector<128x128xf32>
    %c768 = arith.constant 768 : index
    %c0_30 = arith.constant 0 : index
    %43 = vector.load %arg4[%c768, %c0_30] : memref<1024x128xf32, #tpu.memory_space<vmem>>, vector<128x128xf32>
    tpu.vector_store %arg4[%c768, %c0_30], %42 {strides = array<i32>} : memref<1024x128xf32, #tpu.memory_space<vmem>>, vector<128x128xf32>,
    %c7 = arith.constant 7 : index
    %c0_31 = arith.constant 0 : index
    %c0_32 = arith.constant 0 : index
    %44 = vector.load %arg1[%c7, %c0_31, %c0_32] : memref<13x128x12xf32, #tpu.memory_space<vmem>>, vector<1x128x12xf32>
    %45 = vector.shape_cast %44 : vector<1x128x12xf32> to vector<128x12xf32>
    %cst_33 = arith.constant dense<0.000000e+00> : vector<128x128xf32>
    %46 = tpu.matmul %45, %0, %cst_33 {dimension_numbers = #tpu.dot_dimension_numbers<[1], [0], [0], [1], [0, 0, 1, 1], [], []>} : vector<128x12xf32>, vector<12x128xf32>, vector<128x128xf32> -> vector<128x128xf32>
    %47 = vector.broadcast %1 : vector<1x128xf32> to vector<128x128xf32>
    %48 = arith.addf %46, %47 : vector<128x128xf32>
    %c896 = arith.constant 896 : index
    %c0_34 = arith.constant 0 : index
    %49 = vector.load %arg4[%c896, %c0_34] : memref<1024x128xf32, #tpu.memory_space<vmem>>, vector<128x128xf32>
    tpu.vector_store %arg4[%c896, %c0_34], %48 {strides = array<i32>} : memref<1024x128xf32, #tpu.memory_space<vmem>>, vector<128x128xf32>,
    %c16 = arith.constant 16 : index
    %c0_35 = arith.constant 0 : index
    %50 = vector.load %arg2[%c16, %c0_35] : memref<504x128xf32, #tpu.memory_space<vmem>>, vector<32x128xf32>
    %51 = tpu.iota {dimensions = array<i32: 1>} : vector<1x128xi32>
    %c64_i32 = arith.constant 64 : i32
    %52 = vector.broadcast %c64_i32 : i32 to vector<1x128xi32>
    %53 = arith.cmpi sge, %51, %52 : vector<1x128xi32>
    %c96_i32 = arith.constant 96 : i32
    %54 = vector.broadcast %c96_i32 : i32 to vector<1x128xi32>
    %55 = arith.cmpi slt, %51, %54 : vector<1x128xi32>
    %56 = arith.andi %53, %55 : vector<1x128xi1>
    %cst_36 = arith.constant 1.000000e+00 : f32
    %cst_37 = arith.constant 5.000000e-01 : f32
    %57 = vector.broadcast %cst_36 : f32 to vector<1x128xf32>
    %58 = vector.broadcast %cst_37 : f32 to vector<1x128xf32>
    %59 = arith.select %56, %57, %58 : vector<1x128xi1>, vector<1x128xf32>
    %cst_38 = arith.constant 0.000000e+00 : f32
    %cst_39 = arith.constant 5.000000e-01 : f32
    %60 = vector.broadcast %cst_38 : f32 to vector<1x128xf32>
    %61 = vector.broadcast %cst_39 : f32 to vector<1x128xf32>
    %62 = arith.select %56, %60, %61 : vector<1x128xi1>, vector<1x128xf32>
    %cst_40 = arith.constant 0.000000e+00 : f32
    %63 = vector.broadcast %cst_40 : f32 to vector<128x32xf32>
    %cst_41 = arith.constant 0.000000e+00 : f32
    %64 = vector.broadcast %cst_41 : f32 to vector<128x32xf32>
    %c0_42 = arith.constant 0 : index
    %c0_43 = arith.constant 0 : index
    %65 = vector.load %arg4[%c0_42, %c0_43] : memref<1024x128xf32, #tpu.memory_space<vmem>>, vector<128x128xf32>
    %cst_44 = arith.constant dense<0.000000e+00> : vector<128x128xf32>
    %66 = tpu.matmul %63, %50, %cst_44 {dimension_numbers = #tpu.dot_dimension_numbers<[1], [0], [0], [1], [0, 0, 1, 1], [], []>} : vector<128x32xf32>, vector<32x128xf32>, vector<128x128xf32> -> vector<128x128xf32>
    %67 = arith.addf %65, %66 : vector<128x128xf32>
    %68 = math.tanh %67 : vector<128x128xf32>
    %69 = vector.broadcast %59 : vector<1x128xf32> to vector<128x128xf32>
    %70 = arith.mulf %68, %69 : vector<128x128xf32>
    %71 = vector.broadcast %62 : vector<1x128xf32> to vector<128x128xf32>
    %72 = arith.addf %70, %71 : vector<128x128xf32>
    %73 = vector.extract_strided_slice %72 {offsets = [0, 0], sizes = [128, 32], strides = [1, 1]} : vector<128x128xf32> to vector<128x32xf32>
    %74 = vector.extract_strided_slice %72 {offsets = [0, 32], sizes = [128, 32], strides = [1, 1]} : vector<128x128xf32> to vector<128x32xf32>
    %75 = vector.extract_strided_slice %72 {offsets = [0, 64], sizes = [128, 32], strides = [1, 1]} : vector<128x128xf32> to vector<128x32xf32>
    %76 = vector.extract_strided_slice %72 {offsets = [0, 96], sizes = [128, 32], strides = [1, 1]} : vector<128x128xf32> to vector<128x32xf32>
    %77 = arith.mulf %74, %64 : vector<128x32xf32>
    %78 = arith.mulf %73, %75 : vector<128x32xf32>
    %79 = arith.addf %77, %78 : vector<128x32xf32>
    %80 = math.tanh %79 : vector<128x32xf32>
    %81 = arith.mulf %76, %80 : vector<128x32xf32>
    %c128_45 = arith.constant 128 : index
    %c0_46 = arith.constant 0 : index
    %82 = vector.load %arg4[%c128_45, %c0_46] : memref<1024x128xf32, #tpu.memory_space<vmem>>, vector<128x128xf32>
    %cst_47 = arith.constant dense<0.000000e+00> : vector<128x128xf32>
    %83 = tpu.matmul %81, %50, %cst_47 {dimension_numbers = #tpu.dot_dimension_numbers<[1], [0], [0], [1], [0, 0, 1, 1], [], []>} : vector<128x32xf32>, vector<32x128xf32>, vector<128x128xf32> -> vector<128x128xf32>
    %84 = arith.addf %82, %83 : vector<128x128xf32>
    %85 = math.tanh %84 : vector<128x128xf32>
    %86 = vector.broadcast %59 : vector<1x128xf32> to vector<128x128xf32>
    %87 = arith.mulf %85, %86 : vector<128x128xf32>
    %88 = vector.broadcast %62 : vector<1x128xf32> to vector<128x128xf32>
    %89 = arith.addf %87, %88 : vector<128x128xf32>
    %90 = vector.extract_strided_slice %89 {offsets = [0, 0], sizes = [128, 32], strides = [1, 1]} : vector<128x128xf32> to vector<128x32xf32>
    %91 = vector.extract_strided_slice %89 {offsets = [0, 32], sizes = [128, 32], strides = [1, 1]} : vector<128x128xf32> to vector<128x32xf32>
    %92 = vector.extract_strided_slice %89 {offsets = [0, 64], sizes = [128, 32], strides = [1, 1]} : vector<128x128xf32> to vector<128x32xf32>
    %93 = vector.extract_strided_slice %89 {offsets = [0, 96], sizes = [128, 32], strides = [1, 1]} : vector<128x128xf32> to vector<128x32xf32>
    %94 = arith.mulf %91, %79 : vector<128x32xf32>
    %95 = arith.mulf %90, %92 : vector<128x32xf32>
    %96 = arith.addf %94, %95 : vector<128x32xf32>
    %97 = math.tanh %96 : vector<128x32xf32>
    %98 = arith.mulf %93, %97 : vector<128x32xf32>
    %c256_48 = arith.constant 256 : index
    %c0_49 = arith.constant 0 : index
    %99 = vector.load %arg4[%c256_48, %c0_49] : memref<1024x128xf32, #tpu.memory_space<vmem>>, vector<128x128xf32>
    %cst_50 = arith.constant dense<0.000000e+00> : vector<128x128xf32>
    %100 = tpu.matmul %98, %50, %cst_50 {dimension_numbers = #tpu.dot_dimension_numbers<[1], [0], [0], [1], [0, 0, 1, 1], [], []>} : vector<128x32xf32>, vector<32x128xf32>, vector<128x128xf32> -> vector<128x128xf32>
    %101 = arith.addf %99, %100 : vector<128x128xf32>
    %102 = math.tanh %101 : vector<128x128xf32>
    %103 = vector.broadcast %59 : vector<1x128xf32> to vector<128x128xf32>
    %104 = arith.mulf %102, %103 : vector<128x128xf32>
    %105 = vector.broadcast %62 : vector<1x128xf32> to vector<128x128xf32>
    %106 = arith.addf %104, %105 : vector<128x128xf32>
    %107 = vector.extract_strided_slice %106 {offsets = [0, 0], sizes = [128, 32], strides = [1, 1]} : vector<128x128xf32> to vector<128x32xf32>
    %108 = vector.extract_strided_slice %106 {offsets = [0, 32], sizes = [128, 32], strides = [1, 1]} : vector<128x128xf32> to vector<128x32xf32>
    %109 = vector.extract_strided_slice %106 {offsets = [0, 64], sizes = [128, 32], strides = [1, 1]} : vector<128x128xf32> to vector<128x32xf32>
    %110 = vector.extract_strided_slice %106 {offsets = [0, 96], sizes = [128, 32], strides = [1, 1]} : vector<128x128xf32> to vector<128x32xf32>
    %111 = arith.mulf %108, %96 : vector<128x32xf32>
    %112 = arith.mulf %107, %109 : vector<128x32xf32>
    %113 = arith.addf %111, %112 : vector<128x32xf32>
    %114 = math.tanh %113 : vector<128x32xf32>
    %115 = arith.mulf %110, %114 : vector<128x32xf32>
    %c384_51 = arith.constant 384 : index
    %c0_52 = arith.constant 0 : index
    %116 = vector.load %arg4[%c384_51, %c0_52] : memref<1024x128xf32, #tpu.memory_space<vmem>>, vector<128x128xf32>
    %cst_53 = arith.constant dense<0.000000e+00> : vector<128x128xf32>
    %117 = tpu.matmul %115, %50, %cst_53 {dimension_numbers = #tpu.dot_dimension_numbers<[1], [0], [0], [1], [0, 0, 1, 1], [], []>} : vector<128x32xf32>, vector<32x128xf32>, vector<128x128xf32> -> vector<128x128xf32>
    %118 = arith.addf %116, %117 : vector<128x128xf32>
    %119 = math.tanh %118 : vector<128x128xf32>
    %120 = vector.broadcast %59 : vector<1x128xf32> to vector<128x128xf32>
    %121 = arith.mulf %119, %120 : vector<128x128xf32>
    %122 = vector.broadcast %62 : vector<1x128xf32> to vector<128x128xf32>
    %123 = arith.addf %121, %122 : vector<128x128xf32>
    %124 = vector.extract_strided_slice %123 {offsets = [0, 0], sizes = [128, 32], strides = [1, 1]} : vector<128x128xf32> to vector<128x32xf32>
    %125 = vector.extract_strided_slice %123 {offsets = [0, 32], sizes = [128, 32], strides = [1, 1]} : vector<128x128xf32> to vector<128x32xf32>
    %126 = vector.extract_strided_slice %123 {offsets = [0, 64], sizes = [128, 32], strides = [1, 1]} : vector<128x128xf32> to vector<128x32xf32>
    %127 = vector.extract_strided_slice %123 {offsets = [0, 96], sizes = [128, 32], strides = [1, 1]} : vector<128x128xf32> to vector<128x32xf32>
    %128 = arith.mulf %125, %113 : vector<128x32xf32>
    %129 = arith.mulf %124, %126 : vector<128x32xf32>
    %130 = arith.addf %128, %129 : vector<128x32xf32>
    %131 = math.tanh %130 : vector<128x32xf32>
    %132 = arith.mulf %127, %131 : vector<128x32xf32>
    %c512_54 = arith.constant 512 : index
    %c0_55 = arith.constant 0 : index
    %133 = vector.load %arg4[%c512_54, %c0_55] : memref<1024x128xf32, #tpu.memory_space<vmem>>, vector<128x128xf32>
    %cst_56 = arith.constant dense<0.000000e+00> : vector<128x128xf32>
    %134 = tpu.matmul %132, %50, %cst_56 {dimension_numbers = #tpu.dot_dimension_numbers<[1], [0], [0], [1], [0, 0, 1, 1], [], []>} : vector<128x32xf32>, vector<32x128xf32>, vector<128x128xf32> -> vector<128x128xf32>
    %135 = arith.addf %133, %134 : vector<128x128xf32>
    %136 = math.tanh %135 : vector<128x128xf32>
    %137 = vector.broadcast %59 : vector<1x128xf32> to vector<128x128xf32>
    %138 = arith.mulf %136, %137 : vector<128x128xf32>
    %139 = vector.broadcast %62 : vector<1x128xf32> to vector<128x128xf32>
    %140 = arith.addf %138, %139 : vector<128x128xf32>
    %141 = vector.extract_strided_slice %140 {offsets = [0, 0], sizes = [128, 32], strides = [1, 1]} : vector<128x128xf32> to vector<128x32xf32>
    %142 = vector.extract_strided_slice %140 {offsets = [0, 32], sizes = [128, 32], strides = [1, 1]} : vector<128x128xf32> to vector<128x32xf32>
    %143 = vector.extract_strided_slice %140 {offsets = [0, 64], sizes = [128, 32], strides = [1, 1]} : vector<128x128xf32> to vector<128x32xf32>
    %144 = vector.extract_strided_slice %140 {offsets = [0, 96], sizes = [128, 32], strides = [1, 1]} : vector<128x128xf32> to vector<128x32xf32>
    %145 = arith.mulf %142, %130 : vector<128x32xf32>
    %146 = arith.mulf %141, %143 : vector<128x32xf32>
    %147 = arith.addf %145, %146 : vector<128x32xf32>
    %148 = math.tanh %147 : vector<128x32xf32>
    %149 = arith.mulf %144, %148 : vector<128x32xf32>
    %c640_57 = arith.constant 640 : index
    %c0_58 = arith.constant 0 : index
    %150 = vector.load %arg4[%c640_57, %c0_58] : memref<1024x128xf32, #tpu.memory_space<vmem>>, vector<128x128xf32>
    %cst_59 = arith.constant dense<0.000000e+00> : vector<128x128xf32>
    %151 = tpu.matmul %149, %50, %cst_59 {dimension_numbers = #tpu.dot_dimension_numbers<[1], [0], [0], [1], [0, 0, 1, 1], [], []>} : vector<128x32xf32>, vector<32x128xf32>, vector<128x128xf32> -> vector<128x128xf32>
    %152 = arith.addf %150, %151 : vector<128x128xf32>
    %153 = math.tanh %152 : vector<128x128xf32>
    %154 = vector.broadcast %59 : vector<1x128xf32> to vector<128x128xf32>
    %155 = arith.mulf %153, %154 : vector<128x128xf32>
    %156 = vector.broadcast %62 : vector<1x128xf32> to vector<128x128xf32>
    %157 = arith.addf %155, %156 : vector<128x128xf32>
    %158 = vector.extract_strided_slice %157 {offsets = [0, 0], sizes = [128, 32], strides = [1, 1]} : vector<128x128xf32> to vector<128x32xf32>
    %159 = vector.extract_strided_slice %157 {offsets = [0, 32], sizes = [128, 32], strides = [1, 1]} : vector<128x128xf32> to vector<128x32xf32>
    %160 = vector.extract_strided_slice %157 {offsets = [0, 64], sizes = [128, 32], strides = [1, 1]} : vector<128x128xf32> to vector<128x32xf32>
    %161 = vector.extract_strided_slice %157 {offsets = [0, 96], sizes = [128, 32], strides = [1, 1]} : vector<128x128xf32> to vector<128x32xf32>
    %162 = arith.mulf %159, %147 : vector<128x32xf32>
    %163 = arith.mulf %158, %160 : vector<128x32xf32>
    %164 = arith.addf %162, %163 : vector<128x32xf32>
    %165 = math.tanh %164 : vector<128x32xf32>
    %166 = arith.mulf %161, %165 : vector<128x32xf32>
    %c768_60 = arith.constant 768 : index
    %c0_61 = arith.constant 0 : index
    %167 = vector.load %arg4[%c768_60, %c0_61] : memref<1024x128xf32, #tpu.memory_space<vmem>>, vector<128x128xf32>
    %cst_62 = arith.constant dense<0.000000e+00> : vector<128x128xf32>
    %168 = tpu.matmul %166, %50, %cst_62 {dimension_numbers = #tpu.dot_dimension_numbers<[1], [0], [0], [1], [0, 0, 1, 1], [], []>} : vector<128x32xf32>, vector<32x128xf32>, vector<128x128xf32> -> vector<128x128xf32>
    %169 = arith.addf %167, %168 : vector<128x128xf32>
    %170 = math.tanh %169 : vector<128x128xf32>
    %171 = vector.broadcast %59 : vector<1x128xf32> to vector<128x128xf32>
    %172 = arith.mulf %170, %171 : vector<128x128xf32>
    %173 = vector.broadcast %62 : vector<1x128xf32> to vector<128x128xf32>
    %174 = arith.addf %172, %173 : vector<128x128xf32>
    %175 = vector.extract_strided_slice %174 {offsets = [0, 0], sizes = [128, 32], strides = [1, 1]} : vector<128x128xf32> to vector<128x32xf32>
    %176 = vector.extract_strided_slice %174 {offsets = [0, 32], sizes = [128, 32], strides = [1, 1]} : vector<128x128xf32> to vector<128x32xf32>
    %177 = vector.extract_strided_slice %174 {offsets = [0, 64], sizes = [128, 32], strides = [1, 1]} : vector<128x128xf32> to vector<128x32xf32>
    %178 = vector.extract_strided_slice %174 {offsets = [0, 96], sizes = [128, 32], strides = [1, 1]} : vector<128x128xf32> to vector<128x32xf32>
    %179 = arith.mulf %176, %164 : vector<128x32xf32>
    %180 = arith.mulf %175, %177 : vector<128x32xf32>
    %181 = arith.addf %179, %180 : vector<128x32xf32>
    %182 = math.tanh %181 : vector<128x32xf32>
    %183 = arith.mulf %178, %182 : vector<128x32xf32>
    %c896_63 = arith.constant 896 : index
    %c0_64 = arith.constant 0 : index
    %184 = vector.load %arg4[%c896_63, %c0_64] : memref<1024x128xf32, #tpu.memory_space<vmem>>, vector<128x128xf32>
    %cst_65 = arith.constant dense<0.000000e+00> : vector<128x128xf32>
    %185 = tpu.matmul %183, %50, %cst_65 {dimension_numbers = #tpu.dot_dimension_numbers<[1], [0], [0], [1], [0, 0, 1, 1], [], []>} : vector<128x32xf32>, vector<32x128xf32>, vector<128x128xf32> -> vector<128x128xf32>
    %186 = arith.addf %184, %185 : vector<128x128xf32>
    %187 = math.tanh %186 : vector<128x128xf32>
    %188 = vector.broadcast %59 : vector<1x128xf32> to vector<128x128xf32>
    %189 = arith.mulf %187, %188 : vector<128x128xf32>
    %190 = vector.broadcast %62 : vector<1x128xf32> to vector<128x128xf32>
    %191 = arith.addf %189, %190 : vector<128x128xf32>
    %192 = vector.extract_strided_slice %191 {offsets = [0, 0], sizes = [128, 32], strides = [1, 1]} : vector<128x128xf32> to vector<128x32xf32>
    %193 = vector.extract_strided_slice %191 {offsets = [0, 32], sizes = [128, 32], strides = [1, 1]} : vector<128x128xf32> to vector<128x32xf32>
    %194 = vector.extract_strided_slice %191 {offsets = [0, 64], sizes = [128, 32], strides = [1, 1]} : vector<128x128xf32> to vector<128x32xf32>
    %195 = vector.extract_strided_slice %191 {offsets = [0, 96], sizes = [128, 32], strides = [1, 1]} : vector<128x128xf32> to vector<128x32xf32>
    %196 = arith.mulf %193, %181 : vector<128x32xf32>
    %197 = arith.mulf %192, %194 : vector<128x32xf32>
    %198 = arith.addf %196, %197 : vector<128x32xf32>
    %199 = math.tanh %198 : vector<128x32xf32>
    %200 = arith.mulf %195, %199 : vector<128x32xf32>
    %c56 = arith.constant 56 : index
    %c0_66 = arith.constant 0 : index
    %201 = vector.load %arg2[%c56, %c0_66] : memref<504x128xf32, #tpu.memory_space<vmem>>, vector<32x80xf32>
    %cst_67 = arith.constant dense<0.000000e+00> : vector<128x80xf32>
    %202 = tpu.matmul %200, %201, %cst_67 {dimension_numbers = #tpu.dot_dimension_numbers<[1], [0], [0], [1], [0, 0, 1, 1], [], []>} : vector<128x32xf32>, vector<32x80xf32>, vector<128x80xf32> -> vector<128x80xf32>
    %c88 = arith.constant 88 : index
    %c0_68 = arith.constant 0 : index
    %203 = vector.load %arg2[%c88, %c0_68] : memref<504x128xf32, #tpu.memory_space<vmem>>, vector<1x80xf32>
    %204 = vector.broadcast %203 : vector<1x80xf32> to vector<128x80xf32>
    %205 = arith.addf %202, %204 : vector<128x80xf32>
    %cst_69 = arith.constant 0.000000e+00 : f32
    %206 = vector.broadcast %cst_69 : f32 to vector<128x80xf32>
    %207 = arith.maximumf %205, %206 : vector<128x80xf32>
    %c96 = arith.constant 96 : index
    %c0_70 = arith.constant 0 : index
    %208 = vector.load %arg2[%c96, %c0_70] : memref<504x128xf32, #tpu.memory_space<vmem>>, vector<12x16xf32>
    %c112 = arith.constant 112 : index
    %c0_71 = arith.constant 0 : index
    %209 = vector.load %arg2[%c112, %c0_71] : memref<504x128xf32, #tpu.memory_space<vmem>>, vector<1x16xf32>
    %c8 = arith.constant 8 : index
    %c0_72 = arith.constant 0 : index
    %c0_73 = arith.constant 0 : index
    %210 = vector.load %arg1[%c8, %c0_72, %c0_73] : memref<13x128x12xf32, #tpu.memory_space<vmem>>, vector<1x128x12xf32>
    %211 = vector.shape_cast %210 : vector<1x128x12xf32> to vector<128x12xf32>
    %cst_74 = arith.constant dense<0.000000e+00> : vector<128x16xf32>
    %212 = tpu.matmul %211, %208, %cst_74 {dimension_numbers = #tpu.dot_dimension_numbers<[1], [0], [0], [1], [0, 0, 1, 1], [], []>} : vector<128x12xf32>, vector<12x16xf32>, vector<128x16xf32> -> vector<128x16xf32>
    %213 = vector.broadcast %209 : vector<1x16xf32> to vector<128x16xf32>
    %214 = arith.addf %212, %213 : vector<128x16xf32>
    %cst_75 = arith.constant 0.000000e+00 : f32
    %215 = vector.broadcast %cst_75 : f32 to vector<128x16xf32>
    %216 = arith.maximumf %214, %215 : vector<128x16xf32>
    %c9 = arith.constant 9 : index
    %c0_76 = arith.constant 0 : index
    %c0_77 = arith.constant 0 : index
    %217 = vector.load %arg1[%c9, %c0_76, %c0_77] : memref<13x128x12xf32, #tpu.memory_space<vmem>>, vector<1x128x12xf32>
    %218 = vector.shape_cast %217 : vector<1x128x12xf32> to vector<128x12xf32>
    %cst_78 = arith.constant dense<0.000000e+00> : vector<128x16xf32>
    %219 = tpu.matmul %218, %208, %cst_78 {dimension_numbers = #tpu.dot_dimension_numbers<[1], [0], [0], [1], [0, 0, 1, 1], [], []>} : vector<128x12xf32>, vector<12x16xf32>, vector<128x16xf32> -> vector<128x16xf32>
    %220 = vector.broadcast %209 : vector<1x16xf32> to vector<128x16xf32>
    %221 = arith.addf %219, %220 : vector<128x16xf32>
    %cst_79 = arith.constant 0.000000e+00 : f32
    %222 = vector.broadcast %cst_79 : f32 to vector<128x16xf32>
    %223 = arith.maximumf %221, %222 : vector<128x16xf32>
    %c10 = arith.constant 10 : index
    %c0_80 = arith.constant 0 : index
    %c0_81 = arith.constant 0 : index
    %224 = vector.load %arg1[%c10, %c0_80, %c0_81] : memref<13x128x12xf32, #tpu.memory_space<vmem>>, vector<1x128x12xf32>
    %225 = vector.shape_cast %224 : vector<1x128x12xf32> to vector<128x12xf32>
    %cst_82 = arith.constant dense<0.000000e+00> : vector<128x16xf32>
    %226 = tpu.matmul %225, %208, %cst_82 {dimension_numbers = #tpu.dot_dimension_numbers<[1], [0], [0], [1], [0, 0, 1, 1], [], []>} : vector<128x12xf32>, vector<12x16xf32>, vector<128x16xf32> -> vector<128x16xf32>
    %227 = vector.broadcast %209 : vector<1x16xf32> to vector<128x16xf32>
    %228 = arith.addf %226, %227 : vector<128x16xf32>
    %cst_83 = arith.constant 0.000000e+00 : f32
    %229 = vector.broadcast %cst_83 : f32 to vector<128x16xf32>
    %230 = arith.maximumf %228, %229 : vector<128x16xf32>
    %c11 = arith.constant 11 : index
    %c0_84 = arith.constant 0 : index
    %c0_85 = arith.constant 0 : index
    %231 = vector.load %arg1[%c11, %c0_84, %c0_85] : memref<13x128x12xf32, #tpu.memory_space<vmem>>, vector<1x128x12xf32>
    %232 = vector.shape_cast %231 : vector<1x128x12xf32> to vector<128x12xf32>
    %cst_86 = arith.constant dense<0.000000e+00> : vector<128x16xf32>
    %233 = tpu.matmul %232, %208, %cst_86 {dimension_numbers = #tpu.dot_dimension_numbers<[1], [0], [0], [1], [0, 0, 1, 1], [], []>} : vector<128x12xf32>, vector<12x16xf32>, vector<128x16xf32> -> vector<128x16xf32>
    %234 = vector.broadcast %209 : vector<1x16xf32> to vector<128x16xf32>
    %235 = arith.addf %233, %234 : vector<128x16xf32>
    %cst_87 = arith.constant 0.000000e+00 : f32
    %236 = vector.broadcast %cst_87 : f32 to vector<128x16xf32>
    %237 = arith.maximumf %235, %236 : vector<128x16xf32>
    %c168 = arith.constant 168 : index
    %c0_88 = arith.constant 0 : index
    %238 = vector.load %arg2[%c168, %c0_88] : memref<504x128xf32, #tpu.memory_space<vmem>>, vector<1x32xf32>
    %c120 = arith.constant 120 : index
    %c0_89 = arith.constant 0 : index
    %239 = vector.load %arg2[%c120, %c0_89] : memref<504x128xf32, #tpu.memory_space<vmem>>, vector<16x32xf32>
    %cst_90 = arith.constant dense<0.000000e+00> : vector<128x32xf32>
    %240 = tpu.matmul %216, %239, %cst_90 {dimension_numbers = #tpu.dot_dimension_numbers<[1], [0], [0], [1], [0, 0, 1, 1], [], []>} : vector<128x16xf32>, vector<16x32xf32>, vector<128x32xf32> -> vector<128x32xf32>
    %241 = vector.broadcast %238 : vector<1x32xf32> to vector<128x32xf32>
    %242 = arith.addf %241, %240 : vector<128x32xf32>
    %c136 = arith.constant 136 : index
    %c0_91 = arith.constant 0 : index
    %243 = vector.load %arg2[%c136, %c0_91] : memref<504x128xf32, #tpu.memory_space<vmem>>, vector<16x32xf32>
    %cst_92 = arith.constant dense<0.000000e+00> : vector<128x32xf32>
    %244 = tpu.matmul %223, %243, %cst_92 {dimension_numbers = #tpu.dot_dimension_numbers<[1], [0], [0], [1], [0, 0, 1, 1], [], []>} : vector<128x16xf32>, vector<16x32xf32>, vector<128x32xf32> -> vector<128x32xf32>
    %245 = arith.addf %242, %244 : vector<128x32xf32>
    %c152 = arith.constant 152 : index
    %c0_93 = arith.constant 0 : index
    %246 = vector.load %arg2[%c152, %c0_93] : memref<504x128xf32, #tpu.memory_space<vmem>>, vector<16x32xf32>
    %cst_94 = arith.constant dense<0.000000e+00> : vector<128x32xf32>
    %247 = tpu.matmul %230, %246, %cst_94 {dimension_numbers = #tpu.dot_dimension_numbers<[1], [0], [0], [1], [0, 0, 1, 1], [], []>} : vector<128x16xf32>, vector<16x32xf32>, vector<128x32xf32> -> vector<128x32xf32>
    %248 = arith.addf %245, %247 : vector<128x32xf32>
    %cst_95 = arith.constant 0.000000e+00 : f32
    %249 = vector.broadcast %cst_95 : f32 to vector<128x32xf32>
    %250 = arith.maximumf %248, %249 : vector<128x32xf32>
    %c168_96 = arith.constant 168 : index
    %c0_97 = arith.constant 0 : index
    %251 = vector.load %arg2[%c168_96, %c0_97] : memref<504x128xf32, #tpu.memory_space<vmem>>, vector<1x32xf32>
    %c120_98 = arith.constant 120 : index
    %c0_99 = arith.constant 0 : index
    %252 = vector.load %arg2[%c120_98, %c0_99] : memref<504x128xf32, #tpu.memory_space<vmem>>, vector<16x32xf32>
    %cst_100 = arith.constant dense<0.000000e+00> : vector<128x32xf32>
    %253 = tpu.matmul %223, %252, %cst_100 {dimension_numbers = #tpu.dot_dimension_numbers<[1], [0], [0], [1], [0, 0, 1, 1], [], []>} : vector<128x16xf32>, vector<16x32xf32>, vector<128x32xf32> -> vector<128x32xf32>
    %254 = vector.broadcast %251 : vector<1x32xf32> to vector<128x32xf32>
    %255 = arith.addf %254, %253 : vector<128x32xf32>
    %c136_101 = arith.constant 136 : index
    %c0_102 = arith.constant 0 : index
    %256 = vector.load %arg2[%c136_101, %c0_102] : memref<504x128xf32, #tpu.memory_space<vmem>>, vector<16x32xf32>
    %cst_103 = arith.constant dense<0.000000e+00> : vector<128x32xf32>
    %257 = tpu.matmul %230, %256, %cst_103 {dimension_numbers = #tpu.dot_dimension_numbers<[1], [0], [0], [1], [0, 0, 1, 1], [], []>} : vector<128x16xf32>, vector<16x32xf32>, vector<128x32xf32> -> vector<128x32xf32>
    %258 = arith.addf %255, %257 : vector<128x32xf32>
    %c152_104 = arith.constant 152 : index
    %c0_105 = arith.constant 0 : index
    %259 = vector.load %arg2[%c152_104, %c0_105] : memref<504x128xf32, #tpu.memory_space<vmem>>, vector<16x32xf32>
    %cst_106 = arith.constant dense<0.000000e+00> : vector<128x32xf32>
    %260 = tpu.matmul %237, %259, %cst_106 {dimension_numbers = #tpu.dot_dimension_numbers<[1], [0], [0], [1], [0, 0, 1, 1], [], []>} : vector<128x16xf32>, vector<16x32xf32>, vector<128x32xf32> -> vector<128x32xf32>
    %261 = arith.addf %258, %260 : vector<128x32xf32>
    %cst_107 = arith.constant 0.000000e+00 : f32
    %262 = vector.broadcast %cst_107 : f32 to vector<128x32xf32>
    %263 = arith.maximumf %261, %262 : vector<128x32xf32>
    %c240 = arith.constant 240 : index
    %c0_108 = arith.constant 0 : index
    %264 = vector.load %arg2[%c240, %c0_108] : memref<504x128xf32, #tpu.memory_space<vmem>>, vector<1x64xf32>
    %c176 = arith.constant 176 : index
    %c0_109 = arith.constant 0 : index
    %265 = vector.load %arg2[%c176, %c0_109] : memref<504x128xf32, #tpu.memory_space<vmem>>, vector<32x64xf32>
    %cst_110 = arith.constant dense<0.000000e+00> : vector<128x64xf32>
    %266 = tpu.matmul %250, %265, %cst_110 {dimension_numbers = #tpu.dot_dimension_numbers<[1], [0], [0], [1], [0, 0, 1, 1], [], []>} : vector<128x32xf32>, vector<32x64xf32>, vector<128x64xf32> -> vector<128x64xf32>
    %267 = vector.broadcast %264 : vector<1x64xf32> to vector<128x64xf32>
    %268 = arith.addf %267, %266 : vector<128x64xf32>
    %c208 = arith.constant 208 : index
    %c0_111 = arith.constant 0 : index
    %269 = vector.load %arg2[%c208, %c0_111] : memref<504x128xf32, #tpu.memory_space<vmem>>, vector<32x64xf32>
    %cst_112 = arith.constant dense<0.000000e+00> : vector<128x64xf32>
    %270 = tpu.matmul %263, %269, %cst_112 {dimension_numbers = #tpu.dot_dimension_numbers<[1], [0], [0], [1], [0, 0, 1, 1], [], []>} : vector<128x32xf32>, vector<32x64xf32>, vector<128x64xf32> -> vector<128x64xf32>
    %271 = arith.addf %268, %270 : vector<128x64xf32>
    %cst_113 = arith.constant 0.000000e+00 : f32
    %272 = vector.broadcast %cst_113 : f32 to vector<128x64xf32>
    %273 = arith.maximumf %271, %272 : vector<128x64xf32>
    %c248 = arith.constant 248 : index
    %c0_114 = arith.constant 0 : index
    %274 = vector.load %arg2[%c248, %c0_114] : memref<504x128xf32, #tpu.memory_space<vmem>>, vector<64x40xf32>
    %cst_115 = arith.constant dense<0.000000e+00> : vector<128x40xf32>
    %275 = tpu.matmul %273, %274, %cst_115 {dimension_numbers = #tpu.dot_dimension_numbers<[1], [0], [0], [1], [0, 0, 1, 1], [], []>} : vector<128x64xf32>, vector<64x40xf32>, vector<128x40xf32> -> vector<128x40xf32>
    %c312 = arith.constant 312 : index
    %c0_116 = arith.constant 0 : index
    %276 = vector.load %arg2[%c312, %c0_116] : memref<504x128xf32, #tpu.memory_space<vmem>>, vector<1x40xf32>
    %277 = vector.broadcast %276 : vector<1x40xf32> to vector<128x40xf32>
    %278 = arith.addf %275, %277 : vector<128x40xf32>
    %cst_117 = arith.constant 0.000000e+00 : f32
    %279 = vector.broadcast %cst_117 : f32 to vector<128x40xf32>
    %280 = arith.maximumf %278, %279 : vector<128x40xf32>
    %c12 = arith.constant 12 : index
    %c0_118 = arith.constant 0 : index
    %c0_119 = arith.constant 0 : index
    %281 = vector.load %arg1[%c12, %c0_118, %c0_119] : memref<13x128x12xf32, #tpu.memory_space<vmem>>, vector<1x128x12xf32>
    %282 = vector.shape_cast %281 : vector<1x128x12xf32> to vector<128x12xf32>
    %c320 = arith.constant 320 : index
    %c0_120 = arith.constant 0 : index
    %283 = vector.load %arg2[%c320, %c0_120] : memref<504x128xf32, #tpu.memory_space<vmem>>, vector<80x32xf32>
    %cst_121 = arith.constant dense<0.000000e+00> : vector<128x32xf32>
    %284 = tpu.matmul %207, %283, %cst_121 {dimension_numbers = #tpu.dot_dimension_numbers<[1], [0], [0], [1], [0, 0, 1, 1], [], []>} : vector<128x80xf32>, vector<80x32xf32>, vector<128x32xf32> -> vector<128x32xf32>
    %c400 = arith.constant 400 : index
    %c0_122 = arith.constant 0 : index
    %285 = vector.load %arg2[%c400, %c0_122] : memref<504x128xf32, #tpu.memory_space<vmem>>, vector<40x32xf32>
    %cst_123 = arith.constant dense<0.000000e+00> : vector<128x32xf32>
    %286 = tpu.matmul %280, %285, %cst_123 {dimension_numbers = #tpu.dot_dimension_numbers<[1], [0], [0], [1], [0, 0, 1, 1], [], []>} : vector<128x40xf32>, vector<40x32xf32>, vector<128x32xf32> -> vector<128x32xf32>
    %287 = arith.addf %284, %286 : vector<128x32xf32>
    %c440 = arith.constant 440 : index
    %c0_124 = arith.constant 0 : index
    %288 = vector.load %arg2[%c440, %c0_124] : memref<504x128xf32, #tpu.memory_space<vmem>>, vector<12x32xf32>
    %cst_125 = arith.constant dense<0.000000e+00> : vector<128x32xf32>
    %289 = tpu.matmul %282, %288, %cst_125 {dimension_numbers = #tpu.dot_dimension_numbers<[1], [0], [0], [1], [0, 0, 1, 1], [], []>} : vector<128x12xf32>, vector<12x32xf32>, vector<128x32xf32> -> vector<128x32xf32>
    %290 = arith.addf %287, %289 : vector<128x32xf32>
    %c456 = arith.constant 456 : index
    %c0_126 = arith.constant 0 : index
    %291 = vector.load %arg2[%c456, %c0_126] : memref<504x128xf32, #tpu.memory_space<vmem>>, vector<1x32xf32>
    %292 = vector.broadcast %291 : vector<1x32xf32> to vector<128x32xf32>
    %293 = arith.addf %290, %292 : vector<128x32xf32>
    %cst_127 = arith.constant 0.000000e+00 : f32
    %294 = vector.broadcast %cst_127 : f32 to vector<128x32xf32>
    %295 = arith.maximumf %293, %294 : vector<128x32xf32>
    %c464 = arith.constant 464 : index
    %c0_128 = arith.constant 0 : index
    %296 = vector.load %arg2[%c464, %c0_128] : memref<504x128xf32, #tpu.memory_space<vmem>>, vector<32x128xf32>
    %cst_129 = arith.constant dense<0.000000e+00> : vector<128x128xf32>
    %297 = tpu.matmul %295, %296, %cst_129 {dimension_numbers = #tpu.dot_dimension_numbers<[1], [0], [0], [1], [0, 0, 1, 1], [], []>} : vector<128x32xf32>, vector<32x128xf32>, vector<128x128xf32> -> vector<128x128xf32>
    %c496 = arith.constant 496 : index
    %c0_130 = arith.constant 0 : index
    %298 = vector.load %arg2[%c496, %c0_130] : memref<504x128xf32, #tpu.memory_space<vmem>>, vector<1x128xf32>
    %299 = vector.broadcast %298 : vector<1x128xf32> to vector<128x128xf32>
    %300 = arith.addf %297, %299 : vector<128x128xf32>
    %c0_131 = arith.constant 0 : index
    %c0_132 = arith.constant 0 : index
    %301 = vector.load %arg3[%c0_131, %c0_132] : memref<128x128xf32, #tpu.memory_space<vmem>>, vector<128x128xf32>
    tpu.vector_store %arg3[%c0_131, %c0_132], %300 {strides = array<i32>} : memref<128x128xf32, #tpu.memory_space<vmem>>, vector<128x128xf32>,
    return
  }
  func.func @transform_0(%arg0: i32) -> (i32, i32, i32) {
    %c0_i32 = arith.constant 0 : i32
    %c0_i32_0 = arith.constant 0 : i32
    %c0_i32_1 = arith.constant 0 : i32
    return %c0_i32, %arg0, %c0_i32_0 : i32, i32, i32
  }
  func.func @transform_1(%arg0: i32) -> (i32, i32) {
    %c0_i32 = arith.constant 0 : i32
    %c0_i32_0 = arith.constant 0 : i32
    %c0_i32_1 = arith.constant 0 : i32
    return %c0_i32, %c0_i32_0 : i32, i32
  }
  func.func @transform_2(%arg0: i32) -> (i32, i32) {
    %c0_i32 = arith.constant 0 : i32
    %c0_i32_0 = arith.constant 0 : i32
    return %arg0, %c0_i32 : i32, i32
  }
}

</mosaic_0001>

<bundles_post_ra>
// kernel: single_year_rnn_forward.1
= control target key start
LH: loop header
LB: loop body
LE: loop exit
PB: predicated region body
PF: predicated region fallthrough
CT: control target
= control target key end

     0   :  { %vm80_vm0 = vcmask 1043456   ;;  %vm31_vm1 = vcmask 97280   ;;  %v8846_v39 = vmov 0.0   ;;  %v1191_v60 = vlaneseq  ;;  %s8848_s29 = smov 64   ;;  %s8849_s4 = smov 32   ;;  %s13288_s1 = inlined_call_operand.vmem [shape: f32[504,128], index: 1, kind: input, shape index: {}]   ;;  %s13289_s0 = inlined_call_operand.vmem [shape: f32[13,128,12], index: 0, kind: input, shape index: {}]   ;;  %s13290_s2 = inlined_call_operand.vmem [shape: f32[128,128], index: 2, kind: output, shape index: {}]  }
   0x1   :  { %v8868_v0 = vld [vmem:[%s13288_s1 + $0x8] sm:$0xf]  ;;  %v8873_v1 = vld [vmem:[%s13288_s1] sm:$0xff]  ;;  %v16_v4 = vld [vmem:[%s13289_s0 + $0x10] sm:$0xff]  ;;  %vm1214_vm5 = vcmask 261120   ;;  %vm5859_vm6 = vcmask 130048  }
   0x2   :  { %7566 = vmatpush.msk.msra.mxu0 %vm80_vm0, %v8868_v0  ;;  %v14_v2 = vld [vmem:[%s13289_s0] sm:$0xff]  ;;  %8299 = vmatpush.msk.msra.mxu2 %vm80_vm0, %v8868_v0  ;;  %v15_v3 = vld [vmem:[%s13289_s0 + $0x8] sm:$0xff]  ;;  %v17_v5 = vld [vmem:[%s13289_s0 + $0x18] sm:$0xff]  ;;  %v1192_v62 = vand.u32 127, %v1191_v60  ;;  %vm7145_vm7 = vcmask 654336   ;;  %vm6869_vm8 = vcmask 523264  }
   0x3   :  { %7599 = vmatpush.msk.msra.mxu1 %vm80_vm0, %v8868_v0  ;;  %8301 = vmatpush.msk.msra.mxu3 %vm80_vm0, %v8868_v0  ;;  %v18_v6 = vld [vmem:[%s13289_s0 + $0x20] sm:$0xff]  ;;  %v8922_v7 = vld [vmem:[%s13288_s1 + $0x28] sm:$0xff]  ;;  %v20_v9 = vld [vmem:[%s13289_s0 + $0x30] sm:$0xff]  ;;  %vm7031_vm9 = vcmask 326656  }
   0x4   :  { %99 = vmatpush.msra.mxu0 %v8873_v1  ;;  %8300 = vmatpush.msra.mxu2 %v8873_v1  ;;  %v19_v8 = vld [vmem:[%s13289_s0 + $0x28] sm:$0xff]  ;;  %v21_v10 = vld [vmem:[%s13289_s0 + $0x38] sm:$0xff]  ;;  %v7682_v11 = vld [vmem:[%s13289_s0 + $0x200] sm:$0xff]  ;;  %vm1193_vm2 = vcmp.ge.s32.totalorder %v1192_v62, 64  ;;  %vm1194_vm3 = vcmp.lt.s32.totalorder %v1192_v62, 96 }
   0x5   :  { %7567 = vmatmul.msk.f32.vlgmr.msra.gmra.mxu0 %vm31_vm1, %v14_v2  ;;  %245 = vmatpush.msra.mxu1 %v8873_v1  ;;  %v8944_v12 = vld [vmem:[%s13288_s1 + $0x20] sm:$0xff]  ;;  %v7683_v13 = vld [vmem:[%s13289_s0 + $0x208] sm:$0xff]  ;;  %v7684_v14 = vld [vmem:[%s13289_s0 + $0x210] sm:$0xff] }
   0x6   :  { %7698 = vmatpush.msk.msrb.mxu0 %vm80_vm0, %v8868_v0  ;;  %8302 = vmatpush.msra.mxu3 %v8873_v1  ;;  %v7685_v15 = vld [vmem:[%s13289_s0 + $0x218] sm:$0xff]  ;;  %v7686_v16 = vld [vmem:[%s13289_s0 + $0x220] sm:$0xff]  ;;  %v7687_v18 = vld [vmem:[%s13289_s0 + $0x228] sm:$0xff] }
   0x7   :  { %7731 = vmatpush.msk.msrb.mxu1 %vm80_vm0, %v8868_v0  ;;  %7632 = vmatpush.msk.msrb.mxu2 %vm80_vm0, %v8868_v0  ;;  %v8966_v17 = vld [vmem:[%s13288_s1 + $0x18] sm:$0xff]  ;;  %v7688_v19 = vld [vmem:[%s13289_s0 + $0x230] sm:$0xff]  ;;  %v7690_v22 = vld [vmem:[%s13289_s0 + $0x240] sm:$0xff] }
   0x8   :  { %683 = vmatpush.msrb.mxu0 %v8873_v1  ;;  %7665 = vmatpush.msk.msrb.mxu3 %vm80_vm0, %v8868_v0  ;;  %v7689_v20 = vld [vmem:[%s13289_s0 + $0x238] sm:$0xff]  ;;  %v8990_v23 = vld [vmem:[%s13288_s1 + $0x10] sm:$0xff]  ;;  %v7691_v25 = vld [vmem:[%s13289_s0 + $0x248] sm:$0xff] }
   0x9   :  { %829 = vmatpush.msrb.mxu1 %v8873_v1  ;;  %391 = vmatpush.msrb.mxu2 %v8873_v1  ;;  %v7692_v27 = vld [vmem:[%s13289_s0 + $0x250] sm:$0xff]  ;;  %v7693_v29 = vld [vmem:[%s13289_s0 + $0x258] sm:$0xff]  ;;  %v7694_v31 = vld [vmem:[%s13289_s0 + $0x260] sm:$0xff] }
   0xa   :  { %537 = vmatpush.msrb.mxu3 %v8873_v1  ;;  %1230 = vmatpush.msra.mxu0 %v8922_v7  ;;  %v7695_v33 = vld [vmem:[%s13289_s0 + $0x268] sm:$0xff]  ;;  %v7696_v35 = vld [vmem:[%s13289_s0 + $0x270] sm:$0xff]  ;;  %v7697_v37 = vld [vmem:[%s13289_s0 + $0x278] sm:$0xff] }
   0xb   :  { %v22_v50 = vld [vmem:[%s13289_s0 + $0x40] sm:$0xff]  ;;  %v23_v52 = vld [vmem:[%s13289_s0 + $0x48] sm:$0xff]  ;;  %v24_v54 = vld [vmem:[%s13289_s0 + $0x50] sm:$0xff] }
   0xc   :  { %1231 = vmatpush.msra.mxu0 %v8944_v12  ;;  %7575 = vmatmul.msk.f32.vlgmr.msra.gmra.mxu2 %vm31_vm1, %v22_v50  ;;  %v25_v56 = vld [vmem:[%s13289_s0 + $0x58] sm:$0xff]  ;;  %v26_v58 = vld [vmem:[%s13289_s0 + $0x60] sm:$0xff]  ;;  %v9097_v61 = vld [vmem:[%s13288_s1 + $0x30] ss:$0 sm:$0xff] }
   0xd   :  { %7568 = vmatmul.msk.f32.gmra.mxu0 %vm31_vm1, %v15_v3  ;;  %7764 = vmatpush.msk.msra.mxu2 %vm80_vm0, %v8868_v0  ;;  %v27_v0 = vld [vmem:[%s13289_s0 + $0x68] sm:$0xff]  ;;  %vm1195_vm4 = vmand %vm1193_vm2, %vm1194_vm3 }
   0xe   :  { %1232 = vmatpush.msra.mxu0 %v8966_v17 }
   0xf   :  { %975 = vmatpush.msra.mxu2 %v8873_v1 }
  0x10   :  { %1233 = vmatpush.msra.mxu0 %v8990_v23 }
  0x14   :  { %7576 = vmatmul.msk.f32.gmra.mxu2 %vm31_vm1, %v23_v52 }
  0x15   :  { %7569 = vmatmul.msk.f32.gmra.mxu0 %vm31_vm1, %v16_v4  ;;  %v8847_v4 = vmov 0.5  }
  0x1c   :  { %7577 = vmatmul.msk.f32.gmra.mxu2 %vm31_vm1, %v24_v54 }
  0x1d   :  { %7570 = vmatmul.msk.f32.gmra.mxu0 %vm31_vm1, %v17_v5  ;;  %v9107_v5 = vsel %vm1195_vm4, 1.0, %v8847_v4 }
  0x24   :  { %7578 = vmatmul.msk.f32.gmra.mxu2 %vm31_vm1, %v25_v56 }
  0x25   :  { %7571 = vmatmul.msk.f32.gmra.mxu0 %vm31_vm1, %v18_v6  ;;  %v28_v6 = vld [vmem:[%s13289_s0 + $0x70] sm:$0xff] }
  0x2c   :  { %7579 = vmatmul.msk.f32.gmra.mxu2 %vm31_vm1, %v26_v58 }
  0x2d   :  { %7572 = vmatmul.msk.f32.gmra.mxu0 %vm31_vm1, %v19_v8 }
  0x34   :  { %7580 = vmatmul.msk.f32.gmra.mxu2 %vm31_vm1, %v27_v0 }
  0x35   :  { %7573 = vmatmul.msk.f32.gmra.mxu0 %vm31_vm1, %v20_v9 }
  0x3c   :  { %7581 = vmatmul.msk.f32.gmra.mxu2 %vm31_vm1, %v28_v6 }
  0x3d   :  { %7574 = vmatmul.msk.f32.gmra.mxu0 %vm31_vm1, %v21_v10 }
  0x45   :  { %7699 = vmatmul.msk.f32.vlgmr.msrb.gmra.mxu0 %vm31_vm1, %v7682_v11  ;;  %v9113_v11 = vsel %vm1195_vm4, 0.0, %v8847_v4 }
  0x46   :  { %3218 = vmatpush.msrb.mxu0 %v8922_v7 }
  0x48   :  { %3219 = vmatpush.msrb.mxu0 %v8944_v12 }
  0x4a   :  { %3220 = vmatpush.msrb.mxu0 %v8966_v17 }
  0x4c   :  { %3221 = vmatpush.msrb.mxu0 %v8990_v23 }
  0x4d   :  { %7700 = vmatmul.msk.f32.gmra.mxu0 %vm31_vm1, %v7683_v13 }
  0x55   :  { %7701 = vmatmul.msk.f32.gmra.mxu0 %vm31_vm1, %v7684_v14 }
  0x5d   :  { %7702 = vmatmul.msk.f32.gmra.mxu0 %vm31_vm1, %v7685_v15 }
  0x65   :  { %7703 = vmatmul.msk.f32.gmra.mxu0 %vm31_vm1, %v7686_v16  ;;  %v29_v16 = vld [vmem:[%s13289_s0 + $0x78] sm:$0xff] }
  0x66   :  { %7582 = vmatmul.msk.f32.gmra.mxu2 %vm31_vm1, %v29_v16 }
  0x6d   :  { %7704 = vmatmul.msk.f32.gmra.mxu0 %vm31_vm1, %v7687_v18 }
  0x75   :  { %7705 = vmatmul.msk.f32.gmra.mxu0 %vm31_vm1, %v7688_v19 }
  0x7d   :  { %7706 = vmatmul.msk.f32.gmra.mxu0 %vm31_vm1, %v7689_v20 }
  0x82   :  { %v8981_v21 = vpop.f32.mrf.mxu0 }
  0x83   :  { %v102_v63 = vadd.f32 %v9097_v61, %v8981_v21 }
  0x85   :  { %7707 = vmatmul.msk.f32.gmra.mxu0 %vm31_vm1, %v7690_v22 }
  0x8a   :  { %v8995_v24 = vpop.f32.mrf.mxu0 }
  0x8b   :  { %v105_v3 = vadd.f32 %v9097_v61, %v8995_v24 }
  0x8d   :  { %7708 = vmatmul.msk.f32.gmra.mxu0 %vm31_vm1, %v7691_v25 }
  0x92   :  { %v9003_v26 = vpop.f32.mrf.mxu0 }
  0x93   :  { %v108_v15 = vadd.f32 %v9097_v61, %v9003_v26 }
  0x95   :  { %7709 = vmatmul.msk.f32.gmra.mxu0 %vm31_vm1, %v7692_v27 }
  0x9a   :  { %v9009_v28 = vpop.f32.mrf.mxu0 }
  0x9b   :  { %v111_v24 = vadd.f32 %v9097_v61, %v9009_v28 }
  0x9d   :  { %7710 = vmatmul.msk.f32.gmra.mxu0 %vm31_vm1, %v7693_v29 }
  0xa2   :  { %v9015_v30 = vpop.f32.mrf.mxu0 }
  0xa5   :  { %7711 = vmatmul.msk.f32.gmra.mxu0 %vm31_vm1, %v7694_v31 }
  0xaa   :  { %v9021_v32 = vpop.f32.mrf.mxu0 }
  0xab   :  { %v117_v52 = vadd.f32 %v9097_v61, %v9021_v32 }
  0xad   :  { %7712 = vmatmul.msk.f32.gmra.mxu0 %vm31_vm1, %v7695_v33  ;;  %v114_v33 = vadd.f32 %v9097_v61, %v9015_v30 }
  0xb2   :  { %v9027_v34 = vpop.f32.mrf.mxu0 }
  0xb3   :  { %v120_v62 = vadd.f32 %v9097_v61, %v9027_v34 }
  0xb5   :  { %7713 = vmatmul.msk.f32.gmra.mxu0 %vm31_vm1, %v7696_v35 }
  0xba   :  { %v9033_v36 = vpop.f32.mrf.mxu0 }
  0xbd   :  { %7714 = vmatmul.msk.f32.gmra.mxu0 %vm31_vm1, %v7697_v37 }
  0xc2   :  { %v9039_v38 = vpop.f32.mrf.mxu0 }
  0xc5   :  { %1234 = vmatmul.f32.vlgmr.msra.gmra.mxu0 %v8846_v39 }
  0xca   :  { %v9041_v40 = vpop.f32.mrf.mxu0 }
  0xcd   :  { %1237 = vmatmul.f32.gmra.mxu0 %v8846_v39 }
  0xd2   :  { %v9043_v41 = vpop.f32.mrf.mxu0 }
  0xd5   :  { %1240 = vmatmul.f32.gmra.mxu0 %v8846_v39 }
  0xda   :  { %v9045_v42 = vpop.f32.mrf.mxu0 }
  0xdd   :  { %1243 = vmatmul.f32.gmra.mxu0 %v8846_v39 }
  0xe2   :  { %v9047_v43 = vpop.f32.mrf.mxu0 }
  0xe3   :  { %13323 = vst [vmem:[#allocation3_spill] sm:$0xff] %v9047_v43 }
  0xe5   :  { %1246 = vmatmul.f32.gmra.mxu0 %v8846_v39 }
  0xea   :  { %v9049_v44 = vpop.f32.mrf.mxu0 }
  0xeb   :  { %13324 = vst [vmem:[#allocation4_spill] sm:$0xff] %v9049_v44 }
  0xed   :  { %1249 = vmatmul.f32.gmra.mxu0 %v8846_v39 }
  0xf2   :  { %v9051_v45 = vpop.f32.mrf.mxu0 }
  0xf3   :  { %13325 = vst [vmem:[#allocation5_spill] sm:$0xff] %v9051_v45 }
  0xf5   :  { %1252 = vmatmul.f32.gmra.mxu0 %v8846_v39 }
  0xfa   :  { %v9053_v46 = vpop.f32.mrf.mxu0 }
  0xfb   :  { %13326 = vst [vmem:[#allocation6_spill] sm:$0xff] %v9053_v46 }
  0xfd   :  { %1255 = vmatmul.f32.gmra.mxu0 %v8846_v39 }
 0x102   :  { %v9055_v47 = vpop.f32.mrf.mxu0 }
 0x103   :  { %13327 = vst [vmem:[#allocation7_spill] sm:$0xff] %v9055_v47 }
 0x105   :  { %1258 = vmatmul.f32.gmra.mxu0 %v8846_v39 }
 0x10a   :  { %v9057_v48 = vpop.f32.mrf.mxu0 }
 0x10b   :  { %13328 = vst [vmem:[#allocation8_spill] sm:$0xff] %v9057_v48 }
 0x10d   :  { %1261 = vmatmul.f32.gmra.mxu0 %v8846_v39 }
 0x112   :  { %v9059_v49 = vpop.f32.mrf.mxu0 }
 0x113   :  { %13329 = vst [vmem:[#allocation9_spill] sm:$0xff] %v9059_v49  ;;  %v7757_v49 = vld [vmem:[%s13289_s0 + $0x348] sm:$0xff] }
 0x115   :  { %1264 = vmatmul.f32.gmra.mxu0 %v8846_v39 }
 0x11a   :  { %v9068_v51 = vpop.f32.mrf.mxu0 }
 0x11b   :  { %13330 = vst [vmem:[#allocation10_spill] sm:$0xff] %v9068_v51 }
 0x11d   :  { %1267 = vmatmul.f32.gmra.mxu0 %v8846_v39 }
 0x122   :  { %v9074_v53 = vpop.f32.mrf.mxu0 }
 0x123   :  { %13331 = vst [vmem:[#allocation11_spill] sm:$0xff] %v9074_v53 }
 0x125   :  { %1270 = vmatmul.f32.gmra.mxu0 %v8846_v39 }
 0x12a   :  { %v9079_v55 = vpop.f32.mrf.mxu0 }
 0x12b   :  { %13332 = vst [vmem:[#allocation12_spill] sm:$0xff] %v9079_v55 }
 0x12d   :  { %1273 = vmatmul.f32.gmra.mxu0 %v8846_v39 }
 0x132   :  { %v9085_v57 = vpop.f32.mrf.mxu0 }
 0x133   :  { %13333 = vst [vmem:[#allocation13_spill] sm:$0xff] %v9085_v57  ;;  %v7630_v57 = vld [vmem:[%s13289_s0 + $0x170] sm:$0xff] }
 0x135   :  { %1276 = vmatmul.f32.gmra.mxu0 %v8846_v39 }
 0x13a   :  { %v9091_v59 = vpop.f32.mrf.mxu0 }
 0x13b   :  { %13334 = vst [vmem:[#allocation14_spill] sm:$0xff] %v9091_v59 }
 0x13d   :  { %1279 = vmatmul.f32.gmra.mxu0 %v8846_v39 }
 0x142   :  { %v1235_v1 = vpop.f32.mrf.mxu0 }
 0x143   :  { %v1283_v2 = vadd.f32 %v1235_v1, %v102_v63 }
 0x145   :  { %8315 = vtanh.f32 %v1283_v2 }
 0x14a   :  { %v1238_v8 = vpop.f32.mrf.mxu0 }
 0x14b   :  { %v8316_v9 = vpop.eup %8315  ;;  %v1284_v10 = vadd.f32 %v1238_v8, %v105_v3  ;;  %v125_v8 = vpop.f32.mrf.mxu2 }
 0x14c   :  { %v1315_v13 = vmul.f32 %v8316_v9, %v9107_v5 }
 0x14d   :  { %8317 = vtanh.f32 %v1284_v10 }
 0x14e   :  { %v9117_v14 = vadd.f32 %v1315_v13, %v9113_v11 }
 0x150   :  { %1379 = vrot.lane.b32.xlu0 %v9117_v14, %s8848_s29 }
 0x152   :  { %v1241_v18 = vpop.f32.mrf.mxu0 }
 0x153   :  { %v8318_v19 = vpop.eup %8317  ;;  %v1285_v20 = vadd.f32 %v1241_v18, %v108_v15  ;;  %v128_v10 = vpop.f32.mrf.mxu2  ;;  %v123_v15 = vadd.f32 %v9097_v61, %v9033_v36 }
 0x154   :  { %v1316_v21 = vmul.f32 %v8318_v19, %v9107_v5  ;;  %v126_v19 = vadd.f32 %v9097_v61, %v125_v8 }
 0x155   :  { %8319 = vtanh.f32 %v1285_v20 }
 0x156   :  { %v9129_v22 = vadd.f32 %v1316_v21, %v9113_v11 }
 0x158   :  { %1381 = vrot.lane.b32.xlu0 %v9129_v22, %s8848_s29 }
 0x15a   :  { %v1244_v25 = vpop.f32.mrf.mxu0 }
 0x15b   :  { %v8320_v26 = vpop.eup %8319  ;;  %v1286_v27 = vadd.f32 %v1244_v25, %v111_v24  ;;  %v131_v16 = vpop.f32.mrf.mxu2 }
 0x15c   :  { %v1317_v29 = vmul.f32 %v8320_v26, %v9107_v5 }
 0x15d   :  { %8321 = vtanh.f32 %v1286_v27 }
 0x15e   :  { %v9137_v31 = vadd.f32 %v1317_v29, %v9113_v11  ;;  %v129_v29 = vadd.f32 %v9097_v61, %v128_v10 }
 0x160   :  { %1383 = vrot.lane.b32.xlu1 %v9137_v31, %s8848_s29 }
 0x162   :  { %v1247_v35 = vpop.f32.mrf.mxu0 }
 0x163   :  { %v8322_v37 = vpop.eup %8321  ;;  %v1287_v39 = vadd.f32 %v1247_v35, %v114_v33  ;;  %v134_v25 = vpop.f32.mrf.mxu2 }
 0x164   :  { %v1318_v28 = vmul.f32 %v8322_v37, %v9107_v5 }
 0x165   :  { %8323 = vtanh.f32 %v1287_v39 }
 0x166   :  { %v9145_v50 = vadd.f32 %v1318_v28, %v9113_v11 }
 0x168   :  { %1385 = vrot.lane.b32.xlu1 %v9145_v50, %s8848_s29 }
 0x16a   :  { %v1250_v54 = vpop.f32.mrf.mxu0 }
 0x16b   :  { %v8324_v56 = vpop.eup %8323  ;;  %v1288_v58 = vadd.f32 %v1250_v54, %v117_v52  ;;  %v132_v54 = vadd.f32 %v9097_v61, %v131_v16 }
 0x16c   :  { %v1319_v30 = vmul.f32 %v8324_v56, %v9107_v5  ;;  %v137_v56 = vpop.f32.mrf.mxu2 }
 0x16d   :  { %8325 = vtanh.f32 %v1288_v58  ;;  %v138_v8 = vadd.f32 %v9097_v61, %v137_v56 }
 0x16e   :  { %v9153_v60 = vadd.f32 %v1319_v30, %v9113_v11  ;;  %v135_v30 = vadd.f32 %v9097_v61, %v134_v25 }
 0x170   :  { %1387 = vrot.lane.b32.xlu2 %v9153_v60, %s8848_s29 }
 0x172   :  { %v1253_v63 = vpop.f32.mrf.mxu0 }
 0x173   :  { %v8326_v0 = vpop.eup %8325  ;;  %v1289_v1 = vadd.f32 %v1253_v63, %v120_v62 }
 0x174   :  { %v1320_v32 = vmul.f32 %v8326_v0, %v9107_v5  ;;  %v140_v10 = vpop.f32.mrf.mxu2 }
 0x175   :  { %8327 = vtanh.f32 %v1289_v1 }
 0x176   :  { %v9161_v2 = vadd.f32 %v1320_v32, %v9113_v11 }
 0x178   :  { %1389 = vrot.lane.b32.xlu2 %v9161_v2, %s8848_s29 }
 0x17a   :  { %v1256_v34 = vpop.f32.mrf.mxu0 }
 0x17b   :  { %v8328_v3 = vpop.eup %8327  ;;  %v1290_v18 = vadd.f32 %v1256_v34, %v123_v15 }
 0x17c   :  { %v1321_v4 = vmul.f32 %v8328_v3, %v9107_v5 }
 0x17d   :  { %8329 = vtanh.f32 %v1290_v18 }
 0x17e   :  { %v9167_v6 = vadd.f32 %v1321_v4, %v9113_v11 }
 0x180   :  { %1391 = vrot.lane.b32.xlu1 %v9167_v6, %s8848_s29 }
 0x182   :  { %v1259_v9 = vpop.f32.mrf.mxu0 }
 0x183   :  { %v1291_v21 = vadd.f32 %v1259_v9, %v126_v19  ;;  %v8330_v27 = vpop.eup %8329 }
 0x184   :  { %v1322_v36 = vmul.f32 %v8330_v27, %v9107_v5 }
 0x185   :  { %8331 = vtanh.f32 %v1291_v21 }
 0x186   :  { %v9180_v52 = vadd.f32 %v1322_v36, %v9113_v11 }
 0x18a   :  { %v1262_v13 = vpop.f32.mrf.mxu0 }
 0x18b   :  { %v1292_v35 = vadd.f32 %v1262_v13, %v129_v29  ;;  %v8332_v37 = vpop.eup %8331 }
 0x18c   :  { %v1323_v58 = vmul.f32 %v8332_v37, %v9107_v5 }
 0x18d   :  { %8333 = vtanh.f32 %v1292_v35 }
 0x18e   :  { %v9189_v0 = vadd.f32 %v1323_v58, %v9113_v11 }
 0x192   :  { %v1265_v20 = vpop.f32.mrf.mxu0 }
 0x193   :  { %v1293_v62 = vadd.f32 %v1265_v20, %v132_v54  ;;  %v8334_v32 = vpop.eup %8333 }
 0x194   :  { %v1324_v34 = vmul.f32 %v8334_v32, %v9107_v5 }
 0x195   :  { %8335 = vtanh.f32 %v1293_v62 }
 0x196   :  { %v9198_v13 = vadd.f32 %v1324_v34, %v9113_v11 }
 0x19a   :  { %v1268_v33 = vpop.f32.mrf.mxu0 }
 0x19b   :  { %v1294_v1 = vadd.f32 %v1268_v33, %v135_v30  ;;  %v8336_v16 = vpop.eup %8335  ;;  %v143_v33 = vpop.f32.mrf.mxu2 }
 0x19c   :  { %v1325_v25 = vmul.f32 %v8336_v16, %v9107_v5  ;;  %v144_v56 = vadd.f32 %v9097_v61, %v143_v33 }
 0x19d   :  { %8337 = vtanh.f32 %v1294_v1 }
 0x19e   :  { %v9210_v36 = vadd.f32 %v1325_v25, %v9113_v11 }
 0x1a2   :  { %v1271_v63 = vpop.f32.mrf.mxu0 }
 0x1a3   :  { %v1295_v15 = vadd.f32 %v1271_v63, %v138_v8  ;;  %v8338_v20 = vpop.eup %8337  ;;  %v146_v63 = vpop.f32.mrf.mxu2 }
 0x1a4   :  { %v1326_v27 = vmul.f32 %v8338_v20, %v9107_v5  ;;  %v147_v32 = vadd.f32 %v9097_v61, %v146_v63  ;;  %v1349_v63 = vmul.f32 0.0, %v9137_v31 }
 0x1a5   :  { %8339 = vtanh.f32 %v1295_v15 }
 0x1a6   :  { %v9213_v37 = vadd.f32 %v1326_v27, %v9113_v11 }
 0x1aa   :  { %v1274_v19 = vpop.f32.mrf.mxu0 }
 0x1b2   :  { %v1277_v54 = vpop.f32.mrf.mxu0 }
 0x1b3   :  { %v1297_v30 = vadd.f32 %v1277_v54, %v144_v56 }
 0x1c2   :  { %v1380_v24 = vpop.permute.xlu0 %1379 }
 0x1c3   :  { %v1427_v26 = vmul.f32 %v1380_v24, %v9117_v14 }
 0x1c5   :  { %1459 = vrot.lane.b32.xlu0 %v1427_v26, %s8849_s4  ;;  %v141_v26 = vadd.f32 %v9097_v61, %v140_v10 }
 0x1c7   :  { %v1296_v35 = vadd.f32 %v1274_v19, %v141_v26  ;;  %v1347_v26 = vmul.f32 0.0, %v9117_v14 }
 0x1c9   :  { %8341 = vtanh.f32 %v1296_v35  ;;  %v1348_v35 = vmul.f32 0.0, %v9129_v22 }
 0x1ca   :  { %v1382_v39 = vpop.permute.xlu0 %1381  ;;  %v1388_v9 = vpop.permute.xlu2 %1387  ;;  %8343 = vtanh.f32 %v1297_v30 }
 0x1cb   :  { %v1428_v28 = vmul.f32 %v1382_v39, %v9129_v22  ;;  %v1431_v24 = vmul.f32 %v1388_v9, %v9153_v60  ;;  %v8340_v39 = vpop.eup %8339 }
 0x1cc   :  { %v1327_v58 = vmul.f32 %v8340_v39, %v9107_v5 }
 0x1cd   :  { %1393 = vrot.lane.b32.xlu0 %v9180_v52, %s8848_s29  ;;  %1461 = vrot.lane.b32.xlu2 %v1428_v28, %s8849_s4 }
 0x1ce   :  { %v9224_v62 = vadd.f32 %v1327_v58, %v9113_v11 }
 0x1cf   :  { %v8342_v1 = vpop.eup %8341 }
 0x1d0   :  { %v8344_v10 = vpop.eup %8343 }
 0x1d1   :  { %v1329_v16 = vmul.f32 %v8344_v10, %v9107_v5  ;;  %v7583_v10 = vld [vmem:[%s13289_s0 + $0x80] sm:$0xff] }
 0x1d2   :  { %v1384_v3 = vpop.permute.xlu1 %1383  ;;  %v1390_v29 = vpop.permute.xlu2 %1389  ;;  %7600 = vmatmul.msk.f32.vlgmr.msra.gmra.mxu1 %vm31_vm1, %v7583_v10  ;;  %v7586_v10 = vld [vmem:[%s13289_s0 + $0x98] sm:$0xff] }
 0x1d3   :  { %v1429_v4 = vmul.f32 %v1384_v3, %v9137_v31  ;;  %v1432_v28 = vmul.f32 %v1390_v29, %v9161_v2  ;;  %v1328_v3 = vmul.f32 %v8342_v1, %v9107_v5  ;;  %1727 = vmatpush.msra.mxu1 %v8922_v7 }
 0x1d5   :  { %1463 = vrot.lane.b32.xlu1 %v1429_v4, %s8849_s4  ;;  %1395 = vrot.lane.b32.xlu2 %v9189_v0, %s8848_s29  ;;  %v1280_v4 = vpop.f32.mrf.mxu0  ;;  %v9231_v9 = vadd.f32 %v1328_v3, %v9113_v11 }
 0x1d6   :  { %v1298_v34 = vadd.f32 %v1280_v4, %v147_v32  ;;  %1728 = vmatpush.msra.mxu1 %v8944_v12 }
 0x1d8   :  { %8345 = vtanh.f32 %v1298_v34  ;;  %1729 = vmatpush.msra.mxu1 %v8966_v17 }
 0x1da   :  { %v1386_v18 = vpop.permute.xlu1 %1385  ;;  %1730 = vmatpush.msra.mxu1 %v8990_v23 }
 0x1db   :  { %v1430_v21 = vmul.f32 %v1386_v18, %v9145_v50  ;;  %v9239_v18 = vadd.f32 %v1329_v16, %v9113_v11 }
 0x1dd   :  { %1397 = vrot.lane.b32.xlu1 %v9198_v13, %s8848_s29  ;;  %1465 = vrot.lane.b32.xlu0 %v1430_v21, %s8849_s4 }
 0x1de   :  { %1467 = vrot.lane.b32.xlu2 %v1431_v24, %s8849_s4  ;;  %v8346_v19 = vpop.eup %8345 }
 0x1df   :  { %v1330_v20 = vmul.f32 %v8346_v19, %v9107_v5 }
 0x1e1   :  { %v9245_v21 = vadd.f32 %v1330_v20, %v9113_v11  ;;  %v7584_v20 = vld [vmem:[%s13289_s0 + $0x88] sm:$0xff] }
 0x1e2   :  { %7601 = vmatmul.msk.f32.gmra.mxu1 %vm31_vm1, %v7584_v20  ;;  %v1353_v20 = vmul.f32 0.0, %v9167_v6 }
 0x1e5   :  { %1469 = vrot.lane.b32.xlu1 %v1432_v28, %s8849_s4  ;;  %1399 = vrot.lane.b32.xlu0 %v9210_v36, %s8848_s29 }
 0x1e6   :  { %1401 = vrot.lane.b32.xlu2 %v9213_v37, %s8848_s29 }
 0x1ee   :  { %1403 = vrot.lane.b32.xlu2 %v9224_v62, %s8848_s29 }
 0x1f2   :  { %v1392_v8 = vpop.permute.xlu1 %1391 }
 0x1f3   :  { %v1433_v15 = vmul.f32 %v1392_v8, %v9167_v6 }
 0x1f5   :  { %1471 = vrot.lane.b32.xlu0 %v1433_v15, %s8849_s4  ;;  %v1350_v15 = vmul.f32 0.0, %v9145_v50 }
 0x1f6   :  { %1405 = vrot.lane.b32.xlu2 %v9231_v9, %s8848_s29 }
 0x1fe   :  { %1407 = vrot.lane.b32.xlu2 %v9239_v18, %s8848_s29 }
 0x206   :  { %1409 = vrot.lane.b32.xlu2 %v9245_v21, %s8848_s29 }
 0x227   :  { %v1462_v24 = vpop.permute.xlu2 %1461 }
 0x228   :  { %v9254_v39 = vadd.f32 %v1462_v24, %v1348_v35 }
 0x22f   :  { %v1396_v25 = vpop.permute.xlu2 %1395 }
 0x230   :  { %v1435_v3 = vmul.f32 %v1396_v25, %v9189_v0 }
 0x237   :  { %v1460_v27 = vpop.permute.xlu0 %1459 }
 0x238   :  { %v1468_v29 = vpop.permute.xlu2 %1467  ;;  %v9250_v33 = vadd.f32 %v1460_v27, %v1347_v26 }
 0x23a   :  { %8347 = vtanh.f32 %v9250_v33 }
 0x23b   :  { %8349 = vtanh.f32 %v9254_v39 }
 0x23f   :  { %v1394_v28 = vpop.permute.xlu0 %1393 }
 0x240   :  { %v8348_v54 = vpop.eup %8347  ;;  %v1402_v56 = vpop.permute.xlu2 %1401  ;;  %v1434_v58 = vmul.f32 %v1394_v28, %v9180_v52  ;;  %v1351_v28 = vmul.f32 0.0, %v9153_v60 }
 0x241   :  { %v1438_v30 = vmul.f32 %v1402_v56, %v9213_v37  ;;  %1555 = vrot.lane.b32.xlu1 %v8348_v54, %s8848_s29  ;;  %v8350_v32 = vpop.eup %8349  ;;  %v1352_v56 = vmul.f32 0.0, %v9161_v2 }
 0x242   :  { %1473 = vrot.lane.b32.xlu0 %v1434_v58, %s8849_s4  ;;  %v9293_v54 = vadd.f32 %v1468_v29, %v1351_v28 }
 0x243   :  { %1481 = vrot.lane.b32.xlu2 %v1438_v30, %s8849_s4 }
 0x247   :  { %v1464_v1 = vpop.permute.xlu1 %1463 }
 0x248   :  { %v9264_v4 = vadd.f32 %v1464_v1, %v1349_v63  ;;  %v1404_v34 = vpop.permute.xlu2 %1403  ;;  %v7585_v63 = vld [vmem:[%s13289_s0 + $0x90] sm:$0xff] }
 0x249   :  { %v1439_v8 = vmul.f32 %v1404_v34, %v9224_v62  ;;  %1557 = vrot.lane.b32.xlu1 %v8350_v32, %s8848_s29  ;;  %7602 = vmatmul.msk.f32.gmra.mxu1 %vm31_vm1, %v7585_v63  ;;  %v7716_v63 = vld [vmem:[%s13289_s0 + $0x288] sm:$0xff] }
 0x24a   :  { %8351 = vtanh.f32 %v9264_v4  ;;  %1475 = vrot.lane.b32.xlu0 %v1435_v3, %s8849_s4 }
 0x24b   :  { %1483 = vrot.lane.b32.xlu2 %v1439_v8, %s8849_s4 }
 0x24f   :  { %v1398_v16 = vpop.permute.xlu1 %1397  ;;  %v1466_v19 = vpop.permute.xlu0 %1465 }
 0x250   :  { %v8352_v24 = vpop.eup %8351  ;;  %v1436_v25 = vmul.f32 %v1398_v16, %v9198_v13  ;;  %v1406_v26 = vpop.permute.xlu2 %1405  ;;  %v9283_v27 = vadd.f32 %v1466_v19, %v1350_v15 }
 0x251   :  { %v1440_v35 = vmul.f32 %v1406_v26, %v9231_v9  ;;  %1559 = vrot.lane.b32.xlu1 %v8352_v24, %s8848_s29  ;;  %7603 = vmatmul.msk.f32.gmra.mxu1 %vm31_vm1, %v7586_v10  ;;  %v7721_v10 = vld [vmem:[%s13289_s0 + $0x2b0] sm:$0xff] }
 0x252   :  { %8353 = vtanh.f32 %v9283_v27  ;;  %1477 = vrot.lane.b32.xlu0 %v1436_v25, %s8849_s4  ;;  %v7587_v25 = vld [vmem:[%s13289_s0 + $0xa0] sm:$0xff] }
 0x253   :  { %1485 = vrot.lane.b32.xlu2 %v1440_v35, %s8849_s4  ;;  %8355 = vtanh.f32 %v9293_v54  ;;  %v7588_v35 = vld [vmem:[%s13289_s0 + $0xa8] sm:$0xff] }
 0x257   :  { %v1470_v58 = vpop.permute.xlu1 %1469  ;;  %v1400_v30 = vpop.permute.xlu0 %1399 }
 0x258   :  { %v8354_v1 = vpop.eup %8353  ;;  %v9299_v32 = vadd.f32 %v1470_v58, %v1352_v56  ;;  %v1408_v3 = vpop.permute.xlu2 %1407  ;;  %v1437_v34 = vmul.f32 %v1400_v30, %v9210_v36  ;;  %v7589_v56 = vld [vmem:[%s13289_s0 + $0xb0] sm:$0xff]  ;;  %v7590_v58 = vld [vmem:[%s13289_s0 + $0xb8] sm:$0xff]  ;;  %v7715_v30 = vld [vmem:[%s13289_s0 + $0x280] sm:$0xff] }
 0x259   :  { %v1441_v8 = vmul.f32 %v1408_v3, %v9239_v18  ;;  %1561 = vrot.lane.b32.xlu1 %v8354_v1, %s8848_s29  ;;  %v8356_v29 = vpop.eup %8355  ;;  %7604 = vmatmul.msk.f32.gmra.mxu1 %vm31_vm1, %v7587_v25  ;;  %v7717_v1 = vld [vmem:[%s13289_s0 + $0x290] sm:$0xff]  ;;  %v1354_v3 = vmul.f32 0.0, %v9180_v52  ;;  %v7722_v25 = vld [vmem:[%s13289_s0 + $0x2b8] sm:$0xff] }
 0x25a   :  { %8357 = vtanh.f32 %v9299_v32  ;;  %1479 = vrot.lane.b32.xlu0 %v1437_v34, %s8849_s4 }
 0x25b   :  { %1487 = vrot.lane.b32.xlu2 %v1441_v8, %s8849_s4 }
 0x260   :  { %v8358_v15 = vpop.eup %8357  ;;  %v1410_v16 = vpop.permute.xlu2 %1409 }
 0x261   :  { %v1442_v19 = vmul.f32 %v1410_v16, %v9245_v21  ;;  %1563 = vrot.lane.b32.xlu1 %v8356_v29, %s8848_s29  ;;  %7605 = vmatmul.msk.f32.gmra.mxu1 %vm31_vm1, %v7588_v35  ;;  %v1355_v16 = vmul.f32 0.0, %v9189_v0 }
 0x262   :  { %1565 = vrot.lane.b32.xlu0 %v8358_v15, %s8848_s29 }
 0x263   :  { %1489 = vrot.lane.b32.xlu2 %v1442_v19, %s8849_s4 }
 0x267   :  { %v1472_v24 = vpop.permute.xlu0 %1471 }
 0x268   :  { %v9321_v26 = vadd.f32 %v1472_v24, %v1353_v20 }
 0x269   :  { %7606 = vmatmul.msk.f32.gmra.mxu1 %vm31_vm1, %v7589_v56 }
 0x26a   :  { %8359 = vtanh.f32 %v9321_v26 }
 0x270   :  { %v8360_v28 = vpop.eup %8359 }
 0x271   :  { %1567 = vrot.lane.b32.xlu0 %v8360_v28, %s8848_s29  ;;  %7607 = vmatmul.msk.f32.gmra.mxu1 %vm31_vm1, %v7590_v58  ;;  %v1356_v28 = vmul.f32 0.0, %v9198_v13 }
 0x279   :  { %7732 = vmatmul.msk.f32.vlgmr.msrb.gmra.mxu1 %vm31_vm1, %v7715_v30 }
 0x27a   :  { %3715 = vmatpush.msrb.mxu1 %v8922_v7  ;;  %v7718_v7 = vld [vmem:[%s13289_s0 + $0x298] sm:$0xff] }
 0x27c   :  { %3716 = vmatpush.msrb.mxu1 %v8944_v12  ;;  %v7719_v12 = vld [vmem:[%s13289_s0 + $0x2a0] sm:$0xff] }
 0x27e   :  { %3717 = vmatpush.msrb.mxu1 %v8966_v17  ;;  %v7720_v17 = vld [vmem:[%s13289_s0 + $0x2a8] sm:$0xff] }
 0x280   :  { %3718 = vmatpush.msrb.mxu1 %v8990_v23 }
 0x281   :  { %7733 = vmatmul.msk.f32.gmra.mxu1 %vm31_vm1, %v7716_v63 }
 0x289   :  { %7734 = vmatmul.msk.f32.gmra.mxu1 %vm31_vm1, %v7717_v1  ;;  %v9394_v1 = vpop.f32.mrf.mxu1 }
 0x291   :  { %7735 = vmatmul.msk.f32.gmra.mxu1 %vm31_vm1, %v7718_v7  ;;  %v7723_v7 = vld [vmem:[%s13289_s0 + $0x2c0] sm:$0xff] }
 0x299   :  { %7736 = vmatmul.msk.f32.gmra.mxu1 %vm31_vm1, %v7719_v12  ;;  %v1357_v12 = vmul.f32 0.0, %v9210_v36 }
 0x29d   :  { %v1482_v63 = vpop.permute.xlu2 %1481 }
 0x2a1   :  { %7737 = vmatmul.msk.f32.gmra.mxu1 %vm31_vm1, %v7720_v17 }
 0x2a9   :  { %7738 = vmatmul.msk.f32.gmra.mxu1 %vm31_vm1, %v7721_v10  ;;  %v7724_v10 = vld [vmem:[%s13289_s0 + $0x2c8] sm:$0xff] }
 0x2b1   :  { %7739 = vmatmul.msk.f32.gmra.mxu1 %vm31_vm1, %v7722_v25 }
 0x2b3   :  { %v1556_v23 = vpop.permute.xlu1 %1555 }
 0x2b4   :  { %v1603_v34 = vmul.f32 %v1556_v23, %v9117_v14  ;;  %v1474_v8 = vpop.permute.xlu0 %1473 }
 0x2b5   :  { %v9368_v29 = vadd.f32 %v1474_v8, %v1354_v3  ;;  %v9407_v8 = vpop.f32.mrf.mxu1 }
 0x2b6   :  { %1651 = vrot.lane.b32.xlu1 %v1603_v34, %s8849_s4 }
 0x2b7   :  { %8361 = vtanh.f32 %v9368_v29 }
 0x2b9   :  { %7740 = vmatmul.msk.f32.gmra.mxu1 %vm31_vm1, %v7723_v7  ;;  %v7726_v7 = vld [vmem:[%s13289_s0 + $0x2d8] sm:$0xff] }
 0x2bb   :  { %v1558_v15 = vpop.permute.xlu1 %1557 }
 0x2bc   :  { %v1604_v19 = vmul.f32 %v1558_v15, %v9129_v22  ;;  %v1476_v20 = vpop.permute.xlu0 %1475  ;;  %v1358_v15 = vmul.f32 0.0, %v9213_v37 }
 0x2bd   :  { %v8362_v14 = vpop.eup %8361  ;;  %v9378_v24 = vadd.f32 %v1476_v20, %v1355_v16  ;;  %v1484_v16 = vpop.permute.xlu2 %1483 }
 0x2be   :  { %1569 = vrot.lane.b32.xlu0 %v8362_v14, %s8848_s29  ;;  %1653 = vrot.lane.b32.xlu1 %v1604_v19, %s8849_s4  ;;  %v9415_v19 = vadd.f32 %v1482_v63, %v1358_v15  ;;  %v7727_v15 = vld [vmem:[%s13289_s0 + $0x2e0] sm:$0xff] }
 0x2bf   :  { %8363 = vtanh.f32 %v9378_v24 }
 0x2c1   :  { %7741 = vmatmul.msk.f32.gmra.mxu1 %vm31_vm1, %v7724_v10 }
 0x2c3   :  { %v1560_v35 = vpop.permute.xlu1 %1559 }
 0x2c4   :  { %v1605_v22 = vmul.f32 %v1560_v35, %v9137_v31  ;;  %v1478_v56 = vpop.permute.xlu0 %1477 }
 0x2c5   :  { %v8364_v58 = vpop.eup %8363  ;;  %v9389_v30 = vadd.f32 %v1478_v56, %v1356_v28 }
 0x2c6   :  { %1571 = vrot.lane.b32.xlu0 %v8364_v58, %s8848_s29  ;;  %1655 = vrot.lane.b32.xlu1 %v1605_v22, %s8849_s4  ;;  %v9425_v56 = vpop.f32.mrf.mxu1  ;;  %v7725_v58 = vld [vmem:[%s13289_s0 + $0x2d0] sm:$0xff] }
 0x2c7   :  { %8365 = vtanh.f32 %v9389_v30 }
 0x2c9   :  { %7742 = vmatmul.msk.f32.gmra.mxu1 %vm31_vm1, %v7725_v58 }
 0x2cb   :  { %v1562_v31 = vpop.permute.xlu1 %1561 }
 0x2cc   :  { %v1606_v17 = vmul.f32 %v1562_v31, %v9145_v50  ;;  %v1480_v23 = vpop.permute.xlu0 %1479  ;;  %v1359_v50 = vmul.f32 0.0, %v9224_v62  ;;  %v1486_v31 = vpop.permute.xlu2 %1485 }
 0x2cd   :  { %v8366_v3 = vpop.eup %8365  ;;  %v9402_v34 = vadd.f32 %v1480_v23, %v1357_v12  ;;  %v1360_v12 = vmul.f32 0.0, %v9231_v9 }
 0x2ce   :  { %1573 = vrot.lane.b32.xlu0 %v8366_v3, %s8848_s29  ;;  %1657 = vrot.lane.b32.xlu1 %v1606_v17, %s8849_s4  ;;  %v9417_v14 = vadd.f32 %v1484_v16, %v1359_v50  ;;  %v9434_v63 = vpop.f32.mrf.mxu1 }
 0x2cf   :  { %8367 = vtanh.f32 %v9402_v34  ;;  %v9441_v17 = vadd.f32 %v1486_v31, %v1360_v12 }
 0x2d0   :  { %8369 = vtanh.f32 %v9415_v19 }
 0x2d1   :  { %8371 = vtanh.f32 %v9417_v14  ;;  %7743 = vmatmul.msk.f32.gmra.mxu1 %vm31_vm1, %v7726_v7 }
 0x2d2   :  { %8373 = vtanh.f32 %v9441_v17 }
 0x2d3   :  { %v1564_v20 = vpop.permute.xlu1 %1563 }
 0x2d4   :  { %v1607_v25 = vmul.f32 %v1564_v20, %v9153_v60  ;;  %v1566_v35 = vpop.permute.xlu0 %1565  ;;  %v1488_v7 = vpop.permute.xlu2 %1487 }
 0x2d5   :  { %v8368_v28 = vpop.eup %8367  ;;  %v1608_v22 = vmul.f32 %v1566_v35, %v9161_v2 }
 0x2d6   :  { %1575 = vrot.lane.b32.xlu2 %v8368_v28, %s8848_s29  ;;  %1659 = vrot.lane.b32.xlu1 %v1607_v25, %s8849_s4  ;;  %v8370_v60 = vpop.eup %8369  ;;  %v9446_v10 = vpop.f32.mrf.mxu1  ;;  %v7729_v25 = vld [vmem:[%s13289_s0 + $0x2f0] sm:$0xff]  ;;  %v7730_v28 = vld [vmem:[%s13289_s0 + $0x2f8] sm:$0xff] }
 0x2d7   :  { %1661 = vrot.lane.b32.xlu0 %v1608_v22, %s8849_s4  ;;  %v8372_v2 = vpop.eup %8371 }
 0x2d8   :  { %v8374_v16 = vpop.eup %8373 }
 0x2d9   :  { %7744 = vmatmul.msk.f32.gmra.mxu1 %vm31_vm1, %v7727_v15 }
 0x2dc   :  { %v1490_v15 = vpop.permute.xlu2 %1489 }
 0x2de   :  { %1577 = vrot.lane.b32.xlu1 %v8370_v60, %s8848_s29  ;;  %v9453_v50 = vpop.f32.mrf.mxu1 }
 0x2df   :  { %1579 = vrot.lane.b32.xlu0 %v8372_v2, %s8848_s29 }
 0x2e3   :  { %v1568_v23 = vpop.permute.xlu0 %1567 }
 0x2e4   :  { %v1609_v3 = vmul.f32 %v1568_v23, %v9167_v6  ;;  %v7728_v6 = vld [vmem:[%s13289_s0 + $0x2e8] sm:$0xff]  ;;  %v1361_v23 = vmul.f32 0.0, %v9239_v18 }
 0x2e5   :  { %7745 = vmatmul.msk.f32.gmra.mxu1 %vm31_vm1, %v7728_v6 }
 0x2e6   :  { %1663 = vrot.lane.b32.xlu2 %v1609_v3, %s8849_s4  ;;  %v9459_v20 = vpop.f32.mrf.mxu1  ;;  %v9483_v3 = vadd.f32 %v1488_v7, %v1361_v23 }
 0x2e8   :  { %8375 = vtanh.f32 %v9483_v3 }
 0x2ed   :  { %7746 = vmatmul.msk.f32.gmra.mxu1 %vm31_vm1, %v7729_v25 }
 0x2ee   :  { %1581 = vrot.lane.b32.xlu2 %v8374_v16, %s8848_s29  ;;  %v9465_v35 = vpop.f32.mrf.mxu1 }
 0x2f5   :  { %7747 = vmatmul.msk.f32.gmra.mxu1 %vm31_vm1, %v7730_v28  ;;  %v1362_v28 = vmul.f32 0.0, %v9245_v21 }
 0x2f6   :  { %v9471_v22 = vpop.f32.mrf.mxu1 }
 0x2f7   :  { %13335 = vst [vmem:[#allocation15_spill] sm:$0xff] %v9471_v22  ;;  %v8376_v22 = vpop.eup %8375 }
 0x2fe   :  { %v9473_v58 = vpop.f32.mrf.mxu1 }
 0x2ff   :  { %13336 = vst [vmem:[#allocation16_spill] sm:$0xff] %v9473_v58  ;;  %v7629_v58 = vld [vmem:[%s13289_s0 + $0x168] sm:$0xff] }
 0x306   :  { %v9475_v60 = vpop.f32.mrf.mxu1 }
 0x307   :  { %13337 = vst [vmem:[#allocation17_spill] sm:$0xff] %v9475_v60 }
 0x30e   :  { %v9477_v2 = vpop.f32.mrf.mxu1 }
 0x30f   :  { %13338 = vst [vmem:[#allocation18_spill] sm:$0xff] %v9477_v2 }
 0x316   :  { %v9480_v12 = vpop.f32.mrf.mxu1 }
 0x317   :  { %13339 = vst [vmem:[#allocation19_spill] sm:$0xff] %v9480_v12  ;;  %v9492_v12 = vadd.f32 %v1490_v15, %v1362_v28 }
 0x319   :  { %8377 = vtanh.f32 %v9492_v12 }
 0x328   :  { %v1652_v31 = vpop.permute.xlu1 %1651 }
 0x329   :  { %7814 = vmatmul.msk.f32.vlgmr.msra.gmra.mxu1 %vm1214_vm5, %v1652_v31  ;;  %v9490_v31 = vpop.f32.mrf.mxu1 }
 0x32a   :  { %13340 = vst [vmem:[#allocation20_spill] sm:$0xff] %v9490_v31 }
 0x330   :  { %v1570_v16 = vpop.permute.xlu0 %1569  ;;  %v1654_v25 = vpop.permute.xlu1 %1653 }
 0x331   :  { %v1610_v6 = vmul.f32 %v1570_v16, %v9180_v52  ;;  %7815 = vmatmul.msk.f32.gmra.mxu1 %vm1214_vm5, %v1654_v25  ;;  %v1576_v2 = vpop.permute.xlu2 %1575  ;;  %v8378_v25 = vpop.eup %8377 }
 0x332   :  { %v1613_v28 = vmul.f32 %v1576_v2, %v9210_v36 }
 0x333   :  { %1665 = vrot.lane.b32.xlu1 %v1610_v6, %s8849_s4 }
 0x338   :  { %v1572_v7 = vpop.permute.xlu0 %1571  ;;  %v1656_v60 = vpop.permute.xlu1 %1655 }
 0x339   :  { %v1611_v23 = vmul.f32 %v1572_v7, %v9189_v0  ;;  %7816 = vmatmul.msk.f32.gmra.mxu1 %vm1214_vm5, %v1656_v60  ;;  %v9502_v0 = vpop.f32.mrf.mxu1 }
 0x33a   :  { %13341 = vst [vmem:[#allocation21_spill] sm:$0xff] %v9502_v0 }
 0x33b   :  { %1667 = vrot.lane.b32.xlu0 %v1611_v23, %s8849_s4  ;;  %1583 = vrot.lane.b32.xlu1 %v8376_v22, %s8848_s29 }
 0x340   :  { %v1664_v52 = vpop.permute.xlu2 %1663  ;;  %v1574_v16 = vpop.permute.xlu0 %1573 }
 0x341   :  { %v1612_v6 = vmul.f32 %v1574_v16, %v9198_v13  ;;  %v1658_v15 = vpop.permute.xlu1 %1657  ;;  %v9510_v13 = vpop.f32.mrf.mxu1 }
 0x342   :  { %7817 = vmatmul.msk.f32.gmra.mxu1 %vm1214_vm5, %v1658_v15  ;;  %13342 = vst [vmem:[#allocation22_spill] sm:$0xff] %v9510_v13 }
 0x343   :  { %1585 = vrot.lane.b32.xlu0 %v8378_v25, %s8848_s29  ;;  %1669 = vrot.lane.b32.xlu2 %v1612_v6, %s8849_s4 }
 0x344   :  { %1671 = vrot.lane.b32.xlu1 %v1613_v28, %s8849_s4 }
 0x348   :  { %v1582_v22 = vpop.permute.xlu2 %1581 }
 0x349   :  { %v1616_v60 = vmul.f32 %v1582_v22, %v9231_v9  ;;  %v1660_v7 = vpop.permute.xlu1 %1659  ;;  %v1662_v23 = vpop.permute.xlu0 %1661 }
 0x34a   :  { %7818 = vmatmul.msk.f32.gmra.mxu1 %vm1214_vm5, %v1660_v7  ;;  %v9517_v9 = vpop.f32.mrf.mxu1  ;;  %v7592_v7 = vld [vmem:[%s13289_s0 + $0xc8] sm:$0xff] }
 0x34b   :  { %13343 = vst [vmem:[#allocation23_spill] sm:$0xff] %v9517_v9 }
 0x34c   :  { %1677 = vrot.lane.b32.xlu1 %v1616_v60, %s8849_s4  ;;  %v8828_v60 = vld [vmem:[%s13288_s1] sm:$0xff] }
 0x351   :  { %v1578_v36 = vpop.permute.xlu1 %1577  ;;  %v1580_v2 = vpop.permute.xlu0 %1579 }
 0x352   :  { %v1614_v16 = vmul.f32 %v1578_v36, %v9213_v37  ;;  %v1615_v15 = vmul.f32 %v1580_v2, %v9224_v62  ;;  %7819 = vmatmul.msk.f32.gmra.mxu1 %vm1214_vm5, %v1662_v23  ;;  %v9520_v6 = vpop.f32.mrf.mxu1  ;;  %v7591_v37 = vld [vmem:[%s13289_s0 + $0xc0] sm:$0xff]  ;;  %v8827_v62 = vld [vmem:[%s13288_s1 + $0x8] sm:$0xf]  ;;  %v7593_v36 = vld [vmem:[%s13289_s0 + $0xd0] sm:$0xff] }
 0x353   :  { %13344 = vst [vmem:[#allocation24_spill] sm:$0xff] %v9520_v6  ;;  %7608 = vmatmul.msk.f32.vlgmr.msra.gmra.mxu3 %vm31_vm1, %v7591_v37 }
 0x354   :  { %1673 = vrot.lane.b32.xlu2 %v1614_v16, %s8849_s4  ;;  %1675 = vrot.lane.b32.xlu0 %v1615_v15, %s8849_s4  ;;  %v7594_v16 = vld [vmem:[%s13289_s0 + $0xd8] sm:$0xff]  ;;  %v248_v15 = vadd.f32 %v9097_v61, %v9394_v1  ;;  %v7596_v1 = vld [vmem:[%s13289_s0 + $0xe8] sm:$0xff] }
 0x355   :  { %7797 = vmatpush.msk.msra.mxu3 %vm80_vm0, %v8827_v62 }
 0x357   :  { %1121 = vmatpush.msra.mxu3 %v8828_v60  ;;  %v7595_v60 = vld [vmem:[%s13289_s0 + $0xe0] sm:$0xff] }
 0x35a   :  { %7820 = vmatmul.msk.f32.gmra.mxu1 %vm1214_vm5, %v1664_v52  ;;  %v9522_v25 = vpop.f32.mrf.mxu1 }
 0x35b   :  { %13345 = vst [vmem:[#allocation25_spill] sm:$0xff] %v9522_v25  ;;  %7609 = vmatmul.msk.f32.gmra.mxu3 %vm31_vm1, %v7592_v7 }
 0x362   :  { %v9524_v28 = vpop.f32.mrf.mxu1 }
 0x363   :  { %13346 = vst [vmem:[#allocation26_spill] sm:$0xff] %v9524_v28  ;;  %7610 = vmatmul.msk.f32.gmra.mxu3 %vm31_vm1, %v7593_v36 }
 0x36a   :  { %v9526_v22 = vpop.f32.mrf.mxu1 }
 0x36b   :  { %13347 = vst [vmem:[#allocation27_spill] sm:$0xff] %v9526_v22  ;;  %7611 = vmatmul.msk.f32.gmra.mxu3 %vm31_vm1, %v7594_v16  ;;  %v251_v16 = vadd.f32 %v9097_v61, %v9407_v8 }
 0x372   :  { %v9536_v52 = vpop.f32.mrf.mxu1 }
 0x373   :  { %13348 = vst [vmem:[#allocation28_spill] sm:$0xff] %v9536_v52  ;;  %7612 = vmatmul.msk.f32.gmra.mxu3 %vm31_vm1, %v7595_v60  ;;  %v254_v60 = vadd.f32 %v9097_v61, %v9425_v56 }
 0x37a   :  { %v9545_v23 = vpop.f32.mrf.mxu1 }
 0x37b   :  { %13349 = vst [vmem:[#allocation29_spill] sm:$0xff] %v9545_v23  ;;  %7613 = vmatmul.msk.f32.gmra.mxu3 %vm31_vm1, %v7596_v1 }
 0x382   :  { %v9551_v2 = vpop.f32.mrf.mxu1 }
 0x383   :  { %13350 = vst [vmem:[#allocation30_spill] sm:$0xff] %v9551_v2 }
 0x3a5   :  { %v1666_v37 = vpop.permute.xlu1 %1665 }
 0x3a6   :  { %v1732_v62 = vpop.f32.mrf.mxu1  ;;  %7821 = vmatmul.msk.f32.gmra.mxu1 %vm1214_vm5, %v1666_v37 }
 0x3a7   :  { %v1780_v7 = vadd.f32 %v1732_v62, %v248_v15 }
 0x3a9   :  { %8379 = vtanh.f32 %v1780_v7 }
 0x3ad   :  { %v1668_v36 = vpop.permute.xlu0 %1667  ;;  %v1584_v2 = vpop.permute.xlu1 %1583 }
 0x3ae   :  { %v1617_v23 = vmul.f32 %v1584_v2, %v9239_v18  ;;  %7822 = vmatmul.msk.f32.gmra.mxu1 %vm1214_vm5, %v1668_v36  ;;  %v1735_v52 = vpop.f32.mrf.mxu1  ;;  %v1670_v18 = vpop.permute.xlu2 %1669 }
 0x3af   :  { %v8380_v37 = vpop.eup %8379  ;;  %v1781_v62 = vadd.f32 %v1735_v52, %v251_v16 }
 0x3b0   :  { %v1812_v15 = vmul.f32 %v8380_v37, %v9107_v5  ;;  %1679 = vrot.lane.b32.xlu2 %v1617_v23, %s8849_s4 }
 0x3b1   :  { %8381 = vtanh.f32 %v1781_v62 }
 0x3b2   :  { %v9575_v8 = vadd.f32 %v1812_v15, %v9113_v11 }
 0x3b4   :  { %1876 = vrot.lane.b32.xlu1 %v9575_v8, %s8848_s29 }
 0x3b5   :  { %v1586_v2 = vpop.permute.xlu0 %1585 }
 0x3b6   :  { %v1618_v7 = vmul.f32 %v1586_v2, %v9245_v21  ;;  %7823 = vmatmul.msk.f32.gmra.mxu1 %vm1214_vm5, %v1670_v18  ;;  %v1738_v36 = vpop.f32.mrf.mxu1  ;;  %v1672_v37 = vpop.permute.xlu1 %1671  ;;  %v257_v21 = vadd.f32 %v9097_v61, %v9434_v63  ;;  %v260_v63 = vadd.f32 %v9097_v61, %v9446_v10  ;;  %v263_v10 = vadd.f32 %v9097_v61, %v9453_v50 }
 0x3b7   :  { %v8382_v52 = vpop.eup %8381  ;;  %v1782_v16 = vadd.f32 %v1738_v36, %v254_v60  ;;  %v1674_v60 = vpop.permute.xlu2 %1673 }
 0x3b8   :  { %1681 = vrot.lane.b32.xlu0 %v1618_v7, %s8849_s4  ;;  %v1813_v23 = vmul.f32 %v8382_v52, %v9107_v5  ;;  %v7597_v7 = vld [vmem:[%s13289_s0 + $0xf0] sm:$0xff] }
 0x3b9   :  { %8383 = vtanh.f32 %v1782_v16  ;;  %7614 = vmatmul.msk.f32.gmra.mxu3 %vm31_vm1, %v7597_v7 }
 0x3ba   :  { %v9586_v1 = vadd.f32 %v1813_v23, %v9113_v11 }
 0x3bc   :  { %1878 = vrot.lane.b32.xlu2 %v9586_v1, %s8848_s29 }
 0x3be   :  { %7824 = vmatmul.msk.f32.gmra.mxu1 %vm1214_vm5, %v1672_v37  ;;  %v1678_v7 = vpop.permute.xlu1 %1677 }
 0x3bf   :  { %v1741_v56 = vpop.f32.mrf.mxu1  ;;  %v8384_v15 = vpop.eup %8383 }
 0x3c0   :  { %v1783_v62 = vadd.f32 %v1741_v56, %v257_v21  ;;  %v1814_v18 = vmul.f32 %v8384_v15, %v9107_v5 }
 0x3c2   :  { %8385 = vtanh.f32 %v1783_v62  ;;  %v9595_v2 = vadd.f32 %v1814_v18, %v9113_v11 }
 0x3c4   :  { %1880 = vrot.lane.b32.xlu0 %v9595_v2, %s8848_s29 }
 0x3c6   :  { %7825 = vmatmul.msk.f32.gmra.mxu1 %vm1214_vm5, %v1674_v60  ;;  %v1676_v21 = vpop.permute.xlu0 %1675 }
 0x3c7   :  { %v1744_v36 = vpop.f32.mrf.mxu1 }
 0x3c8   :  { %v8386_v52 = vpop.eup %8385  ;;  %v1784_v16 = vadd.f32 %v1744_v36, %v260_v63  ;;  %v9624_v63 = vld [vmem:[%s13288_s1 + $0x30] ss:$0 sm:$0xff] }
 0x3c9   :  { %v1815_v23 = vmul.f32 %v8386_v52, %v9107_v5  ;;  %v266_v61 = vadd.f32 %v9624_v63, %v9459_v20  ;;  %v7598_v20 = vld [vmem:[%s13289_s0 + $0xf8] sm:$0xff] }
 0x3ca   :  { %8387 = vtanh.f32 %v1784_v16  ;;  %7615 = vmatmul.msk.f32.gmra.mxu3 %vm31_vm1, %v7598_v20 }
 0x3cb   :  { %v9608_v37 = vadd.f32 %v1815_v23, %v9113_v11 }
 0x3cd   :  { %1882 = vrot.lane.b32.xlu1 %v9608_v37, %s8848_s29 }
 0x3ce   :  { %7826 = vmatmul.msk.f32.gmra.mxu1 %vm1214_vm5, %v1676_v21 }
 0x3cf   :  { %v1747_v56 = vpop.f32.mrf.mxu1 }
 0x3d0   :  { %v8388_v15 = vpop.eup %8387  ;;  %v1785_v62 = vadd.f32 %v1747_v56, %v263_v10 }
 0x3d1   :  { %v1816_v18 = vmul.f32 %v8388_v15, %v9107_v5 }
 0x3d2   :  { %8389 = vtanh.f32 %v1785_v62 }
 0x3d3   :  { %v9617_v60 = vadd.f32 %v1816_v18, %v9113_v11 }
 0x3d5   :  { %1884 = vrot.lane.b32.xlu2 %v9617_v60, %s8848_s29 }
 0x3d6   :  { %7827 = vmatmul.msk.f32.gmra.mxu1 %vm1214_vm5, %v1678_v7  ;;  %v271_v7 = vpop.f32.mrf.mxu3 }
 0x3d7   :  { %v1750_v50 = vpop.f32.mrf.mxu1 }
 0x3d8   :  { %v8390_v36 = vpop.eup %8389  ;;  %v1786_v52 = vadd.f32 %v1750_v50, %v266_v61  ;;  %v269_v61 = vadd.f32 %v9624_v63, %v9465_v35 }
 0x3d9   :  { %v1817_v16 = vmul.f32 %v8390_v36, %v9107_v5 }
 0x3da   :  { %8391 = vtanh.f32 %v1786_v52 }
 0x3db   :  { %v9631_v23 = vadd.f32 %v1817_v16, %v9113_v11 }
 0x3dd   :  { %1886 = vrot.lane.b32.xlu0 %v9631_v23, %s8848_s29 }
 0x3de   :  { %v274_v52 = vpop.f32.mrf.mxu3 }
 0x3e0   :  { %v8392_v21 = vpop.eup %8391 }
 0x3e1   :  { %v1818_v10 = vmul.f32 %v8392_v21, %v9107_v5 }
 0x3e3   :  { %v9637_v56 = vadd.f32 %v1818_v10, %v9113_v11  ;;  %v272_v10 = vadd.f32 %v9624_v63, %v271_v7 }
 0x3e5   :  { %1888 = vrot.lane.b32.xlu2 %v9637_v56, %s8848_s29 }
 0x40a   :  { %v1680_v15 = vpop.permute.xlu2 %1679 }
 0x40b   :  { %7828 = vmatmul.msk.f32.gmra.mxu1 %vm1214_vm5, %v1680_v15 }
 0x416   :  { %v1879_v62 = vpop.permute.xlu2 %1878 }
 0x417   :  { %v1925_v18 = vmul.f32 %v1879_v62, %v9586_v1 }
 0x419   :  { %1958 = vrot.lane.b32.xlu0 %v1925_v18, %s8849_s4 }
 0x423   :  { %v1753_v50 = vpop.f32.mrf.mxu1 }
 0x424   :  { %v1787_v36 = vadd.f32 %v1753_v50, %v269_v61  ;;  %v277_v61 = vpop.f32.mrf.mxu3  ;;  %v275_v50 = vadd.f32 %v9624_v63, %v274_v52 }
 0x426   :  { %8393 = vtanh.f32 %v1787_v36  ;;  %v1877_v16 = vpop.permute.xlu1 %1876 }
 0x427   :  { %v1924_v21 = vmul.f32 %v1877_v16, %v9575_v8 }
 0x429   :  { %1956 = vrot.lane.b32.xlu1 %v1924_v21, %s8849_s4 }
 0x42a   :  { %v1682_v20 = vpop.permute.xlu0 %1681 }
 0x42b   :  { %v1756_v15 = vpop.f32.mrf.mxu1  ;;  %7829 = vmatmul.msk.f32.gmra.mxu1 %vm1214_vm5, %v1682_v20 }
 0x42c   :  { %v8394_v62 = vpop.eup %8393  ;;  %v1788_v18 = vadd.f32 %v1756_v15, %v272_v10  ;;  %v280_v52 = vpop.f32.mrf.mxu3 }
 0x42d   :  { %v1819_v22 = vmul.f32 %v8394_v62, %v9107_v5 }
 0x42e   :  { %8395 = vtanh.f32 %v1788_v18 }
 0x42f   :  { %v9656_v35 = vadd.f32 %v1819_v22, %v9113_v11  ;;  %v278_v22 = vadd.f32 %v9624_v63, %v277_v61 }
 0x431   :  { %1890 = vrot.lane.b32.xlu1 %v9656_v35, %s8848_s29 }
 0x433   :  { %v1759_v7 = vpop.f32.mrf.mxu1 }
 0x434   :  { %v8396_v36 = vpop.eup %8395  ;;  %v1789_v16 = vadd.f32 %v1759_v7, %v275_v50  ;;  %v1885_v50 = vpop.permute.xlu2 %1884 }
 0x435   :  { %v1820_v21 = vmul.f32 %v8396_v36, %v9107_v5  ;;  %v1928_v61 = vmul.f32 %v1885_v50, %v9617_v60 }
 0x436   :  { %8397 = vtanh.f32 %v1789_v16  ;;  %v1881_v20 = vpop.permute.xlu0 %1880  ;;  %v7616_v16 = vld [vmem:[%s13289_s0 + $0x100] sm:$0xff] }
 0x437   :  { %v9663_v10 = vadd.f32 %v1820_v21, %v9113_v11  ;;  %v1926_v15 = vmul.f32 %v1881_v20, %v9595_v2  ;;  %7633 = vmatmul.msk.f32.vlgmr.msrb.gmra.mxu2 %vm31_vm1, %v7616_v16 }
 0x439   :  { %1892 = vrot.lane.b32.xlu0 %v9663_v10, %s8848_s29  ;;  %1960 = vrot.lane.b32.xlu2 %v1926_v15, %s8849_s4  ;;  %v9682_v15 = vld [vmem:[%s13288_s1 + $0x28] sm:$0xff] }
 0x43a   :  { %2224 = vmatpush.msrb.mxu2 %v9682_v15 }
 0x43b   :  { %v1762_v62 = vpop.f32.mrf.mxu1 }
 0x43c   :  { %v8398_v18 = vpop.eup %8397  ;;  %v1790_v7 = vadd.f32 %v1762_v62, %v278_v22  ;;  %v281_v62 = vadd.f32 %v9624_v63, %v280_v52  ;;  %v7617_v52 = vld [vmem:[%s13289_s0 + $0x108] sm:$0xff] }
 0x43d   :  { %v1821_v36 = vmul.f32 %v8398_v18, %v9107_v5  ;;  %v9691_v18 = vld [vmem:[%s13288_s1 + $0x20] sm:$0xff] }
 0x43e   :  { %8399 = vtanh.f32 %v1790_v7  ;;  %2225 = vmatpush.msrb.mxu2 %v9691_v18  ;;  %v283_v7 = vpop.f32.mrf.mxu3 }
 0x43f   :  { %v1883_v21 = vpop.permute.xlu1 %1882  ;;  %v9677_v20 = vadd.f32 %v1821_v36, %v9113_v11  ;;  %v9703_v36 = vld [vmem:[%s13288_s1 + $0x18] sm:$0xff]  ;;  %7634 = vmatmul.msk.f32.gmra.mxu2 %vm31_vm1, %v7617_v52  ;;  %v284_v25 = vadd.f32 %v9624_v63, %v283_v7  ;;  %v1889_v9 = vpop.permute.xlu2 %1888 }
 0x440   :  { %v1927_v22 = vmul.f32 %v1883_v21, %v9608_v37  ;;  %2226 = vmatpush.msrb.mxu2 %v9703_v36 }
 0x441   :  { %1964 = vrot.lane.b32.xlu0 %v1928_v61, %s8849_s4  ;;  %1894 = vrot.lane.b32.xlu2 %v9677_v20, %s8848_s29 }
 0x442   :  { %1962 = vrot.lane.b32.xlu1 %v1927_v22, %s8849_s4  ;;  %v9710_v22 = vld [vmem:[%s13288_s1 + $0x10] sm:$0xff] }
 0x443   :  { %v1765_v50 = vpop.f32.mrf.mxu1  ;;  %2227 = vmatpush.msrb.mxu2 %v9710_v22 }
 0x444   :  { %v8400_v16 = vpop.eup %8399  ;;  %v1791_v61 = vadd.f32 %v1765_v50, %v281_v62  ;;  %v7618_v50 = vld [vmem:[%s13289_s0 + $0x110] sm:$0xff] }
 0x445   :  { %v1822_v21 = vmul.f32 %v8400_v16, %v9107_v5 }
 0x446   :  { %8401 = vtanh.f32 %v1791_v61  ;;  %v286_v13 = vpop.f32.mrf.mxu3 }
 0x447   :  { %v9715_v28 = vadd.f32 %v1822_v21, %v9113_v11  ;;  %7635 = vmatmul.msk.f32.gmra.mxu2 %vm31_vm1, %v7618_v50  ;;  %v1930_v21 = vmul.f32 %v1889_v9, %v9637_v56  ;;  %v287_v31 = vadd.f32 %v9624_v63, %v286_v13 }
 0x44a   :  { %1896 = vrot.lane.b32.xlu1 %v9715_v28, %s8848_s29 }
 0x44b   :  { %v1768_v62 = vpop.f32.mrf.mxu1 }
 0x44c   :  { %v8402_v16 = vpop.eup %8401  ;;  %v1792_v6 = vadd.f32 %v1768_v62, %v284_v25  ;;  %v7619_v25 = vld [vmem:[%s13289_s0 + $0x118] sm:$0xff] }
 0x44d   :  { %v1823_v61 = vmul.f32 %v8402_v16, %v9107_v5 }
 0x44e   :  { %8403 = vtanh.f32 %v1792_v6 }
 0x44f   :  { %v1887_v52 = vpop.permute.xlu0 %1886  ;;  %v9726_v7 = vadd.f32 %v1823_v61, %v9113_v11  ;;  %7636 = vmatmul.msk.f32.gmra.mxu2 %vm31_vm1, %v7619_v25  ;;  %v7624_v25 = vld [vmem:[%s13289_s0 + $0x140] sm:$0xff] }
 0x450   :  { %v1929_v0 = vmul.f32 %v1887_v52, %v9631_v23  ;;  %v7621_v52 = vld [vmem:[%s13289_s0 + $0x128] sm:$0xff] }
 0x451   :  { %1898 = vrot.lane.b32.xlu0 %v9726_v7, %s8848_s29 }
 0x452   :  { %1966 = vrot.lane.b32.xlu2 %v1929_v0, %s8849_s4  ;;  %1968 = vrot.lane.b32.xlu1 %v1930_v21, %s8849_s4  ;;  %v7620_v0 = vld [vmem:[%s13289_s0 + $0x120] sm:$0xff]  ;;  %v7622_v21 = vld [vmem:[%s13289_s0 + $0x130] sm:$0xff] }
 0x453   :  { %v1771_v6 = vpop.f32.mrf.mxu1 }
 0x454   :  { %v8404_v62 = vpop.eup %8403  ;;  %v1793_v50 = vadd.f32 %v1771_v6, %v287_v31  ;;  %v7623_v6 = vld [vmem:[%s13289_s0 + $0x138] sm:$0xff] }
 0x455   :  { %v1824_v9 = vmul.f32 %v8404_v62, %v9107_v5  ;;  %v289_v62 = vpop.f32.mrf.mxu3 }
 0x456   :  { %8405 = vtanh.f32 %v1793_v50  ;;  %v7625_v50 = vld [vmem:[%s13289_s0 + $0x148] sm:$0xff] }
 0x457   :  { %v9741_v13 = vadd.f32 %v1824_v9, %v9113_v11  ;;  %7637 = vmatmul.msk.f32.gmra.mxu2 %vm31_vm1, %v7620_v0  ;;  %v290_v9 = vadd.f32 %v9624_v63, %v289_v62  ;;  %v1844_v62 = vmul.f32 %v9575_v8, %v9250_v33 }
 0x459   :  { %1900 = vrot.lane.b32.xlu0 %v9741_v13, %s8848_s29 }
 0x45c   :  { %v8406_v16 = vpop.eup %8405 }
 0x45d   :  { %v1825_v61 = vmul.f32 %v8406_v16, %v9107_v5 }
 0x45f   :  { %v9751_v31 = vadd.f32 %v1825_v61, %v9113_v11  ;;  %7638 = vmatmul.msk.f32.gmra.mxu2 %vm31_vm1, %v7621_v52  ;;  %v7626_v61 = vld [vmem:[%s13289_s0 + $0x150] sm:$0xff] }
 0x461   :  { %1902 = vrot.lane.b32.xlu0 %v9751_v31, %s8848_s29 }
 0x467   :  { %7639 = vmatmul.msk.f32.gmra.mxu2 %vm31_vm1, %v7622_v21 }
 0x46f   :  { %7640 = vmatmul.msk.f32.gmra.mxu2 %vm31_vm1, %v7623_v6 }
 0x477   :  { %7641 = vmatmul.msk.f32.gmra.mxu2 %vm31_vm1, %v7624_v25  ;;  %v7627_v25 = vld [vmem:[%s13289_s0 + $0x158] sm:$0xff] }
 0x47f   :  { %7642 = vmatmul.msk.f32.gmra.mxu2 %vm31_vm1, %v7625_v50 }
 0x487   :  { %7643 = vmatmul.msk.f32.gmra.mxu2 %vm31_vm1, %v7626_v61  ;;  %v1845_v61 = vmul.f32 %v9586_v1, %v9254_v39 }
 0x488   :  { %v1774_v0 = vpop.f32.mrf.mxu1 }
 0x489   :  { %v1794_v16 = vadd.f32 %v1774_v0, %v290_v9  ;;  %v7628_v0 = vld [vmem:[%s13289_s0 + $0x160] sm:$0xff] }
 0x48b   :  { %8407 = vtanh.f32 %v1794_v16  ;;  %v1959_v16 = vpop.permute.xlu0 %1958 }
 0x48f   :  { %7644 = vmatmul.msk.f32.gmra.mxu2 %vm31_vm1, %v7627_v25 }
 0x491   :  { %v8408_v52 = vpop.eup %8407 }
 0x492   :  { %v1826_v21 = vmul.f32 %v8408_v52, %v9107_v5  ;;  %v9801_v52 = vadd.f32 %v1959_v16, %v1845_v61 }
 0x493   :  { %v1961_v39 = vpop.permute.xlu2 %1960 }
 0x494   :  { %v9782_v6 = vadd.f32 %v1826_v21, %v9113_v11  ;;  %v292_v21 = vpop.f32.mrf.mxu3 }
 0x496   :  { %1904 = vrot.lane.b32.xlu0 %v9782_v6, %s8848_s29 }
 0x497   :  { %7645 = vmatmul.msk.f32.gmra.mxu2 %vm31_vm1, %v7628_v0  ;;  %v1846_v0 = vmul.f32 %v9595_v2, %v9264_v4 }
 0x49b   :  { %v1957_v50 = vpop.permute.xlu1 %1956 }
 0x49c   :  { %v9792_v9 = vadd.f32 %v1957_v50, %v1844_v62  ;;  %v293_v50 = vadd.f32 %v9624_v63, %v292_v21 }
 0x49e   :  { %8409 = vtanh.f32 %v9792_v9 }
 0x49f   :  { %8411 = vtanh.f32 %v9801_v52  ;;  %7646 = vmatmul.msk.f32.gmra.mxu2 %vm31_vm1, %v7629_v58  ;;  %v1895_v58 = vpop.permute.xlu2 %1894 }
 0x4a3   :  { %v1891_v25 = vpop.permute.xlu1 %1890 }
 0x4a4   :  { %v8410_v33 = vpop.eup %8409  ;;  %v1931_v62 = vmul.f32 %v1891_v25, %v9656_v35  ;;  %v9814_v25 = vadd.f32 %v1961_v39, %v1846_v0  ;;  %v1933_v0 = vmul.f32 %v1895_v58, %v9677_v20 }
 0x4a5   :  { %2052 = vrot.lane.b32.xlu2 %v8410_v33, %s8848_s29  ;;  %v8412_v33 = vpop.eup %8411 }
 0x4a6   :  { %1970 = vrot.lane.b32.xlu1 %v1931_v62, %s8849_s4 }
 0x4a7   :  { %7647 = vmatmul.msk.f32.gmra.mxu2 %vm31_vm1, %v7630_v57 }
 0x4a8   :  { %v1777_v16 = vpop.f32.mrf.mxu1 }
 0x4a9   :  { %v1795_v61 = vadd.f32 %v1777_v16, %v293_v50  ;;  %v1847_v50 = vmul.f32 %v9608_v37, %v9283_v27 }
 0x4ab   :  { %8413 = vtanh.f32 %v1795_v61  ;;  %v1893_v21 = vpop.permute.xlu0 %1892 }
 0x4ac   :  { %v1932_v59 = vmul.f32 %v1893_v21, %v9663_v10  ;;  %8415 = vtanh.f32 %v9814_v25  ;;  %v1967_v27 = vpop.permute.xlu2 %1966 }
 0x4ad   :  { %2054 = vrot.lane.b32.xlu2 %v8412_v33, %s8848_s29  ;;  %v1848_v33 = vmul.f32 %v9617_v60, %v9293_v54 }
 0x4ae   :  { %1972 = vrot.lane.b32.xlu1 %v1932_v59, %s8849_s4  ;;  %v7631_v59 = vld [vmem:[%s13289_s0 + $0x178] sm:$0xff] }
 0x4af   :  { %7648 = vmatmul.msk.f32.gmra.mxu2 %vm31_vm1, %v7631_v59  ;;  %v1850_v59 = vmul.f32 %v9637_v56, %v9321_v26 }
 0x4b1   :  { %v8414_v4 = vpop.eup %8413 }
 0x4b2   :  { %v1827_v62 = vmul.f32 %v8414_v4, %v9107_v5  ;;  %v8416_v39 = vpop.eup %8415  ;;  %v1849_v4 = vmul.f32 %v9631_v23, %v9299_v32 }
 0x4b3   :  { %v1965_v57 = vpop.permute.xlu0 %1964 }
 0x4b4   :  { %v1963_v16 = vpop.permute.xlu1 %1962  ;;  %v9829_v61 = vadd.f32 %v1827_v62, %v9113_v11  ;;  %v9846_v58 = vadd.f32 %v1965_v57, %v1848_v33  ;;  %v9848_v62 = vadd.f32 %v1967_v27, %v1849_v4  ;;  %v7749_v33 = vld [vmem:[%s13289_s0 + $0x308] sm:$0xff] }
 0x4b5   :  { %v9834_v21 = vadd.f32 %v1963_v16, %v1847_v50  ;;  %2056 = vrot.lane.b32.xlu2 %v8416_v39, %s8848_s29  ;;  %v7748_v39 = vld [vmem:[%s13289_s0 + $0x300] sm:$0xff] }
 0x4b6   :  { %1906 = vrot.lane.b32.xlu0 %v9829_v61, %s8848_s29  ;;  %1974 = vrot.lane.b32.xlu1 %v1933_v0, %s8849_s4 }
 0x4b7   :  { %8417 = vtanh.f32 %v9834_v21  ;;  %7765 = vmatmul.msk.f32.vlgmr.msra.gmra.mxu2 %vm31_vm1, %v7748_v39 }
 0x4b8   :  { %8419 = vtanh.f32 %v9846_v58  ;;  %4212 = vmatpush.msra.mxu2 %v9682_v15 }
 0x4b9   :  { %8421 = vtanh.f32 %v9848_v62 }
 0x4ba   :  { %v9860_v54 = vpop.f32.mrf.mxu2  ;;  %4213 = vmatpush.msra.mxu2 %v9691_v18 }
 0x4bc   :  { %v1897_v50 = vpop.permute.xlu1 %1896  ;;  %4214 = vmatpush.msra.mxu2 %v9703_v36 }
 0x4bd   :  { %v8418_v0 = vpop.eup %8417  ;;  %v1934_v16 = vmul.f32 %v1897_v50, %v9715_v28 }
 0x4be   :  { %2058 = vrot.lane.b32.xlu2 %v8418_v0, %s8848_s29  ;;  %v8420_v4 = vpop.eup %8419  ;;  %4215 = vmatpush.msra.mxu2 %v9710_v22 }
 0x4bf   :  { %1976 = vrot.lane.b32.xlu1 %v1934_v16, %s8849_s4  ;;  %v8422_v39 = vpop.eup %8421  ;;  %7766 = vmatmul.msk.f32.gmra.mxu2 %vm31_vm1, %v7749_v33 }
 0x4c2   :  { %v9878_v26 = vpop.f32.mrf.mxu2 }
 0x4c3   :  { %v1899_v32 = vpop.permute.xlu0 %1898 }
 0x4c4   :  { %v1935_v57 = vmul.f32 %v1899_v32, %v9726_v7  ;;  %v1969_v27 = vpop.permute.xlu1 %1968  ;;  %v7750_v32 = vld [vmem:[%s13289_s0 + $0x310] sm:$0xff] }
 0x4c5   :  { %v9870_v50 = vadd.f32 %v1969_v27, %v1850_v59 }
 0x4c6   :  { %2060 = vrot.lane.b32.xlu2 %v8420_v4, %s8848_s29  ;;  %1978 = vrot.lane.b32.xlu0 %v1935_v57, %s8849_s4  ;;  %v7751_v4 = vld [vmem:[%s13289_s0 + $0x318] sm:$0xff] }
 0x4c7   :  { %8423 = vtanh.f32 %v9870_v50  ;;  %2062 = vrot.lane.b32.xlu1 %v8422_v39, %s8848_s29  ;;  %7767 = vmatmul.msk.f32.gmra.mxu2 %vm31_vm1, %v7750_v32  ;;  %v7753_v32 = vld [vmem:[%s13289_s0 + $0x328] sm:$0xff] }
 0x4ca   :  { %v9887_v57 = vpop.f32.mrf.mxu2 }
 0x4cb   :  { %v1901_v0 = vpop.permute.xlu0 %1900 }
 0x4cc   :  { %v1936_v16 = vmul.f32 %v1901_v0, %v9741_v13  ;;  %v7752_v0 = vld [vmem:[%s13289_s0 + $0x320] sm:$0xff] }
 0x4cd   :  { %v8424_v59 = vpop.eup %8423 }
 0x4ce   :  { %1980 = vrot.lane.b32.xlu0 %v1936_v16, %s8849_s4 }
 0x4cf   :  { %2064 = vrot.lane.b32.xlu1 %v8424_v59, %s8848_s29  ;;  %7768 = vmatmul.msk.f32.gmra.mxu2 %vm31_vm1, %v7751_v4  ;;  %v7755_v4 = vld [vmem:[%s13289_s0 + $0x338] sm:$0xff] }
 0x4d2   :  { %v9895_v39 = vpop.f32.mrf.mxu2 }
 0x4d3   :  { %v1903_v27 = vpop.permute.xlu0 %1902 }
 0x4d4   :  { %v1937_v33 = vmul.f32 %v1903_v27, %v9751_v31  ;;  %v7754_v27 = vld [vmem:[%s13289_s0 + $0x330] sm:$0xff] }
 0x4d6   :  { %1982 = vrot.lane.b32.xlu0 %v1937_v33, %s8849_s4 }
 0x4d7   :  { %7769 = vmatmul.msk.f32.gmra.mxu2 %vm31_vm1, %v7752_v0 }
 0x4da   :  { %v9901_v16 = vpop.f32.mrf.mxu2 }
 0x4df   :  { %7770 = vmatmul.msk.f32.gmra.mxu2 %vm31_vm1, %v7753_v32  ;;  %v7756_v32 = vld [vmem:[%s13289_s0 + $0x340] sm:$0xff] }
 0x4e2   :  { %v9907_v59 = vpop.f32.mrf.mxu2 }
 0x4e7   :  { %7771 = vmatmul.msk.f32.gmra.mxu2 %vm31_vm1, %v7754_v27 }
 0x4ea   :  { %v9913_v33 = vpop.f32.mrf.mxu2 }
 0x4ef   :  { %7772 = vmatmul.msk.f32.gmra.mxu2 %vm31_vm1, %v7755_v4 }
 0x4f2   :  { %v9919_v0 = vpop.f32.mrf.mxu2 }
 0x4f7   :  { %7773 = vmatmul.msk.f32.gmra.mxu2 %vm31_vm1, %v7756_v32 }
 0x4fa   :  { %v9926_v27 = vpop.f32.mrf.mxu2 }
 0x4ff   :  { %v2053_v55 = vpop.permute.xlu2 %2052  ;;  %7774 = vmatmul.msk.f32.gmra.mxu2 %vm31_vm1, %v7757_v49 }
 0x500   :  { %v2100_v53 = vmul.f32 %v2053_v55, %v9575_v8 }
 0x502   :  { %2148 = vrot.lane.b32.xlu2 %v2100_v53, %s8849_s4  ;;  %v9935_v46 = vpop.f32.mrf.mxu2  ;;  %v7758_v53 = vld [vmem:[%s13289_s0 + $0x350] sm:$0xff] }
 0x507   :  { %v2055_v4 = vpop.permute.xlu2 %2054  ;;  %7775 = vmatmul.msk.f32.gmra.mxu2 %vm31_vm1, %v7758_v53  ;;  %v7760_v53 = vld [vmem:[%s13289_s0 + $0x360] sm:$0xff] }
 0x508   :  { %v2101_v51 = vmul.f32 %v2055_v4, %v9586_v1  ;;  %v1905_v48 = vpop.permute.xlu0 %1904 }
 0x509   :  { %v1938_v47 = vmul.f32 %v1905_v48, %v9782_v6  ;;  %v7759_v48 = vld [vmem:[%s13289_s0 + $0x358] sm:$0xff] }
 0x50a   :  { %2150 = vrot.lane.b32.xlu2 %v2101_v51, %s8849_s4  ;;  %v9944_v8 = vpop.f32.mrf.mxu2 }
 0x50b   :  { %1984 = vrot.lane.b32.xlu0 %v1938_v47, %s8849_s4  ;;  %v1851_v47 = vmul.f32 %v9656_v35, %v9368_v29  ;;  %v1852_v29 = vmul.f32 %v9663_v10, %v9378_v24  ;;  %v7761_v24 = vld [vmem:[%s13289_s0 + $0x368] sm:$0xff] }
 0x50f   :  { %v2057_v55 = vpop.permute.xlu2 %2056  ;;  %7776 = vmatmul.msk.f32.gmra.mxu2 %vm31_vm1, %v7759_v48 }
 0x510   :  { %v2102_v49 = vmul.f32 %v2057_v55, %v9595_v2 }
 0x512   :  { %2152 = vrot.lane.b32.xlu2 %v2102_v49, %s8849_s4  ;;  %v9956_v2 = vpop.f32.mrf.mxu2 }
 0x517   :  { %7777 = vmatmul.msk.f32.gmra.mxu2 %vm31_vm1, %v7760_v53 }
 0x518   :  { %v2059_v51 = vpop.permute.xlu2 %2058  ;;  %v1971_v1 = vpop.permute.xlu1 %1970 }
 0x519   :  { %v2103_v32 = vmul.f32 %v2059_v51, %v9608_v37  ;;  %v9954_v4 = vadd.f32 %v1971_v1, %v1851_v47  ;;  %v1853_v1 = vmul.f32 %v9677_v20, %v9389_v30  ;;  %v7762_v30 = vld [vmem:[%s13289_s0 + $0x370] sm:$0xff] }
 0x51a   :  { %v9969_v51 = vpop.f32.mrf.mxu2 }
 0x51b   :  { %8425 = vtanh.f32 %v9954_v4  ;;  %2154 = vrot.lane.b32.xlu2 %v2103_v32, %s8849_s4 }
 0x51f   :  { %7778 = vmatmul.msk.f32.gmra.mxu2 %vm31_vm1, %v7761_v24 }
 0x520   :  { %v2061_v55 = vpop.permute.xlu2 %2060  ;;  %v1973_v49 = vpop.permute.xlu1 %1972 }
 0x521   :  { %v8426_v37 = vpop.eup %8425  ;;  %v2104_v48 = vmul.f32 %v2061_v55, %v9617_v60  ;;  %v9967_v47 = vadd.f32 %v1973_v49, %v1852_v29 }
 0x522   :  { %2066 = vrot.lane.b32.xlu1 %v8426_v37, %s8848_s29  ;;  %v9983_v49 = vpop.f32.mrf.mxu2  ;;  %v1854_v37 = vmul.f32 %v9715_v28, %v9402_v34 }
 0x523   :  { %8427 = vtanh.f32 %v9967_v47  ;;  %2156 = vrot.lane.b32.xlu2 %v2104_v48, %s8849_s4 }
 0x527   :  { %7779 = vmatmul.msk.f32.gmra.mxu2 %vm31_vm1, %v7762_v30 }
 0x528   :  { %v1907_v60 = vpop.permute.xlu0 %1906  ;;  %v1975_v32 = vpop.permute.xlu1 %1974 }
 0x529   :  { %v8428_v53 = vpop.eup %8427  ;;  %v1939_v29 = vmul.f32 %v1907_v60, %v9829_v61  ;;  %v9981_v55 = vadd.f32 %v1975_v32, %v1853_v1  ;;  %v7763_v32 = vld [vmem:[%s13289_s0 + $0x378] sm:$0xff] }
 0x52a   :  { %2068 = vrot.lane.b32.xlu1 %v8428_v53, %s8848_s29  ;;  %v9994_v1 = vpop.f32.mrf.mxu2  ;;  %v1855_v53 = vmul.f32 %v9726_v7, %v9415_v19  ;;  %v1856_v19 = vmul.f32 %v9741_v13, %v9417_v14 }
 0x52b   :  { %8429 = vtanh.f32 %v9981_v55  ;;  %1986 = vrot.lane.b32.xlu0 %v1939_v29, %s8849_s4 }
 0x52f   :  { %7780 = vmatmul.msk.f32.gmra.mxu2 %vm31_vm1, %v7763_v32 }
 0x531   :  { %v8430_v48 = vpop.eup %8429  ;;  %v1977_v24 = vpop.permute.xlu1 %1976 }
 0x532   :  { %v9996_v60 = vadd.f32 %v1977_v24, %v1854_v37  ;;  %2070 = vrot.lane.b32.xlu1 %v8430_v48, %s8848_s29  ;;  %v10009_v24 = vpop.f32.mrf.mxu2 }
 0x534   :  { %8431 = vtanh.f32 %v9996_v60 }
 0x538   :  { %v1979_v34 = vpop.permute.xlu0 %1978 }
 0x539   :  { %v10006_v29 = vadd.f32 %v1979_v34, %v1855_v53  ;;  %v2063_v30 = vpop.permute.xlu1 %2062 }
 0x53a   :  { %v8432_v45 = vpop.eup %8431  ;;  %v2105_v37 = vmul.f32 %v2063_v30, %v9631_v23  ;;  %v10020_v23 = vpop.f32.mrf.mxu2 }
 0x53b   :  { %8433 = vtanh.f32 %v10006_v29  ;;  %2072 = vrot.lane.b32.xlu0 %v8432_v45, %s8848_s29  ;;  %13351 = vst [vmem:[#allocation31_spill] sm:$0xff] %v10020_v23  ;;  %v1857_v45 = vmul.f32 %v9751_v31, %v9441_v17 }
 0x53c   :  { %2158 = vrot.lane.b32.xlu1 %v2105_v37, %s8849_s4 }
 0x540   :  { %v1981_v48 = vpop.permute.xlu0 %1980 }
 0x541   :  { %v8434_v32 = vpop.eup %8433  ;;  %v10016_v44 = vadd.f32 %v1981_v48, %v1856_v19  ;;  %v2065_v53 = vpop.permute.xlu1 %2064 }
 0x542   :  { %v2106_v34 = vmul.f32 %v2065_v53, %v9637_v56  ;;  %2074 = vrot.lane.b32.xlu2 %v8434_v32, %s8848_s29  ;;  %v10029_v19 = vpop.f32.mrf.mxu2 }
 0x543   :  { %8435 = vtanh.f32 %v10016_v44  ;;  %13352 = vst [vmem:[#allocation32_spill] sm:$0xff] %v10029_v19 }
 0x544   :  { %2160 = vrot.lane.b32.xlu0 %v2106_v34, %s8849_s4 }
 0x548   :  { %v1983_v30 = vpop.permute.xlu0 %1982 }
 0x549   :  { %v8436_v14 = vpop.eup %8435  ;;  %v10026_v37 = vadd.f32 %v1983_v30, %v1857_v45 }
 0x54a   :  { %2076 = vrot.lane.b32.xlu1 %v8436_v14, %s8848_s29  ;;  %v10033_v48 = vpop.f32.mrf.mxu2 }
 0x54b   :  { %8437 = vtanh.f32 %v10026_v37  ;;  %13353 = vst [vmem:[#allocation33_spill] sm:$0xff] %v10033_v48 }
 0x551   :  { %v8438_v56 = vpop.eup %8437 }
 0x552   :  { %2078 = vrot.lane.b32.xlu0 %v8438_v56, %s8848_s29  ;;  %v10036_v53 = vpop.f32.mrf.mxu2 }
 0x553   :  { %13354 = vst [vmem:[#allocation34_spill] sm:$0xff] %v10036_v53 }
 0x55a   :  { %v10039_v34 = vpop.f32.mrf.mxu2 }
 0x55b   :  { %13355 = vst [vmem:[#allocation35_spill] sm:$0xff] %v10039_v34  ;;  %v1858_v34 = vmul.f32 %v9782_v6, %v9483_v3 }
 0x55c   :  { %v2149_v32 = vpop.permute.xlu2 %2148 }
 0x55d   :  { %7830 = vmatmul.msk.f32.vlgmr.msrb.gmra.mxu2 %vm1214_vm5, %v2149_v32 }
 0x562   :  { %v10042_v30 = vpop.f32.mrf.mxu2 }
 0x563   :  { %13356 = vst [vmem:[#allocation36_spill] sm:$0xff] %v10042_v30 }
 0x564   :  { %v2151_v17 = vpop.permute.xlu2 %2150 }
 0x565   :  { %7831 = vmatmul.msk.f32.gmra.mxu2 %vm1214_vm5, %v2151_v17 }
 0x56a   :  { %v10045_v56 = vpop.f32.mrf.mxu2 }
 0x56b   :  { %13357 = vst [vmem:[#allocation37_spill] sm:$0xff] %v10045_v56 }
 0x56c   :  { %v2153_v45 = vpop.permute.xlu2 %2152 }
 0x56d   :  { %7832 = vmatmul.msk.f32.gmra.mxu2 %vm1214_vm5, %v2153_v45 }
 0x572   :  { %v10048_v32 = vpop.f32.mrf.mxu2 }
 0x573   :  { %13358 = vst [vmem:[#allocation38_spill] sm:$0xff] %v10048_v32  ;;  %v1859_v32 = vmul.f32 %v9829_v61, %v9492_v12 }
 0x575   :  { %v2155_v14 = vpop.permute.xlu2 %2154 }
 0x576   :  { %7833 = vmatmul.msk.f32.gmra.mxu2 %vm1214_vm5, %v2155_v14 }
 0x57a   :  { %v10050_v53 = vpop.f32.mrf.mxu2 }
 0x57b   :  { %13359 = vst [vmem:[#allocation39_spill] sm:$0xff] %v10050_v53 }
 0x57d   :  { %v2157_v48 = vpop.permute.xlu2 %2156  ;;  %v1985_v17 = vpop.permute.xlu0 %1984 }
 0x57e   :  { %7834 = vmatmul.msk.f32.gmra.mxu2 %vm1214_vm5, %v2157_v48  ;;  %v10054_v19 = vadd.f32 %v1985_v17, %v1858_v34 }
 0x580   :  { %8439 = vtanh.f32 %v10054_v19 }
 0x582   :  { %v10059_v14 = vpop.f32.mrf.mxu2 }
 0x583   :  { %13360 = vst [vmem:[#allocation40_spill] sm:$0xff] %v10059_v14 }
 0x586   :  { %v8440_v23 = vpop.eup %8439 }
 0x58a   :  { %v10069_v34 = vpop.f32.mrf.mxu2 }
 0x58b   :  { %13361 = vst [vmem:[#allocation41_spill] sm:$0xff] %v10069_v34 }
 0x594   :  { %v2067_v45 = vpop.permute.xlu1 %2066 }
 0x595   :  { %v2107_v30 = vmul.f32 %v2067_v45, %v9656_v35 }
 0x597   :  { %2162 = vrot.lane.b32.xlu2 %v2107_v30, %s8849_s4 }
 0x59c   :  { %v2069_v48 = vpop.permute.xlu1 %2068  ;;  %v2075_v12 = vpop.permute.xlu2 %2074 }
 0x59d   :  { %v2108_v53 = vmul.f32 %v2069_v48, %v9663_v10  ;;  %v1987_v56 = vpop.permute.xlu0 %1986  ;;  %v2111_v10 = vmul.f32 %v2075_v12, %v9726_v7 }
 0x59e   :  { %v10064_v3 = vadd.f32 %v1987_v56, %v1859_v32 }
 0x59f   :  { %2080 = vrot.lane.b32.xlu2 %v8440_v23, %s8848_s29  ;;  %2164 = vrot.lane.b32.xlu1 %v2108_v53, %s8849_s4  ;;  %v10076_v53 = vpop.f32.mrf.mxu2 }
 0x5a0   :  { %8441 = vtanh.f32 %v10064_v3  ;;  %13362 = vst [vmem:[#allocation42_spill] sm:$0xff] %v10076_v53 }
 0x5a4   :  { %v2071_v35 = vpop.permute.xlu1 %2070 }
 0x5a5   :  { %v2109_v30 = vmul.f32 %v2071_v35, %v9677_v20 }
 0x5a6   :  { %v8442_v17 = vpop.eup %8441 }
 0x5a7   :  { %2082 = vrot.lane.b32.xlu1 %v8442_v17, %s8848_s29  ;;  %2166 = vrot.lane.b32.xlu0 %v2109_v30, %s8849_s4  ;;  %v10082_v45 = vpop.f32.mrf.mxu2 }
 0x5a8   :  { %13363 = vst [vmem:[#allocation43_spill] sm:$0xff] %v10082_v45 }
 0x5ad   :  { %v2073_v56 = vpop.permute.xlu0 %2072 }
 0x5ae   :  { %v2110_v23 = vmul.f32 %v2073_v56, %v9715_v28  ;;  %v2159_v32 = vpop.permute.xlu1 %2158 }
 0x5af   :  { %7835 = vmatmul.msk.f32.gmra.mxu2 %vm1214_vm5, %v2159_v32  ;;  %2170 = vrot.lane.b32.xlu0 %v2111_v10, %s8849_s4  ;;  %v10086_v28 = vpop.f32.mrf.mxu2  ;;  %v394_v10 = vadd.f32 %v9624_v63, %v9860_v54  ;;  %v403_v54 = vadd.f32 %v9624_v63, %v9895_v39 }
 0x5b0   :  { %2168 = vrot.lane.b32.xlu2 %v2110_v23, %s8849_s4  ;;  %13364 = vst [vmem:[#allocation44_spill] sm:$0xff] %v10086_v28 }
 0x5b6   :  { %v2161_v20 = vpop.permute.xlu0 %2160 }
 0x5b7   :  { %7836 = vmatmul.msk.f32.gmra.mxu2 %vm1214_vm5, %v2161_v20  ;;  %v10090_v17 = vpop.f32.mrf.mxu2 }
 0x5b8   :  { %13365 = vst [vmem:[#allocation45_spill] sm:$0xff] %v10090_v17 }
 0x5bc   :  { %v2077_v48 = vpop.permute.xlu1 %2076 }
 0x5bd   :  { %v2112_v7 = vmul.f32 %v2077_v48, %v9741_v13 }
 0x5bf   :  { %2172 = vrot.lane.b32.xlu1 %v2112_v7, %s8849_s4  ;;  %v10092_v12 = vpop.f32.mrf.mxu2 }
 0x5c0   :  { %13366 = vst [vmem:[#allocation46_spill] sm:$0xff] %v10092_v12 }
 0x5c4   :  { %v2079_v35 = vpop.permute.xlu0 %2078 }
 0x5c5   :  { %v2113_v30 = vmul.f32 %v2079_v35, %v9751_v31  ;;  %v397_v31 = vadd.f32 %v9624_v63, %v9878_v26 }
 0x5c7   :  { %2174 = vrot.lane.b32.xlu2 %v2113_v30, %s8849_s4 }
 0x5e0   :  { %v2229_v56 = vpop.f32.mrf.mxu2 }
 0x5e1   :  { %v2277_v23 = vadd.f32 %v2229_v56, %v394_v10 }
 0x5e3   :  { %8443 = vtanh.f32 %v2277_v23 }
 0x5e8   :  { %v2232_v13 = vpop.f32.mrf.mxu2 }
 0x5e9   :  { %v8444_v32 = vpop.eup %8443  ;;  %v2278_v35 = vadd.f32 %v2232_v13, %v397_v31  ;;  %v406_v13 = vadd.f32 %v9624_v63, %v9901_v16 }
 0x5ea   :  { %v2309_v20 = vmul.f32 %v8444_v32, %v9107_v5 }
 0x5eb   :  { %8445 = vtanh.f32 %v2278_v35 }
 0x5ec   :  { %v10098_v48 = vadd.f32 %v2309_v20, %v9113_v11 }
 0x5ee   :  { %2373 = vrot.lane.b32.xlu2 %v10098_v48, %s8848_s29 }
 0x5f0   :  { %v2235_v7 = vpop.f32.mrf.mxu2 }
 0x5f1   :  { %v2163_v30 = vpop.permute.xlu2 %2162  ;;  %v8446_v20 = vpop.eup %8445 }
 0x5f2   :  { %7837 = vmatmul.msk.f32.gmra.mxu2 %vm1214_vm5, %v2163_v30  ;;  %v2310_v26 = vmul.f32 %v8446_v20, %v9107_v5 }
 0x5f4   :  { %v10113_v12 = vadd.f32 %v2310_v26, %v9113_v11 }
 0x5f9   :  { %v2238_v10 = vpop.f32.mrf.mxu2  ;;  %v2081_v56 = vpop.permute.xlu2 %2080 }
 0x5fa   :  { %v2280_v23 = vadd.f32 %v2238_v10, %v403_v54  ;;  %v2114_v32 = vmul.f32 %v2081_v56, %v9782_v6  ;;  %v400_v56 = vadd.f32 %v9624_v63, %v9887_v57 }
 0x5fc   :  { %8447 = vtanh.f32 %v2280_v23  ;;  %2176 = vrot.lane.b32.xlu0 %v2114_v32, %s8849_s4  ;;  %v2279_v23 = vadd.f32 %v2235_v7, %v400_v56  ;;  %v412_v56 = vadd.f32 %v9624_v63, %v9913_v33 }
 0x601   :  { %v2241_v31 = vpop.f32.mrf.mxu2 }
 0x602   :  { %v8448_v30 = vpop.eup %8447  ;;  %v2281_v35 = vadd.f32 %v2241_v31, %v406_v13 }
 0x603   :  { %v2312_v39 = vmul.f32 %v8448_v30, %v9107_v5 }
 0x604   :  { %8449 = vtanh.f32 %v2281_v35  ;;  %2375 = vrot.lane.b32.xlu0 %v10113_v12, %s8848_s29 }
 0x605   :  { %v10119_v6 = vadd.f32 %v2312_v39, %v9113_v11  ;;  %8451 = vtanh.f32 %v2279_v23 }
 0x607   :  { %2379 = vrot.lane.b32.xlu2 %v10119_v6, %s8848_s29 }
 0x60a   :  { %v8450_v54 = vpop.eup %8449  ;;  %v2169_v57 = vpop.permute.xlu2 %2168 }
 0x60b   :  { %v2313_v16 = vmul.f32 %v8450_v54, %v9107_v5  ;;  %v8452_v31 = vpop.eup %8451 }
 0x60c   :  { %v2311_v30 = vmul.f32 %v8452_v31, %v9107_v5 }
 0x60d   :  { %v10125_v10 = vadd.f32 %v2313_v16, %v9113_v11 }
 0x60e   :  { %v10138_v7 = vadd.f32 %v2311_v30, %v9113_v11 }
 0x60f   :  { %2381 = vrot.lane.b32.xlu0 %v10125_v10, %s8848_s29 }
 0x611   :  { %v2165_v32 = vpop.permute.xlu1 %2164 }
 0x612   :  { %7838 = vmatmul.msk.f32.gmra.mxu2 %vm1214_vm5, %v2165_v32 }
 0x619   :  { %v2167_v20 = vpop.permute.xlu0 %2166  ;;  %v2083_v26 = vpop.permute.xlu1 %2082 }
 0x61a   :  { %v2115_v13 = vmul.f32 %v2083_v26, %v9829_v61  ;;  %7839 = vmatmul.msk.f32.gmra.mxu2 %vm1214_vm5, %v2167_v20  ;;  %v409_v61 = vadd.f32 %v9624_v63, %v9907_v59 }
 0x61c   :  { %2178 = vrot.lane.b32.xlu1 %v2115_v13, %s8849_s4 }
 0x621   :  { %v2171_v35 = vpop.permute.xlu0 %2170  ;;  %v2175_v23 = vpop.permute.xlu2 %2174 }
 0x622   :  { %7840 = vmatmul.msk.f32.gmra.mxu2 %vm1214_vm5, %v2169_v57 }
 0x624   :  { %2377 = vrot.lane.b32.xlu1 %v10138_v7, %s8848_s29 }
 0x62a   :  { %7841 = vmatmul.msk.f32.gmra.mxu2 %vm1214_vm5, %v2171_v35 }
 0x631   :  { %v2173_v39 = vpop.permute.xlu1 %2172 }
 0x632   :  { %v2244_v54 = vpop.f32.mrf.mxu2  ;;  %7842 = vmatmul.msk.f32.gmra.mxu2 %vm1214_vm5, %v2173_v39  ;;  %v415_v39 = vadd.f32 %v9624_v63, %v9919_v0  ;;  %v7649_v0 = vld [vmem:[%s13289_s0 + $0x180] sm:$0xff] }
 0x633   :  { %v2282_v16 = vadd.f32 %v2244_v54, %v409_v61  ;;  %7666 = vmatmul.msk.f32.vlgmr.msrb.gmra.mxu3 %vm31_vm1, %v7649_v0 }
 0x634   :  { %2721 = vmatpush.msrb.mxu3 %v9682_v15  ;;  %v418_v15 = vadd.f32 %v9624_v63, %v9926_v27  ;;  %v7652_v27 = vld [vmem:[%s13289_s0 + $0x198] sm:$0xff] }
 0x635   :  { %8453 = vtanh.f32 %v2282_v16 }
 0x636   :  { %2722 = vmatpush.msrb.mxu3 %v9691_v18  ;;  %v7651_v18 = vld [vmem:[%s13289_s0 + $0x190] sm:$0xff] }
 0x638   :  { %2723 = vmatpush.msrb.mxu3 %v9703_v36 }
 0x63a   :  { %v2247_v32 = vpop.f32.mrf.mxu2  ;;  %7843 = vmatmul.msk.f32.gmra.mxu2 %vm1214_vm5, %v2175_v23  ;;  %2724 = vmatpush.msrb.mxu3 %v9710_v22  ;;  %v10200_v22 = vld [vmem:[%s13288_s1 + $0x30] ss:$0 sm:$0xff] }
 0x63b   :  { %v8454_v20 = vpop.eup %8453  ;;  %v2283_v26 = vadd.f32 %v2247_v32, %v412_v56  ;;  %v421_v63 = vadd.f32 %v10200_v22, %v9935_v46  ;;  %v424_v46 = vadd.f32 %v10200_v22, %v9944_v8  ;;  %v7654_v8 = vld [vmem:[%s13289_s0 + $0x1a8] sm:$0xff] }
 0x63c   :  { %v2314_v13 = vmul.f32 %v8454_v20, %v9107_v5 }
 0x63d   :  { %8455 = vtanh.f32 %v2283_v26 }
 0x63e   :  { %v10151_v59 = vadd.f32 %v2314_v13, %v9113_v11 }
 0x640   :  { %2383 = vrot.lane.b32.xlu1 %v10151_v59, %s8848_s29 }
 0x643   :  { %v8456_v31 = vpop.eup %8455 }
 0x644   :  { %v2315_v30 = vmul.f32 %v8456_v31, %v9107_v5 }
 0x646   :  { %v10157_v33 = vadd.f32 %v2315_v30, %v9113_v11  ;;  %v7650_v30 = vld [vmem:[%s13289_s0 + $0x188] sm:$0xff] }
 0x647   :  { %7667 = vmatmul.msk.f32.gmra.mxu3 %vm31_vm1, %v7650_v30 }
 0x648   :  { %2385 = vrot.lane.b32.xlu0 %v10157_v33, %s8848_s29  ;;  %v2374_v57 = vpop.permute.xlu2 %2373 }
 0x649   :  { %v2421_v35 = vmul.f32 %v2374_v57, %v10098_v48 }
 0x64b   :  { %2453 = vrot.lane.b32.xlu2 %v2421_v35, %s8849_s4 }
 0x64f   :  { %7668 = vmatmul.msk.f32.gmra.mxu3 %vm31_vm1, %v7651_v18 }
 0x657   :  { %7669 = vmatmul.msk.f32.gmra.mxu3 %vm31_vm1, %v7652_v27  ;;  %v2341_v27 = vmul.f32 %v10098_v48, %v9792_v9 }
 0x661   :  { %v2380_v13 = vpop.permute.xlu2 %2379 }
 0x662   :  { %v2424_v31 = vmul.f32 %v2380_v13, %v10119_v6 }
 0x66e   :  { %v2177_v61 = vpop.permute.xlu0 %2176 }
 0x66f   :  { %7844 = vmatmul.msk.f32.gmra.mxu2 %vm1214_vm5, %v2177_v61 }
 0x675   :  { %v2250_v54 = vpop.f32.mrf.mxu2 }
 0x676   :  { %v2284_v16 = vadd.f32 %v2250_v54, %v415_v39  ;;  %v2376_v56 = vpop.permute.xlu0 %2375 }
 0x677   :  { %v2422_v23 = vmul.f32 %v2376_v56, %v10113_v12 }
 0x678   :  { %8457 = vtanh.f32 %v2284_v16 }
 0x679   :  { %2455 = vrot.lane.b32.xlu1 %v2422_v23, %s8849_s4 }
 0x67e   :  { %v8458_v32 = vpop.eup %8457 }
 0x67f   :  { %v2316_v20 = vmul.f32 %v8458_v32, %v9107_v5 }
 0x681   :  { %v10170_v26 = vadd.f32 %v2316_v20, %v9113_v11  ;;  %v7653_v20 = vld [vmem:[%s13289_s0 + $0x1a0] sm:$0xff] }
 0x682   :  { %7670 = vmatmul.msk.f32.gmra.mxu3 %vm31_vm1, %v7653_v20  ;;  %v430_v20 = vadd.f32 %v10200_v22, %v9969_v51 }
 0x683   :  { %2387 = vrot.lane.b32.xlu2 %v10170_v26, %s8848_s29 }
 0x68a   :  { %7671 = vmatmul.msk.f32.gmra.mxu3 %vm31_vm1, %v7654_v8 }
 0x68b   :  { %2459 = vrot.lane.b32.xlu2 %v2424_v31, %s8849_s4  ;;  %v2382_v31 = vpop.permute.xlu0 %2381 }
 0x68e   :  { %v2179_v57 = vpop.permute.xlu1 %2178 }
 0x68f   :  { %7845 = vmatmul.msk.f32.gmra.mxu2 %vm1214_vm5, %v2179_v57 }
 0x695   :  { %v2253_v36 = vpop.f32.mrf.mxu2 }
 0x696   :  { %v2285_v35 = vadd.f32 %v2253_v36, %v418_v15  ;;  %v2378_v61 = vpop.permute.xlu1 %2377  ;;  %v2425_v15 = vmul.f32 %v2382_v31, %v10125_v10  ;;  %v427_v36 = vadd.f32 %v10200_v22, %v9956_v2  ;;  %v7655_v2 = vld [vmem:[%s13289_s0 + $0x1b0] sm:$0xff] }
 0x697   :  { %v2423_v39 = vmul.f32 %v2378_v61, %v10138_v7  ;;  %7672 = vmatmul.msk.f32.gmra.mxu3 %vm31_vm1, %v7655_v2 }
 0x698   :  { %8459 = vtanh.f32 %v2285_v35 }
 0x699   :  { %2457 = vrot.lane.b32.xlu0 %v2423_v39, %s8849_s4 }
 0x69d   :  { %v2256_v54 = vpop.f32.mrf.mxu2 }
 0x69e   :  { %v8460_v16 = vpop.eup %8459  ;;  %v2286_v56 = vadd.f32 %v2256_v54, %v421_v63 }
 0x69f   :  { %v2317_v23 = vmul.f32 %v8460_v16, %v9107_v5 }
 0x6a0   :  { %8461 = vtanh.f32 %v2286_v56 }
 0x6a1   :  { %v10210_v32 = vadd.f32 %v2317_v23, %v9113_v11 }
 0x6a3   :  { %2389 = vrot.lane.b32.xlu1 %v10210_v32, %s8848_s29 }
 0x6a5   :  { %v2259_v0 = vpop.f32.mrf.mxu2  ;;  %v2454_v63 = vpop.permute.xlu2 %2453 }
 0x6a6   :  { %v8462_v13 = vpop.eup %8461  ;;  %v2287_v30 = vadd.f32 %v2259_v0, %v424_v46  ;;  %v10237_v16 = vadd.f32 %v2454_v63, %v2341_v27 }
 0x6a7   :  { %v2318_v57 = vmul.f32 %v8462_v13, %v9107_v5 }
 0x6a8   :  { %8463 = vtanh.f32 %v2287_v30 }
 0x6a9   :  { %v10223_v18 = vadd.f32 %v2318_v57, %v9113_v11 }
 0x6ab   :  { %2461 = vrot.lane.b32.xlu1 %v2425_v15, %s8849_s4  ;;  %2391 = vrot.lane.b32.xlu0 %v10223_v18, %s8848_s29  ;;  %v7656_v15 = vld [vmem:[%s13289_s0 + $0x1b8] sm:$0xff] }
 0x6ac   :  { %7673 = vmatmul.msk.f32.gmra.mxu3 %vm31_vm1, %v7656_v15 }
 0x6ad   :  { %v2262_v35 = vpop.f32.mrf.mxu2 }
 0x6ae   :  { %v2288_v61 = vadd.f32 %v2262_v35, %v427_v36  ;;  %v8464_v39 = vpop.eup %8463  ;;  %v433_v36 = vadd.f32 %v10200_v22, %v9983_v49  ;;  %v7657_v49 = vld [vmem:[%s13289_s0 + $0x1c0] sm:$0xff] }
 0x6af   :  { %v2319_v54 = vmul.f32 %v8464_v39, %v9107_v5 }
 0x6b0   :  { %8465 = vtanh.f32 %v2288_v61 }
 0x6b1   :  { %v10240_v23 = vadd.f32 %v2319_v54, %v9113_v11  ;;  %8467 = vtanh.f32 %v10237_v16 }
 0x6b2   :  { %v2384_v56 = vpop.permute.xlu1 %2383 }
 0x6b3   :  { %v2426_v46 = vmul.f32 %v2384_v56, %v10151_v59  ;;  %2393 = vrot.lane.b32.xlu2 %v10240_v23, %s8848_s29 }
 0x6b4   :  { %7674 = vmatmul.msk.f32.gmra.mxu3 %vm31_vm1, %v7657_v49 }
 0x6b5   :  { %2463 = vrot.lane.b32.xlu0 %v2426_v46, %s8849_s4  ;;  %v2265_v9 = vpop.f32.mrf.mxu2  ;;  %v7658_v46 = vld [vmem:[%s13289_s0 + $0x1c8] sm:$0xff] }
 0x6b6   :  { %v8466_v0 = vpop.eup %8465  ;;  %v2289_v13 = vadd.f32 %v2265_v9, %v430_v20  ;;  %v7659_v20 = vld [vmem:[%s13289_s0 + $0x1d0] sm:$0xff]  ;;  %v7660_v9 = vld [vmem:[%s13289_s0 + $0x1d8] sm:$0xff] }
 0x6b7   :  { %v2320_v31 = vmul.f32 %v8466_v0, %v9107_v5  ;;  %v8468_v8 = vpop.eup %8467 }
 0x6b8   :  { %8469 = vtanh.f32 %v2289_v13 }
 0x6b9   :  { %v10255_v30 = vadd.f32 %v2320_v31, %v9113_v11  ;;  %v7661_v31 = vld [vmem:[%s13289_s0 + $0x1e0] sm:$0xff] }
 0x6ba   :  { %v2386_v57 = vpop.permute.xlu0 %2385 }
 0x6bb   :  { %v2427_v51 = vmul.f32 %v2386_v57, %v10157_v33  ;;  %2395 = vrot.lane.b32.xlu1 %v10255_v30, %s8848_s29  ;;  %v2342_v57 = vmul.f32 %v10113_v12, %v9801_v52  ;;  %v7663_v52 = vld [vmem:[%s13289_s0 + $0x1f0] sm:$0xff] }
 0x6bc   :  { %7675 = vmatmul.msk.f32.gmra.mxu3 %vm31_vm1, %v7658_v46  ;;  %v8835_v46 = vld [vmem:[%s13288_s1 + $0x28] sm:$0xff] }
 0x6bd   :  { %2465 = vrot.lane.b32.xlu2 %v2427_v51, %s8849_s4  ;;  %2549 = vrot.lane.b32.xlu0 %v8468_v8, %s8848_s29  ;;  %v2268_v35 = vpop.f32.mrf.mxu2  ;;  %v7662_v8 = vld [vmem:[%s13289_s0 + $0x1e8] sm:$0xff] }
 0x6be   :  { %v8470_v61 = vpop.eup %8469  ;;  %v2290_v39 = vadd.f32 %v2268_v35, %v433_v36  ;;  %v436_v36 = vadd.f32 %v10200_v22, %v9994_v1 }
 0x6bf   :  { %v2321_v63 = vmul.f32 %v8470_v61, %v9107_v5 }
 0x6c0   :  { %8471 = vtanh.f32 %v2290_v39 }
 0x6c1   :  { %v10270_v27 = vadd.f32 %v2321_v63, %v9113_v11 }
 0x6c3   :  { %2397 = vrot.lane.b32.xlu1 %v10270_v27, %s8848_s29 }
 0x6c4   :  { %7676 = vmatmul.msk.f32.gmra.mxu3 %vm31_vm1, %v7659_v20  ;;  %v10335_v20 = vpop.f32.mrf.mxu3 }
 0x6c6   :  { %v8472_v54 = vpop.eup %8471 }
 0x6c7   :  { %v2322_v56 = vmul.f32 %v8472_v54, %v9107_v5  ;;  %v7664_v54 = vld [vmem:[%s13289_s0 + $0x1f8] sm:$0xff] }
 0x6c9   :  { %v10280_v2 = vadd.f32 %v2322_v56, %v9113_v11  ;;  %v7781_v56 = vld [vmem:[%s13289_s0 + $0x380] sm:$0xff] }
 0x6cb   :  { %2399 = vrot.lane.b32.xlu1 %v10280_v2, %s8848_s29 }
 0x6cc   :  { %7677 = vmatmul.msk.f32.gmra.mxu3 %vm31_vm1, %v7660_v9  ;;  %v8836_v9 = vld [vmem:[%s13288_s1 + $0x20] sm:$0xff] }
 0x6d4   :  { %7678 = vmatmul.msk.f32.gmra.mxu3 %vm31_vm1, %v7661_v31  ;;  %v7782_v31 = vld [vmem:[%s13289_s0 + $0x388] sm:$0xff] }
 0x6dc   :  { %7679 = vmatmul.msk.f32.gmra.mxu3 %vm31_vm1, %v7662_v8  ;;  %v8838_v8 = vld [vmem:[%s13288_s1 + $0x10] sm:$0xff] }
 0x6dd   :  { %v2388_v0 = vpop.permute.xlu2 %2387 }
 0x6de   :  { %v2428_v13 = vmul.f32 %v2388_v0, %v10170_v26  ;;  %v2343_v0 = vmul.f32 %v10138_v7, %v9814_v25 }
 0x6e0   :  { %2467 = vrot.lane.b32.xlu2 %v2428_v13, %s8849_s4 }
 0x6e4   :  { %7680 = vmatmul.msk.f32.gmra.mxu3 %vm31_vm1, %v7663_v52 }
 0x6e5   :  { %v2460_v25 = vpop.permute.xlu2 %2459 }
 0x6eb   :  { %v2456_v51 = vpop.permute.xlu1 %2455 }
 0x6ec   :  { %v10304_v15 = vadd.f32 %v2456_v51, %v2342_v57  ;;  %7681 = vmatmul.msk.f32.gmra.mxu3 %vm31_vm1, %v7664_v54  ;;  %v8837_v57 = vld [vmem:[%s13288_s1 + $0x18] sm:$0xff] }
 0x6ee   :  { %8473 = vtanh.f32 %v10304_v15 }
 0x6f2   :  { %v2271_v35 = vpop.f32.mrf.mxu2 }
 0x6f3   :  { %v2291_v61 = vadd.f32 %v2271_v35, %v436_v36  ;;  %v2344_v36 = vmul.f32 %v10119_v6, %v9834_v21  ;;  %v10357_v35 = vpop.f32.mrf.mxu3 }
 0x6f4   :  { %v8474_v39 = vpop.eup %8473  ;;  %7798 = vmatmul.msk.f32.vlgmr.msra.gmra.mxu3 %vm31_vm1, %v7781_v56 }
 0x6f5   :  { %8475 = vtanh.f32 %v2291_v61  ;;  %2551 = vrot.lane.b32.xlu0 %v8474_v39, %s8848_s29  ;;  %4709 = vmatpush.msra.mxu3 %v8835_v46  ;;  %v439_v61 = vadd.f32 %v10200_v22, %v10009_v24  ;;  %v10361_v39 = vadd.f32 %v2460_v25, %v2344_v36 }
 0x6f7   :  { %4710 = vmatpush.msra.mxu3 %v8836_v9 }
 0x6f9   :  { %4711 = vmatpush.msra.mxu3 %v8837_v57 }
 0x6fb   :  { %v8476_v63 = vpop.eup %8475  ;;  %4712 = vmatpush.msra.mxu3 %v8838_v8  ;;  %v10371_v24 = vpop.f32.mrf.mxu3 }
 0x6fc   :  { %v2323_v49 = vmul.f32 %v8476_v63, %v9107_v5  ;;  %7799 = vmatmul.msk.f32.gmra.mxu3 %vm31_vm1, %v7782_v31  ;;  %v7784_v31 = vld [vmem:[%s13289_s0 + $0x398] sm:$0xff] }
 0x6fe   :  { %v10323_v1 = vadd.f32 %v2323_v49, %v9113_v11  ;;  %v7783_v49 = vld [vmem:[%s13289_s0 + $0x390] sm:$0xff] }
 0x700   :  { %2401 = vrot.lane.b32.xlu1 %v10323_v1, %s8848_s29 }
 0x704   :  { %7800 = vmatmul.msk.f32.gmra.mxu3 %vm31_vm1, %v7783_v49 }
 0x70b   :  { %v2458_v13 = vpop.permute.xlu0 %2457 }
 0x70c   :  { %v10348_v51 = vadd.f32 %v2458_v13, %v2343_v0  ;;  %v2345_v13 = vmul.f32 %v10125_v10, %v9846_v58  ;;  %7801 = vmatmul.msk.f32.gmra.mxu3 %vm31_vm1, %v7784_v31  ;;  %v10391_v58 = vpop.f32.mrf.mxu3 }
 0x70e   :  { %8477 = vtanh.f32 %v10348_v51 }
 0x712   :  { %v2274_v52 = vpop.f32.mrf.mxu2 }
 0x713   :  { %v2292_v63 = vadd.f32 %v2274_v52, %v439_v61  ;;  %v2394_v52 = vpop.permute.xlu2 %2393 }
 0x714   :  { %v8478_v54 = vpop.eup %8477 }
 0x715   :  { %8479 = vtanh.f32 %v2292_v63  ;;  %2553 = vrot.lane.b32.xlu0 %v8478_v54, %s8848_s29  ;;  %v2390_v56 = vpop.permute.xlu1 %2389  ;;  %v7785_v63 = vld [vmem:[%s13289_s0 + $0x3a0] sm:$0xff]  ;;  %v2431_v54 = vmul.f32 %v2394_v52, %v10240_v23 }
 0x716   :  { %8481 = vtanh.f32 %v10361_v39  ;;  %v2429_v21 = vmul.f32 %v2390_v56, %v10210_v32  ;;  %v2346_v56 = vmul.f32 %v10151_v59, %v9848_v62  ;;  %7802 = vmatmul.msk.f32.gmra.mxu3 %vm31_vm1, %v7785_v63  ;;  %v2347_v62 = vmul.f32 %v10157_v33, %v9870_v50  ;;  %v7787_v50 = vld [vmem:[%s13289_s0 + $0x3b0] sm:$0xff] }
 0x718   :  { %2469 = vrot.lane.b32.xlu2 %v2429_v21, %s8849_s4 }
 0x71b   :  { %v8480_v46 = vpop.eup %8479 }
 0x71c   :  { %v8482_v9 = vpop.eup %8481  ;;  %v2324_v0 = vmul.f32 %v8480_v46, %v9107_v5 }
 0x71d   :  { %v2392_v57 = vpop.permute.xlu0 %2391  ;;  %2555 = vrot.lane.b32.xlu0 %v8482_v9, %s8848_s29  ;;  %v2462_v8 = vpop.permute.xlu1 %2461 }
 0x71e   :  { %v2430_v25 = vmul.f32 %v2392_v57, %v10223_v18  ;;  %v10381_v36 = vadd.f32 %v2462_v8, %v2345_v13  ;;  %v10384_v61 = vadd.f32 %v2324_v0, %v9113_v11  ;;  %v10404_v9 = vpop.f32.mrf.mxu3  ;;  %v2466_v0 = vpop.permute.xlu2 %2465  ;;  %v7786_v13 = vld [vmem:[%s13289_s0 + $0x3a8] sm:$0xff] }
 0x71f   :  { %v10412_v57 = vadd.f32 %v2466_v0, %v2347_v62  ;;  %7803 = vmatmul.msk.f32.gmra.mxu3 %vm31_vm1, %v7786_v13  ;;  %v2348_v0 = vmul.f32 %v10170_v26, %v9954_v4  ;;  %v7789_v4 = vld [vmem:[%s13289_s0 + $0x3c0] sm:$0xff] }
 0x720   :  { %8483 = vtanh.f32 %v10381_v36  ;;  %2403 = vrot.lane.b32.xlu1 %v10384_v61, %s8848_s29  ;;  %2471 = vrot.lane.b32.xlu2 %v2430_v25, %s8849_s4 }
 0x726   :  { %v8484_v49 = vpop.eup %8483 }
 0x727   :  { %v2464_v21 = vpop.permute.xlu0 %2463  ;;  %2557 = vrot.lane.b32.xlu0 %v8484_v49, %s8848_s29  ;;  %v10418_v49 = vpop.f32.mrf.mxu3  ;;  %7804 = vmatmul.msk.f32.gmra.mxu3 %vm31_vm1, %v7787_v50 }
 0x728   :  { %v10401_v46 = vadd.f32 %v2464_v21, %v2346_v56  ;;  %2473 = vrot.lane.b32.xlu2 %v2431_v54, %s8849_s4 }
 0x72a   :  { %8485 = vtanh.f32 %v10401_v46 }
 0x72b   :  { %8487 = vtanh.f32 %v10412_v57 }
 0x72d   :  { %v2396_v31 = vpop.permute.xlu1 %2395 }
 0x72e   :  { %v2432_v8 = vmul.f32 %v2396_v31, %v10255_v30  ;;  %v7788_v31 = vld [vmem:[%s13289_s0 + $0x3b8] sm:$0xff] }
 0x72f   :  { %v2550_v25 = vpop.permute.xlu0 %2549  ;;  %v10429_v21 = vpop.f32.mrf.mxu3  ;;  %7805 = vmatmul.msk.f32.gmra.mxu3 %vm31_vm1, %v7788_v31 }
 0x730   :  { %v8486_v52 = vpop.eup %8485  ;;  %v2597_v63 = vmul.f32 %v2550_v25, %v10098_v48  ;;  %2475 = vrot.lane.b32.xlu1 %v2432_v8, %s8849_s4 }
 0x731   :  { %2559 = vrot.lane.b32.xlu2 %v8486_v52, %s8848_s29  ;;  %v8488_v48 = vpop.eup %8487 }
 0x732   :  { %2645 = vrot.lane.b32.xlu0 %v2597_v63, %s8849_s4 }
 0x735   :  { %v2398_v54 = vpop.permute.xlu1 %2397 }
 0x736   :  { %v2433_v56 = vmul.f32 %v2398_v54, %v10270_v27  ;;  %v7790_v54 = vld [vmem:[%s13289_s0 + $0x3c8] sm:$0xff] }
 0x737   :  { %v10443_v52 = vpop.f32.mrf.mxu3  ;;  %7806 = vmatmul.msk.f32.gmra.mxu3 %vm31_vm1, %v7789_v4 }
 0x738   :  { %2477 = vrot.lane.b32.xlu1 %v2433_v56, %s8849_s4 }
 0x739   :  { %2561 = vrot.lane.b32.xlu2 %v8488_v48, %s8848_s29  ;;  %v7791_v48 = vld [vmem:[%s13289_s0 + $0x3d0] sm:$0xff] }
 0x73a   :  { %v2468_v13 = vpop.permute.xlu2 %2467 }
 0x73b   :  { %v10434_v62 = vadd.f32 %v2468_v13, %v2348_v0  ;;  %v7792_v13 = vld [vmem:[%s13289_s0 + $0x3d8] sm:$0xff] }
 0x73d   :  { %8489 = vtanh.f32 %v10434_v62  ;;  %v2400_v8 = vpop.permute.xlu1 %2399 }
 0x73e   :  { %v2434_v25 = vmul.f32 %v2400_v8, %v10280_v2  ;;  %v7793_v8 = vld [vmem:[%s13289_s0 + $0x3e0] sm:$0xff] }
 0x73f   :  { %v10450_v50 = vpop.f32.mrf.mxu3  ;;  %7807 = vmatmul.msk.f32.gmra.mxu3 %vm31_vm1, %v7790_v54  ;;  %v7794_v54 = vld [vmem:[%s13289_s0 + $0x3e8] sm:$0xff] }
 0x740   :  { %2479 = vrot.lane.b32.xlu1 %v2434_v25, %s8849_s4 }
 0x743   :  { %v8490_v63 = vpop.eup %8489 }
 0x744   :  { %2563 = vrot.lane.b32.xlu2 %v8490_v63, %s8848_s29 }
 0x747   :  { %v10456_v56 = vpop.f32.mrf.mxu3  ;;  %7808 = vmatmul.msk.f32.gmra.mxu3 %vm31_vm1, %v7791_v48  ;;  %v2349_v48 = vmul.f32 %v10210_v32, %v9967_v47  ;;  %v2350_v47 = vmul.f32 %v10223_v18, %v9981_v55 }
 0x74f   :  { %v10462_v0 = vpop.f32.mrf.mxu3  ;;  %7809 = vmatmul.msk.f32.gmra.mxu3 %vm31_vm1, %v7792_v13 }
 0x757   :  { %v10468_v31 = vpop.f32.mrf.mxu3  ;;  %7810 = vmatmul.msk.f32.gmra.mxu3 %vm31_vm1, %v7793_v8 }
 0x75f   :  { %v10475_v4 = vpop.f32.mrf.mxu3  ;;  %7811 = vmatmul.msk.f32.gmra.mxu3 %vm31_vm1, %v7794_v54 }
 0x767   :  { %v2552_v25 = vpop.permute.xlu0 %2551  ;;  %v10484_v13 = vpop.f32.mrf.mxu3 }
 0x768   :  { %v2598_v63 = vmul.f32 %v2552_v25, %v10113_v12  ;;  %v7795_v25 = vld [vmem:[%s13289_s0 + $0x3f0] sm:$0xff] }
 0x769   :  { %7812 = vmatmul.msk.f32.gmra.mxu3 %vm31_vm1, %v7795_v25 }
 0x76a   :  { %2647 = vrot.lane.b32.xlu0 %v2598_v63, %s8849_s4 }
 0x76f   :  { %v10497_v63 = vpop.f32.mrf.mxu3 }
 0x772   :  { %v2470_v17 = vpop.permute.xlu2 %2469  ;;  %v2402_v8 = vpop.permute.xlu1 %2401 }
 0x773   :  { %v10486_v28 = vadd.f32 %v2470_v17, %v2349_v48  ;;  %v2435_v12 = vmul.f32 %v2402_v8, %v10323_v1  ;;  %v7796_v8 = vld [vmem:[%s13289_s0 + $0x3f8] sm:$0xff] }
 0x774   :  { %7813 = vmatmul.msk.f32.gmra.mxu3 %vm31_vm1, %v7796_v8  ;;  %v2351_v8 = vmul.f32 %v10240_v23, %v9996_v60 }
 0x775   :  { %8491 = vtanh.f32 %v10486_v28  ;;  %2481 = vrot.lane.b32.xlu1 %v2435_v12, %s8849_s4 }
 0x777   :  { %v10507_v12 = vpop.f32.mrf.mxu3 }
 0x77a   :  { %v2472_v54 = vpop.permute.xlu2 %2471 }
 0x77b   :  { %v8492_v17 = vpop.eup %8491  ;;  %v10499_v48 = vadd.f32 %v2472_v54, %v2350_v47 }
 0x77c   :  { %2565 = vrot.lane.b32.xlu2 %v8492_v17, %s8848_s29 }
 0x77d   :  { %8493 = vtanh.f32 %v10499_v48 }
 0x77f   :  { %v10511_v54 = vpop.f32.mrf.mxu3 }
 0x782   :  { %v2474_v25 = vpop.permute.xlu2 %2473 }
 0x783   :  { %v8494_v55 = vpop.eup %8493 }
 0x784   :  { %2567 = vrot.lane.b32.xlu2 %v8494_v55, %s8848_s29  ;;  %v10521_v55 = vadd.f32 %v2474_v25, %v2351_v8 }
 0x786   :  { %8495 = vtanh.f32 %v10521_v55 }
 0x787   :  { %v2554_v45 = vpop.permute.xlu0 %2553  ;;  %v10519_v43 = vpop.f32.mrf.mxu3 }
 0x788   :  { %v2599_v47 = vmul.f32 %v2554_v45, %v10138_v7 }
 0x78a   :  { %2649 = vrot.lane.b32.xlu0 %v2599_v47, %s8849_s4 }
 0x78b   :  { %v2560_v53 = vpop.permute.xlu2 %2559 }
 0x78c   :  { %v2602_v17 = vmul.f32 %v2560_v53, %v10151_v59  ;;  %v8496_v60 = vpop.eup %8495 }
 0x78e   :  { %2655 = vrot.lane.b32.xlu2 %v2602_v17, %s8849_s4 }
 0x78f   :  { %v2556_v34 = vpop.permute.xlu0 %2555  ;;  %v10528_v47 = vpop.f32.mrf.mxu3 }
 0x790   :  { %v2600_v14 = vmul.f32 %v2556_v34, %v10119_v6 }
 0x792   :  { %2651 = vrot.lane.b32.xlu0 %v2600_v14, %s8849_s4  ;;  %v2404_v45 = vpop.permute.xlu1 %2403  ;;  %v2352_v14 = vmul.f32 %v10255_v30, %v10006_v29 }
 0x793   :  { %v2436_v7 = vmul.f32 %v2404_v45, %v10384_v61  ;;  %v2562_v34 = vpop.permute.xlu2 %2561  ;;  %v2353_v45 = vmul.f32 %v10270_v27, %v10016_v44 }
 0x794   :  { %v2603_v25 = vmul.f32 %v2562_v34, %v10157_v33 }
 0x795   :  { %2483 = vrot.lane.b32.xlu1 %v2436_v7, %s8849_s4 }
 0x799   :  { %v2558_v53 = vpop.permute.xlu0 %2557 }
 0x79a   :  { %v2601_v59 = vmul.f32 %v2558_v53, %v10125_v10  ;;  %v10540_v10 = vpop.f32.mrf.mxu3 }
 0x79c   :  { %2653 = vrot.lane.b32.xlu0 %v2601_v59, %s8849_s4 }
 0x79d   :  { %2569 = vrot.lane.b32.xlu1 %v8496_v60, %s8848_s29  ;;  %v2354_v60 = vmul.f32 %v10280_v2, %v10026_v37 }
 0x79e   :  { %v2564_v33 = vpop.permute.xlu2 %2563 }
 0x79f   :  { %v2604_v34 = vmul.f32 %v2564_v33, %v10170_v26 }
 0x7a2   :  { %v2476_v6 = vpop.permute.xlu1 %2475  ;;  %v10548_v59 = vpop.f32.mrf.mxu3 }
 0x7a3   :  { %v10535_v17 = vadd.f32 %v2476_v6, %v2352_v14 }
 0x7a4   :  { %v2646_v8 = vpop.permute.xlu0 %2645 }
 0x7a5   :  { %8497 = vtanh.f32 %v10535_v17  ;;  %7846 = vmatmul.msk.f32.vlgmr.msrb.gmra.mxu3 %vm1214_vm5, %v2646_v8  ;;  %2657 = vrot.lane.b32.xlu1 %v2603_v25, %s8849_s4 }
 0x7aa   :  { %v2478_v7 = vpop.permute.xlu1 %2477  ;;  %v10558_v44 = vpop.f32.mrf.mxu3 }
 0x7ab   :  { %v8498_v53 = vpop.eup %8497  ;;  %v10544_v29 = vadd.f32 %v2478_v7, %v2353_v45 }
 0x7ac   :  { %2571 = vrot.lane.b32.xlu0 %v8498_v53, %s8848_s29 }
 0x7ad   :  { %8499 = vtanh.f32 %v10544_v29 }
 0x7b2   :  { %v2480_v14 = vpop.permute.xlu1 %2479  ;;  %v10561_v45 = vpop.f32.mrf.mxu3 }
 0x7b3   :  { %v8500_v6 = vpop.eup %8499  ;;  %v10553_v25 = vadd.f32 %v2480_v14, %v2354_v60 }
 0x7b4   :  { %2659 = vrot.lane.b32.xlu0 %v2604_v34, %s8849_s4  ;;  %2573 = vrot.lane.b32.xlu2 %v8500_v6, %s8848_s29  ;;  %v2355_v6 = vmul.f32 %v10323_v1, %v10054_v19  ;;  %v2356_v19 = vmul.f32 %v10384_v61, %v10064_v3 }
 0x7b5   :  { %8501 = vtanh.f32 %v10553_v25 }
 0x7ba   :  { %v10563_v37 = vpop.f32.mrf.mxu3 }
 0x7bb   :  { %v8502_v8 = vpop.eup %8501  ;;  %13367 = vst [vmem:[#allocation47_spill] sm:$0xff] %v10563_v37 }
 0x7bc   :  { %2575 = vrot.lane.b32.xlu1 %v8502_v8, %s8848_s29 }
 0x7c2   :  { %v10566_v53 = vpop.f32.mrf.mxu3 }
 0x7ca   :  { %v10572_v14 = vpop.f32.mrf.mxu3 }
 0x7cb   :  { %13368 = vst [vmem:[#allocation48_spill] sm:$0xff] %v10572_v14 }
 0x7d6   :  { %v2566_v26 = vpop.permute.xlu2 %2565 }
 0x7d7   :  { %v2605_v7 = vmul.f32 %v2566_v26, %v10210_v32  ;;  %v10579_v32 = vpop.f32.mrf.mxu3 }
 0x7d8   :  { %13369 = vst [vmem:[#allocation49_spill] sm:$0xff] %v10579_v32 }
 0x7d9   :  { %2661 = vrot.lane.b32.xlu2 %v2605_v7, %s8849_s4 }
 0x7dc   :  { %v2648_v33 = vpop.permute.xlu0 %2647 }
 0x7dd   :  { %7847 = vmatmul.msk.f32.gmra.mxu3 %vm1214_vm5, %v2648_v33 }
 0x7de   :  { %v2568_v60 = vpop.permute.xlu2 %2567 }
 0x7df   :  { %v2606_v34 = vmul.f32 %v2568_v60, %v10223_v18  ;;  %v10582_v7 = vpop.f32.mrf.mxu3 }
 0x7e0   :  { %13370 = vst [vmem:[#allocation50_spill] sm:$0xff] %v10582_v7 }
 0x7e1   :  { %2663 = vrot.lane.b32.xlu1 %v2606_v34, %s8849_s4 }
 0x7e7   :  { %v2482_v8 = vpop.permute.xlu1 %2481  ;;  %v10585_v33 = vpop.f32.mrf.mxu3 }
 0x7e8   :  { %v10576_v37 = vadd.f32 %v2482_v8, %v2355_v6  ;;  %13371 = vst [vmem:[#allocation51_spill] sm:$0xff] %v10585_v33 }
 0x7ea   :  { %8503 = vtanh.f32 %v10576_v37 }
 0x7ef   :  { %v10592_v8 = vpop.f32.mrf.mxu3 }
 0x7f0   :  { %v8504_v26 = vpop.eup %8503  ;;  %13372 = vst [vmem:[#allocation52_spill] sm:$0xff] %v10592_v8 }
 0x7f1   :  { %2577 = vrot.lane.b32.xlu0 %v8504_v26, %s8848_s29  ;;  %v2656_v26 = vpop.permute.xlu2 %2655 }
 0x7f7   :  { %v10599_v3 = vpop.f32.mrf.mxu3 }
 0x7fc   :  { %v2650_v18 = vpop.permute.xlu0 %2649 }
 0x7fd   :  { %7848 = vmatmul.msk.f32.gmra.mxu3 %vm1214_vm5, %v2650_v18 }
 0x804   :  { %v2652_v60 = vpop.permute.xlu0 %2651 }
 0x805   :  { %7849 = vmatmul.msk.f32.gmra.mxu3 %vm1214_vm5, %v2652_v60 }
 0x807   :  { %v2484_v34 = vpop.permute.xlu1 %2483 }
 0x808   :  { %v10590_v6 = vadd.f32 %v2484_v34, %v2356_v19  ;;  %v10604_v34 = vpop.f32.mrf.mxu3 }
 0x80a   :  { %8505 = vtanh.f32 %v10590_v6 }
 0x80e   :  { %v2654_v32 = vpop.permute.xlu0 %2653  ;;  %v2574_v60 = vpop.permute.xlu2 %2573 }
 0x80f   :  { %7850 = vmatmul.msk.f32.gmra.mxu3 %vm1214_vm5, %v2654_v32  ;;  %v2570_v18 = vpop.permute.xlu1 %2569  ;;  %v2609_v19 = vmul.f32 %v2574_v60, %v10270_v27 }
 0x810   :  { %v8506_v7 = vpop.eup %8505  ;;  %v2607_v33 = vmul.f32 %v2570_v18, %v10240_v23 }
 0x811   :  { %2579 = vrot.lane.b32.xlu2 %v8506_v7, %s8848_s29  ;;  %v540_v7 = vadd.f32 %v10200_v22, %v10335_v20 }
 0x812   :  { %2665 = vrot.lane.b32.xlu0 %v2607_v33, %s8849_s4 }
 0x817   :  { %7851 = vmatmul.msk.f32.gmra.mxu3 %vm1214_vm5, %v2656_v26  ;;  %v2658_v32 = vpop.permute.xlu1 %2657 }
 0x819   :  { %2669 = vrot.lane.b32.xlu2 %v2609_v19, %s8849_s4 }
 0x81e   :  { %v2572_v8 = vpop.permute.xlu0 %2571 }
 0x81f   :  { %v2608_v14 = vmul.f32 %v2572_v8, %v10255_v30  ;;  %7852 = vmatmul.msk.f32.gmra.mxu3 %vm1214_vm5, %v2658_v32 }
 0x821   :  { %2667 = vrot.lane.b32.xlu1 %v2608_v14, %s8849_s4 }
 0x826   :  { %v2660_v23 = vpop.permute.xlu0 %2659 }
 0x827   :  { %7853 = vmatmul.msk.f32.gmra.mxu3 %vm1214_vm5, %v2660_v23 }
 0x828   :  { %v2726_v27 = vpop.f32.mrf.mxu3 }
 0x829   :  { %v2774_v33 = vadd.f32 %v2726_v27, %v540_v7 }
 0x82b   :  { %8507 = vtanh.f32 %v2774_v33 }
 0x82e   :  { %v2576_v26 = vpop.permute.xlu1 %2575 }
 0x82f   :  { %v2610_v18 = vmul.f32 %v2576_v26, %v10280_v2  ;;  %v543_v2 = vadd.f32 %v10200_v22, %v10357_v35  ;;  %v546_v35 = vadd.f32 %v10200_v22, %v10371_v24 }
 0x831   :  { %v8508_v60 = vpop.eup %8507  ;;  %2671 = vrot.lane.b32.xlu0 %v2610_v18, %s8849_s4 }
 0x832   :  { %v2806_v30 = vmul.f32 %v8508_v60, %v9107_v5 }
 0x833   :  { %v2662_v8 = vpop.permute.xlu2 %2661 }
 0x834   :  { %7854 = vmatmul.msk.f32.gmra.mxu3 %vm1214_vm5, %v2662_v8  ;;  %v10617_v14 = vadd.f32 %v2806_v30, %v9113_v11 }
 0x839   :  { %2870 = vrot.lane.b32.xlu0 %v10617_v14, %s8848_s29 }
 0x853   :  { %v2664_v20 = vpop.permute.xlu1 %2663 }
 0x854   :  { %7855 = vmatmul.msk.f32.gmra.mxu3 %vm1214_vm5, %v2664_v20 }
 0x860   :  { %v2729_v19 = vpop.f32.mrf.mxu3 }
 0x861   :  { %v2775_v32 = vadd.f32 %v2729_v19, %v543_v2 }
 0x863   :  { %8509 = vtanh.f32 %v2775_v32  ;;  %v2578_v23 = vpop.permute.xlu0 %2577 }
 0x864   :  { %v2611_v7 = vmul.f32 %v2578_v23, %v10323_v1 }
 0x866   :  { %2673 = vrot.lane.b32.xlu1 %v2611_v7, %s8849_s4  ;;  %v552_v7 = vadd.f32 %v10200_v22, %v10404_v9 }
 0x869   :  { %v8510_v27 = vpop.eup %8509 }
 0x86a   :  { %v2807_v33 = vmul.f32 %v8510_v27, %v9107_v5 }
 0x86b   :  { %v2580_v26 = vpop.permute.xlu2 %2579 }
 0x86c   :  { %v2612_v18 = vmul.f32 %v2580_v26, %v10384_v61  ;;  %v10629_v60 = vadd.f32 %v2807_v33, %v9113_v11  ;;  %v549_v61 = vadd.f32 %v10200_v22, %v10391_v58 }
 0x86e   :  { %2872 = vrot.lane.b32.xlu1 %v10629_v60, %s8848_s29  ;;  %2675 = vrot.lane.b32.xlu2 %v2612_v18, %s8849_s4 }
 0x873   :  { %v2670_v9 = vpop.permute.xlu2 %2669 }
 0x880   :  { %v2732_v1 = vpop.f32.mrf.mxu3 }
 0x881   :  { %v2776_v30 = vadd.f32 %v2732_v1, %v546_v35  ;;  %v555_v35 = vadd.f32 %v10200_v22, %v10418_v49 }
 0x883   :  { %8511 = vtanh.f32 %v2776_v30 }
 0x884   :  { %v2666_v8 = vpop.permute.xlu0 %2665 }
 0x885   :  { %7856 = vmatmul.msk.f32.gmra.mxu3 %vm1214_vm5, %v2666_v8 }
 0x888   :  { %v2735_v20 = vpop.f32.mrf.mxu3 }
 0x889   :  { %v8512_v2 = vpop.eup %8511  ;;  %v2777_v19 = vadd.f32 %v2735_v20, %v549_v61 }
 0x88a   :  { %v2808_v32 = vmul.f32 %v8512_v2, %v9107_v5  ;;  %v558_v2 = vadd.f32 %v10200_v22, %v10429_v21 }
 0x88b   :  { %8513 = vtanh.f32 %v2777_v19 }
 0x88c   :  { %v10641_v23 = vadd.f32 %v2808_v32, %v9113_v11 }
 0x88e   :  { %2874 = vrot.lane.b32.xlu2 %v10641_v23, %s8848_s29 }
 0x891   :  { %v8514_v24 = vpop.eup %8513 }
 0x892   :  { %v2809_v27 = vmul.f32 %v8514_v24, %v9107_v5  ;;  %v2738_v33 = vpop.f32.mrf.mxu3 }
 0x893   :  { %v2778_v58 = vadd.f32 %v2738_v33, %v552_v7  ;;  %v2668_v26 = vpop.permute.xlu1 %2667  ;;  %v561_v33 = vadd.f32 %v10200_v22, %v10443_v52 }
 0x894   :  { %7857 = vmatmul.msk.f32.gmra.mxu3 %vm1214_vm5, %v2668_v26  ;;  %v10650_v18 = vadd.f32 %v2809_v27, %v9113_v11 }
 0x895   :  { %8515 = vtanh.f32 %v2778_v58 }
 0x896   :  { %2876 = vrot.lane.b32.xlu0 %v10650_v18, %s8848_s29 }
 0x89a   :  { %v2741_v1 = vpop.f32.mrf.mxu3 }
 0x89b   :  { %v8516_v30 = vpop.eup %8515  ;;  %v2779_v8 = vadd.f32 %v2741_v1, %v555_v35 }
 0x89c   :  { %v2810_v61 = vmul.f32 %v8516_v30, %v9107_v5  ;;  %7858 = vmatmul.msk.f32.gmra.mxu3 %vm1214_vm5, %v2670_v9 }
 0x89d   :  { %8517 = vtanh.f32 %v2779_v8 }
 0x89e   :  { %v10659_v20 = vadd.f32 %v2810_v61, %v9113_v11 }
 0x8a0   :  { %2878 = vrot.lane.b32.xlu1 %v10659_v20, %s8848_s29 }
 0x8a2   :  { %v2744_v19 = vpop.f32.mrf.mxu3 }
 0x8a3   :  { %v8518_v49 = vpop.eup %8517  ;;  %v2780_v32 = vadd.f32 %v2744_v19, %v558_v2  ;;  %v2672_v24 = vpop.permute.xlu0 %2671  ;;  %v564_v19 = vadd.f32 %v10200_v22, %v10450_v50 }
 0x8a4   :  { %v2811_v7 = vmul.f32 %v8518_v49, %v9107_v5  ;;  %7859 = vmatmul.msk.f32.gmra.mxu3 %vm1214_vm5, %v2672_v24 }
 0x8a5   :  { %8519 = vtanh.f32 %v2780_v32 }
 0x8a6   :  { %v10668_v27 = vadd.f32 %v2811_v7, %v9113_v11  ;;  %v567_v7 = vadd.f32 %v10200_v22, %v10456_v56 }
 0x8a8   :  { %2880 = vrot.lane.b32.xlu2 %v10668_v27, %s8848_s29 }
 0x8aa   :  { %v2747_v58 = vpop.f32.mrf.mxu3 }
 0x8ab   :  { %v8520_v21 = vpop.eup %8519  ;;  %v2781_v26 = vadd.f32 %v2747_v58, %v561_v33  ;;  %v2871_v35 = vpop.permute.xlu0 %2870 }
 0x8ac   :  { %v2812_v1 = vmul.f32 %v8520_v21, %v9107_v5  ;;  %v2918_v30 = vmul.f32 %v2871_v35, %v10617_v14 }
 0x8ad   :  { %8521 = vtanh.f32 %v2781_v26 }
 0x8ae   :  { %2950 = vrot.lane.b32.xlu0 %v2918_v30, %s8849_s4  ;;  %v10678_v9 = vadd.f32 %v2812_v1, %v9113_v11 }
 0x8b0   :  { %2882 = vrot.lane.b32.xlu1 %v10678_v9, %s8848_s29 }
 0x8b3   :  { %v8522_v8 = vpop.eup %8521 }
 0x8b4   :  { %v2813_v52 = vmul.f32 %v8522_v8, %v9107_v5 }
 0x8b6   :  { %v10684_v61 = vadd.f32 %v2813_v52, %v9113_v11 }
 0x8b7   :  { %v2750_v2 = vpop.f32.mrf.mxu3 }
 0x8b8   :  { %2884 = vrot.lane.b32.xlu0 %v10684_v61, %s8848_s29  ;;  %v2782_v49 = vadd.f32 %v2750_v2, %v564_v19 }
 0x8ba   :  { %8523 = vtanh.f32 %v2782_v49 }
 0x8c0   :  { %v8524_v35 = vpop.eup %8523 }
 0x8c1   :  { %v2814_v50 = vmul.f32 %v8524_v35, %v9107_v5 }
 0x8c3   :  { %v10699_v8 = vadd.f32 %v2814_v50, %v9113_v11 }
 0x8c8   :  { %v2676_v33 = vpop.permute.xlu2 %2675 }
 0x8d7   :  { %v2753_v24 = vpop.f32.mrf.mxu3 }
 0x8d8   :  { %v2674_v32 = vpop.permute.xlu1 %2673  ;;  %v2783_v58 = vadd.f32 %v2753_v24, %v567_v7 }
 0x8d9   :  { %7860 = vmatmul.msk.f32.gmra.mxu3 %vm1214_vm5, %v2674_v32  ;;  %v570_v32 = vadd.f32 %v10200_v22, %v10462_v0  ;;  %v573_v0 = vadd.f32 %v10200_v22, %v10468_v31 }
 0x8da   :  { %8525 = vtanh.f32 %v2783_v58 }
 0x8e0   :  { %v2873_v21 = vpop.permute.xlu1 %2872  ;;  %v8526_v56 = vpop.eup %8525 }
 0x8e1   :  { %v2919_v26 = vmul.f32 %v2873_v21, %v10629_v60  ;;  %7861 = vmatmul.msk.f32.gmra.mxu3 %vm1214_vm5, %v2676_v33  ;;  %v2815_v52 = vmul.f32 %v8526_v56, %v9107_v5 }
 0x8e3   :  { %2952 = vrot.lane.b32.xlu2 %v2919_v26, %s8849_s4  ;;  %v10706_v2 = vadd.f32 %v2815_v52, %v9113_v11  ;;  %v576_v52 = vadd.f32 %v10200_v22, %v10475_v4 }
 0x8e8   :  { %v2875_v1 = vpop.permute.xlu2 %2874 }
 0x8e9   :  { %v2920_v30 = vmul.f32 %v2875_v1, %v10641_v23 }
 0x8eb   :  { %2954 = vrot.lane.b32.xlu1 %v2920_v30, %s8849_s4  ;;  %2886 = vrot.lane.b32.xlu2 %v10699_v8, %s8848_s29 }
 0x8f3   :  { %2888 = vrot.lane.b32.xlu1 %v10706_v2, %s8848_s29 }
 0x902   :  { %v2881_v19 = vpop.permute.xlu2 %2880 }
 0x903   :  { %v2923_v49 = vmul.f32 %v2881_v19, %v10668_v27 }
 0x905   :  { %2960 = vrot.lane.b32.xlu1 %v2923_v49, %s8849_s4  ;;  %v2838_v49 = vmul.f32 %v10617_v14, %v10237_v16  ;;  %v579_v16 = vadd.f32 %v10200_v22, %v10484_v13 }
 0x908   :  { %v2877_v24 = vpop.permute.xlu0 %2876  ;;  %v2756_v7 = vpop.f32.mrf.mxu3 }
 0x909   :  { %v2921_v33 = vmul.f32 %v2877_v24, %v10650_v18  ;;  %v2784_v58 = vadd.f32 %v2756_v7, %v570_v32 }
 0x90b   :  { %8527 = vtanh.f32 %v2784_v58  ;;  %2956 = vrot.lane.b32.xlu0 %v2921_v33, %s8849_s4 }
 0x911   :  { %v8528_v21 = vpop.eup %8527 }
 0x912   :  { %v2816_v26 = vmul.f32 %v8528_v21, %v9107_v5  ;;  %v2879_v35 = vpop.permute.xlu1 %2878 }
 0x913   :  { %v2922_v50 = vmul.f32 %v2879_v35, %v10659_v20 }
 0x914   :  { %v10719_v1 = vadd.f32 %v2816_v26, %v9113_v11 }
 0x915   :  { %2958 = vrot.lane.b32.xlu2 %v2922_v50, %s8849_s4 }
 0x916   :  { %2890 = vrot.lane.b32.xlu0 %v10719_v1, %s8848_s29 }
 0x917   :  { %v2759_v30 = vpop.f32.mrf.mxu3 }
 0x918   :  { %v2785_v56 = vadd.f32 %v2759_v30, %v573_v0 }
 0x91a   :  { %8529 = vtanh.f32 %v2785_v56 }
 0x91f   :  { %v2762_v19 = vpop.f32.mrf.mxu3 }
 0x920   :  { %v8530_v32 = vpop.eup %8529  ;;  %v2786_v24 = vadd.f32 %v2762_v19, %v576_v52  ;;  %v2951_v7 = vpop.permute.xlu0 %2950 }
 0x921   :  { %v2817_v33 = vmul.f32 %v8530_v32, %v9107_v5  ;;  %v10731_v58 = vadd.f32 %v2951_v7, %v2838_v49  ;;  %v2839_v32 = vmul.f32 %v10629_v60, %v10304_v15 }
 0x922   :  { %8531 = vtanh.f32 %v2786_v24  ;;  %v2883_v31 = vpop.permute.xlu1 %2882 }
 0x923   :  { %8533 = vtanh.f32 %v10731_v58  ;;  %v2924_v21 = vmul.f32 %v2883_v31, %v10678_v9  ;;  %v10736_v26 = vadd.f32 %v2817_v33, %v9113_v11 }
 0x925   :  { %2892 = vrot.lane.b32.xlu2 %v10736_v26, %s8848_s29  ;;  %2962 = vrot.lane.b32.xlu0 %v2924_v21, %s8849_s4 }
 0x927   :  { %v2765_v4 = vpop.f32.mrf.mxu3 }
 0x928   :  { %v8532_v35 = vpop.eup %8531  ;;  %v2787_v50 = vadd.f32 %v2765_v4, %v579_v16  ;;  %v10769_v16 = vld [vmem:[%s13288_s1 + $0x30] ss:$0 sm:$0xff] }
 0x929   :  { %v8534_v0 = vpop.eup %8533  ;;  %v2818_v30 = vmul.f32 %v8532_v35, %v9107_v5  ;;  %v582_v15 = vadd.f32 %v10769_v16, %v10497_v63  ;;  %v2840_v35 = vmul.f32 %v10641_v23, %v10348_v51 }
 0x92a   :  { %8535 = vtanh.f32 %v2787_v50  ;;  %v2885_v56 = vpop.permute.xlu0 %2884  ;;  %3046 = vrot.lane.b32.xlu1 %v8534_v0, %s8848_s29 }
 0x92b   :  { %v2925_v52 = vmul.f32 %v2885_v56, %v10684_v61  ;;  %v10747_v19 = vadd.f32 %v2818_v30, %v9113_v11  ;;  %v585_v56 = vadd.f32 %v10769_v16, %v10507_v12 }
 0x92d   :  { %2894 = vrot.lane.b32.xlu2 %v10747_v19, %s8848_s29  ;;  %2964 = vrot.lane.b32.xlu0 %v2925_v52, %s8849_s4 }
 0x930   :  { %v8536_v22 = vpop.eup %8535 }
 0x931   :  { %v2819_v13 = vmul.f32 %v8536_v22, %v9107_v5 }
 0x933   :  { %v10754_v49 = vadd.f32 %v2819_v13, %v9113_v11 }
 0x935   :  { %2896 = vrot.lane.b32.xlu2 %v10754_v49, %s8848_s29 }
 0x93d   :  { %v2953_v24 = vpop.permute.xlu2 %2952 }
 0x93e   :  { %v10760_v7 = vadd.f32 %v2953_v24, %v2839_v32 }
 0x940   :  { %8537 = vtanh.f32 %v10760_v7 }
 0x945   :  { %v2887_v33 = vpop.permute.xlu2 %2886 }
 0x946   :  { %v8538_v31 = vpop.eup %8537  ;;  %v2926_v21 = vmul.f32 %v2887_v33, %v10699_v8 }
 0x947   :  { %3048 = vrot.lane.b32.xlu1 %v8538_v31, %s8848_s29 }
 0x948   :  { %2966 = vrot.lane.b32.xlu0 %v2926_v21, %s8849_s4 }
 0x95c   :  { %v2768_v4 = vpop.f32.mrf.mxu3 }
 0x95d   :  { %v2788_v50 = vadd.f32 %v2768_v4, %v582_v15  ;;  %v2955_v0 = vpop.permute.xlu1 %2954  ;;  %v2841_v4 = vmul.f32 %v10650_v18, %v10361_v39  ;;  %v2843_v39 = vmul.f32 %v10668_v27, %v10401_v46 }
 0x95e   :  { %v10775_v30 = vadd.f32 %v2955_v0, %v2840_v35 }
 0x95f   :  { %8539 = vtanh.f32 %v2788_v50 }
 0x960   :  { %8541 = vtanh.f32 %v10775_v30 }
 0x964   :  { %v2771_v52 = vpop.f32.mrf.mxu3 }
 0x965   :  { %v8540_v22 = vpop.eup %8539  ;;  %v2789_v13 = vadd.f32 %v2771_v52, %v585_v56  ;;  %v2889_v32 = vpop.permute.xlu1 %2888  ;;  %v2842_v52 = vmul.f32 %v10659_v20, %v10381_v36 }
 0x966   :  { %v8542_v24 = vpop.eup %8541  ;;  %v2820_v63 = vmul.f32 %v8540_v22, %v9107_v5  ;;  %v2927_v33 = vmul.f32 %v2889_v32, %v10706_v2 }
 0x967   :  { %8543 = vtanh.f32 %v2789_v13  ;;  %3050 = vrot.lane.b32.xlu1 %v8542_v24, %s8848_s29 }
 0x968   :  { %2968 = vrot.lane.b32.xlu0 %v2927_v33, %s8849_s4  ;;  %v10785_v51 = vadd.f32 %v2820_v63, %v9113_v11 }
 0x96a   :  { %2898 = vrot.lane.b32.xlu2 %v10785_v51, %s8848_s29 }
 0x96d   :  { %v8544_v12 = vpop.eup %8543 }
 0x96e   :  { %v2821_v31 = vmul.f32 %v8544_v12, %v9107_v5 }
 0x96f   :  { %v2959_v15 = vpop.permute.xlu2 %2958 }
 0x970   :  { %v10791_v21 = vadd.f32 %v2821_v31, %v9113_v11  ;;  %v10804_v22 = vadd.f32 %v2959_v15, %v2842_v52 }
 0x972   :  { %2900 = vrot.lane.b32.xlu2 %v10791_v21, %s8848_s29 }
 0x977   :  { %v2961_v13 = vpop.permute.xlu1 %2960 }
 0x978   :  { %v10810_v63 = vadd.f32 %v2961_v13, %v2843_v39 }
 0x97d   :  { %v2957_v35 = vpop.permute.xlu0 %2956 }
 0x97e   :  { %v10797_v50 = vadd.f32 %v2957_v35, %v2841_v4  ;;  %v2844_v35 = vmul.f32 %v10678_v9, %v10412_v57 }
 0x97f   :  { %v2893_v0 = vpop.permute.xlu2 %2892 }
 0x980   :  { %8545 = vtanh.f32 %v10797_v50  ;;  %v2929_v56 = vmul.f32 %v2893_v0, %v10736_v26 }
 0x981   :  { %8547 = vtanh.f32 %v10804_v22 }
 0x982   :  { %2972 = vrot.lane.b32.xlu2 %v2929_v56, %s8849_s4  ;;  %8549 = vtanh.f32 %v10810_v63 }
 0x986   :  { %v8546_v32 = vpop.eup %8545 }
 0x987   :  { %v2895_v24 = vpop.permute.xlu2 %2894  ;;  %3052 = vrot.lane.b32.xlu1 %v8546_v32, %s8848_s29  ;;  %v8548_v31 = vpop.eup %8547  ;;  %v2845_v32 = vmul.f32 %v10684_v61, %v10434_v62 }
 0x988   :  { %v2930_v33 = vmul.f32 %v2895_v24, %v10747_v19  ;;  %v2891_v12 = vpop.permute.xlu0 %2890  ;;  %v8550_v4 = vpop.eup %8549 }
 0x989   :  { %v2928_v36 = vmul.f32 %v2891_v12, %v10719_v1 }
 0x98a   :  { %2974 = vrot.lane.b32.xlu2 %v2930_v33, %s8849_s4 }
 0x98b   :  { %2970 = vrot.lane.b32.xlu0 %v2928_v36, %s8849_s4 }
 0x98f   :  { %v2897_v46 = vpop.permute.xlu2 %2896  ;;  %3054 = vrot.lane.b32.xlu1 %v8548_v31, %s8848_s29 }
 0x990   :  { %v2931_v15 = vmul.f32 %v2897_v46, %v10754_v49 }
 0x992   :  { %2976 = vrot.lane.b32.xlu2 %v2931_v15, %s8849_s4 }
 0x993   :  { %3056 = vrot.lane.b32.xlu0 %v8550_v4, %s8848_s29 }
 0x997   :  { %v2963_v0 = vpop.permute.xlu0 %2962 }
 0x998   :  { %v10823_v56 = vadd.f32 %v2963_v0, %v2844_v35  ;;  %v2847_v0 = vmul.f32 %v10706_v2, %v10499_v48  ;;  %v2848_v48 = vmul.f32 %v10719_v1, %v10521_v55 }
 0x99a   :  { %8551 = vtanh.f32 %v10823_v56 }
 0x99c   :  { %v3047_v52 = vpop.permute.xlu1 %3046 }
 0x99d   :  { %v3094_v13 = vmul.f32 %v3047_v52, %v10617_v14  ;;  %v2846_v14 = vmul.f32 %v10699_v8, %v10486_v28 }
 0x99f   :  { %v2965_v39 = vpop.permute.xlu0 %2964  ;;  %3142 = vrot.lane.b32.xlu1 %v3094_v13, %s8849_s4 }
 0x9a0   :  { %v8552_v24 = vpop.eup %8551  ;;  %v10830_v33 = vadd.f32 %v2965_v39, %v2845_v32 }
 0x9a1   :  { %3058 = vrot.lane.b32.xlu0 %v8552_v24, %s8848_s29 }
 0x9a2   :  { %8553 = vtanh.f32 %v10830_v33 }
 0x9a8   :  { %v8554_v57 = vpop.eup %8553 }
 0x9a9   :  { %3060 = vrot.lane.b32.xlu0 %v8554_v57, %s8848_s29 }
 0x9b9   :  { %v3049_v12 = vpop.permute.xlu1 %3048 }
 0x9ba   :  { %v3095_v36 = vmul.f32 %v3049_v12, %v10629_v60  ;;  %v2967_v62 = vpop.permute.xlu0 %2966 }
 0x9bb   :  { %v10838_v31 = vadd.f32 %v2967_v62, %v2846_v14 }
 0x9bc   :  { %3144 = vrot.lane.b32.xlu1 %v3095_v36, %s8849_s4  ;;  %v2849_v36 = vmul.f32 %v10736_v26, %v10535_v17 }
 0x9bd   :  { %8555 = vtanh.f32 %v10838_v31 }
 0x9c3   :  { %v8556_v46 = vpop.eup %8555 }
 0x9c4   :  { %v2899_v15 = vpop.permute.xlu2 %2898  ;;  %3062 = vrot.lane.b32.xlu0 %v8556_v46, %s8848_s29 }
 0x9c5   :  { %v2932_v4 = vmul.f32 %v2899_v15, %v10785_v51 }
 0x9c7   :  { %2978 = vrot.lane.b32.xlu2 %v2932_v4, %s8849_s4 }
 0x9cc   :  { %v2901_v35 = vpop.permute.xlu2 %2900 }
 0x9cd   :  { %v2933_v28 = vmul.f32 %v2901_v35, %v10791_v21 }
 0x9cf   :  { %2980 = vrot.lane.b32.xlu2 %v2933_v28, %s8849_s4 }
 0x9d9   :  { %v3051_v60 = vpop.permute.xlu1 %3050 }
 0x9da   :  { %v3096_v52 = vmul.f32 %v3051_v60, %v10641_v23  ;;  %v2969_v13 = vpop.permute.xlu0 %2968 }
 0x9db   :  { %v10850_v32 = vadd.f32 %v2969_v13, %v2847_v0  ;;  %v2851_v0 = vmul.f32 %v10754_v49, %v10553_v25  ;;  %v2852_v25 = vmul.f32 %v10785_v51, %v10576_v37 }
 0x9dc   :  { %3146 = vrot.lane.b32.xlu1 %v3096_v52, %s8849_s4  ;;  %v2973_v24 = vpop.permute.xlu2 %2972 }
 0x9dd   :  { %8557 = vtanh.f32 %v10850_v32  ;;  %v10864_v62 = vadd.f32 %v2973_v24, %v2849_v36 }
 0x9e3   :  { %v8558_v39 = vpop.eup %8557 }
 0x9e4   :  { %3064 = vrot.lane.b32.xlu0 %v8558_v39, %s8848_s29  ;;  %v2975_v15 = vpop.permute.xlu2 %2974 }
 0x9ec   :  { %v2977_v60 = vpop.permute.xlu2 %2976 }
 0x9f9   :  { %v3053_v57 = vpop.permute.xlu1 %3052 }
 0x9fa   :  { %v3097_v12 = vmul.f32 %v3053_v57, %v10650_v18  ;;  %v2850_v18 = vmul.f32 %v10747_v19, %v10544_v29 }
 0x9fc   :  { %3148 = vrot.lane.b32.xlu1 %v3097_v12, %s8849_s4  ;;  %v10871_v55 = vadd.f32 %v2975_v15, %v2850_v18 }
 0x9fd   :  { %v2971_v23 = vpop.permute.xlu0 %2970 }
 0x9fe   :  { %v10859_v14 = vadd.f32 %v2971_v23, %v2848_v48 }
 0xa00   :  { %8559 = vtanh.f32 %v10859_v14 }
 0xa01   :  { %v3055_v46 = vpop.permute.xlu1 %3054  ;;  %8561 = vtanh.f32 %v10864_v62 }
 0xa02   :  { %v3098_v4 = vmul.f32 %v3055_v46, %v10659_v20  ;;  %8563 = vtanh.f32 %v10871_v55  ;;  %v2853_v46 = vmul.f32 %v10791_v21, %v10590_v6 }
 0xa04   :  { %3150 = vrot.lane.b32.xlu1 %v3098_v4, %s8849_s4 }
 0xa05   :  { %v3057_v35 = vpop.permute.xlu0 %3056 }
 0xa06   :  { %v8560_v28 = vpop.eup %8559  ;;  %v3099_v17 = vmul.f32 %v3057_v35, %v10668_v27  ;;  %v10882_v27 = vadd.f32 %v2977_v60, %v2851_v0 }
 0xa07   :  { %3066 = vrot.lane.b32.xlu2 %v8560_v28, %s8848_s29  ;;  %v8562_v20 = vpop.eup %8561 }
 0xa08   :  { %3152 = vrot.lane.b32.xlu0 %v3099_v17, %s8849_s4  ;;  %v8564_v29 = vpop.eup %8563  ;;  %8565 = vtanh.f32 %v10882_v27 }
 0xa0c   :  { %3068 = vrot.lane.b32.xlu1 %v8562_v20, %s8848_s29 }
 0xa0e   :  { %v8566_v12 = vpop.eup %8565 }
 0xa10   :  { %3070 = vrot.lane.b32.xlu0 %v8564_v29, %s8848_s29 }
 0xa11   :  { %v3143_v52 = vpop.permute.xlu1 %3142 }
 0xa12   :  { %7862 = vmatmul.msk.f32.vlgmr.msrb.gmra.mxu0 %vm1214_vm5, %v3143_v52 }
 0xa13   :  { %v3059_v13 = vpop.permute.xlu0 %3058 }
 0xa14   :  { %v3100_v39 = vmul.f32 %v3059_v13, %v10678_v9 }
 0xa16   :  { %3154 = vrot.lane.b32.xlu2 %v3100_v39, %s8849_s4 }
 0xa1b   :  { %v3061_v24 = vpop.permute.xlu0 %3060 }
 0xa1c   :  { %v3101_v57 = vmul.f32 %v3061_v24, %v10684_v61 }
 0xa1e   :  { %3072 = vrot.lane.b32.xlu2 %v8566_v12, %s8848_s29  ;;  %3156 = vrot.lane.b32.xlu1 %v3101_v57, %s8849_s4 }
 0xa21   :  { %v2979_v48 = vpop.permute.xlu2 %2978 }
 0xa22   :  { %v10892_v23 = vadd.f32 %v2979_v48, %v2852_v25 }
 0xa24   :  { %8567 = vtanh.f32 %v10892_v23 }
 0xa29   :  { %v2981_v61 = vpop.permute.xlu2 %2980 }
 0xa2a   :  { %v8568_v9 = vpop.eup %8567  ;;  %v10899_v15 = vadd.f32 %v2981_v61, %v2853_v46 }
 0xa2b   :  { %3074 = vrot.lane.b32.xlu1 %v8568_v9, %s8848_s29 }
 0xa2c   :  { %8569 = vtanh.f32 %v10899_v15 }
 0xa2e   :  { %v3145_v36 = vpop.permute.xlu1 %3144 }
 0xa2f   :  { %7863 = vmatmul.msk.f32.gmra.mxu0 %vm1214_vm5, %v3145_v36 }
 0xa32   :  { %v8570_v18 = vpop.eup %8569 }
 0xa36   :  { %v3063_v4 = vpop.permute.xlu0 %3062 }
 0xa37   :  { %v3102_v37 = vmul.f32 %v3063_v4, %v10699_v8 }
 0xa39   :  { %3158 = vrot.lane.b32.xlu0 %v3102_v37, %s8849_s4 }
 0xa41   :  { %3076 = vrot.lane.b32.xlu0 %v8570_v18, %s8848_s29 }
 0xa4e   :  { %v3147_v35 = vpop.permute.xlu1 %3146 }
 0xa4f   :  { %7864 = vmatmul.msk.f32.gmra.mxu0 %vm1214_vm5, %v3147_v35 }
 0xa56   :  { %v3065_v28 = vpop.permute.xlu0 %3064 }
 0xa57   :  { %v3103_v17 = vmul.f32 %v3065_v28, %v10706_v2 }
 0xa59   :  { %3160 = vrot.lane.b32.xlu2 %v3103_v17, %s8849_s4 }
 0xa61   :  { %v3067_v6 = vpop.permute.xlu2 %3066 }
 0xa62   :  { %v3104_v20 = vmul.f32 %v3067_v6, %v10719_v1 }
 0xa64   :  { %3162 = vrot.lane.b32.xlu1 %v3104_v20, %s8849_s4 }
 0xa6e   :  { %v3149_v8 = vpop.permute.xlu1 %3148 }
 0xa6f   :  { %7865 = vmatmul.msk.f32.gmra.mxu0 %vm1214_vm5, %v3149_v8 }
 0xa70   :  { %v3155_v29 = vpop.permute.xlu2 %3154 }
 0xa76   :  { %v3151_v60 = vpop.permute.xlu1 %3150 }
 0xa77   :  { %7866 = vmatmul.msk.f32.gmra.mxu0 %vm1214_vm5, %v3151_v60 }
 0xa78   :  { %v3073_v0 = vpop.permute.xlu2 %3072 }
 0xa79   :  { %v3107_v52 = vmul.f32 %v3073_v0, %v10754_v49  ;;  %v686_v49 = vadd.f32 %v10769_v16, %v9039_v38  ;;  %v689_v38 = vadd.f32 %v10769_v16, %v9041_v40  ;;  %v692_v40 = vadd.f32 %v10769_v16, %v9043_v41 }
 0xa7a   :  { %v3153_v13 = vpop.permute.xlu0 %3152  ;;  %v695_v41 = vadd.f32 %v10769_v16, %v9045_v42  ;;  %v13374_v42 = vld [vmem:[#allocation4_spill] sm:$0xff] }
 0xa7b   :  { %3168 = vrot.lane.b32.xlu1 %v3107_v52, %s8849_s4 }
 0xa7e   :  { %v3069_v2 = vpop.permute.xlu1 %3068 }
 0xa7f   :  { %v3105_v39 = vmul.f32 %v3069_v2, %v10736_v26  ;;  %7867 = vmatmul.msk.f32.gmra.mxu0 %vm1214_vm5, %v3153_v13  ;;  %v13373_v2 = vld [vmem:[#allocation3_spill] sm:$0xff] }
 0xa81   :  { %3164 = vrot.lane.b32.xlu2 %v3105_v39, %s8849_s4  ;;  %v698_v39 = vadd.f32 %v10769_v16, %v13373_v2 }
 0xa82   :  { %v3071_v1 = vpop.permute.xlu0 %3070 }
 0xa83   :  { %v3106_v24 = vmul.f32 %v3071_v1, %v10747_v19 }
 0xa85   :  { %3166 = vrot.lane.b32.xlu0 %v3106_v24, %s8849_s4 }
 0xa87   :  { %7868 = vmatmul.msk.f32.gmra.mxu0 %vm1214_vm5, %v3155_v29 }
 0xa8f   :  { %v3223_v57 = vpop.f32.mrf.mxu0 }
 0xa90   :  { %v3271_v12 = vadd.f32 %v3223_v57, %v686_v49  ;;  %v3157_v25 = vpop.permute.xlu1 %3156 }
 0xa91   :  { %7869 = vmatmul.msk.f32.gmra.mxu0 %vm1214_vm5, %v3157_v25 }
 0xa92   :  { %8571 = vtanh.f32 %v3271_v12 }
 0xa98   :  { %v8572_v26 = vpop.eup %8571 }
 0xa99   :  { %v3303_v48 = vmul.f32 %v8572_v26, %v9107_v5  ;;  %v701_v26 = vadd.f32 %v10769_v16, %v13374_v42 }
 0xa9b   :  { %v10925_v9 = vadd.f32 %v3303_v48, %v9113_v11 }
 0xa9d   :  { %3367 = vrot.lane.b32.xlu1 %v10925_v9, %s8848_s29  ;;  %v3075_v19 = vpop.permute.xlu1 %3074 }
 0xa9e   :  { %v3108_v36 = vmul.f32 %v3075_v19, %v10785_v51 }
 0xaa0   :  { %3170 = vrot.lane.b32.xlu2 %v3108_v36, %s8849_s4 }
 0xaab   :  { %v3159_v61 = vpop.permute.xlu0 %3158 }
 0xaac   :  { %v3226_v46 = vpop.f32.mrf.mxu0  ;;  %7870 = vmatmul.msk.f32.gmra.mxu0 %vm1214_vm5, %v3159_v61 }
 0xaad   :  { %v3272_v4 = vadd.f32 %v3226_v46, %v689_v38 }
 0xaaf   :  { %8573 = vtanh.f32 %v3272_v4  ;;  %v13375_v4 = vld [vmem:[#allocation5_spill] sm:$0xff] }
 0xab3   :  { %v3161_v37 = vpop.permute.xlu2 %3160  ;;  %v3077_v18 = vpop.permute.xlu0 %3076 }
 0xab4   :  { %v3109_v35 = vmul.f32 %v3077_v18, %v10791_v21  ;;  %7871 = vmatmul.msk.f32.gmra.mxu0 %vm1214_vm5, %v3161_v37  ;;  %v704_v37 = vadd.f32 %v10769_v16, %v13375_v4 }
 0xab5   :  { %v8574_v28 = vpop.eup %8573 }
 0xab6   :  { %v3304_v51 = vmul.f32 %v8574_v28, %v9107_v5  ;;  %3172 = vrot.lane.b32.xlu0 %v3109_v35, %s8849_s4 }
 0xab8   :  { %v10939_v17 = vadd.f32 %v3304_v51, %v9113_v11 }
 0xaba   :  { %3369 = vrot.lane.b32.xlu2 %v10939_v17, %s8848_s29 }
 0xacc   :  { %v3229_v6 = vpop.f32.mrf.mxu0 }
 0xacd   :  { %v3273_v20 = vadd.f32 %v3229_v6, %v692_v40 }
 0xacf   :  { %8575 = vtanh.f32 %v3273_v20 }
 0xad5   :  { %v8576_v21 = vpop.eup %8575 }
 0xad6   :  { %v3305_v8 = vmul.f32 %v8576_v21, %v9107_v5  ;;  %v3163_v29 = vpop.permute.xlu1 %3162  ;;  %v13376_v21 = vld [vmem:[#allocation6_spill] sm:$0xff] }
 0xad7   :  { %7872 = vmatmul.msk.f32.gmra.mxu0 %vm1214_vm5, %v3163_v29 }
 0xad8   :  { %v10948_v60 = vadd.f32 %v3305_v8, %v9113_v11  ;;  %v707_v8 = vadd.f32 %v10769_v16, %v13376_v21 }
 0xada   :  { %3371 = vrot.lane.b32.xlu0 %v10948_v60, %s8848_s29 }
 0xadb   :  { %v3165_v0 = vpop.permute.xlu2 %3164 }
 0xadf   :  { %7873 = vmatmul.msk.f32.gmra.mxu0 %vm1214_vm5, %v3165_v0 }
 0xaec   :  { %v3232_v52 = vpop.f32.mrf.mxu0 }
 0xaed   :  { %v3274_v13 = vadd.f32 %v3232_v52, %v695_v41  ;;  %v3169_v61 = vpop.permute.xlu1 %3168 }
 0xaef   :  { %8577 = vtanh.f32 %v3274_v13 }
 0xaf4   :  { %v3235_v1 = vpop.f32.mrf.mxu0 }
 0xaf5   :  { %v8578_v24 = vpop.eup %8577  ;;  %v3275_v49 = vadd.f32 %v3235_v1, %v698_v39 }
 0xaf6   :  { %v3306_v57 = vmul.f32 %v8578_v24, %v9107_v5 }
 0xaf7   :  { %8579 = vtanh.f32 %v3275_v49  ;;  %v3167_v12 = vpop.permute.xlu0 %3166 }
 0xaf8   :  { %7874 = vmatmul.msk.f32.gmra.mxu0 %vm1214_vm5, %v3167_v12  ;;  %v10960_v25 = vadd.f32 %v3306_v57, %v9113_v11  ;;  %v13377_v12 = vld [vmem:[#allocation7_spill] sm:$0xff] }
 0xaf9   :  { %v710_v42 = vadd.f32 %v10769_v16, %v13377_v12 }
 0xafa   :  { %3373 = vrot.lane.b32.xlu1 %v10960_v25, %s8848_s29  ;;  %v3171_v40 = vpop.permute.xlu2 %3170 }
 0xafc   :  { %v3238_v48 = vpop.f32.mrf.mxu0 }
 0xafd   :  { %v8580_v19 = vpop.eup %8579  ;;  %v3276_v36 = vadd.f32 %v3238_v48, %v701_v26 }
 0xafe   :  { %v3307_v38 = vmul.f32 %v8580_v19, %v9107_v5 }
 0xaff   :  { %8581 = vtanh.f32 %v3276_v36 }
 0xb00   :  { %7875 = vmatmul.msk.f32.gmra.mxu0 %vm1214_vm5, %v3169_v61  ;;  %v10969_v46 = vadd.f32 %v3307_v38, %v9113_v11 }
 0xb02   :  { %3375 = vrot.lane.b32.xlu2 %v10969_v46, %s8848_s29 }
 0xb04   :  { %v3241_v18 = vpop.f32.mrf.mxu0 }
 0xb05   :  { %v8582_v35 = vpop.eup %8581  ;;  %v3277_v28 = vadd.f32 %v3241_v18, %v704_v37  ;;  %v13378_v37 = vld [vmem:[#allocation8_spill] sm:$0xff] }
 0xb06   :  { %v3308_v51 = vmul.f32 %v8582_v35, %v9107_v5  ;;  %v713_v18 = vadd.f32 %v10769_v16, %v13378_v37 }
 0xb07   :  { %8583 = vtanh.f32 %v3277_v28 }
 0xb08   :  { %7876 = vmatmul.msk.f32.gmra.mxu0 %vm1214_vm5, %v3171_v40  ;;  %v10978_v6 = vadd.f32 %v3308_v51, %v9113_v11 }
 0xb0a   :  { %3377 = vrot.lane.b32.xlu0 %v10978_v6, %s8848_s29 }
 0xb0d   :  { %v8584_v20 = vpop.eup %8583 }
 0xb0e   :  { %v3309_v29 = vmul.f32 %v8584_v20, %v9107_v5  ;;  %v3244_v0 = vpop.f32.mrf.mxu0 }
 0xb0f   :  { %v3278_v41 = vadd.f32 %v3244_v0, %v707_v8  ;;  %v3368_v52 = vpop.permute.xlu1 %3367 }
 0xb10   :  { %v3415_v13 = vmul.f32 %v3368_v52, %v10925_v9  ;;  %v10987_v2 = vadd.f32 %v3309_v29, %v9113_v11  ;;  %v13379_v29 = vld [vmem:[#allocation10_spill] sm:$0xff] }
 0xb11   :  { %8585 = vtanh.f32 %v3278_v41  ;;  %v719_v0 = vadd.f32 %v10769_v16, %v13379_v29 }
 0xb12   :  { %3379 = vrot.lane.b32.xlu2 %v10987_v2, %s8848_s29  ;;  %3447 = vrot.lane.b32.xlu1 %v3415_v13, %s8849_s4 }
 0xb14   :  { %v3370_v39 = vpop.permute.xlu2 %3369 }
 0xb15   :  { %v3416_v1 = vmul.f32 %v3370_v39, %v10939_v17 }
 0xb17   :  { %v8586_v24 = vpop.eup %8585  ;;  %3449 = vrot.lane.b32.xlu0 %v3416_v1, %s8849_s4  ;;  %v13380_v1 = vld [vmem:[#allocation9_spill] sm:$0xff] }
 0xb18   :  { %v3310_v49 = vmul.f32 %v8586_v24, %v9107_v5  ;;  %v716_v24 = vadd.f32 %v10769_v16, %v13380_v1 }
 0xb1a   :  { %v10996_v57 = vadd.f32 %v3310_v49, %v9113_v11 }
 0xb1c   :  { %3381 = vrot.lane.b32.xlu1 %v10996_v57, %s8848_s29 }
 0xb28   :  { %v3173_v26 = vpop.permute.xlu0 %3172 }
 0xb29   :  { %v3247_v48 = vpop.f32.mrf.mxu0  ;;  %7877 = vmatmul.msk.f32.gmra.mxu0 %vm1214_vm5, %v3173_v26 }
 0xb2a   :  { %v3279_v19 = vadd.f32 %v3247_v48, %v710_v42 }
 0xb2c   :  { %8587 = vtanh.f32 %v3279_v19 }
 0xb31   :  { %v3250_v4 = vpop.f32.mrf.mxu0 }
 0xb32   :  { %v8588_v36 = vpop.eup %8587  ;;  %v3280_v35 = vadd.f32 %v3250_v4, %v713_v18  ;;  %v13381_v4 = vld [vmem:[#allocation11_spill] sm:$0xff] }
 0xb33   :  { %v3311_v38 = vmul.f32 %v8588_v36, %v9107_v5  ;;  %v722_v37 = vadd.f32 %v10769_v16, %v13381_v4 }
 0xb34   :  { %8589 = vtanh.f32 %v3280_v35 }
 0xb35   :  { %v11005_v61 = vadd.f32 %v3311_v38, %v9113_v11 }
 0xb37   :  { %3383 = vrot.lane.b32.xlu0 %v11005_v61, %s8848_s29 }
 0xb3a   :  { %v8590_v40 = vpop.eup %8589 }
 0xb3b   :  { %v3312_v20 = vmul.f32 %v8590_v40, %v9107_v5  ;;  %v13382_v40 = vld [vmem:[#allocation12_spill] sm:$0xff] }
 0xb3d   :  { %v11015_v8 = vadd.f32 %v3312_v20, %v9113_v11  ;;  %v725_v20 = vadd.f32 %v10769_v16, %v13382_v40 }
 0xb4c   :  { %v3372_v28 = vpop.permute.xlu0 %3371 }
 0xb4d   :  { %v3417_v51 = vmul.f32 %v3372_v28, %v10948_v60 }
 0xb4f   :  { %3451 = vrot.lane.b32.xlu2 %v3417_v51, %s8849_s4 }
 0xb54   :  { %v3253_v21 = vpop.f32.mrf.mxu0 }
 0xb55   :  { %v3281_v49 = vadd.f32 %v3253_v21, %v716_v24  ;;  %v3335_v24 = vmul.f32 %v10925_v9, %v10731_v58 }
 0xb57   :  { %3385 = vrot.lane.b32.xlu2 %v11015_v8, %s8848_s29 }
 0xb5c   :  { %v3376_v41 = vpop.permute.xlu2 %3375  ;;  %v3256_v52 = vpop.f32.mrf.mxu0 }
 0xb5d   :  { %v3419_v13 = vmul.f32 %v3376_v41, %v10969_v46  ;;  %v3282_v39 = vadd.f32 %v3256_v52, %v719_v0 }
 0xb5f   :  { %8591 = vtanh.f32 %v3282_v39  ;;  %3455 = vrot.lane.b32.xlu0 %v3419_v13, %s8849_s4 }
 0xb60   :  { %8593 = vtanh.f32 %v3281_v49  ;;  %v13383_v49 = vld [vmem:[#allocation13_spill] sm:$0xff] }
 0xb65   :  { %v8592_v12 = vpop.eup %8591 }
 0xb66   :  { %v3314_v42 = vmul.f32 %v8592_v12, %v9107_v5  ;;  %v8594_v36 = vpop.eup %8593  ;;  %v728_v12 = vadd.f32 %v10769_v16, %v13383_v49 }
 0xb67   :  { %v3313_v38 = vmul.f32 %v8594_v36, %v9107_v5 }
 0xb68   :  { %v11027_v26 = vadd.f32 %v3314_v42, %v9113_v11 }
 0xb69   :  { %v11037_v35 = vadd.f32 %v3313_v38, %v9113_v11 }
 0xb6a   :  { %3389 = vrot.lane.b32.xlu0 %v11027_v26, %s8848_s29 }
 0xb6c   :  { %v3374_v48 = vpop.permute.xlu1 %3373  ;;  %v3380_v51 = vpop.permute.xlu2 %3379 }
 0xb6d   :  { %v3418_v19 = vmul.f32 %v3374_v48, %v10960_v25  ;;  %v3421_v29 = vmul.f32 %v3380_v51, %v10987_v2 }
 0xb6f   :  { %3453 = vrot.lane.b32.xlu1 %v3418_v19, %s8849_s4 }
 0xb75   :  { %v3259_v18 = vpop.f32.mrf.mxu0 }
 0xb76   :  { %v3283_v28 = vadd.f32 %v3259_v18, %v722_v37  ;;  %v3336_v37 = vmul.f32 %v10939_v17, %v10760_v7 }
 0xb77   :  { %3387 = vrot.lane.b32.xlu1 %v11037_v35, %s8848_s29 }
 0xb78   :  { %8595 = vtanh.f32 %v3283_v28 }
 0xb7c   :  { %v3378_v21 = vpop.permute.xlu0 %3377 }
 0xb7d   :  { %v3420_v0 = vmul.f32 %v3378_v21, %v10978_v6  ;;  %v3262_v41 = vpop.f32.mrf.mxu0 }
 0xb7e   :  { %v8596_v52 = vpop.eup %8595  ;;  %v3284_v13 = vadd.f32 %v3262_v41, %v725_v20  ;;  %v13384_v41 = vld [vmem:[#allocation14_spill] sm:$0xff] }
 0xb7f   :  { %v3315_v39 = vmul.f32 %v8596_v52, %v9107_v5  ;;  %3457 = vrot.lane.b32.xlu2 %v3420_v0, %s8849_s4  ;;  %3459 = vrot.lane.b32.xlu1 %v3421_v29, %s8849_s4  ;;  %v731_v52 = vadd.f32 %v10769_v16, %v13384_v41 }
 0xb80   :  { %8597 = vtanh.f32 %v3284_v13 }
 0xb81   :  { %v11049_v1 = vadd.f32 %v3315_v39, %v9113_v11 }
 0xb83   :  { %3391 = vrot.lane.b32.xlu0 %v11049_v1, %s8848_s29 }
 0xb84   :  { %v3448_v42 = vpop.permute.xlu1 %3447 }
 0xb85   :  { %v11057_v48 = vadd.f32 %v3448_v42, %v3335_v24  ;;  %v3265_v19 = vpop.f32.mrf.mxu0  ;;  %v3337_v24 = vmul.f32 %v10948_v60, %v10775_v30 }
 0xb86   :  { %v8598_v36 = vpop.eup %8597  ;;  %v3285_v38 = vadd.f32 %v3265_v19, %v728_v12 }
 0xb87   :  { %v3316_v4 = vmul.f32 %v8598_v36, %v9107_v5  ;;  %8599 = vtanh.f32 %v11057_v48 }
 0xb88   :  { %8601 = vtanh.f32 %v3285_v38 }
 0xb89   :  { %v3450_v18 = vpop.permute.xlu0 %3449  ;;  %v11064_v58 = vadd.f32 %v3316_v4, %v9113_v11 }
 0xb8a   :  { %v11066_v28 = vadd.f32 %v3450_v18, %v3336_v37 }
 0xb8b   :  { %3393 = vrot.lane.b32.xlu0 %v11064_v58, %s8848_s29 }
 0xb8c   :  { %8603 = vtanh.f32 %v11066_v28 }
 0xb8d   :  { %v8600_v51 = vpop.eup %8599 }
 0xb8e   :  { %v8602_v40 = vpop.eup %8601  ;;  %3543 = vrot.lane.b32.xlu2 %v8600_v51, %s8848_s29  ;;  %v3382_v20 = vpop.permute.xlu1 %3381 }
 0xb8f   :  { %v3317_v21 = vmul.f32 %v8602_v40, %v9107_v5  ;;  %v3422_v7 = vmul.f32 %v3382_v20, %v10996_v57  ;;  %v3338_v20 = vmul.f32 %v10960_v25, %v10797_v50 }
 0xb91   :  { %3461 = vrot.lane.b32.xlu1 %v3422_v7, %s8849_s4  ;;  %v11076_v29 = vadd.f32 %v3317_v21, %v9113_v11 }
 0xb92   :  { %v8604_v0 = vpop.eup %8603 }
 0xb93   :  { %3395 = vrot.lane.b32.xlu0 %v11076_v29, %s8848_s29 }
 0xb96   :  { %3545 = vrot.lane.b32.xlu2 %v8604_v0, %s8848_s29  ;;  %v3339_v0 = vmul.f32 %v10969_v46, %v10804_v22  ;;  %v3341_v22 = vmul.f32 %v10987_v2, %v10823_v56 }
 0xba6   :  { %v3268_v13 = vpop.f32.mrf.mxu0 }
 0xba7   :  { %v3286_v39 = vadd.f32 %v3268_v13, %v731_v52  ;;  %v3340_v52 = vmul.f32 %v10978_v6, %v10810_v63 }
 0xba9   :  { %8605 = vtanh.f32 %v3286_v39  ;;  %v3384_v49 = vpop.permute.xlu0 %3383  ;;  %v3452_v12 = vpop.permute.xlu2 %3451 }
 0xbaa   :  { %v3423_v42 = vmul.f32 %v3384_v49, %v11005_v61  ;;  %v11086_v19 = vadd.f32 %v3452_v12, %v3337_v24 }
 0xbac   :  { %8607 = vtanh.f32 %v11086_v19  ;;  %3463 = vrot.lane.b32.xlu1 %v3423_v42, %s8849_s4 }
 0xbaf   :  { %v8606_v36 = vpop.eup %8605 }
 0xbb0   :  { %v3318_v38 = vmul.f32 %v8606_v36, %v9107_v5 }
 0xbb1   :  { %v3386_v16 = vpop.permute.xlu2 %3385 }
 0xbb2   :  { %v8608_v4 = vpop.eup %8607  ;;  %v3424_v37 = vmul.f32 %v3386_v16, %v11015_v8  ;;  %v11093_v30 = vadd.f32 %v3318_v38, %v9113_v11 }
 0xbb3   :  { %3547 = vrot.lane.b32.xlu2 %v8608_v4, %s8848_s29 }
 0xbb4   :  { %3397 = vrot.lane.b32.xlu0 %v11093_v30, %s8848_s29  ;;  %3465 = vrot.lane.b32.xlu1 %v3424_v37, %s8849_s4 }
 0xbd1   :  { %v3456_v18 = vpop.permute.xlu0 %3455 }
 0xbd2   :  { %v11110_v13 = vadd.f32 %v3456_v18, %v3339_v0 }
 0xbd9   :  { %v3458_v41 = vpop.permute.xlu2 %3457 }
 0xbda   :  { %v11112_v39 = vadd.f32 %v3458_v41, %v3340_v52 }
 0xbdc   :  { %v3390_v51 = vpop.permute.xlu0 %3389 }
 0xbdd   :  { %v3426_v40 = vmul.f32 %v3390_v51, %v11027_v26 }
 0xbdf   :  { %3469 = vrot.lane.b32.xlu0 %v3426_v40, %s8849_s4 }
 0xbe1   :  { %v3454_v21 = vpop.permute.xlu1 %3453 }
 0xbe2   :  { %v11103_v7 = vadd.f32 %v3454_v21, %v3338_v20  ;;  %v3342_v21 = vmul.f32 %v10996_v57, %v10830_v33  ;;  %v3343_v33 = vmul.f32 %v11005_v61, %v10838_v31 }
 0xbe4   :  { %8609 = vtanh.f32 %v11103_v7 }
 0xbe5   :  { %8611 = vtanh.f32 %v11110_v13 }
 0xbe6   :  { %8613 = vtanh.f32 %v11112_v39 }
 0xbe8   :  { %v3544_v38 = vpop.permute.xlu2 %3543 }
 0xbe9   :  { %v3388_v24 = vpop.permute.xlu1 %3387  ;;  %v3591_v37 = vmul.f32 %v3544_v38, %v10925_v9 }
 0xbea   :  { %v8610_v49 = vpop.eup %8609  ;;  %v3425_v50 = vmul.f32 %v3388_v24, %v11037_v35 }
 0xbeb   :  { %3549 = vrot.lane.b32.xlu2 %v8610_v49, %s8848_s29  ;;  %v8612_v12 = vpop.eup %8611 }
 0xbec   :  { %3467 = vrot.lane.b32.xlu1 %v3425_v50, %s8849_s4  ;;  %v8614_v36 = vpop.eup %8613 }
 0xbf0   :  { %v3546_v51 = vpop.permute.xlu2 %3545 }
 0xbf1   :  { %v3460_v63 = vpop.permute.xlu1 %3459  ;;  %v3592_v20 = vmul.f32 %v3546_v51, %v10939_v17 }
 0xbf2   :  { %v11121_v42 = vadd.f32 %v3460_v63, %v3341_v22  ;;  %v3344_v63 = vmul.f32 %v11015_v8, %v10850_v32 }
 0xbf3   :  { %3551 = vrot.lane.b32.xlu2 %v8612_v12, %s8848_s29 }
 0xbf4   :  { %8615 = vtanh.f32 %v11121_v42  ;;  %3553 = vrot.lane.b32.xlu1 %v8614_v36, %s8848_s29 }
 0xbf5   :  { %v3392_v16 = vpop.permute.xlu0 %3391 }
 0xbf6   :  { %v3427_v4 = vmul.f32 %v3392_v16, %v11049_v1 }
 0xbf8   :  { %3471 = vrot.lane.b32.xlu0 %v3427_v4, %s8849_s4 }
 0xbfa   :  { %v8616_v56 = vpop.eup %8615 }
 0xbfb   :  { %3639 = vrot.lane.b32.xlu2 %v3591_v37, %s8849_s4 }
 0xbfc   :  { %3555 = vrot.lane.b32.xlu1 %v8616_v56, %s8848_s29 }
 0xbfd   :  { %v3394_v18 = vpop.permute.xlu0 %3393 }
 0xbfe   :  { %v3428_v40 = vmul.f32 %v3394_v18, %v11064_v58  ;;  %v3346_v18 = vmul.f32 %v11027_v26, %v10864_v62 }
 0xc00   :  { %3473 = vrot.lane.b32.xlu0 %v3428_v40, %s8849_s4 }
 0xc03   :  { %3641 = vrot.lane.b32.xlu2 %v3592_v20, %s8849_s4  ;;  %v3462_v0 = vpop.permute.xlu1 %3461 }
 0xc04   :  { %v11137_v9 = vadd.f32 %v3462_v0, %v3342_v21 }
 0xc05   :  { %v3396_v41 = vpop.permute.xlu0 %3395 }
 0xc06   :  { %8617 = vtanh.f32 %v11137_v9  ;;  %v3429_v52 = vmul.f32 %v3396_v41, %v11076_v29 }
 0xc08   :  { %3475 = vrot.lane.b32.xlu0 %v3429_v52, %s8849_s4 }
 0xc0c   :  { %v8618_v24 = vpop.eup %8617 }
 0xc0d   :  { %v3548_v49 = vpop.permute.xlu2 %3547  ;;  %3557 = vrot.lane.b32.xlu1 %v8618_v24, %s8848_s29 }
 0xc0e   :  { %v3593_v17 = vmul.f32 %v3548_v49, %v10948_v60  ;;  %v3347_v49 = vmul.f32 %v11049_v1, %v10871_v55 }
 0xc10   :  { %3643 = vrot.lane.b32.xlu2 %v3593_v17, %s8849_s4 }
 0xc1e   :  { %v3464_v50 = vpop.permute.xlu1 %3463 }
 0xc1f   :  { %v11147_v22 = vadd.f32 %v3464_v50, %v3343_v33 }
 0xc21   :  { %8619 = vtanh.f32 %v11147_v22 }
 0xc26   :  { %v3398_v12 = vpop.permute.xlu0 %3397  ;;  %v3466_v36 = vpop.permute.xlu1 %3465 }
 0xc27   :  { %v8620_v38 = vpop.eup %8619  ;;  %v3430_v16 = vmul.f32 %v3398_v12, %v11093_v30  ;;  %v11153_v4 = vadd.f32 %v3466_v36, %v3344_v63 }
 0xc28   :  { %3559 = vrot.lane.b32.xlu1 %v8620_v38, %s8848_s29 }
 0xc29   :  { %8621 = vtanh.f32 %v11153_v4  ;;  %3477 = vrot.lane.b32.xlu0 %v3430_v16, %s8849_s4 }
 0xc2f   :  { %v8622_v31 = vpop.eup %8621 }
 0xc30   :  { %3561 = vrot.lane.b32.xlu1 %v8622_v31, %s8848_s29 }
 0xc45   :  { %v3550_v60 = vpop.permute.xlu2 %3549 }
 0xc46   :  { %v3594_v37 = vmul.f32 %v3550_v60, %v10960_v25 }
 0xc48   :  { %3645 = vrot.lane.b32.xlu2 %v3594_v37, %s8849_s4 }
 0xc4d   :  { %v3552_v32 = vpop.permute.xlu2 %3551 }
 0xc4e   :  { %v3595_v56 = vmul.f32 %v3552_v32, %v10969_v46  ;;  %v3345_v46 = vmul.f32 %v11037_v35, %v10859_v14 }
 0xc50   :  { %3647 = vrot.lane.b32.xlu2 %v3595_v56, %s8849_s4  ;;  %v3350_v56 = vmul.f32 %v11093_v30, %v10899_v15 }
 0xc51   :  { %v3470_v51 = vpop.permute.xlu0 %3469 }
 0xc52   :  { %v11165_v40 = vadd.f32 %v3470_v51, %v3346_v18 }
 0xc54   :  { %8623 = vtanh.f32 %v11165_v40 }
 0xc55   :  { %v3640_v20 = vpop.permute.xlu2 %3639 }
 0xc56   :  { %7878 = vmatmul.msk.f32.vlgmr.msrb.gmra.mxu1 %vm1214_vm5, %v3640_v20 }
 0xc5a   :  { %v8624_v21 = vpop.eup %8623 }
 0xc5b   :  { %3565 = vrot.lane.b32.xlu2 %v8624_v21, %s8848_s29 }
 0xc5d   :  { %v3642_v25 = vpop.permute.xlu2 %3641 }
 0xc5e   :  { %7879 = vmatmul.msk.f32.gmra.mxu1 %vm1214_vm5, %v3642_v25  ;;  %v3468_v0 = vpop.permute.xlu1 %3467 }
 0xc5f   :  { %v11173_v41 = vadd.f32 %v3468_v0, %v3345_v46 }
 0xc61   :  { %8625 = vtanh.f32 %v11173_v41 }
 0xc66   :  { %v3554_v62 = vpop.permute.xlu1 %3553 }
 0xc67   :  { %v8626_v52 = vpop.eup %8625  ;;  %v3596_v24 = vmul.f32 %v3554_v62, %v10978_v6  ;;  %v3348_v6 = vmul.f32 %v11064_v58, %v10882_v27  ;;  %v13385_v62 = vld [vmem:[#allocation16_spill] sm:$0xff] }
 0xc68   :  { %3563 = vrot.lane.b32.xlu0 %v8626_v52, %s8848_s29 }
 0xc69   :  { %3649 = vrot.lane.b32.xlu1 %v3596_v24, %s8849_s4 }
 0xc6a   :  { %v3472_v17 = vpop.permute.xlu0 %3471  ;;  %v3644_v14 = vpop.permute.xlu2 %3643 }
 0xc6b   :  { %v11181_v33 = vadd.f32 %v3472_v17, %v3347_v49  ;;  %7880 = vmatmul.msk.f32.gmra.mxu1 %vm1214_vm5, %v3644_v14 }
 0xc6d   :  { %8627 = vtanh.f32 %v11181_v33 }
 0xc6e   :  { %v3556_v50 = vpop.permute.xlu1 %3555 }
 0xc6f   :  { %v3597_v63 = vmul.f32 %v3556_v50, %v10987_v2  ;;  %v3349_v2 = vmul.f32 %v11076_v29, %v10892_v23 }
 0xc71   :  { %3651 = vrot.lane.b32.xlu0 %v3597_v63, %s8849_s4 }
 0xc72   :  { %v3474_v12 = vpop.permute.xlu0 %3473 }
 0xc73   :  { %v8628_v36 = vpop.eup %8627  ;;  %v11189_v38 = vadd.f32 %v3474_v12, %v3348_v6  ;;  %v13386_v6 = vld [vmem:[#allocation15_spill] sm:$0xff] }
 0xc74   :  { %3567 = vrot.lane.b32.xlu1 %v8628_v36, %s8848_s29 }
 0xc75   :  { %8629 = vtanh.f32 %v11189_v38 }
 0xc7a   :  { %v3476_v16 = vpop.permute.xlu0 %3475 }
 0xc7b   :  { %v8630_v55 = vpop.eup %8629  ;;  %v11196_v31 = vadd.f32 %v3476_v16, %v3349_v2 }
 0xc7c   :  { %3569 = vrot.lane.b32.xlu0 %v8630_v55, %s8848_s29 }
 0xc7d   :  { %8631 = vtanh.f32 %v11196_v31 }
 0xc7f   :  { %v3558_v60 = vpop.permute.xlu1 %3557 }
 0xc80   :  { %v3598_v27 = vmul.f32 %v3558_v60, %v10996_v57 }
 0xc82   :  { %3653 = vrot.lane.b32.xlu2 %v3598_v27, %s8849_s4 }
 0xc83   :  { %v8632_v37 = vpop.eup %8631 }
 0xc8a   :  { %3571 = vrot.lane.b32.xlu2 %v8632_v37, %s8848_s29 }
 0xc9a   :  { %v3560_v32 = vpop.permute.xlu1 %3559 }
 0xc9b   :  { %v3599_v18 = vmul.f32 %v3560_v32, %v11005_v61  ;;  %v3478_v51 = vpop.permute.xlu0 %3477 }
 0xc9c   :  { %v11205_v23 = vadd.f32 %v3478_v51, %v3350_v56 }
 0xc9d   :  { %3655 = vrot.lane.b32.xlu1 %v3599_v18, %s8849_s4 }
 0xc9e   :  { %8633 = vtanh.f32 %v11205_v23 }
 0xca2   :  { %v3646_v57 = vpop.permute.xlu2 %3645  ;;  %v3562_v20 = vpop.permute.xlu1 %3561 }
 0xca3   :  { %v3600_v21 = vmul.f32 %v3562_v20, %v11015_v8  ;;  %7881 = vmatmul.msk.f32.gmra.mxu1 %vm1214_vm5, %v3646_v57  ;;  %v11219_v8 = vld [vmem:[%s13288_s1 + $0x30] ss:$0 sm:$0xff] }
 0xca4   :  { %v8634_v25 = vpop.eup %8633  ;;  %v835_v52 = vadd.f32 %v11219_v8, %v13385_v62  ;;  %v832_v12 = vadd.f32 %v11219_v8, %v13386_v6  ;;  %v13387_v57 = vld [vmem:[#allocation17_spill] sm:$0xff]  ;;  %v13388_v62 = vld [vmem:[#allocation18_spill] sm:$0xff] }
 0xca5   :  { %3573 = vrot.lane.b32.xlu1 %v8634_v25, %s8848_s29  ;;  %3657 = vrot.lane.b32.xlu0 %v3600_v21, %s8849_s4  ;;  %v838_v20 = vadd.f32 %v11219_v8, %v13387_v57 }
 0xcaa   :  { %v3648_v15 = vpop.permute.xlu2 %3647 }
 0xcab   :  { %7882 = vmatmul.msk.f32.gmra.mxu1 %vm1214_vm5, %v3648_v15 }
 0xcb5   :  { %v3566_v61 = vpop.permute.xlu2 %3565 }
 0xcb6   :  { %v3602_v46 = vmul.f32 %v3566_v61, %v11027_v26 }
 0xcb8   :  { %3661 = vrot.lane.b32.xlu0 %v3602_v46, %s8849_s4 }
 0xcd3   :  { %v3720_v0 = vpop.f32.mrf.mxu1 }
 0xcda   :  { %v3564_v24 = vpop.permute.xlu0 %3563 }
 0xcdb   :  { %v3601_v49 = vmul.f32 %v3564_v24, %v11037_v35  ;;  %v3723_v17 = vpop.f32.mrf.mxu1  ;;  %v3650_v14 = vpop.permute.xlu1 %3649  ;;  %v3768_v35 = vadd.f32 %v3720_v0, %v832_v12 }
 0xcdc   :  { %v3769_v50 = vadd.f32 %v3723_v17, %v835_v52  ;;  %v3654_v63 = vpop.permute.xlu2 %3653  ;;  %7883 = vmatmul.msk.f32.gmra.mxu1 %vm1214_vm5, %v3650_v14  ;;  %v841_v52 = vadd.f32 %v11219_v8, %v13388_v62  ;;  %v13392_v62 = vld [vmem:[#allocation22_spill] sm:$0xff] }
 0xcdd   :  { %3659 = vrot.lane.b32.xlu2 %v3601_v49, %s8849_s4 }
 0xcde   :  { %8635 = vtanh.f32 %v3769_v50 }
 0xcdf   :  { %8637 = vtanh.f32 %v3768_v35 }
 0xce3   :  { %v3652_v26 = vpop.permute.xlu0 %3651 }
 0xce4   :  { %v3572_v36 = vpop.permute.xlu2 %3571  ;;  %7884 = vmatmul.msk.f32.gmra.mxu1 %vm1214_vm5, %v3652_v26  ;;  %v8636_v16 = vpop.eup %8635 }
 0xce5   :  { %v3605_v55 = vmul.f32 %v3572_v36, %v11076_v29  ;;  %v3801_v27 = vmul.f32 %v8636_v16, %v9107_v5  ;;  %v8638_v56 = vpop.eup %8637 }
 0xce6   :  { %v3568_v2 = vpop.permute.xlu1 %3567 }
 0xce7   :  { %v3603_v60 = vmul.f32 %v3568_v2, %v11049_v1  ;;  %3667 = vrot.lane.b32.xlu0 %v3605_v55, %s8849_s4  ;;  %v11236_v37 = vadd.f32 %v3801_v27, %v9113_v11  ;;  %v3800_v1 = vmul.f32 %v8638_v56, %v9107_v5 }
 0xce8   :  { %v3726_v51 = vpop.f32.mrf.mxu1 }
 0xce9   :  { %3663 = vrot.lane.b32.xlu1 %v3603_v60, %s8849_s4  ;;  %v11244_v18 = vadd.f32 %v3800_v1, %v9113_v11  ;;  %v3770_v21 = vadd.f32 %v3726_v51, %v838_v20  ;;  %v13391_v20 = vld [vmem:[#allocation21_spill] sm:$0xff] }
 0xceb   :  { %8639 = vtanh.f32 %v3770_v21  ;;  %v850_v21 = vadd.f32 %v11219_v8, %v13391_v20 }
 0xcec   :  { %7885 = vmatmul.msk.f32.gmra.mxu1 %vm1214_vm5, %v3654_v63 }
 0xcee   :  { %v3570_v32 = vpop.permute.xlu0 %3569 }
 0xcef   :  { %v3604_v29 = vmul.f32 %v3570_v32, %v11064_v58  ;;  %3866 = vrot.lane.b32.xlu0 %v11236_v37, %s8848_s29 }
 0xcf1   :  { %3665 = vrot.lane.b32.xlu2 %v3604_v29, %s8849_s4  ;;  %v8640_v46 = vpop.eup %8639  ;;  %v13390_v29 = vld [vmem:[#allocation20_spill] sm:$0xff] }
 0xcf2   :  { %v3802_v0 = vmul.f32 %v8640_v46, %v9107_v5  ;;  %v847_v56 = vadd.f32 %v11219_v8, %v13390_v29 }
 0xcf4   :  { %v11258_v49 = vadd.f32 %v3802_v0, %v9113_v11 }
 0xcf9   :  { %3864 = vrot.lane.b32.xlu2 %v11244_v18, %s8848_s29 }
 0xd0f   :  { %v3656_v58 = vpop.permute.xlu1 %3655 }
 0xd10   :  { %7886 = vmatmul.msk.f32.gmra.mxu1 %vm1214_vm5, %v3656_v58 }
 0xd17   :  { %v3658_v25 = vpop.permute.xlu0 %3657  ;;  %v3574_v15 = vpop.permute.xlu1 %3573 }
 0xd18   :  { %v3606_v61 = vmul.f32 %v3574_v15, %v11093_v30  ;;  %7887 = vmatmul.msk.f32.gmra.mxu1 %vm1214_vm5, %v3658_v25  ;;  %v13389_v30 = vld [vmem:[#allocation19_spill] sm:$0xff] }
 0xd19   :  { %v844_v14 = vadd.f32 %v11219_v8, %v13389_v30 }
 0xd1a   :  { %3669 = vrot.lane.b32.xlu1 %v3606_v61, %s8849_s4 }
 0xd20   :  { %v3729_v24 = vpop.f32.mrf.mxu1 }
 0xd21   :  { %v3771_v17 = vadd.f32 %v3729_v24, %v841_v52  ;;  %v853_v52 = vadd.f32 %v11219_v8, %v13392_v62 }
 0xd22   :  { %3868 = vrot.lane.b32.xlu1 %v11258_v49, %s8848_s29 }
 0xd23   :  { %8641 = vtanh.f32 %v3771_v17 }
 0xd28   :  { %v3732_v50 = vpop.f32.mrf.mxu1 }
 0xd29   :  { %v8642_v63 = vpop.eup %8641  ;;  %v3772_v26 = vadd.f32 %v3732_v50, %v844_v14 }
 0xd2a   :  { %v3803_v6 = vmul.f32 %v8642_v63, %v9107_v5  ;;  %v3662_v2 = vpop.permute.xlu0 %3661 }
 0xd2b   :  { %8643 = vtanh.f32 %v3772_v26 }
 0xd2c   :  { %v11266_v12 = vadd.f32 %v3803_v6, %v9113_v11 }
 0xd2e   :  { %3870 = vrot.lane.b32.xlu2 %v11266_v12, %s8848_s29 }
 0xd31   :  { %v8644_v36 = vpop.eup %8643 }
 0xd32   :  { %v3804_v55 = vmul.f32 %v8644_v36, %v9107_v5 }
 0xd34   :  { %v11272_v16 = vadd.f32 %v3804_v55, %v9113_v11 }
 0xd36   :  { %3872 = vrot.lane.b32.xlu0 %v11272_v16, %s8848_s29 }
 0xd37   :  { %v3660_v35 = vpop.permute.xlu2 %3659 }
 0xd38   :  { %7888 = vmatmul.msk.f32.gmra.mxu1 %vm1214_vm5, %v3660_v35 }
 0xd40   :  { %7889 = vmatmul.msk.f32.gmra.mxu1 %vm1214_vm5, %v3662_v2 }
 0xd4b   :  { %v3666_v60 = vpop.permute.xlu2 %3665 }
 0xd53   :  { %v3865_v27 = vpop.permute.xlu2 %3864 }
 0xd54   :  { %v3912_v32 = vmul.f32 %v3865_v27, %v11244_v18 }
 0xd56   :  { %3944 = vrot.lane.b32.xlu2 %v3912_v32, %s8849_s4 }
 0xd59   :  { %v3735_v1 = vpop.f32.mrf.mxu1  ;;  %v3668_v58 = vpop.permute.xlu0 %3667 }
 0xd5a   :  { %v3773_v51 = vadd.f32 %v3735_v1, %v847_v56  ;;  %v13394_v1 = vld [vmem:[#allocation24_spill] sm:$0xff] }
 0xd5b   :  { %v3664_v57 = vpop.permute.xlu1 %3663 }
 0xd5c   :  { %8645 = vtanh.f32 %v3773_v51  ;;  %7890 = vmatmul.msk.f32.gmra.mxu1 %vm1214_vm5, %v3664_v57  ;;  %v859_v51 = vadd.f32 %v11219_v8, %v13394_v1 }
 0xd61   :  { %v3738_v25 = vpop.f32.mrf.mxu1  ;;  %v3867_v30 = vpop.permute.xlu0 %3866 }
 0xd62   :  { %v8646_v15 = vpop.eup %8645  ;;  %v3774_v61 = vadd.f32 %v3738_v25, %v850_v21  ;;  %v3913_v63 = vmul.f32 %v3867_v30, %v11236_v37  ;;  %v13395_v30 = vld [vmem:[#allocation25_spill] sm:$0xff] }
 0xd63   :  { %v3805_v46 = vmul.f32 %v8646_v15, %v9107_v5 }
 0xd64   :  { %8647 = vtanh.f32 %v3774_v61  ;;  %7891 = vmatmul.msk.f32.gmra.mxu1 %vm1214_vm5, %v3666_v60  ;;  %v13393_v60 = vld [vmem:[#allocation23_spill] sm:$0xff] }
 0xd65   :  { %v11288_v0 = vadd.f32 %v3805_v46, %v9113_v11  ;;  %v856_v27 = vadd.f32 %v11219_v8, %v13393_v60 }
 0xd67   :  { %3874 = vrot.lane.b32.xlu1 %v11288_v0, %s8848_s29 }
 0xd69   :  { %v3741_v24 = vpop.f32.mrf.mxu1 }
 0xd6a   :  { %v8648_v17 = vpop.eup %8647  ;;  %v3775_v14 = vadd.f32 %v3741_v24, %v853_v52 }
 0xd6b   :  { %v3806_v50 = vmul.f32 %v8648_v17, %v9107_v5 }
 0xd6c   :  { %8649 = vtanh.f32 %v3775_v14  ;;  %7892 = vmatmul.msk.f32.gmra.mxu1 %vm1214_vm5, %v3668_v58  ;;  %v862_v14 = vadd.f32 %v11219_v8, %v13395_v30 }
 0xd6d   :  { %v11298_v26 = vadd.f32 %v3806_v50, %v9113_v11 }
 0xd6f   :  { %3876 = vrot.lane.b32.xlu0 %v11298_v26, %s8848_s29  ;;  %3946 = vrot.lane.b32.xlu1 %v3913_v63, %s8849_s4 }
 0xd72   :  { %v8650_v6 = vpop.eup %8649 }
 0xd73   :  { %v3807_v36 = vmul.f32 %v8650_v6, %v9107_v5  ;;  %v13396_v6 = vld [vmem:[#allocation26_spill] sm:$0xff] }
 0xd75   :  { %v11305_v55 = vadd.f32 %v3807_v36, %v9113_v11  ;;  %v865_v36 = vadd.f32 %v11219_v8, %v13396_v6 }
 0xd77   :  { %3878 = vrot.lane.b32.xlu2 %v11305_v55, %s8848_s29 }
 0xd88   :  { %v3871_v35 = vpop.permute.xlu2 %3870 }
 0xd89   :  { %v3915_v2 = vmul.f32 %v3871_v35, %v11266_v12 }
 0xd8b   :  { %3950 = vrot.lane.b32.xlu2 %v3915_v2, %s8849_s4 }
 0xd8c   :  { %v3670_v32 = vpop.permute.xlu1 %3669 }
 0xd8d   :  { %v3744_v29 = vpop.f32.mrf.mxu1  ;;  %7893 = vmatmul.msk.f32.gmra.mxu1 %vm1214_vm5, %v3670_v32 }
 0xd8e   :  { %v3776_v56 = vadd.f32 %v3744_v29, %v856_v27 }
 0xd90   :  { %8651 = vtanh.f32 %v3776_v56 }
 0xd94   :  { %v3869_v57 = vpop.permute.xlu1 %3868 }
 0xd95   :  { %v3914_v20 = vmul.f32 %v3869_v57, %v11258_v49  ;;  %v3747_v21 = vpop.f32.mrf.mxu1  ;;  %v3832_v57 = vmul.f32 %v11244_v18, %v11057_v48 }
 0xd96   :  { %v8652_v58 = vpop.eup %8651  ;;  %v3777_v25 = vadd.f32 %v3747_v21, %v859_v51 }
 0xd97   :  { %v3808_v15 = vmul.f32 %v8652_v58, %v9107_v5  ;;  %3948 = vrot.lane.b32.xlu0 %v3914_v20, %s8849_s4  ;;  %v13397_v20 = vld [vmem:[#allocation27_spill] sm:$0xff] }
 0xd98   :  { %8653 = vtanh.f32 %v3777_v25  ;;  %v868_v21 = vadd.f32 %v11219_v8, %v13397_v20 }
 0xd99   :  { %v11320_v61 = vadd.f32 %v3808_v15, %v9113_v11 }
 0xd9b   :  { %3880 = vrot.lane.b32.xlu1 %v11320_v61, %s8848_s29 }
 0xd9e   :  { %v8654_v46 = vpop.eup %8653 }
 0xd9f   :  { %v3809_v62 = vmul.f32 %v8654_v46, %v9107_v5 }
 0xda1   :  { %v11326_v52 = vadd.f32 %v3809_v62, %v9113_v11 }
 0xda3   :  { %3882 = vrot.lane.b32.xlu0 %v11326_v52, %s8848_s29 }
 0xda8   :  { %v3873_v24 = vpop.permute.xlu0 %3872 }
 0xda9   :  { %v3916_v17 = vmul.f32 %v3873_v24, %v11272_v16  ;;  %v13398_v24 = vld [vmem:[#allocation28_spill] sm:$0xff] }
 0xdab   :  { %3952 = vrot.lane.b32.xlu1 %v3916_v17, %s8849_s4  ;;  %v871_v17 = vadd.f32 %v11219_v8, %v13398_v24 }
 0xdb0   :  { %v3945_v51 = vpop.permute.xlu2 %3944 }
 0xdb1   :  { %v11352_v58 = vadd.f32 %v3945_v51, %v3832_v57 }
 0xdb5   :  { %v3750_v50 = vpop.f32.mrf.mxu1 }
 0xdb6   :  { %v3778_v63 = vadd.f32 %v3750_v50, %v862_v14  ;;  %v3833_v14 = vmul.f32 %v11236_v37, %v11066_v28 }
 0xdb8   :  { %8655 = vtanh.f32 %v3778_v63 }
 0xdbd   :  { %v3753_v35 = vpop.f32.mrf.mxu1 }
 0xdbe   :  { %v8656_v2 = vpop.eup %8655  ;;  %v3779_v60 = vadd.f32 %v3753_v35, %v865_v36 }
 0xdbf   :  { %v3810_v27 = vmul.f32 %v8656_v2, %v9107_v5 }
 0xdc0   :  { %8657 = vtanh.f32 %v3779_v60 }
 0xdc1   :  { %v11338_v32 = vadd.f32 %v3810_v27, %v9113_v11 }
 0xdc3   :  { %3884 = vrot.lane.b32.xlu2 %v11338_v32, %s8848_s29 }
 0xdc6   :  { %v8658_v29 = vpop.eup %8657 }
 0xdc7   :  { %v3811_v56 = vmul.f32 %v8658_v29, %v9107_v5  ;;  %v13399_v29 = vld [vmem:[#allocation29_spill] sm:$0xff] }
 0xdc9   :  { %v11344_v1 = vadd.f32 %v3811_v56, %v9113_v11  ;;  %v874_v56 = vadd.f32 %v11219_v8, %v13399_v29 }
 0xdcb   :  { %3886 = vrot.lane.b32.xlu1 %v11344_v1, %s8848_s29 }
 0xdd1   :  { %v3879_v28 = vpop.permute.xlu2 %3878 }
 0xdd2   :  { %v3919_v20 = vmul.f32 %v3879_v28, %v11305_v55  ;;  %v3835_v28 = vmul.f32 %v11266_v12, %v11103_v7 }
 0xdd9   :  { %v3756_v25 = vpop.f32.mrf.mxu1  ;;  %v3875_v15 = vpop.permute.xlu1 %3874 }
 0xdda   :  { %v3780_v46 = vadd.f32 %v3756_v25, %v868_v21  ;;  %v3917_v62 = vmul.f32 %v3875_v15, %v11288_v0 }
 0xddc   :  { %8659 = vtanh.f32 %v3780_v46  ;;  %3954 = vrot.lane.b32.xlu0 %v3917_v62, %s8849_s4 }
 0xddd   :  { %8661 = vtanh.f32 %v11352_v58 }
 0xde1   :  { %v3877_v30 = vpop.permute.xlu0 %3876  ;;  %v3759_v48 = vpop.f32.mrf.mxu1 }
 0xde2   :  { %v8660_v50 = vpop.eup %8659  ;;  %v3918_v63 = vmul.f32 %v3877_v30, %v11298_v26  ;;  %v3781_v6 = vadd.f32 %v3759_v48, %v871_v17  ;;  %v3947_v36 = vpop.permute.xlu1 %3946  ;;  %v3834_v30 = vmul.f32 %v11258_v49, %v11086_v19  ;;  %v13400_v48 = vld [vmem:[#allocation30_spill] sm:$0xff] }
 0xde3   :  { %v8662_v35 = vpop.eup %8661  ;;  %v3812_v2 = vmul.f32 %v8660_v50, %v9107_v5  ;;  %v11363_v60 = vadd.f32 %v3947_v36, %v3833_v14  ;;  %v877_v14 = vadd.f32 %v11219_v8, %v13400_v48 }
 0xde4   :  { %8663 = vtanh.f32 %v3781_v6  ;;  %3956 = vrot.lane.b32.xlu2 %v3918_v63, %s8849_s4  ;;  %4040 = vrot.lane.b32.xlu0 %v8662_v35, %s8848_s29 }
 0xde5   :  { %8665 = vtanh.f32 %v11363_v60  ;;  %v11369_v27 = vadd.f32 %v3812_v2, %v9113_v11  ;;  %v3951_v35 = vpop.permute.xlu2 %3950 }
 0xde7   :  { %3888 = vrot.lane.b32.xlu1 %v11369_v27, %s8848_s29 }
 0xde9   :  { %v3762_v51 = vpop.f32.mrf.mxu1 }
 0xdea   :  { %v8664_v57 = vpop.eup %8663  ;;  %v3782_v21 = vadd.f32 %v3762_v51, %v874_v56  ;;  %v11400_v56 = vadd.f32 %v3951_v35, %v3835_v28  ;;  %v3838_v28 = vmul.f32 %v11298_v26, %v11121_v42 }
 0xdeb   :  { %v8666_v25 = vpop.eup %8665  ;;  %v3813_v15 = vmul.f32 %v8664_v57, %v9107_v5 }
 0xdec   :  { %8667 = vtanh.f32 %v3782_v21  ;;  %3958 = vrot.lane.b32.xlu2 %v3919_v20, %s8849_s4  ;;  %4042 = vrot.lane.b32.xlu0 %v8666_v25, %s8848_s29 }
 0xded   :  { %v11380_v46 = vadd.f32 %v3813_v15, %v9113_v11  ;;  %v3836_v15 = vmul.f32 %v11272_v16, %v11110_v13  ;;  %v3837_v13 = vmul.f32 %v11288_v0, %v11112_v39 }
 0xdef   :  { %3890 = vrot.lane.b32.xlu1 %v11380_v46, %s8848_s29 }
 0xdf2   :  { %v8668_v62 = vpop.eup %8667 }
 0xdf3   :  { %v3814_v24 = vmul.f32 %v8668_v62, %v9107_v5 }
 0xdf5   :  { %v11386_v17 = vadd.f32 %v3814_v24, %v9113_v11 }
 0xdf7   :  { %3892 = vrot.lane.b32.xlu1 %v11386_v17, %s8848_s29 }
 0xe09   :  { %v3949_v50 = vpop.permute.xlu0 %3948 }
 0xe0a   :  { %v11394_v63 = vadd.f32 %v3949_v50, %v3834_v30  ;;  %v3765_v6 = vpop.f32.mrf.mxu1 }
 0xe0b   :  { %v3783_v36 = vadd.f32 %v3765_v6, %v877_v14 }
 0xe0c   :  { %8669 = vtanh.f32 %v11394_v63 }
 0xe0d   :  { %8671 = vtanh.f32 %v3783_v36  ;;  %v3881_v2 = vpop.permute.xlu1 %3880 }
 0xe0e   :  { %v3920_v29 = vmul.f32 %v3881_v2, %v11320_v61  ;;  %8673 = vtanh.f32 %v11400_v56 }
 0xe10   :  { %3960 = vrot.lane.b32.xlu2 %v3920_v29, %s8849_s4 }
 0xe12   :  { %v8670_v19 = vpop.eup %8669 }
 0xe13   :  { %v8672_v51 = vpop.eup %8671  ;;  %4044 = vrot.lane.b32.xlu0 %v8670_v19, %s8848_s29 }
 0xe14   :  { %v3815_v57 = vmul.f32 %v8672_v51, %v9107_v5  ;;  %v8674_v7 = vpop.eup %8673 }
 0xe15   :  { %v3883_v20 = vpop.permute.xlu0 %3882 }
 0xe16   :  { %v3921_v21 = vmul.f32 %v3883_v20, %v11326_v52  ;;  %v11408_v25 = vadd.f32 %v3815_v57, %v9113_v11 }
 0xe18   :  { %3894 = vrot.lane.b32.xlu1 %v11408_v25, %s8848_s29  ;;  %3962 = vrot.lane.b32.xlu2 %v3921_v21, %s8849_s4 }
 0xe1b   :  { %4046 = vrot.lane.b32.xlu0 %v8674_v7, %s8848_s29  ;;  %v3839_v7 = vmul.f32 %v11305_v55, %v11137_v9 }
 0xe1d   :  { %v3885_v62 = vpop.permute.xlu2 %3884  ;;  %v3953_v24 = vpop.permute.xlu1 %3952 }
 0xe1e   :  { %v3922_v30 = vmul.f32 %v3885_v62, %v11338_v32  ;;  %v11417_v48 = vadd.f32 %v3953_v24, %v3836_v15 }
 0xe20   :  { %8675 = vtanh.f32 %v11417_v48  ;;  %3964 = vrot.lane.b32.xlu2 %v3922_v30, %s8849_s4 }
 0xe26   :  { %v8676_v14 = vpop.eup %8675 }
 0xe27   :  { %4048 = vrot.lane.b32.xlu0 %v8676_v14, %s8848_s29 }
 0xe3d   :  { %v3887_v50 = vpop.permute.xlu1 %3886 }
 0xe3e   :  { %v3923_v6 = vmul.f32 %v3887_v50, %v11344_v1  ;;  %v3957_v2 = vpop.permute.xlu2 %3956  ;;  %v3840_v50 = vmul.f32 %v11320_v61, %v11147_v22 }
 0xe3f   :  { %v11431_v29 = vadd.f32 %v3957_v2, %v3838_v28 }
 0xe40   :  { %3966 = vrot.lane.b32.xlu1 %v3923_v6, %s8849_s4 }
 0xe46   :  { %v3959_v20 = vpop.permute.xlu2 %3958 }
 0xe47   :  { %v11441_v42 = vadd.f32 %v3959_v20, %v3839_v7  ;;  %v3842_v20 = vmul.f32 %v11338_v32, %v11173_v41 }
 0xe4e   :  { %v3955_v36 = vpop.permute.xlu0 %3954 }
 0xe4f   :  { %v11426_v35 = vadd.f32 %v3955_v36, %v3837_v13  ;;  %v3841_v36 = vmul.f32 %v11326_v52, %v11153_v4 }
 0xe51   :  { %8677 = vtanh.f32 %v11426_v35 }
 0xe52   :  { %8679 = vtanh.f32 %v11431_v29 }
 0xe53   :  { %8681 = vtanh.f32 %v11441_v42 }
 0xe56   :  { %v4041_v19 = vpop.permute.xlu0 %4040 }
 0xe57   :  { %v8678_v51 = vpop.eup %8677  ;;  %v4088_v57 = vmul.f32 %v4041_v19, %v11244_v18 }
 0xe58   :  { %4050 = vrot.lane.b32.xlu2 %v8678_v51, %s8848_s29  ;;  %v8680_v62 = vpop.eup %8679 }
 0xe59   :  { %4136 = vrot.lane.b32.xlu0 %v4088_v57, %s8849_s4  ;;  %v3889_v39 = vpop.permute.xlu1 %3888  ;;  %v8682_v9 = vpop.eup %8681 }
 0xe5a   :  { %v3924_v21 = vmul.f32 %v3889_v39, %v11369_v27 }
 0xe5c   :  { %3968 = vrot.lane.b32.xlu1 %v3924_v21, %s8849_s4 }
 0xe5e   :  { %v4043_v15 = vpop.permute.xlu0 %4042 }
 0xe5f   :  { %v4089_v18 = vmul.f32 %v4043_v15, %v11236_v37 }
 0xe60   :  { %4052 = vrot.lane.b32.xlu2 %v8680_v62, %s8848_s29 }
 0xe61   :  { %4138 = vrot.lane.b32.xlu0 %v4089_v18, %s8849_s4  ;;  %v3891_v24 = vpop.permute.xlu1 %3890 }
 0xe62   :  { %v3925_v30 = vmul.f32 %v3891_v24, %v11380_v46  ;;  %v3843_v24 = vmul.f32 %v11344_v1, %v11165_v40 }
 0xe64   :  { %3970 = vrot.lane.b32.xlu1 %v3925_v30, %s8849_s4 }
 0xe68   :  { %4054 = vrot.lane.b32.xlu2 %v8682_v9, %s8848_s29 }
 0xe69   :  { %v3893_v14 = vpop.permute.xlu1 %3892 }
 0xe6a   :  { %v3926_v37 = vmul.f32 %v3893_v14, %v11386_v17  ;;  %v3961_v6 = vpop.permute.xlu2 %3960 }
 0xe6b   :  { %v11453_v13 = vadd.f32 %v3961_v6, %v3840_v50 }
 0xe6c   :  { %3972 = vrot.lane.b32.xlu1 %v3926_v37, %s8849_s4 }
 0xe6d   :  { %8683 = vtanh.f32 %v11453_v13 }
 0xe72   :  { %v3963_v2 = vpop.permute.xlu2 %3962 }
 0xe73   :  { %v8684_v28 = vpop.eup %8683  ;;  %v11459_v19 = vadd.f32 %v3963_v2, %v3841_v36  ;;  %v3844_v36 = vmul.f32 %v11369_v27, %v11181_v33  ;;  %v3846_v33 = vmul.f32 %v11386_v17, %v11196_v31 }
 0xe74   :  { %4056 = vrot.lane.b32.xlu2 %v8684_v28, %s8848_s29 }
 0xe75   :  { %8685 = vtanh.f32 %v11459_v19 }
 0xe7a   :  { %v3965_v39 = vpop.permute.xlu2 %3964 }
 0xe7b   :  { %v8686_v22 = vpop.eup %8685  ;;  %v11468_v4 = vadd.f32 %v3965_v39, %v3842_v20 }
 0xe7c   :  { %4058 = vrot.lane.b32.xlu2 %v8686_v22, %s8848_s29  ;;  %v3845_v22 = vmul.f32 %v11380_v46, %v11189_v38 }
 0xe7d   :  { %8687 = vtanh.f32 %v11468_v4 }
 0xe85   :  { %v4045_v51 = vpop.permute.xlu0 %4044 }
 0xe86   :  { %v4090_v57 = vmul.f32 %v4045_v51, %v11258_v49  ;;  %v8688_v49 = vpop.eup %8687 }
 0xe88   :  { %4140 = vrot.lane.b32.xlu0 %v4090_v57, %s8849_s4 }
 0xe8a   :  { %v3895_v21 = vpop.permute.xlu1 %3894 }
 0xe8b   :  { %v3927_v7 = vmul.f32 %v3895_v21, %v11408_v25 }
 0xe8d   :  { %v4047_v15 = vpop.permute.xlu0 %4046  ;;  %3974 = vrot.lane.b32.xlu1 %v3927_v7, %s8849_s4 }
 0xe8e   :  { %v4091_v62 = vmul.f32 %v4047_v15, %v11266_v12 }
 0xe90   :  { %4142 = vrot.lane.b32.xlu0 %v4091_v62, %s8849_s4 }
 0xe95   :  { %4060 = vrot.lane.b32.xlu1 %v8688_v49, %s8848_s29 }
 0xe99   :  { %v4049_v41 = vpop.permute.xlu0 %4048 }
 0xe9a   :  { %v4092_v18 = vmul.f32 %v4049_v41, %v11272_v16 }
 0xe9c   :  { %4144 = vrot.lane.b32.xlu0 %v4092_v18, %s8849_s4 }
 0xeb2   :  { %v4051_v30 = vpop.permute.xlu2 %4050  ;;  %v3967_v9 = vpop.permute.xlu1 %3966 }
 0xeb3   :  { %v4093_v14 = vmul.f32 %v4051_v30, %v11288_v0  ;;  %v11481_v50 = vadd.f32 %v3967_v9, %v3843_v24 }
 0xeb5   :  { %8689 = vtanh.f32 %v11481_v50  ;;  %4146 = vrot.lane.b32.xlu2 %v4093_v14, %s8849_s4 }
 0xeba   :  { %v4053_v12 = vpop.permute.xlu2 %4052 }
 0xebb   :  { %v8690_v37 = vpop.eup %8689  ;;  %v4094_v6 = vmul.f32 %v4053_v12, %v11298_v26 }
 0xebc   :  { %4062 = vrot.lane.b32.xlu0 %v8690_v37, %s8848_s29 }
 0xebd   :  { %4148 = vrot.lane.b32.xlu1 %v4094_v6, %s8849_s4 }
 0xec2   :  { %v4055_v16 = vpop.permute.xlu2 %4054 }
 0xec3   :  { %v4095_v40 = vmul.f32 %v4055_v16, %v11305_v55 }
 0xec5   :  { %4150 = vrot.lane.b32.xlu0 %v4095_v40, %s8849_s4 }
 0xecb   :  { %v4137_v0 = vpop.permute.xlu0 %4136 }
 0xecc   :  { %7894 = vmatmul.msk.f32.vlgmr.msra.gmra.mxu2 %vm1214_vm5, %v4137_v0 }
 0xece   :  { %v3969_v2 = vpop.permute.xlu1 %3968  ;;  %v4057_v39 = vpop.permute.xlu2 %4056 }
 0xecf   :  { %v11493_v28 = vadd.f32 %v3969_v2, %v3844_v36  ;;  %v4096_v20 = vmul.f32 %v4057_v39, %v11320_v61  ;;  %v3847_v61 = vmul.f32 %v11408_v25, %v11205_v23  ;;  %v13401_v36 = vld [vmem:[#allocation31_spill] sm:$0xff] }
 0xed0   :  { %v978_v2 = vadd.f32 %v11219_v8, %v13401_v36  ;;  %v13405_v36 = vld [vmem:[#allocation35_spill] sm:$0xff] }
 0xed1   :  { %8691 = vtanh.f32 %v11493_v28 }
 0xed3   :  { %v4139_v26 = vpop.permute.xlu0 %4138 }
 0xed4   :  { %7895 = vmatmul.msk.f32.gmra.mxu2 %vm1214_vm5, %v4139_v26 }
 0xed6   :  { %v3971_v55 = vpop.permute.xlu1 %3970  ;;  %v4059_v38 = vpop.permute.xlu2 %4058 }
 0xed7   :  { %v8692_v51 = vpop.eup %8691  ;;  %v11499_v57 = vadd.f32 %v3971_v55, %v3845_v22  ;;  %v4097_v62 = vmul.f32 %v4059_v38, %v11326_v52 }
 0xed8   :  { %4064 = vrot.lane.b32.xlu2 %v8692_v51, %s8848_s29 }
 0xed9   :  { %8693 = vtanh.f32 %v11499_v57 }
 0xede   :  { %v3973_v21 = vpop.permute.xlu1 %3972 }
 0xedf   :  { %v8694_v7 = vpop.eup %8693  ;;  %v11506_v15 = vadd.f32 %v3973_v21, %v3846_v33 }
 0xee0   :  { %4152 = vrot.lane.b32.xlu2 %v4096_v20, %s8849_s4  ;;  %4066 = vrot.lane.b32.xlu1 %v8694_v7, %s8848_s29 }
 0xee1   :  { %8695 = vtanh.f32 %v11506_v15 }
 0xee7   :  { %v8696_v49 = vpop.eup %8695 }
 0xee8   :  { %4154 = vrot.lane.b32.xlu1 %v4097_v62, %s8849_s4  ;;  %4068 = vrot.lane.b32.xlu0 %v8696_v49, %s8848_s29 }
 0xefa   :  { %v4141_v31 = vpop.permute.xlu0 %4140 }
 0xefb   :  { %7896 = vmatmul.msk.f32.gmra.mxu2 %vm1214_vm5, %v4141_v31 }
 0xeff   :  { %v3975_v41 = vpop.permute.xlu1 %3974 }
 0xf00   :  { %v11517_v18 = vadd.f32 %v3975_v41, %v3847_v61 }
 0xf02   :  { %8697 = vtanh.f32 %v11517_v18  ;;  %v4143_v24 = vpop.permute.xlu0 %4142 }
 0xf03   :  { %7897 = vmatmul.msk.f32.gmra.mxu2 %vm1214_vm5, %v4143_v24 }
 0xf07   :  { %v4061_v52 = vpop.permute.xlu1 %4060 }
 0xf08   :  { %v8698_v30 = vpop.eup %8697  ;;  %v4098_v9 = vmul.f32 %v4061_v52, %v11338_v32  ;;  %v13403_v52 = vld [vmem:[#allocation33_spill] sm:$0xff] }
 0xf09   :  { %4070 = vrot.lane.b32.xlu2 %v8698_v30, %s8848_s29  ;;  %v984_v30 = vadd.f32 %v11219_v8, %v13403_v52 }
 0xf0a   :  { %4156 = vrot.lane.b32.xlu0 %v4098_v9, %s8849_s4 }
 0xf0e   :  { %v4145_v14 = vpop.permute.xlu0 %4144 }
 0xf0f   :  { %7898 = vmatmul.msk.f32.gmra.mxu2 %vm1214_vm5, %v4145_v14  ;;  %v4147_v23 = vpop.permute.xlu2 %4146 }
 0xf17   :  { %7899 = vmatmul.msk.f32.gmra.mxu2 %vm1214_vm5, %v4147_v23  ;;  %v13404_v23 = vld [vmem:[#allocation34_spill] sm:$0xff] }
 0xf2e   :  { %v4063_v12 = vpop.permute.xlu0 %4062 }
 0xf2f   :  { %v4099_v37 = vmul.f32 %v4063_v12, %v11344_v1  ;;  %v4149_v6 = vpop.permute.xlu1 %4148  ;;  %v987_v12 = vadd.f32 %v11219_v8, %v13404_v23 }
 0xf30   :  { %7900 = vmatmul.msk.f32.gmra.mxu2 %vm1214_vm5, %v4149_v6 }
 0xf31   :  { %4158 = vrot.lane.b32.xlu1 %v4099_v37, %s8849_s4 }
 0xf32   :  { %v4065_v16 = vpop.permute.xlu2 %4064 }
 0xf33   :  { %v4100_v32 = vmul.f32 %v4065_v16, %v11369_v27  ;;  %v13402_v27 = vld [vmem:[#allocation32_spill] sm:$0xff] }
 0xf34   :  { %v981_v51 = vadd.f32 %v11219_v8, %v13402_v27 }
 0xf35   :  { %4160 = vrot.lane.b32.xlu2 %v4100_v32, %s8849_s4 }
 0xf37   :  { %v4151_v40 = vpop.permute.xlu0 %4150 }
 0xf38   :  { %7901 = vmatmul.msk.f32.gmra.mxu2 %vm1214_vm5, %v4151_v40 }
 0xf3a   :  { %v4153_v0 = vpop.permute.xlu2 %4152 }
 0xf40   :  { %7902 = vmatmul.msk.f32.gmra.mxu2 %vm1214_vm5, %v4153_v0 }
 0xf4f   :  { %v4217_v1 = vpop.f32.mrf.mxu2 }
 0xf50   :  { %v4265_v26 = vadd.f32 %v4217_v1, %v978_v2  ;;  %v990_v2 = vadd.f32 %v11219_v8, %v13405_v36 }
 0xf52   :  { %8699 = vtanh.f32 %v4265_v26  ;;  %v4067_v22 = vpop.permute.xlu1 %4066 }
 0xf53   :  { %v4101_v55 = vmul.f32 %v4067_v22, %v11380_v46 }
 0xf55   :  { %4162 = vrot.lane.b32.xlu0 %v4101_v55, %s8849_s4  ;;  %v13406_v55 = vld [vmem:[#allocation36_spill] sm:$0xff] }
 0xf56   :  { %v993_v27 = vadd.f32 %v11219_v8, %v13406_v55 }
 0xf57   :  { %v4220_v39 = vpop.f32.mrf.mxu2 }
 0xf58   :  { %v8700_v33 = vpop.eup %8699  ;;  %v4266_v20 = vadd.f32 %v4220_v39, %v981_v51 }
 0xf59   :  { %v4297_v21 = vmul.f32 %v8700_v33, %v9107_v5 }
 0xf5a   :  { %8701 = vtanh.f32 %v4266_v20  ;;  %v4069_v7 = vpop.permute.xlu0 %4068  ;;  %v4155_v38 = vpop.permute.xlu1 %4154 }
 0xf5b   :  { %v4102_v62 = vmul.f32 %v4069_v7, %v11386_v17  ;;  %7903 = vmatmul.msk.f32.gmra.mxu2 %vm1214_vm5, %v4155_v38  ;;  %v11543_v49 = vadd.f32 %v4297_v21, %v9113_v11 }
 0xf5d   :  { %4164 = vrot.lane.b32.xlu1 %v4102_v62, %s8849_s4  ;;  %4361 = vrot.lane.b32.xlu0 %v11543_v49, %s8848_s29 }
 0xf60   :  { %v8702_v46 = vpop.eup %8701 }
 0xf61   :  { %v4298_v31 = vmul.f32 %v8702_v46, %v9107_v5 }
 0xf63   :  { %v4071_v61 = vpop.permute.xlu2 %4070  ;;  %v11550_v41 = vadd.f32 %v4298_v31, %v9113_v11 }
 0xf64   :  { %v4103_v24 = vmul.f32 %v4071_v61, %v11408_v25  ;;  %v13407_v61 = vld [vmem:[#allocation37_spill] sm:$0xff] }
 0xf65   :  { %4363 = vrot.lane.b32.xlu1 %v11550_v41, %s8848_s29 }
 0xf66   :  { %4166 = vrot.lane.b32.xlu2 %v4103_v24, %s8849_s4  ;;  %v996_v24 = vadd.f32 %v11219_v8, %v13407_v61 }
 0xf7c   :  { %v4157_v17 = vpop.permute.xlu0 %4156 }
 0xf7d   :  { %7904 = vmatmul.msk.f32.gmra.mxu2 %vm1214_vm5, %v4157_v17 }
 0xf7e   :  { %v4223_v9 = vpop.f32.mrf.mxu2 }
 0xf7f   :  { %v4267_v14 = vadd.f32 %v4223_v9, %v984_v30 }
 0xf81   :  { %8703 = vtanh.f32 %v4267_v14 }
 0xf86   :  { %v4226_v37 = vpop.f32.mrf.mxu2 }
 0xf87   :  { %v8704_v6 = vpop.eup %8703  ;;  %v4268_v25 = vadd.f32 %v4226_v37, %v987_v12  ;;  %v13408_v12 = vld [vmem:[#allocation38_spill] sm:$0xff] }
 0xf88   :  { %v4299_v16 = vmul.f32 %v8704_v6, %v9107_v5  ;;  %v999_v37 = vadd.f32 %v11219_v8, %v13408_v12 }
 0xf89   :  { %8705 = vtanh.f32 %v4268_v25 }
 0xf8a   :  { %v11563_v32 = vadd.f32 %v4299_v16, %v9113_v11 }
 0xf8c   :  { %4365 = vrot.lane.b32.xlu2 %v11563_v32, %s8848_s29 }
 0xf8f   :  { %v8706_v40 = vpop.eup %8705  ;;  %v4161_v31 = vpop.permute.xlu2 %4160 }
 0xf90   :  { %v4300_v0 = vmul.f32 %v8706_v40, %v9107_v5  ;;  %v13409_v40 = vld [vmem:[#allocation39_spill] sm:$0xff] }
 0xf92   :  { %v4229_v1 = vpop.f32.mrf.mxu2  ;;  %v11571_v26 = vadd.f32 %v4300_v0, %v9113_v11  ;;  %v1002_v0 = vadd.f32 %v11219_v8, %v13409_v40 }
 0xf93   :  { %v4269_v22 = vadd.f32 %v4229_v1, %v990_v2 }
 0xf94   :  { %4367 = vrot.lane.b32.xlu0 %v11571_v26, %s8848_s29 }
 0xf95   :  { %8707 = vtanh.f32 %v4269_v22 }
 0xf9a   :  { %v4232_v51 = vpop.f32.mrf.mxu2 }
 0xf9b   :  { %v8708_v39 = vpop.eup %8707  ;;  %v4270_v33 = vadd.f32 %v4232_v51, %v993_v27 }
 0xf9c   :  { %v4301_v20 = vmul.f32 %v8708_v39, %v9107_v5 }
 0xf9d   :  { %8709 = vtanh.f32 %v4270_v33 }
 0xf9e   :  { %v11579_v21 = vadd.f32 %v4301_v20, %v9113_v11 }
 0xfa0   :  { %4369 = vrot.lane.b32.xlu1 %v11579_v21, %s8848_s29 }
 0xfa3   :  { %v8710_v7 = vpop.eup %8709  ;;  %v4159_v38 = vpop.permute.xlu1 %4158 }
 0xfa4   :  { %v4302_v62 = vmul.f32 %v8710_v7, %v9107_v5  ;;  %7905 = vmatmul.msk.f32.gmra.mxu2 %vm1214_vm5, %v4159_v38 }
 0xfa6   :  { %v11586_v46 = vadd.f32 %v4302_v62, %v9113_v11  ;;  %v13410_v62 = vld [vmem:[#allocation40_spill] sm:$0xff] }
 0xfa8   :  { %4371 = vrot.lane.b32.xlu2 %v11586_v46, %s8848_s29 }
 0xfac   :  { %7906 = vmatmul.msk.f32.gmra.mxu2 %vm1214_vm5, %v4161_v31  ;;  %v1005_v31 = vadd.f32 %v11219_v8, %v13410_v62  ;;  %v13413_v62 = vld [vmem:[#allocation43_spill] sm:$0xff] }
 0xfb3   :  { %v4235_v17 = vpop.f32.mrf.mxu2 }
 0xfb4   :  { %v4271_v52 = vadd.f32 %v4235_v17, %v996_v24 }
 0xfb6   :  { %8711 = vtanh.f32 %v4271_v52 }
 0xfbb   :  { %v4238_v23 = vpop.f32.mrf.mxu2 }
 0xfbc   :  { %v8712_v30 = vpop.eup %8711  ;;  %v4272_v6 = vadd.f32 %v4238_v23, %v999_v37  ;;  %v13411_v37 = vld [vmem:[#allocation41_spill] sm:$0xff] }
 0xfbd   :  { %v4303_v9 = vmul.f32 %v8712_v30, %v9107_v5 }
 0xfbe   :  { %8713 = vtanh.f32 %v4272_v6  ;;  %v1008_v6 = vadd.f32 %v11219_v8, %v13411_v37 }
 0xfbf   :  { %v11595_v14 = vadd.f32 %v4303_v9, %v9113_v11 }
 0xfc0   :  { %v4167_v51 = vpop.permute.xlu2 %4166 }
 0xfc1   :  { %4373 = vrot.lane.b32.xlu1 %v11595_v14, %s8848_s29 }
 0xfc3   :  { %v4241_v16 = vpop.f32.mrf.mxu2 }
 0xfc4   :  { %v4273_v36 = vadd.f32 %v4241_v16, %v1002_v0  ;;  %v8714_v55 = vpop.eup %8713 }
 0xfc5   :  { %v4304_v27 = vmul.f32 %v8714_v55, %v9107_v5 }
 0xfc6   :  { %8715 = vtanh.f32 %v4273_v36 }
 0xfc7   :  { %v4163_v25 = vpop.permute.xlu0 %4162  ;;  %v11611_v20 = vadd.f32 %v4304_v27, %v9113_v11 }
 0xfc8   :  { %7907 = vmatmul.msk.f32.gmra.mxu2 %vm1214_vm5, %v4163_v25 }
 0xfcc   :  { %v8716_v7 = vpop.eup %8715 }
 0xfcd   :  { %v4305_v38 = vmul.f32 %v8716_v7, %v9107_v5 }
 0xfcf   :  { %v4362_v2 = vpop.permute.xlu0 %4361  ;;  %v4165_v1 = vpop.permute.xlu1 %4164  ;;  %v11620_v17 = vadd.f32 %v4305_v38, %v9113_v11 }
 0xfd0   :  { %v4409_v22 = vmul.f32 %v4362_v2, %v11543_v49  ;;  %7908 = vmatmul.msk.f32.gmra.mxu2 %vm1214_vm5, %v4165_v1 }
 0xfd2   :  { %4441 = vrot.lane.b32.xlu0 %v4409_v22, %s8849_s4 }
 0xfd7   :  { %v4364_v39 = vpop.permute.xlu1 %4363 }
 0xfd8   :  { %v4410_v33 = vmul.f32 %v4364_v39, %v11550_v41  ;;  %7909 = vmatmul.msk.f32.gmra.mxu2 %vm1214_vm5, %v4167_v51  ;;  %v13412_v39 = vld [vmem:[#allocation42_spill] sm:$0xff] }
 0xfda   :  { %4375 = vrot.lane.b32.xlu0 %v11611_v20, %s8848_s29  ;;  %4443 = vrot.lane.b32.xlu2 %v4410_v33, %s8849_s4  ;;  %v1011_v33 = vadd.f32 %v11219_v8, %v13412_v39 }
 0xfde   :  { %v4244_v61 = vpop.f32.mrf.mxu2 }
 0xfdf   :  { %v4274_v24 = vadd.f32 %v4244_v61, %v1005_v31  ;;  %v1014_v31 = vadd.f32 %v11219_v8, %v13413_v62 }
 0xfe1   :  { %8717 = vtanh.f32 %v4274_v24 }
 0xfe2   :  { %4377 = vrot.lane.b32.xlu2 %v11620_v17, %s8848_s29 }
 0xfe6   :  { %v4366_v52 = vpop.permute.xlu2 %4365 }
 0xfe7   :  { %v4411_v30 = vmul.f32 %v4366_v52, %v11563_v32  ;;  %v8718_v9 = vpop.eup %8717 }
 0xfe8   :  { %v4306_v23 = vmul.f32 %v8718_v9, %v9107_v5 }
 0xfe9   :  { %4445 = vrot.lane.b32.xlu1 %v4411_v30, %s8849_s4 }
 0xfea   :  { %v11628_v12 = vadd.f32 %v4306_v23, %v9113_v11 }
 0xff1   :  { %4379 = vrot.lane.b32.xlu1 %v11628_v12, %s8848_s29 }
0x1000   :  { %v4247_v25 = vpop.f32.mrf.mxu2 }
0x1001   :  { %v4275_v16 = vadd.f32 %v4247_v25, %v1008_v6 }
0x1002   :  { %v4372_v40 = vpop.permute.xlu2 %4371 }
0x1003   :  { %8719 = vtanh.f32 %v4275_v16  ;;  %v4414_v0 = vmul.f32 %v4372_v40, %v11586_v46  ;;  %v4329_v16 = vmul.f32 %v11543_v49, %v11352_v58 }
0x1005   :  { %4451 = vrot.lane.b32.xlu1 %v4414_v0, %s8849_s4 }
0x1006   :  { %v4368_v36 = vpop.permute.xlu0 %4367 }
0x1007   :  { %v4412_v2 = vmul.f32 %v4368_v36, %v11571_v26 }
0x1009   :  { %v8720_v1 = vpop.eup %8719  ;;  %4447 = vrot.lane.b32.xlu0 %v4412_v2, %s8849_s4  ;;  %v4330_v2 = vmul.f32 %v11550_v41, %v11363_v60  ;;  %v13415_v60 = vld [vmem:[#allocation45_spill] sm:$0xff] }
0x100a   :  { %v4307_v22 = vmul.f32 %v8720_v1, %v9107_v5  ;;  %v11674_v1 = vld [vmem:[%s13288_s1 + $0x30] ss:$0 sm:$0xff] }
0x100b   :  { %v1020_v62 = vadd.f32 %v11674_v1, %v13415_v60 }
0x100c   :  { %v11640_v55 = vadd.f32 %v4307_v22, %v9113_v11  ;;  %v13414_v22 = vld [vmem:[#allocation44_spill] sm:$0xff] }
0x1011   :  { %4381 = vrot.lane.b32.xlu0 %v11640_v55, %s8848_s29 }
0x1012   :  { %v4370_v27 = vpop.permute.xlu1 %4369 }
0x1013   :  { %v4413_v51 = vmul.f32 %v4370_v27, %v11579_v21  ;;  %v1017_v27 = vadd.f32 %v11674_v1, %v13414_v22 }
0x1015   :  { %4449 = vrot.lane.b32.xlu2 %v4413_v51, %s8849_s4 }
0x1027   :  { %v4250_v7 = vpop.f32.mrf.mxu2 }
0x1028   :  { %v4276_v38 = vadd.f32 %v4250_v7, %v1011_v33 }
0x102a   :  { %8721 = vtanh.f32 %v4276_v38 }
0x102f   :  { %v4253_v61 = vpop.f32.mrf.mxu2 }
0x1030   :  { %v8722_v24 = vpop.eup %8721  ;;  %v4277_v52 = vadd.f32 %v4253_v61, %v1014_v31 }
0x1031   :  { %v4308_v30 = vmul.f32 %v8722_v24, %v9107_v5 }
0x1032   :  { %8723 = vtanh.f32 %v4277_v52 }
0x1033   :  { %v4374_v9 = vpop.permute.xlu1 %4373  ;;  %v11652_v23 = vadd.f32 %v4308_v30, %v9113_v11 }
0x1034   :  { %v4415_v37 = vmul.f32 %v4374_v9, %v11595_v14  ;;  %v4444_v36 = vpop.permute.xlu2 %4443 }
0x1035   :  { %4383 = vrot.lane.b32.xlu2 %v11652_v23, %s8848_s29  ;;  %v11678_v51 = vadd.f32 %v4444_v36, %v4330_v2 }
0x1036   :  { %4453 = vrot.lane.b32.xlu0 %v4415_v37, %s8849_s4 }
0x1038   :  { %v8724_v6 = vpop.eup %8723 }
0x1039   :  { %v4309_v8 = vmul.f32 %v8724_v6, %v9107_v5 }
0x103b   :  { %v11660_v25 = vadd.f32 %v4309_v8, %v9113_v11  ;;  %v13416_v8 = vld [vmem:[#allocation46_spill] sm:$0xff] }
0x103c   :  { %v4378_v31 = vpop.permute.xlu2 %4377 }
0x103d   :  { %4385 = vrot.lane.b32.xlu2 %v11660_v25, %s8848_s29  ;;  %v4417_v9 = vmul.f32 %v4378_v31, %v11620_v17 }
0x1044   :  { %v4442_v40 = vpop.permute.xlu0 %4441 }
0x1045   :  { %v11666_v0 = vadd.f32 %v4442_v40, %v4329_v16  ;;  %v1023_v16 = vadd.f32 %v11674_v1, %v13416_v8  ;;  %v4331_v40 = vmul.f32 %v11563_v32, %v11394_v63  ;;  %v4334_v8 = vmul.f32 %v11586_v46, %v11426_v35 }
0x1047   :  { %8725 = vtanh.f32 %v11666_v0 }
0x104b   :  { %v4256_v58 = vpop.f32.mrf.mxu2 }
0x104c   :  { %v4278_v39 = vadd.f32 %v4256_v58, %v1017_v27  ;;  %v4376_v33 = vpop.permute.xlu0 %4375 }
0x104d   :  { %v8726_v7 = vpop.eup %8725  ;;  %v4416_v38 = vmul.f32 %v4376_v33, %v11611_v20 }
0x104e   :  { %8727 = vtanh.f32 %v4278_v39  ;;  %4537 = vrot.lane.b32.xlu1 %v8726_v7, %s8848_s29 }
0x104f   :  { %8729 = vtanh.f32 %v11678_v51  ;;  %4455 = vrot.lane.b32.xlu0 %v4416_v38, %s8849_s4 }
0x1053   :  { %v4259_v61 = vpop.f32.mrf.mxu2 }
0x1054   :  { %v8728_v24 = vpop.eup %8727  ;;  %v4279_v52 = vadd.f32 %v4259_v61, %v1020_v62  ;;  %v4332_v61 = vmul.f32 %v11571_v26, %v11400_v56 }
0x1055   :  { %v8730_v30 = vpop.eup %8729  ;;  %v4310_v37 = vmul.f32 %v8728_v24, %v9107_v5 }
0x1056   :  { %8731 = vtanh.f32 %v4279_v52  ;;  %4539 = vrot.lane.b32.xlu1 %v8730_v30, %s8848_s29 }
0x1057   :  { %4457 = vrot.lane.b32.xlu0 %v4417_v9, %s8849_s4  ;;  %v11691_v6 = vadd.f32 %v4310_v37, %v9113_v11  ;;  %v4333_v9 = vmul.f32 %v11579_v21, %v11417_v48 }
0x1059   :  { %4387 = vrot.lane.b32.xlu2 %v11691_v6, %s8848_s29 }
0x105b   :  { %v4262_v36 = vpop.f32.mrf.mxu2  ;;  %v4446_v2 = vpop.permute.xlu1 %4445 }
0x105c   :  { %v8732_v22 = vpop.eup %8731  ;;  %v4280_v27 = vadd.f32 %v4262_v36, %v1023_v16  ;;  %v11699_v58 = vadd.f32 %v4446_v2, %v4331_v40 }
0x105d   :  { %v4311_v39 = vmul.f32 %v8732_v22, %v9107_v5 }
0x105e   :  { %8733 = vtanh.f32 %v4280_v27 }
0x105f   :  { %8735 = vtanh.f32 %v11699_v58  ;;  %v11704_v33 = vadd.f32 %v4311_v39, %v9113_v11 }
0x1061   :  { %4389 = vrot.lane.b32.xlu2 %v11704_v33, %s8848_s29 }
0x1063   :  { %v4380_v7 = vpop.permute.xlu1 %4379 }
0x1064   :  { %v8734_v38 = vpop.eup %8733  ;;  %v4418_v63 = vmul.f32 %v4380_v7, %v11628_v12 }
0x1065   :  { %v8736_v60 = vpop.eup %8735  ;;  %v4312_v62 = vmul.f32 %v8734_v38, %v9107_v5  ;;  %v4335_v38 = vmul.f32 %v11595_v14, %v11431_v29  ;;  %v4336_v29 = vmul.f32 %v11611_v20, %v11441_v42 }
0x1066   :  { %4541 = vrot.lane.b32.xlu1 %v8736_v60, %s8848_s29  ;;  %4459 = vrot.lane.b32.xlu0 %v4418_v63, %s8849_s4 }
0x1067   :  { %v11713_v31 = vadd.f32 %v4312_v62, %v9113_v11 }
0x1069   :  { %4391 = vrot.lane.b32.xlu2 %v11713_v31, %s8848_s29 }
0x106f   :  { %v4450_v30 = vpop.permute.xlu2 %4449 }
0x1070   :  { %v11726_v16 = vadd.f32 %v4450_v30, %v4333_v9 }
0x1077   :  { %v4452_v37 = vpop.permute.xlu1 %4451 }
0x1078   :  { %v11728_v40 = vadd.f32 %v4452_v37, %v4334_v8 }
0x107b   :  { %v4448_v24 = vpop.permute.xlu0 %4447 }
0x107c   :  { %v11719_v52 = vadd.f32 %v4448_v24, %v4332_v61 }
0x107e   :  { %8737 = vtanh.f32 %v11719_v52 }
0x107f   :  { %8739 = vtanh.f32 %v11726_v16 }
0x1080   :  { %8741 = vtanh.f32 %v11728_v40 }
0x1083   :  { %v4382_v36 = vpop.permute.xlu0 %4381 }
0x1084   :  { %v8738_v2 = vpop.eup %8737  ;;  %v4419_v56 = vmul.f32 %v4382_v36, %v11640_v55 }
0x1085   :  { %4543 = vrot.lane.b32.xlu1 %v8738_v2, %s8848_s29  ;;  %v8740_v48 = vpop.eup %8739 }
0x1086   :  { %4461 = vrot.lane.b32.xlu0 %v4419_v56, %s8849_s4  ;;  %v8742_v22 = vpop.eup %8741 }
0x108d   :  { %4545 = vrot.lane.b32.xlu1 %v8740_v48, %s8848_s29 }
0x108e   :  { %4547 = vrot.lane.b32.xlu0 %v8742_v22, %s8848_s29 }
0x108f   :  { %v4384_v35 = vpop.permute.xlu2 %4383 }
0x1090   :  { %v4420_v27 = vmul.f32 %v4384_v35, %v11652_v23  ;;  %v4337_v35 = vmul.f32 %v11620_v17, %v11453_v13 }
0x1092   :  { %4463 = vrot.lane.b32.xlu2 %v4420_v27, %s8849_s4 }
0x1097   :  { %v4386_v39 = vpop.permute.xlu2 %4385 }
0x1098   :  { %v4421_v7 = vmul.f32 %v4386_v39, %v11660_v25 }
0x109a   :  { %4465 = vrot.lane.b32.xlu2 %v4421_v7, %s8849_s4 }
0x10a8   :  { %v4454_v63 = vpop.permute.xlu0 %4453 }
0x10a9   :  { %v11743_v60 = vadd.f32 %v4454_v63, %v4335_v38  ;;  %v4338_v38 = vmul.f32 %v11628_v12, %v11459_v19 }
0x10ab   :  { %8743 = vtanh.f32 %v11743_v60 }
0x10b1   :  { %v8744_v62 = vpop.eup %8743 }
0x10b2   :  { %4549 = vrot.lane.b32.xlu0 %v8744_v62, %s8848_s29 }
0x10b3   :  { %v4388_v61 = vpop.permute.xlu2 %4387 }
0x10b4   :  { %v4422_v24 = vmul.f32 %v4388_v61, %v11691_v6 }
0x10b6   :  { %4467 = vrot.lane.b32.xlu2 %v4422_v24, %s8849_s4 }
0x10bb   :  { %v4390_v30 = vpop.permute.xlu2 %4389 }
0x10bc   :  { %v4423_v9 = vmul.f32 %v4390_v30, %v11704_v33 }
0x10be   :  { %4469 = vrot.lane.b32.xlu2 %v4423_v9, %s8849_s4  ;;  %v4339_v9 = vmul.f32 %v11640_v55, %v11468_v4 }
0x10c0   :  { %v4538_v37 = vpop.permute.xlu1 %4537 }
0x10c1   :  { %v4585_v8 = vmul.f32 %v4538_v37, %v11543_v49  ;;  %v4456_v36 = vpop.permute.xlu0 %4455 }
0x10c2   :  { %v11754_v2 = vadd.f32 %v4456_v36, %v4336_v29  ;;  %v4341_v36 = vmul.f32 %v11660_v25, %v11493_v28 }
0x10c3   :  { %v4392_v56 = vpop.permute.xlu2 %4391  ;;  %4633 = vrot.lane.b32.xlu1 %v4585_v8, %s8849_s4 }
0x10c4   :  { %8745 = vtanh.f32 %v11754_v2  ;;  %v4424_v48 = vmul.f32 %v4392_v56, %v11713_v31 }
0x10c6   :  { %4471 = vrot.lane.b32.xlu2 %v4424_v48, %s8849_s4 }
0x10c8   :  { %v4540_v22 = vpop.permute.xlu1 %4539 }
0x10c9   :  { %v4586_v42 = vmul.f32 %v4540_v22, %v11550_v41  ;;  %v4458_v27 = vpop.permute.xlu0 %4457 }
0x10ca   :  { %v8746_v49 = vpop.eup %8745  ;;  %v11763_v39 = vadd.f32 %v4458_v27, %v4337_v35 }
0x10cb   :  { %4551 = vrot.lane.b32.xlu0 %v8746_v49, %s8848_s29  ;;  %4635 = vrot.lane.b32.xlu1 %v4586_v42, %s8849_s4 }
0x10cc   :  { %8747 = vtanh.f32 %v11763_v39 }
0x10d2   :  { %v8748_v7 = vpop.eup %8747 }
0x10d3   :  { %4553 = vrot.lane.b32.xlu0 %v8748_v7, %s8848_s29 }
0x10d8   :  { %v4542_v63 = vpop.permute.xlu1 %4541  ;;  %v4460_v13 = vpop.permute.xlu0 %4459 }
0x10d9   :  { %v4587_v41 = vmul.f32 %v4542_v63, %v11563_v32  ;;  %v11772_v62 = vadd.f32 %v4460_v13, %v4338_v38  ;;  %v4340_v32 = vmul.f32 %v11652_v23, %v11481_v50 }
0x10db   :  { %8749 = vtanh.f32 %v11772_v62  ;;  %4637 = vrot.lane.b32.xlu1 %v4587_v41, %s8849_s4  ;;  %v4343_v41 = vmul.f32 %v11704_v33, %v11506_v15 }
0x10e1   :  { %v8750_v61 = vpop.eup %8749 }
0x10e2   :  { %4555 = vrot.lane.b32.xlu0 %v8750_v61, %s8848_s29 }
0x10ec   :  { %v4464_v24 = vpop.permute.xlu2 %4463 }
0x10ed   :  { %v11788_v56 = vadd.f32 %v4464_v24, %v4340_v32 }
0x10f4   :  { %v4466_v8 = vpop.permute.xlu2 %4465 }
0x10f5   :  { %v11790_v4 = vadd.f32 %v4466_v8, %v4341_v36 }
0x10f7   :  { %v4544_v30 = vpop.permute.xlu1 %4543 }
0x10f8   :  { %v4588_v19 = vmul.f32 %v4544_v30, %v11571_v26  ;;  %v4462_v37 = vpop.permute.xlu0 %4461 }
0x10f9   :  { %v11780_v29 = vadd.f32 %v4462_v37, %v4339_v9  ;;  %v4344_v9 = vmul.f32 %v11713_v31, %v11517_v18 }
0x10fa   :  { %4639 = vrot.lane.b32.xlu1 %v4588_v19, %s8849_s4 }
0x10fb   :  { %8751 = vtanh.f32 %v11780_v29 }
0x10fc   :  { %8753 = vtanh.f32 %v11788_v56 }
0x10fd   :  { %8755 = vtanh.f32 %v11790_v4 }
0x10ff   :  { %v4546_v48 = vpop.permute.xlu1 %4545 }
0x1100   :  { %v4589_v26 = vmul.f32 %v4546_v48, %v11579_v21  ;;  %v4548_v22 = vpop.permute.xlu0 %4547 }
0x1101   :  { %v8752_v35 = vpop.eup %8751  ;;  %v4590_v42 = vmul.f32 %v4548_v22, %v11586_v46  ;;  %v4342_v46 = vmul.f32 %v11691_v6, %v11499_v57 }
0x1102   :  { %4557 = vrot.lane.b32.xlu2 %v8752_v35, %s8848_s29  ;;  %4641 = vrot.lane.b32.xlu1 %v4589_v26, %s8849_s4  ;;  %v8754_v50 = vpop.eup %8753 }
0x1103   :  { %4643 = vrot.lane.b32.xlu0 %v4590_v42, %s8849_s4  ;;  %v8756_v28 = vpop.eup %8755 }
0x110a   :  { %4559 = vrot.lane.b32.xlu1 %v8754_v50, %s8848_s29 }
0x110b   :  { %4561 = vrot.lane.b32.xlu0 %v8756_v28, %s8848_s29 }
0x1110   :  { %v4468_v21 = vpop.permute.xlu2 %4467 }
0x1111   :  { %v11803_v27 = vadd.f32 %v4468_v21, %v4342_v46 }
0x1113   :  { %8757 = vtanh.f32 %v11803_v27 }
0x1118   :  { %v4470_v13 = vpop.permute.xlu2 %4469 }
0x1119   :  { %v8758_v38 = vpop.eup %8757  ;;  %v11812_v57 = vadd.f32 %v4470_v13, %v4343_v41 }
0x111b   :  { %8759 = vtanh.f32 %v11812_v57 }
0x1120   :  { %v4472_v30 = vpop.permute.xlu2 %4471 }
0x1121   :  { %v11820_v19 = vadd.f32 %v4472_v30, %v4344_v9  ;;  %v8760_v32 = vpop.eup %8759 }
0x1123   :  { %8761 = vtanh.f32 %v11820_v19 }
0x1124   :  { %v4550_v49 = vpop.permute.xlu0 %4549 }
0x1125   :  { %v4591_v7 = vmul.f32 %v4550_v49, %v11595_v14 }
0x1127   :  { %4645 = vrot.lane.b32.xlu2 %v4591_v7, %s8849_s4 }
0x1129   :  { %v8762_v8 = vpop.eup %8761 }
0x112f   :  { %4563 = vrot.lane.b32.xlu2 %v8758_v38, %s8848_s29 }
0x1135   :  { %v4634_v63 = vpop.permute.xlu1 %4633 }
0x1136   :  { %7910 = vmatmul.msk.f32.vlgmr.msra.gmra.mxu3 %vm1214_vm5, %v4634_v63 }
0x113d   :  { %v4552_v61 = vpop.permute.xlu0 %4551  ;;  %v4636_v24 = vpop.permute.xlu1 %4635 }
0x113e   :  { %v4592_v14 = vmul.f32 %v4552_v61, %v11611_v20  ;;  %7911 = vmatmul.msk.f32.gmra.mxu3 %vm1214_vm5, %v4636_v24 }
0x1140   :  { %4647 = vrot.lane.b32.xlu1 %v4592_v14, %s8849_s4 }
0x1145   :  { %v4554_v37 = vpop.permute.xlu0 %4553 }
0x1146   :  { %v4593_v15 = vmul.f32 %v4554_v37, %v11620_v17 }
0x1148   :  { %4649 = vrot.lane.b32.xlu0 %v4593_v15, %s8849_s4  ;;  %4565 = vrot.lane.b32.xlu1 %v8760_v32, %s8848_s29 }
0x114d   :  { %v4638_v20 = vpop.permute.xlu1 %4637 }
0x114e   :  { %7912 = vmatmul.msk.f32.gmra.mxu3 %vm1214_vm5, %v4638_v20 }
0x1150   :  { %4567 = vrot.lane.b32.xlu0 %v8762_v8, %s8848_s29 }
0x1154   :  { %v4556_v36 = vpop.permute.xlu0 %4555 }
0x1155   :  { %v4594_v18 = vmul.f32 %v4556_v36, %v11628_v12 }
0x1157   :  { %4651 = vrot.lane.b32.xlu2 %v4594_v18, %s8849_s4 }
0x115c   :  { %v4558_v48 = vpop.permute.xlu2 %4557 }
0x115d   :  { %v4595_v17 = vmul.f32 %v4558_v48, %v11640_v55 }
0x115f   :  { %4653 = vrot.lane.b32.xlu1 %v4595_v17, %s8849_s4 }
0x116c   :  { %v4640_v26 = vpop.permute.xlu1 %4639 }
0x116d   :  { %7913 = vmatmul.msk.f32.gmra.mxu3 %vm1214_vm5, %v4640_v26 }
0x1174   :  { %v4642_v22 = vpop.permute.xlu1 %4641 }
0x1175   :  { %v4644_v35 = vpop.permute.xlu0 %4643  ;;  %7914 = vmatmul.msk.f32.gmra.mxu3 %vm1214_vm5, %v4642_v22 }
0x117c   :  { %v4560_v42 = vpop.permute.xlu1 %4559 }
0x117d   :  { %v4596_v50 = vmul.f32 %v4560_v42, %v11652_v23  ;;  %v4562_v28 = vpop.permute.xlu0 %4561  ;;  %7915 = vmatmul.msk.f32.gmra.mxu3 %vm1214_vm5, %v4644_v35  ;;  %v1124_v23 = vadd.f32 %v11674_v1, %v10511_v54  ;;  %v1136_v42 = vadd.f32 %v11674_v1, %v10548_v59 }
0x117e   :  { %v4597_v12 = vmul.f32 %v4562_v28, %v11660_v25 }
0x117f   :  { %4655 = vrot.lane.b32.xlu2 %v4596_v50, %s8849_s4 }
0x1180   :  { %4657 = vrot.lane.b32.xlu0 %v4597_v12, %s8849_s4 }
0x1181   :  { %v4646_v55 = vpop.permute.xlu2 %4645 }
0x1185   :  { %7916 = vmatmul.msk.f32.gmra.mxu3 %vm1214_vm5, %v4646_v55 }
0x1189   :  { %v4564_v21 = vpop.permute.xlu2 %4563 }
0x118a   :  { %v4598_v46 = vmul.f32 %v4564_v21, %v11691_v6  ;;  %v1127_v6 = vadd.f32 %v11674_v1, %v10519_v43 }
0x118c   :  { %4659 = vrot.lane.b32.xlu1 %v4598_v46, %s8849_s4  ;;  %v1139_v46 = vadd.f32 %v11674_v1, %v10558_v44 }
0x11b1   :  { %v4652_v24 = vpop.permute.xlu2 %4651 }
0x11b2   :  { %v4648_v49 = vpop.permute.xlu1 %4647 }
0x11b3   :  { %7917 = vmatmul.msk.f32.gmra.mxu3 %vm1214_vm5, %v4648_v49 }
0x11b9   :  { %v4714_v7 = vpop.f32.mrf.mxu3 }
0x11ba   :  { %v4762_v25 = vadd.f32 %v4714_v7, %v1124_v23  ;;  %v4650_v38 = vpop.permute.xlu0 %4649  ;;  %v4566_v63 = vpop.permute.xlu1 %4565 }
0x11bb   :  { %v4599_v13 = vmul.f32 %v4566_v63, %v11704_v33  ;;  %7918 = vmatmul.msk.f32.gmra.mxu3 %vm1214_vm5, %v4650_v38  ;;  %v1142_v38 = vadd.f32 %v11674_v1, %v10561_v45 }
0x11bc   :  { %8763 = vtanh.f32 %v4762_v25 }
0x11bd   :  { %4661 = vrot.lane.b32.xlu2 %v4599_v13, %s8849_s4 }
0x11c1   :  { %v4717_v41 = vpop.f32.mrf.mxu3 }
0x11c2   :  { %v8764_v61 = vpop.eup %8763  ;;  %v4763_v14 = vadd.f32 %v4717_v41, %v1127_v6  ;;  %v4568_v30 = vpop.permute.xlu0 %4567 }
0x11c3   :  { %v4794_v54 = vmul.f32 %v8764_v61, %v9107_v5  ;;  %v4600_v9 = vmul.f32 %v4568_v30, %v11713_v31  ;;  %7919 = vmatmul.msk.f32.gmra.mxu3 %vm1214_vm5, %v4652_v24  ;;  %v1130_v31 = vadd.f32 %v11674_v1, %v10528_v47  ;;  %v1133_v47 = vadd.f32 %v11674_v1, %v10540_v10 }
0x11c4   :  { %8765 = vtanh.f32 %v4763_v14 }
0x11c5   :  { %4663 = vrot.lane.b32.xlu0 %v4600_v9, %s8849_s4  ;;  %v11855_v33 = vadd.f32 %v4794_v54, %v9113_v11  ;;  %v13417_v9 = vld [vmem:[#allocation47_spill] sm:$0xff] }
0x11c7   :  { %4858 = vrot.lane.b32.xlu1 %v11855_v33, %s8848_s29 }
0x11ca   :  { %v8766_v43 = vpop.eup %8765 }
0x11cb   :  { %v4795_v37 = vmul.f32 %v8766_v43, %v9107_v5  ;;  %v1145_v43 = vadd.f32 %v11674_v1, %v13417_v9 }
0x11cd   :  { %v11861_v15 = vadd.f32 %v4795_v37, %v9113_v11 }
0x11cf   :  { %4860 = vrot.lane.b32.xlu2 %v11861_v15, %s8848_s29 }
0x11d1   :  { %v4720_v32 = vpop.f32.mrf.mxu3  ;;  %v4654_v20 = vpop.permute.xlu1 %4653 }
0x11d2   :  { %v4764_v8 = vadd.f32 %v4720_v32, %v1130_v31  ;;  %7920 = vmatmul.msk.f32.gmra.mxu3 %vm1214_vm5, %v4654_v20 }
0x11d4   :  { %8767 = vtanh.f32 %v4764_v8 }
0x11d9   :  { %v4656_v36 = vpop.permute.xlu2 %4655 }
0x11da   :  { %v8768_v18 = vpop.eup %8767  ;;  %7921 = vmatmul.msk.f32.gmra.mxu3 %vm1214_vm5, %v4656_v36  ;;  %v1148_v36 = vadd.f32 %v11674_v1, %v10566_v53  ;;  %v7975_v53 = vld [vmem:[%s13289_s0 + $0x480] sm:$0xff] }
0x11db   :  { %v4796_v48 = vmul.f32 %v8768_v18, %v9107_v5  ;;  %v5266_v18 = vld [vmem:[%s13288_s1 + $0x68] sm:$0xf] }
0x11dc   :  { %7991 = vmatpush.msk.msrb.mxu2 %vm80_vm0, %v5266_v18  ;;  %8024 = vmatpush.msk.msrb.mxu3 %vm80_vm0, %v5266_v18 }
0x11dd   :  { %v11871_v17 = vadd.f32 %v4796_v48, %v9113_v11  ;;  %7958 = vmatpush.msk.msra.mxu1 %vm80_vm0, %v5266_v18  ;;  %v7979_v18 = vld [vmem:[%s13289_s0 + $0x4a0] sm:$0xff] }
0x11df   :  { %4862 = vrot.lane.b32.xlu0 %v11871_v17, %s8848_s29 }
0x11f0   :  { %v4723_v26 = vpop.f32.mrf.mxu3 }
0x11f1   :  { %v4765_v22 = vadd.f32 %v4723_v26, %v1133_v47 }
0x11f2   :  { %v4658_v35 = vpop.permute.xlu0 %4657 }
0x11f3   :  { %8769 = vtanh.f32 %v4765_v22  ;;  %7922 = vmatmul.msk.f32.gmra.mxu3 %vm1214_vm5, %v4658_v35  ;;  %v5265_v22 = vld [vmem:[%s13288_s1 + $0x60] sm:$0xff] }
0x11f4   :  { %5498 = vmatpush.msrb.mxu2 %v5265_v22  ;;  %5644 = vmatpush.msrb.mxu3 %v5265_v22 }
0x11f5   :  { %7992 = vmatmul.msk.f32.vlgmr.msrb.gmra.mxu2 %vm31_vm1, %v7975_v53  ;;  %5352 = vmatpush.msra.mxu1 %v5265_v22 }
0x11f8   :  { %v4726_v50 = vpop.f32.mrf.mxu3 }
0x11f9   :  { %v8770_v28 = vpop.eup %8769  ;;  %v4766_v12 = vadd.f32 %v4726_v50, %v1136_v42  ;;  %v8008_v50 = vld [vmem:[%s13289_s0 + $0x500] sm:$0xff] }
0x11fa   :  { %v4797_v55 = vmul.f32 %v8770_v28, %v9107_v5 }
0x11fb   :  { %8771 = vtanh.f32 %v4766_v12 }
0x11fc   :  { %v11882_v21 = vadd.f32 %v4797_v55, %v9113_v11  ;;  %v13418_v55 = vld [vmem:[#allocation48_spill] sm:$0xff] }
0x11fe   :  { %4864 = vrot.lane.b32.xlu1 %v11882_v21, %s8848_s29  ;;  %v4660_v10 = vpop.permute.xlu1 %4659 }
0x11ff   :  { %7923 = vmatmul.msk.f32.gmra.mxu3 %vm1214_vm5, %v4660_v10  ;;  %v1151_v10 = vadd.f32 %v11674_v1, %v13418_v55 }
0x1200   :  { %v4729_v49 = vpop.f32.mrf.mxu3 }
0x1201   :  { %v8772_v59 = vpop.eup %8771  ;;  %v4767_v23 = vadd.f32 %v4729_v49, %v1139_v46  ;;  %v7976_v46 = vld [vmem:[%s13289_s0 + $0x488] sm:$0xff]  ;;  %v7942_v49 = vld [vmem:[%s13289_s0 + $0x400] sm:$0xff] }
0x1202   :  { %v4798_v7 = vmul.f32 %v8772_v59, %v9107_v5  ;;  %7959 = vmatmul.msk.f32.vlgmr.msra.gmra.mxu1 %vm31_vm1, %v7942_v49  ;;  %7993 = vmatmul.msk.f32.gmra.mxu2 %vm31_vm1, %v7976_v46  ;;  %v8013_v46 = vld [vmem:[%s13289_s0 + $0x528] sm:$0xff]  ;;  %v7981_v49 = vld [vmem:[%s13289_s0 + $0x4b0] sm:$0xff] }
0x1203   :  { %8773 = vtanh.f32 %v4767_v23  ;;  %v8009_v23 = vld [vmem:[%s13289_s0 + $0x508] sm:$0xff] }
0x1204   :  { %v11891_v25 = vadd.f32 %v4798_v7, %v9113_v11 }
0x1206   :  { %4866 = vrot.lane.b32.xlu2 %v11891_v25, %s8848_s29 }
0x1208   :  { %v4732_v63 = vpop.f32.mrf.mxu3 }
0x1209   :  { %v8774_v13 = vpop.eup %8773  ;;  %v4768_v44 = vadd.f32 %v4732_v63, %v1142_v38  ;;  %v7977_v63 = vld [vmem:[%s13289_s0 + $0x490] sm:$0xff] }
0x120a   :  { %v4799_v6 = vmul.f32 %v8774_v13, %v9107_v5  ;;  %7994 = vmatmul.msk.f32.gmra.mxu2 %vm31_vm1, %v7977_v63  ;;  %v8014_v63 = vld [vmem:[%s13289_s0 + $0x530] sm:$0xff] }
0x120b   :  { %8775 = vtanh.f32 %v4768_v44  ;;  %v7943_v44 = vld [vmem:[%s13289_s0 + $0x408] sm:$0xff] }
0x120c   :  { %v11899_v41 = vadd.f32 %v4799_v6, %v9113_v11  ;;  %v8010_v6 = vld [vmem:[%s13289_s0 + $0x510] sm:$0xff]  ;;  %7960 = vmatmul.msk.f32.gmra.mxu1 %vm31_vm1, %v7943_v44  ;;  %v13421_v44 = vld [vmem:[#allocation51_spill] sm:$0xff] }
0x120e   :  { %4868 = vrot.lane.b32.xlu0 %v11899_v41, %s8848_s29 }
0x1211   :  { %v8776_v61 = vpop.eup %8775 }
0x1212   :  { %v4800_v24 = vmul.f32 %v8776_v61, %v9107_v5 }
0x1214   :  { %v11905_v14 = vadd.f32 %v4800_v24, %v9113_v11 }
0x1216   :  { %4870 = vrot.lane.b32.xlu2 %v11905_v14, %s8848_s29 }
0x1217   :  { %v4662_v45 = vpop.permute.xlu2 %4661 }
0x1218   :  { %7924 = vmatmul.msk.f32.gmra.mxu3 %vm1214_vm5, %v4662_v45 }
0x1229   :  { %v4861_v30 = vpop.permute.xlu2 %4860 }
0x122a   :  { %v4907_v54 = vmul.f32 %v4861_v30, %v11861_v15 }
0x122c   :  { %4940 = vrot.lane.b32.xlu0 %v4907_v54, %s8849_s4  ;;  %v7978_v54 = vld [vmem:[%s13289_s0 + $0x498] sm:$0xff] }
0x122d   :  { %7995 = vmatmul.msk.f32.gmra.mxu2 %vm31_vm1, %v7978_v54  ;;  %v7948_v54 = vld [vmem:[%s13289_s0 + $0x430] sm:$0xff] }
0x1235   :  { %7996 = vmatmul.msk.f32.gmra.mxu2 %vm31_vm1, %v7979_v18  ;;  %v13422_v18 = vld [vmem:[#allocation52_spill] sm:$0xff] }
0x1236   :  { %v4735_v37 = vpop.f32.mrf.mxu3 }
0x1237   :  { %v4769_v31 = vadd.f32 %v4735_v37, %v1145_v43  ;;  %v4664_v32 = vpop.permute.xlu0 %4663  ;;  %v7944_v43 = vld [vmem:[%s13289_s0 + $0x410] sm:$0xff]  ;;  %v8011_v37 = vld [vmem:[%s13289_s0 + $0x518] sm:$0xff] }
0x1238   :  { %7925 = vmatmul.msk.f32.gmra.mxu3 %vm1214_vm5, %v4664_v32  ;;  %7961 = vmatmul.msk.f32.gmra.mxu1 %vm31_vm1, %v7944_v43 }
0x1239   :  { %8777 = vtanh.f32 %v4769_v31  ;;  %v4859_v20 = vpop.permute.xlu1 %4858  ;;  %v13419_v31 = vld [vmem:[#allocation50_spill] sm:$0xff] }
0x123a   :  { %v4906_v8 = vmul.f32 %v4859_v20, %v11855_v33  ;;  %v1157_v32 = vadd.f32 %v11674_v1, %v13419_v31 }
0x123c   :  { %4938 = vrot.lane.b32.xlu1 %v4906_v8, %s8849_s4 }
0x123e   :  { %v4738_v48 = vpop.f32.mrf.mxu3 }
0x123f   :  { %v8778_v47 = vpop.eup %8777  ;;  %v4770_v26 = vadd.f32 %v4738_v48, %v1148_v36 }
0x1240   :  { %v4801_v35 = vmul.f32 %v8778_v47, %v9107_v5  ;;  %8025 = vmatmul.msk.f32.vlgmr.msrb.gmra.mxu3 %vm31_vm1, %v8008_v50  ;;  %v7945_v47 = vld [vmem:[%s13289_s0 + $0x418] sm:$0xff] }
0x1241   :  { %8779 = vtanh.f32 %v4770_v26  ;;  %v8012_v26 = vld [vmem:[%s13289_s0 + $0x520] sm:$0xff]  ;;  %7962 = vmatmul.msk.f32.gmra.mxu1 %vm31_vm1, %v7945_v47 }
0x1242   :  { %v11934_v42 = vadd.f32 %v4801_v35, %v9113_v11  ;;  %v13420_v35 = vld [vmem:[#allocation49_spill] sm:$0xff] }
0x1243   :  { %v1154_v53 = vadd.f32 %v11674_v1, %v13420_v35 }
0x1244   :  { %4872 = vrot.lane.b32.xlu1 %v11934_v42, %s8848_s29 }
0x1246   :  { %v4741_v28 = vpop.f32.mrf.mxu3 }
0x1247   :  { %v8780_v12 = vpop.eup %8779  ;;  %v4771_v7 = vadd.f32 %v4741_v28, %v1151_v10  ;;  %v7946_v10 = vld [vmem:[%s13289_s0 + $0x420] sm:$0xff] }
0x1248   :  { %v4802_v59 = vmul.f32 %v8780_v12, %v9107_v5  ;;  %8026 = vmatmul.msk.f32.gmra.mxu3 %vm31_vm1, %v8009_v23  ;;  %v7980_v12 = vld [vmem:[%s13289_s0 + $0x4a8] sm:$0xff] }
0x1249   :  { %8781 = vtanh.f32 %v4771_v7  ;;  %7997 = vmatmul.msk.f32.gmra.mxu2 %vm31_vm1, %v7980_v12  ;;  %7963 = vmatmul.msk.f32.gmra.mxu1 %vm31_vm1, %v7946_v10  ;;  %v7947_v23 = vld [vmem:[%s13289_s0 + $0x428] sm:$0xff]  ;;  %v7950_v10 = vld [vmem:[%s13289_s0 + $0x440] sm:$0xff] }
0x124a   :  { %v11957_v38 = vadd.f32 %v4802_v59, %v9113_v11  ;;  %v7984_v12 = vld [vmem:[%s13289_s0 + $0x4c8] sm:$0xff] }
0x124c   :  { %4874 = vrot.lane.b32.xlu0 %v11957_v38, %s8848_s29 }
0x124f   :  { %v8782_v24 = vpop.eup %8781 }
0x1250   :  { %8027 = vmatmul.msk.f32.gmra.mxu3 %vm31_vm1, %v8010_v6  ;;  %v4803_v30 = vmul.f32 %v8782_v24, %v9107_v5  ;;  %v1160_v6 = vadd.f32 %v11674_v1, %v13421_v44  ;;  %v7986_v44 = vld [vmem:[%s13289_s0 + $0x4d8] sm:$0xff] }
0x1251   :  { %v4863_v13 = vpop.permute.xlu0 %4862  ;;  %7998 = vmatmul.msk.f32.gmra.mxu2 %vm31_vm1, %v7981_v49  ;;  %7964 = vmatmul.msk.f32.gmra.mxu1 %vm31_vm1, %v7947_v23 }
0x1252   :  { %v4908_v61 = vmul.f32 %v4863_v13, %v11871_v17  ;;  %v11982_v9 = vadd.f32 %v4803_v30, %v9113_v11 }
0x1254   :  { %4942 = vrot.lane.b32.xlu2 %v4908_v61, %s8849_s4 }
0x1255   :  { %v4744_v45 = vpop.f32.mrf.mxu3 }
0x1256   :  { %v4772_v28 = vadd.f32 %v4744_v45, %v1154_v53  ;;  %v7982_v45 = vld [vmem:[%s13289_s0 + $0x4b8] sm:$0xff] }
0x1257   :  { %v7949_v53 = vld [vmem:[%s13289_s0 + $0x438] sm:$0xff] }
0x1258   :  { %8028 = vmatmul.msk.f32.gmra.mxu3 %vm31_vm1, %v8011_v37  ;;  %v8015_v37 = vld [vmem:[%s13289_s0 + $0x538] sm:$0xff] }
0x1259   :  { %7999 = vmatmul.msk.f32.gmra.mxu2 %vm31_vm1, %v7982_v45  ;;  %7965 = vmatmul.msk.f32.gmra.mxu1 %vm31_vm1, %v7948_v54  ;;  %v7987_v54 = vld [vmem:[%s13289_s0 + $0x4e0] sm:$0xff] }
0x125c   :  { %4876 = vrot.lane.b32.xlu2 %v11982_v9, %s8848_s29 }
0x125d   :  { %v4747_v20 = vpop.f32.mrf.mxu3 }
0x125e   :  { %v4773_v8 = vadd.f32 %v4747_v20, %v1157_v32 }
0x1260   :  { %8783 = vtanh.f32 %v4773_v8  ;;  %v4867_v36 = vpop.permute.xlu2 %4866  ;;  %8029 = vmatmul.msk.f32.gmra.mxu3 %vm31_vm1, %v8012_v26 }
0x1261   :  { %v4910_v48 = vmul.f32 %v4867_v36, %v11891_v25  ;;  %8785 = vtanh.f32 %v4772_v28  ;;  %v7983_v36 = vld [vmem:[%s13289_s0 + $0x4c0] sm:$0xff]  ;;  %7966 = vmatmul.msk.f32.gmra.mxu1 %vm31_vm1, %v7949_v53  ;;  %v7955_v53 = vld [vmem:[%s13289_s0 + $0x468] sm:$0xff] }
0x1262   :  { %8000 = vmatmul.msk.f32.gmra.mxu2 %vm31_vm1, %v7983_v36  ;;  %v7954_v36 = vld [vmem:[%s13289_s0 + $0x460] sm:$0xff] }
0x1263   :  { %4946 = vrot.lane.b32.xlu0 %v4910_v48, %s8849_s4  ;;  %v1163_v48 = vadd.f32 %v11674_v1, %v13422_v18  ;;  %v8021_v18 = vld [vmem:[%s13289_s0 + $0x568] sm:$0xff] }
0x1266   :  { %v8784_v22 = vpop.eup %8783 }
0x1267   :  { %v4805_v50 = vmul.f32 %v8784_v22, %v9107_v5  ;;  %v8786_v13 = vpop.eup %8785 }
0x1268   :  { %8030 = vmatmul.msk.f32.gmra.mxu3 %vm31_vm1, %v8013_v46  ;;  %v4804_v61 = vmul.f32 %v8786_v13, %v9107_v5  ;;  %v8017_v46 = vld [vmem:[%s13289_s0 + $0x548] sm:$0xff]  ;;  %v8018_v13 = vld [vmem:[%s13289_s0 + $0x550] sm:$0xff] }
0x1269   :  { %v12017_v55 = vadd.f32 %v4805_v50, %v9113_v11  ;;  %v8016_v50 = vld [vmem:[%s13289_s0 + $0x540] sm:$0xff]  ;;  %7967 = vmatmul.msk.f32.gmra.mxu1 %vm31_vm1, %v7950_v10 }
0x126a   :  { %v12054_v43 = vadd.f32 %v4804_v61, %v9113_v11  ;;  %8001 = vmatmul.msk.f32.gmra.mxu2 %vm31_vm1, %v7984_v12  ;;  %v1166_v61 = vadd.f32 %v11674_v1, %v10599_v3  ;;  %v7953_v3 = vld [vmem:[%s13289_s0 + $0x458] sm:$0xff] }
0x126b   :  { %4880 = vrot.lane.b32.xlu0 %v12017_v55, %s8848_s29 }
0x1270   :  { %v4865_v59 = vpop.permute.xlu1 %4864  ;;  %8031 = vmatmul.msk.f32.gmra.mxu3 %vm31_vm1, %v8014_v63  ;;  %v4871_v31 = vpop.permute.xlu2 %4870  ;;  %v7951_v63 = vld [vmem:[%s13289_s0 + $0x448] sm:$0xff] }
0x1271   :  { %v4909_v7 = vmul.f32 %v4865_v59, %v11882_v21  ;;  %v4912_v47 = vmul.f32 %v4871_v31, %v11905_v14  ;;  %7968 = vmatmul.msk.f32.gmra.mxu1 %vm31_vm1, %v7951_v63  ;;  %v8023_v63 = vld [vmem:[%s13289_s0 + $0x578] sm:$0xff] }
0x1273   :  { %4944 = vrot.lane.b32.xlu1 %v4909_v7, %s8849_s4  ;;  %v7985_v7 = vld [vmem:[%s13289_s0 + $0x4d0] sm:$0xff] }
0x1274   :  { %8002 = vmatmul.msk.f32.gmra.mxu2 %vm31_vm1, %v7985_v7  ;;  %v1169_v7 = vadd.f32 %v11674_v1, %v10604_v34 }
0x1276   :  { %v4750_v24 = vpop.f32.mrf.mxu3 }
0x1277   :  { %v4774_v30 = vadd.f32 %v4750_v24, %v1160_v6  ;;  %v7952_v6 = vld [vmem:[%s13289_s0 + $0x450] sm:$0xff]  ;;  %v8019_v24 = vld [vmem:[%s13289_s0 + $0x558] sm:$0xff] }
0x1278   :  { %8032 = vmatmul.msk.f32.gmra.mxu3 %vm31_vm1, %v8015_v37  ;;  %v8020_v37 = vld [vmem:[%s13289_s0 + $0x560] sm:$0xff] }
0x1279   :  { %8787 = vtanh.f32 %v4774_v30  ;;  %7969 = vmatmul.msk.f32.gmra.mxu1 %vm31_vm1, %v7952_v6  ;;  %v4828_v6 = vmul.f32 %v11871_v17, %v11699_v58  ;;  %v7957_v58 = vld [vmem:[%s13289_s0 + $0x478] sm:$0xff] }
0x127b   :  { %4878 = vrot.lane.b32.xlu1 %v12054_v43, %s8848_s29 }
0x127c   :  { %8003 = vmatmul.msk.f32.gmra.mxu2 %vm31_vm1, %v7986_v44 }
0x127f   :  { %v8788_v32 = vpop.eup %8787 }
0x1280   :  { %v4806_v20 = vmul.f32 %v8788_v32, %v9107_v5  ;;  %v4869_v8 = vpop.permute.xlu0 %4868  ;;  %8033 = vmatmul.msk.f32.gmra.mxu3 %vm31_vm1, %v8016_v50  ;;  %v8022_v50 = vld [vmem:[%s13289_s0 + $0x570] sm:$0xff] }
0x1281   :  { %v4911_v26 = vmul.f32 %v4869_v8, %v11899_v41  ;;  %7970 = vmatmul.msk.f32.gmra.mxu1 %vm31_vm1, %v7953_v3 }
0x1282   :  { %v4753_v22 = vpop.f32.mrf.mxu3  ;;  %v12074_v35 = vadd.f32 %v4806_v20, %v9113_v11  ;;  %v7988_v20 = vld [vmem:[%s13289_s0 + $0x4e8] sm:$0xff] }
0x1283   :  { %v4775_v28 = vadd.f32 %v4753_v22, %v1163_v48  ;;  %4948 = vrot.lane.b32.xlu2 %v4911_v26, %s8849_s4  ;;  %4950 = vrot.lane.b32.xlu1 %v4912_v47, %s8849_s4  ;;  %v4826_v48 = vmul.f32 %v11855_v33, %v11666_v0  ;;  %v7989_v26 = vld [vmem:[%s13289_s0 + $0x4f0] sm:$0xff] }
0x1284   :  { %4882 = vrot.lane.b32.xlu0 %v12074_v35, %s8848_s29  ;;  %8004 = vmatmul.msk.f32.gmra.mxu2 %vm31_vm1, %v7987_v54  ;;  %v12209_v54 = vld [vmem:[%s13288_s1 + $0x70] ss:$0 sm:$0xff] }
0x1285   :  { %8789 = vtanh.f32 %v4775_v28  ;;  %v4827_v28 = vmul.f32 %v11861_v15, %v11678_v51  ;;  %v7956_v51 = vld [vmem:[%s13289_s0 + $0x470] sm:$0xff] }
0x1288   :  { %8034 = vmatmul.msk.f32.gmra.mxu3 %vm31_vm1, %v8017_v46 }
0x1289   :  { %7971 = vmatmul.msk.f32.gmra.mxu1 %vm31_vm1, %v7954_v36 }
0x128b   :  { %v8790_v49 = vpop.eup %8789 }
0x128c   :  { %v4807_v59 = vmul.f32 %v8790_v49, %v9107_v5  ;;  %8005 = vmatmul.msk.f32.gmra.mxu2 %vm31_vm1, %v7988_v20 }
0x128e   :  { %v12102_v23 = vadd.f32 %v4807_v59, %v9113_v11  ;;  %v7990_v59 = vld [vmem:[%s13289_s0 + $0x4f8] sm:$0xff] }
0x1290   :  { %4884 = vrot.lane.b32.xlu0 %v12102_v23, %s8848_s29  ;;  %8035 = vmatmul.msk.f32.gmra.mxu3 %vm31_vm1, %v8018_v13 }
0x1291   :  { %7972 = vmatmul.msk.f32.gmra.mxu1 %vm31_vm1, %v7955_v53 }
0x1294   :  { %8006 = vmatmul.msk.f32.gmra.mxu2 %vm31_vm1, %v7989_v26  ;;  %v5990_v26 = vld [vmem:[%s13288_s1 + $0x88] sm:$0xff] }
0x1298   :  { %8036 = vmatmul.msk.f32.gmra.mxu3 %vm31_vm1, %v8019_v24 }
0x1299   :  { %7973 = vmatmul.msk.f32.gmra.mxu1 %vm31_vm1, %v7956_v51 }
0x129b   :  { %v4756_v45 = vpop.f32.mrf.mxu3 }
0x129c   :  { %v4776_v30 = vadd.f32 %v4756_v45, %v1166_v61  ;;  %8007 = vmatmul.msk.f32.gmra.mxu2 %vm31_vm1, %v7990_v59 }
0x129e   :  { %8791 = vtanh.f32 %v4776_v30  ;;  %v4941_v0 = vpop.permute.xlu0 %4940  ;;  %v5991_v30 = vld [vmem:[%s13288_s1 + $0x90] sm:$0xff] }
0x129f   :  { %v4987_v12 = vadd.f32 %v4941_v0, %v4827_v28  ;;  %6054 = vmatpush.msra.mxu2 %v5991_v30  ;;  %v6121_v0 = vld [vmem:[%s13288_s1 + $0x98] sm:$0xff] }
0x12a0   :  { %8037 = vmatmul.msk.f32.gmra.mxu3 %vm31_vm1, %v8020_v37  ;;  %v5500_v37 = vpop.f32.mrf.mxu2 }
0x12a1   :  { %7974 = vmatmul.msk.f32.gmra.mxu1 %vm31_vm1, %v7957_v58  ;;  %v12214_v20 = vadd.f32 %v12209_v54, %v5500_v37  ;;  %6055 = vmatpush.msra.mxu2 %v5990_v26 }
0x12a4   :  { %v8792_v31 = vpop.eup %8791 }
0x12a5   :  { %v4808_v32 = vmul.f32 %v8792_v31, %v9107_v5 }
0x12a7   :  { %v12149_v8 = vadd.f32 %v4808_v32, %v9113_v11 }
0x12a8   :  { %8038 = vmatmul.msk.f32.gmra.mxu3 %vm31_vm1, %v8021_v18 }
0x12a9   :  { %4886 = vrot.lane.b32.xlu0 %v12149_v8, %s8848_s29 }
0x12ae   :  { %v4939_v47 = vpop.permute.xlu1 %4938  ;;  %v4943_v13 = vpop.permute.xlu2 %4942 }
0x12af   :  { %v4986_v22 = vadd.f32 %v4939_v47, %v4826_v48  ;;  %v4988_v24 = vadd.f32 %v4943_v13, %v4828_v6  ;;  %v13299_v48 = vmax.f32 %v12214_v20, 0.0 }
0x12b0   :  { %8039 = vmatmul.msk.f32.gmra.mxu3 %vm31_vm1, %v8022_v50  ;;  %v5354_v50 = vpop.f32.mrf.mxu1 }
0x12b1   :  { %8793 = vtanh.f32 %v4986_v22  ;;  %8090 = vmatmul.msk.f32.vlgmr.msra.gmra.mxu2 %vm5859_vm6, %v13299_v48 }
0x12b2   :  { %8795 = vtanh.f32 %v4987_v12  ;;  %v5355_v12 = vadd.f32 %v12209_v54, %v5354_v50 }
0x12b6   :  { %v4873_v10 = vpop.permute.xlu1 %4872  ;;  %v4877_v31 = vpop.permute.xlu2 %4876 }
0x12b7   :  { %v4913_v46 = vmul.f32 %v4873_v10, %v11934_v42  ;;  %v8794_v49 = vpop.eup %8793  ;;  %v4915_v53 = vmul.f32 %v4877_v31, %v11982_v9  ;;  %v12250_v10 = vld [vmem:[%s13288_s1 + $0x78] sm:$0xff] }
0x12b8   :  { %5034 = vrot.lane.b32.xlu2 %v8794_v49, %s8848_s29  ;;  %8040 = vmatmul.msk.f32.gmra.mxu3 %vm31_vm1, %v8023_v63  ;;  %v8796_v45 = vpop.eup %8795  ;;  %v5503_v49 = vpop.f32.mrf.mxu2 }
0x12b9   :  { %4952 = vrot.lane.b32.xlu1 %v4913_v46, %s8849_s4  ;;  %v5402_v46 = vmax.f32 %v5355_v12, 0.0  ;;  %v12257_v59 = vadd.f32 %v12209_v54, %v5503_v49  ;;  %v5357_v13 = vpop.f32.mrf.mxu1 }
0x12ba   :  { %v5358_v6 = vadd.f32 %v12209_v54, %v5357_v13  ;;  %v4829_v13 = vmul.f32 %v11882_v21, %v11719_v52 }
0x12bb   :  { %v4759_v44 = vpop.f32.mrf.mxu3 }
0x12bc   :  { %v4777_v61 = vadd.f32 %v4759_v44, %v1169_v7  ;;  %v13297_v7 = vmax.f32 %v12257_v59, 0.0 }
0x12be   :  { %8797 = vtanh.f32 %v4777_v61  ;;  %v4875_v34 = vpop.permute.xlu0 %4874  ;;  %8091 = vmatmul.msk.f32.gmra.mxu2 %vm5859_vm6, %v13297_v7  ;;  %v5403_v61 = vmax.f32 %v5358_v6, 0.0 }
0x12bf   :  { %v4914_v1 = vmul.f32 %v4875_v34, %v11957_v38  ;;  %8799 = vtanh.f32 %v4988_v24 }
0x12c0   :  { %5036 = vrot.lane.b32.xlu2 %v8796_v45, %s8848_s29  ;;  %v5506_v24 = vpop.f32.mrf.mxu2 }
0x12c1   :  { %4954 = vrot.lane.b32.xlu1 %v4914_v1, %s8849_s4  ;;  %v12274_v1 = vadd.f32 %v12209_v54, %v5506_v24 }
0x12c3   :  { %v5646_v36 = vpop.f32.mrf.mxu3 }
0x12c4   :  { %v8798_v3 = vpop.eup %8797  ;;  %v12221_v47 = vadd.f32 %v12209_v54, %v5646_v36 }
0x12c5   :  { %v4809_v32 = vmul.f32 %v8798_v3, %v9107_v5  ;;  %v6122_v5 = vld [vmem:[%s13288_s1 + $0xa0] sm:$0xff]  ;;  %v8800_v22 = vpop.eup %8799  ;;  %v5360_v3 = vpop.f32.mrf.mxu1 }
0x12c6   :  { %6185 = vmatpush.msra.mxu3 %v6122_v5  ;;  %v13318_v28 = vmax.f32 %v12221_v47, 0.0  ;;  %6492 = vmatpush.msrb.mxu2 %v6122_v5  ;;  %v5361_v31 = vadd.f32 %v12209_v54, %v5360_v3 }
0x12c7   :  { %v12217_v18 = vadd.f32 %v4809_v32, %v9113_v11  ;;  %v12233_v11 = vld [vmem:[%s13288_s1 + $0x80] sm:$0xff] }
0x12c8   :  { %5038 = vrot.lane.b32.xlu2 %v8800_v22, %s8848_s29  ;;  %5922 = vmatpush.msrb.mxu1 %v12233_v11  ;;  %v5404_v32 = vmax.f32 %v5361_v31, 0.0  ;;  %v5509_v36 = vpop.f32.mrf.mxu2 }
0x12c9   :  { %4888 = vrot.lane.b32.xlu0 %v12217_v18, %s8848_s29  ;;  %4956 = vrot.lane.b32.xlu1 %v4915_v53, %s8849_s4  ;;  %v12290_v5 = vadd.f32 %v12209_v54, %v5509_v36 }
0x12ca   :  { %6186 = vmatpush.msra.mxu3 %v6121_v0  ;;  %5923 = vmatpush.msrb.mxu1 %v12250_v10 }
0x12cb   :  { %8106 = vmatmul.msk.f32.vlgmr.msra.gmra.mxu3 %vm5859_vm6, %v13318_v28  ;;  %8074 = vmatmul.msk.f32.vlgmr.msrb.gmra.mxu1 %vm5859_vm6, %v5402_v46  ;;  %v5649_v51 = vpop.f32.mrf.mxu3  ;;  %v13294_v50 = vmax.f32 %v12290_v5, 0.0 }
0x12cc   :  { %6493 = vmatpush.msrb.mxu2 %v6121_v0  ;;  %v12263_v63 = vadd.f32 %v12209_v54, %v5649_v51  ;;  %6363 = vmatpush.msra.mxu1 %v5991_v30  ;;  %v13296_v30 = vmax.f32 %v12274_v1, 0.0 }
0x12cd   :  { %v5363_v12 = vpop.f32.mrf.mxu1 }
0x12ce   :  { %v13315_v44 = vmax.f32 %v12263_v63, 0.0  ;;  %6364 = vmatpush.msra.mxu1 %v5990_v26  ;;  %8092 = vmatmul.msk.f32.gmra.mxu2 %vm5859_vm6, %v13296_v30  ;;  %v5364_v49 = vadd.f32 %v12209_v54, %v5363_v12  ;;  %v4831_v12 = vmul.f32 %v11899_v41, %v11728_v40 }
0x12d0   :  { %v5405_v51 = vmax.f32 %v5364_v49, 0.0  ;;  %v5512_v6 = vpop.f32.mrf.mxu2 }
0x12d1   :  { %v12310_v24 = vadd.f32 %v12209_v54, %v5512_v6 }
0x12d3   :  { %8107 = vmatmul.msk.f32.gmra.mxu3 %vm5859_vm6, %v13315_v44  ;;  %8075 = vmatmul.msk.f32.gmra.mxu1 %vm5859_vm6, %v5403_v61  ;;  %v5652_v45 = vpop.f32.mrf.mxu3  ;;  %v13293_v3 = vmax.f32 %v12310_v24, 0.0 }
0x12d4   :  { %v12279_v58 = vadd.f32 %v12209_v54, %v5652_v45 }
0x12d5   :  { %v4947_v34 = vpop.permute.xlu0 %4946  ;;  %v5366_v52 = vpop.f32.mrf.mxu1 }
0x12d6   :  { %v13313_v37 = vmax.f32 %v12279_v58, 0.0  ;;  %8093 = vmatmul.msk.f32.gmra.mxu2 %vm5859_vm6, %v13294_v50  ;;  %v5367_v36 = vadd.f32 %v12209_v54, %v5366_v52 }
0x12d8   :  { %v5406_v49 = vmax.f32 %v5367_v36, 0.0 }
0x12db   :  { %8108 = vmatmul.msk.f32.gmra.mxu3 %vm5859_vm6, %v13313_v37  ;;  %8076 = vmatmul.msk.f32.gmra.mxu1 %vm5859_vm6, %v5404_v32  ;;  %v5655_v53 = vpop.f32.mrf.mxu3 }
0x12dc   :  { %v12296_v0 = vadd.f32 %v12209_v54, %v5655_v53 }
0x12dd   :  { %v4881_v26 = vpop.permute.xlu0 %4880  ;;  %v5369_v36 = vpop.f32.mrf.mxu1 }
0x12de   :  { %v4917_v22 = vmul.f32 %v4881_v26, %v12017_v55  ;;  %v13311_v46 = vmax.f32 %v12296_v0, 0.0  ;;  %v4830_v26 = vmul.f32 %v11891_v25, %v11726_v16  ;;  %8094 = vmatmul.msk.f32.gmra.mxu2 %vm5859_vm6, %v13293_v3 }
0x12e0   :  { %4960 = vrot.lane.b32.xlu0 %v4917_v22, %s8849_s4  ;;  %v4949_v22 = vpop.permute.xlu2 %4948 }
0x12e1   :  { %v4991_v6 = vadd.f32 %v4949_v22, %v4831_v12 }
0x12e3   :  { %8109 = vmatmul.msk.f32.gmra.mxu3 %vm5859_vm6, %v13311_v46  ;;  %8077 = vmatmul.msk.f32.gmra.mxu1 %vm5859_vm6, %v5405_v51  ;;  %v5658_v31 = vpop.f32.mrf.mxu3  ;;  %v4990_v51 = vadd.f32 %v4947_v34, %v4830_v26  ;;  %v5370_v26 = vadd.f32 %v12209_v54, %v5369_v36 }
0x12e4   :  { %v12315_v32 = vadd.f32 %v12209_v54, %v5658_v31 }
0x12e5   :  { %v4945_v61 = vpop.permute.xlu1 %4944  ;;  %v5407_v12 = vmax.f32 %v5370_v26, 0.0 }
0x12e6   :  { %v4989_v45 = vadd.f32 %v4945_v61, %v4829_v13  ;;  %v13306_v53 = vmax.f32 %v12315_v32, 0.0  ;;  %v5515_v13 = vpop.f32.mrf.mxu2 }
0x12e7   :  { %v12330_v16 = vadd.f32 %v12209_v54, %v5515_v13 }
0x12e8   :  { %8801 = vtanh.f32 %v4989_v45 }
0x12e9   :  { %v13291_v40 = vmax.f32 %v12330_v16, 0.0  ;;  %8803 = vtanh.f32 %v4990_v51 }
0x12ea   :  { %8805 = vtanh.f32 %v4991_v6 }
0x12eb   :  { %8110 = vmatmul.msk.f32.gmra.mxu3 %vm5859_vm6, %v13306_v53  ;;  %8078 = vmatmul.msk.f32.gmra.mxu1 %vm5859_vm6, %v5406_v49  ;;  %v5661_v34 = vpop.f32.mrf.mxu3  ;;  %v4832_v49 = vmul.f32 %v11905_v14, %v11743_v60 }
0x12ec   :  { %v12338_v52 = vadd.f32 %v12209_v54, %v5661_v34  ;;  %8095 = vmatmul.msk.f32.gmra.mxu2 %vm5859_vm6, %v13291_v40 }
0x12ed   :  { %v4879_v61 = vpop.permute.xlu1 %4878 }
0x12ee   :  { %v8802_v45 = vpop.eup %8801  ;;  %v4916_v31 = vmul.f32 %v4879_v61, %v12054_v43  ;;  %v13305_v22 = vmax.f32 %v12338_v52, 0.0  ;;  %v5518_v51 = vpop.f32.mrf.mxu2 }
0x12ef   :  { %5040 = vrot.lane.b32.xlu2 %v8802_v45, %s8848_s29  ;;  %v12351_v6 = vadd.f32 %v12209_v54, %v5518_v51  ;;  %v8804_v61 = vpop.eup %8803  ;;  %v5372_v51 = vpop.f32.mrf.mxu1 }
0x12f0   :  { %4958 = vrot.lane.b32.xlu1 %v4916_v31, %s8849_s4  ;;  %v8806_v34 = vpop.eup %8805 }
0x12f1   :  { %v13292_v60 = vmax.f32 %v12351_v6, 0.0 }
0x12f3   :  { %8111 = vmatmul.msk.f32.gmra.mxu3 %vm5859_vm6, %v13305_v22  ;;  %8079 = vmatmul.msk.f32.gmra.mxu1 %vm5859_vm6, %v5407_v12  ;;  %v5664_v26 = vpop.f32.mrf.mxu3 }
0x12f4   :  { %v12359_v40 = vadd.f32 %v12209_v54, %v5664_v26  ;;  %8096 = vmatmul.msk.f32.gmra.mxu2 %vm5859_vm6, %v13292_v60 }
0x12f5   :  { %v4951_v13 = vpop.permute.xlu1 %4950 }
0x12f6   :  { %v4992_v45 = vadd.f32 %v4951_v13, %v4832_v49  ;;  %v4883_v31 = vpop.permute.xlu0 %4882  ;;  %v5373_v49 = vadd.f32 %v12209_v54, %v5372_v51  ;;  %v13303_v12 = vmax.f32 %v12359_v40, 0.0 }
0x12f7   :  { %v4918_v36 = vmul.f32 %v4883_v31, %v12074_v35  ;;  %5042 = vrot.lane.b32.xlu2 %v8804_v61, %s8848_s29  ;;  %v5521_v61 = vpop.f32.mrf.mxu2  ;;  %v5375_v51 = vpop.f32.mrf.mxu1 }
0x12f8   :  { %8807 = vtanh.f32 %v4992_v45  ;;  %5044 = vrot.lane.b32.xlu1 %v8806_v34, %s8848_s29  ;;  %v5408_v13 = vmax.f32 %v5373_v49, 0.0  ;;  %v12371_v45 = vadd.f32 %v12209_v54, %v5521_v61  ;;  %v5376_v3 = vadd.f32 %v12209_v54, %v5375_v51 }
0x12f9   :  { %4962 = vrot.lane.b32.xlu0 %v4918_v36, %s8849_s4 }
0x12fa   :  { %v13295_v34 = vmax.f32 %v12371_v45, 0.0  ;;  %v5409_v61 = vmax.f32 %v5376_v3, 0.0 }
0x12fb   :  { %8112 = vmatmul.msk.f32.gmra.mxu3 %vm5859_vm6, %v13303_v12  ;;  %8080 = vmatmul.msk.f32.gmra.mxu1 %vm5859_vm6, %v5408_v13  ;;  %v5667_v36 = vpop.f32.mrf.mxu3 }
0x12fc   :  { %v12377_v26 = vadd.f32 %v12209_v54, %v5667_v36  ;;  %8097 = vmatmul.msk.f32.gmra.mxu2 %vm5859_vm6, %v13295_v34 }
0x12fe   :  { %v8808_v31 = vpop.eup %8807  ;;  %v13301_v60 = vmax.f32 %v12377_v26, 0.0 }
0x1300   :  { %5046 = vrot.lane.b32.xlu1 %v8808_v31, %s8848_s29  ;;  %v5524_v31 = vpop.f32.mrf.mxu2 }
0x1301   :  { %v12390_v36 = vadd.f32 %v12209_v54, %v5524_v31 }
0x1302   :  { %v4885_v49 = vpop.permute.xlu0 %4884 }
0x1303   :  { %v4919_v13 = vmul.f32 %v4885_v49, %v12102_v23  ;;  %8113 = vmatmul.msk.f32.gmra.mxu3 %vm5859_vm6, %v13301_v60  ;;  %8081 = vmatmul.msk.f32.gmra.mxu1 %vm5859_vm6, %v5409_v61  ;;  %v13298_v51 = vmax.f32 %v12390_v36, 0.0  ;;  %v5670_v50 = vpop.f32.mrf.mxu3  ;;  %v5378_v49 = vpop.f32.mrf.mxu1 }
0x1304   :  { %v12395_v34 = vadd.f32 %v12209_v54, %v5670_v50  ;;  %v5379_v3 = vadd.f32 %v12209_v54, %v5378_v49 }
0x1305   :  { %4964 = vrot.lane.b32.xlu0 %v4919_v13, %s8849_s4  ;;  %8098 = vmatmul.msk.f32.gmra.mxu2 %vm5859_vm6, %v13298_v51 }
0x1306   :  { %v13300_v13 = vmax.f32 %v12395_v34, 0.0  ;;  %v5410_v30 = vmax.f32 %v5379_v3, 0.0 }
0x1308   :  { %v5527_v31 = vpop.f32.mrf.mxu2 }
0x1309   :  { %v12406_v61 = vadd.f32 %v12209_v54, %v5527_v31 }
0x130b   :  { %8114 = vmatmul.msk.f32.gmra.mxu3 %vm5859_vm6, %v13300_v13  ;;  %8082 = vmatmul.msk.f32.gmra.mxu1 %vm5859_vm6, %v5410_v30  ;;  %v13302_v50 = vmax.f32 %v12406_v61, 0.0  ;;  %v5673_v49 = vpop.f32.mrf.mxu3  ;;  %v5381_v51 = vpop.f32.mrf.mxu1 }
0x130c   :  { %v12411_v7 = vadd.f32 %v12209_v54, %v5673_v49  ;;  %v5382_v48 = vadd.f32 %v12209_v54, %v5381_v51 }
0x130d   :  { %8099 = vmatmul.msk.f32.gmra.mxu2 %vm5859_vm6, %v13302_v50 }
0x130e   :  { %v13304_v13 = vmax.f32 %v12411_v7, 0.0  ;;  %v5411_v60 = vmax.f32 %v5382_v48, 0.0 }
0x1310   :  { %v5530_v30 = vpop.f32.mrf.mxu2 }
0x1311   :  { %v12423_v49 = vadd.f32 %v12209_v54, %v5530_v30 }
0x1312   :  { %v5035_v3 = vpop.permute.xlu2 %5034 }
0x1313   :  { %v5082_v31 = vmul.f32 %v5035_v3, %v11855_v33  ;;  %8115 = vmatmul.msk.f32.gmra.mxu3 %vm5859_vm6, %v13304_v13  ;;  %8083 = vmatmul.msk.f32.gmra.mxu1 %vm5859_vm6, %v5411_v60  ;;  %v13307_v51 = vmax.f32 %v12423_v49, 0.0  ;;  %v5676_v50 = vpop.f32.mrf.mxu3  ;;  %v5384_v33 = vpop.f32.mrf.mxu1 }
0x1314   :  { %v12429_v12 = vadd.f32 %v12209_v54, %v5676_v50  ;;  %v5385_v48 = vadd.f32 %v12209_v54, %v5384_v33 }
0x1315   :  { %5120 = vrot.lane.b32.xlu2 %v5082_v31, %s8849_s4  ;;  %8100 = vmatmul.msk.f32.gmra.mxu2 %vm5859_vm6, %v13307_v51 }
0x1316   :  { %v13308_v13 = vmax.f32 %v12429_v12, 0.0  ;;  %v5412_v22 = vmax.f32 %v5385_v48, 0.0 }
0x1318   :  { %v5533_v53 = vpop.f32.mrf.mxu2 }
0x1319   :  { %v12442_v50 = vadd.f32 %v12209_v54, %v5533_v53 }
0x131a   :  { %v5037_v3 = vpop.permute.xlu2 %5036 }
0x131b   :  { %v4887_v30 = vpop.permute.xlu0 %4886  ;;  %v5083_v31 = vmul.f32 %v5037_v3, %v11861_v15  ;;  %8116 = vmatmul.msk.f32.gmra.mxu3 %vm5859_vm6, %v13308_v13  ;;  %v13309_v33 = vmax.f32 %v12442_v50, 0.0  ;;  %8084 = vmatmul.msk.f32.gmra.mxu1 %vm5859_vm6, %v5412_v22  ;;  %v5679_v15 = vpop.f32.mrf.mxu3 }
0x131c   :  { %v4920_v60 = vmul.f32 %v4887_v30, %v12149_v8  ;;  %v12449_v3 = vadd.f32 %v12209_v54, %v5679_v15  ;;  %v5387_v48 = vpop.f32.mrf.mxu1 }
0x131d   :  { %5122 = vrot.lane.b32.xlu2 %v5083_v31, %s8849_s4  ;;  %v5388_v30 = vadd.f32 %v12209_v54, %v5387_v48  ;;  %8101 = vmatmul.msk.f32.gmra.mxu2 %vm5859_vm6, %v13309_v33 }
0x131e   :  { %4966 = vrot.lane.b32.xlu0 %v4920_v60, %s8849_s4  ;;  %v13310_v31 = vmax.f32 %v12449_v3, 0.0 }
0x131f   :  { %v5413_v51 = vmax.f32 %v5388_v30, 0.0  ;;  %v4833_v30 = vmul.f32 %v11934_v42, %v11754_v2 }
0x1320   :  { %v5536_v13 = vpop.f32.mrf.mxu2 }
0x1321   :  { %v12461_v22 = vadd.f32 %v12209_v54, %v5536_v13 }
0x1322   :  { %v5039_v53 = vpop.permute.xlu2 %5038 }
0x1323   :  { %v5084_v60 = vmul.f32 %v5039_v53, %v11871_v17  ;;  %8117 = vmatmul.msk.f32.gmra.mxu3 %vm5859_vm6, %v13310_v31  ;;  %v13312_v15 = vmax.f32 %v12461_v22, 0.0  ;;  %8085 = vmatmul.msk.f32.gmra.mxu1 %vm5859_vm6, %v5413_v51  ;;  %v5682_v48 = vpop.f32.mrf.mxu3 }
0x1324   :  { %v12467_v33 = vadd.f32 %v12209_v54, %v5682_v48  ;;  %v5390_v17 = vpop.f32.mrf.mxu1 }
0x1325   :  { %5124 = vrot.lane.b32.xlu2 %v5084_v60, %s8849_s4  ;;  %v5391_v53 = vadd.f32 %v12209_v54, %v5390_v17  ;;  %8102 = vmatmul.msk.f32.gmra.mxu2 %vm5859_vm6, %v13312_v15 }
0x1326   :  { %v13314_v60 = vmax.f32 %v12467_v33, 0.0 }
0x1327   :  { %v5414_v46 = vmax.f32 %v5391_v53, 0.0 }
0x1328   :  { %v5539_v51 = vpop.f32.mrf.mxu2 }
0x1329   :  { %v12480_v48 = vadd.f32 %v12209_v54, %v5539_v51 }
0x132b   :  { %v4953_v13 = vpop.permute.xlu1 %4952  ;;  %8118 = vmatmul.msk.f32.gmra.mxu3 %vm5859_vm6, %v13314_v60  ;;  %v13316_v2 = vmax.f32 %v12480_v48, 0.0  ;;  %8086 = vmatmul.msk.f32.gmra.mxu1 %vm5859_vm6, %v5414_v46  ;;  %v5685_v17 = vpop.f32.mrf.mxu3 }
0x132c   :  { %v4993_v31 = vadd.f32 %v4953_v13, %v4833_v30  ;;  %v12485_v15 = vadd.f32 %v12209_v54, %v5685_v17  ;;  %v5393_v37 = vpop.f32.mrf.mxu1  ;;  %v4834_v30 = vmul.f32 %v11957_v38, %v11763_v39 }
0x132d   :  { %v5394_v53 = vadd.f32 %v12209_v54, %v5393_v37  ;;  %8103 = vmatmul.msk.f32.gmra.mxu2 %vm5859_vm6, %v13316_v2 }
0x132e   :  { %8809 = vtanh.f32 %v4993_v31  ;;  %v13317_v31 = vmax.f32 %v12485_v15, 0.0 }
0x132f   :  { %v5415_v46 = vmax.f32 %v5394_v53, 0.0 }
0x1330   :  { %v5542_v44 = vpop.f32.mrf.mxu2 }
0x1331   :  { %v12499_v39 = vadd.f32 %v12209_v54, %v5542_v44  ;;  %v4835_v44 = vmul.f32 %v11982_v9, %v11772_v62 }
0x1333   :  { %v4955_v13 = vpop.permute.xlu1 %4954  ;;  %8119 = vmatmul.msk.f32.gmra.mxu3 %vm5859_vm6, %v13317_v31  ;;  %v13319_v37 = vmax.f32 %v12499_v39, 0.0  ;;  %8087 = vmatmul.msk.f32.gmra.mxu1 %vm5859_vm6, %v5415_v46  ;;  %v5688_v17 = vpop.f32.mrf.mxu3 }
0x1334   :  { %v8810_v51 = vpop.eup %8809  ;;  %v4994_v60 = vadd.f32 %v4955_v13, %v4834_v30  ;;  %v12504_v2 = vadd.f32 %v12209_v54, %v5688_v17  ;;  %v5396_v30 = vpop.f32.mrf.mxu1 }
0x1335   :  { %5048 = vrot.lane.b32.xlu1 %v8810_v51, %s8848_s29  ;;  %v5397_v53 = vadd.f32 %v12209_v54, %v5396_v30  ;;  %8104 = vmatmul.msk.f32.gmra.mxu2 %vm5859_vm6, %v13319_v37 }
0x1336   :  { %8811 = vtanh.f32 %v4994_v60  ;;  %v13322_v60 = vmax.f32 %v12504_v2, 0.0 }
0x1337   :  { %v5416_v28 = vmax.f32 %v5397_v53, 0.0 }
0x1338   :  { %v5545_v30 = vpop.f32.mrf.mxu2 }
0x1339   :  { %v12520_v37 = vadd.f32 %v12209_v54, %v5545_v30 }
0x133b   :  { %v4889_v13 = vpop.permute.xlu0 %4888  ;;  %v4957_v31 = vpop.permute.xlu1 %4956  ;;  %8120 = vmatmul.msk.f32.gmra.mxu3 %vm5859_vm6, %v13322_v60  ;;  %8088 = vmatmul.msk.f32.gmra.mxu1 %vm5859_vm6, %v5416_v28  ;;  %v13320_v62 = vmax.f32 %v12520_v37, 0.0  ;;  %v5101_v28 = vld [vmem:[%s13288_s1 + $0x50] sm:$0xff] }
0x133c   :  { %v8812_v51 = vpop.eup %8811  ;;  %v4921_v46 = vmul.f32 %v4889_v13, %v12217_v18  ;;  %v4995_v17 = vadd.f32 %v4957_v31, %v4835_v44  ;;  %v5691_v13 = vpop.f32.mrf.mxu3  ;;  %5196 = vmatpush.msra.mxu0 %v5101_v28 }
0x133d   :  { %5050 = vrot.lane.b32.xlu1 %v8812_v51, %s8848_s29  ;;  %v12525_v31 = vadd.f32 %v12209_v54, %v5691_v13  ;;  %v5399_v53 = vpop.f32.mrf.mxu1  ;;  %8105 = vmatmul.msk.f32.gmra.mxu2 %vm5859_vm6, %v13320_v62 }
0x133e   :  { %4968 = vrot.lane.b32.xlu0 %v4921_v46, %s8849_s4  ;;  %8813 = vtanh.f32 %v4995_v17  ;;  %v5400_v44 = vadd.f32 %v12209_v54, %v5399_v53  ;;  %v12543_v54 = vld [vmem:[%s13288_s1 + $0xa8] ss:$0 sm:$0xff] }
0x133f   :  { %v13321_v51 = vmax.f32 %v12525_v31, 0.0 }
0x1340   :  { %v5417_v46 = vmax.f32 %v5400_v44, 0.0  ;;  %v5100_v44 = vld [vmem:[%s13288_s1 + $0x48] sm:$0xff]  ;;  %v6057_v28 = vpop.f32.mrf.mxu2 }
0x1341   :  { %5197 = vmatpush.msra.mxu0 %v5100_v44  ;;  %v13423_v44 = vmax.f32 %v12221_v47, 0.0 }
0x1343   :  { %8121 = vmatmul.msk.f32.gmra.mxu3 %vm5859_vm6, %v13321_v51  ;;  %8089 = vmatmul.msk.f32.gmra.mxu1 %vm5859_vm6, %v5417_v46  ;;  %v5098_v51 = vld [vmem:[%s13288_s1 + $0x38] sm:$0xff] }
0x1344   :  { %v8814_v30 = vpop.eup %8813 }
0x1345   :  { %5052 = vrot.lane.b32.xlu1 %v8814_v30, %s8848_s29  ;;  %v6579_v30 = vld [vmem:[%s13288_s1 + $0xc8] sm:$0xff] }
0x1346   :  { %6640 = vmatpush.msrb.mxu3 %v6579_v30 }
0x1348   :  { %v5925_v53 = vpop.f32.mrf.mxu1 }
0x1349   :  { %v5041_v17 = vpop.permute.xlu2 %5040  ;;  %v5974_v46 = vadd.f32 %v12543_v54, %v5925_v53 }
0x134a   :  { %v5085_v13 = vmul.f32 %v5041_v17, %v11882_v21  ;;  %v5099_v21 = vld [vmem:[%s13288_s1 + $0x40] sm:$0xff] }
0x134b   :  { %v6578_v17 = vld [vmem:[%s13288_s1 + $0xc0] sm:$0xff]  ;;  %v6105_v62 = vadd.f32 %v6057_v28, %v5974_v46  ;;  %5198 = vmatpush.msra.mxu0 %v5099_v21  ;;  %8138 = vmatmul.msk.f32.vlgmr.msra.gmra.mxu1 %vm5859_vm6, %v13423_v44  ;;  %v4837_v46 = vmul.f32 %v12017_v55, %v11788_v56  ;;  %v6576_v28 = vld [vmem:[%s13288_s1 + $0xb0] sm:$0xff]  ;;  %v8842_v21 = vld [vmem:[%s13288_s1 + $0x68] sm:$0xf]  ;;  %v6060_v44 = vpop.f32.mrf.mxu2 }
0x134c   :  { %5126 = vrot.lane.b32.xlu2 %v5085_v13, %s8849_s4  ;;  %v6577_v13 = vld [vmem:[%s13288_s1 + $0xb8] sm:$0xff]  ;;  %6641 = vmatpush.msrb.mxu3 %v6578_v17  ;;  %v8843_v56 = vld [vmem:[%s13288_s1 + $0x60] sm:$0xff] }
0x134d   :  { %5199 = vmatpush.msra.mxu0 %v5098_v51 }
0x134e   :  { %v6188_v53 = vpop.f32.mrf.mxu3  ;;  %6642 = vmatpush.msrb.mxu3 %v6577_v13 }
0x134f   :  { %v6236_v30 = vadd.f32 %v6188_v53, %v6105_v62  ;;  %8057 = vmatpush.msk.msrb.mxu0 %vm80_vm0, %v8842_v21 }
0x1350   :  { %v5928_v53 = vpop.f32.mrf.mxu1  ;;  %6643 = vmatpush.msrb.mxu3 %v6576_v28 }
0x1351   :  { %v5043_v60 = vpop.permute.xlu2 %5042  ;;  %v6252_v62 = vmax.f32 %v6236_v30, 0.0  ;;  %5790 = vmatpush.msrb.mxu0 %v8843_v56  ;;  %v5975_v13 = vadd.f32 %v12543_v54, %v5928_v53  ;;  %v13425_v56 = vmax.f32 %v12279_v58, 0.0  ;;  %v13426_v58 = vmax.f32 %v12296_v0, 0.0 }
0x1352   :  { %v5086_v47 = vmul.f32 %v5043_v60, %v11891_v25  ;;  %v4961_v17 = vpop.permute.xlu0 %4960  ;;  %v13424_v60 = vmax.f32 %v12263_v63, 0.0 }
0x1353   :  { %v4997_v51 = vadd.f32 %v4961_v17, %v4837_v46  ;;  %8170 = vmatmul.msk.f32.vlgmr.msrb.gmra.mxu3 %vm1214_vm5, %v6252_v62  ;;  %v6106_v21 = vadd.f32 %v6060_v44, %v5975_v13  ;;  %v6063_v53 = vpop.f32.mrf.mxu2  ;;  %v4836_v13 = vmul.f32 %v12054_v43, %v11780_v29  ;;  %v4838_v29 = vmul.f32 %v12074_v35, %v11790_v4 }
0x1354   :  { %5128 = vrot.lane.b32.xlu2 %v5086_v47, %s8849_s4  ;;  %8139 = vmatmul.msk.f32.gmra.mxu1 %vm5859_vm6, %v13424_v60  ;;  %v13427_v4 = vmax.f32 %v12315_v32, 0.0 }
0x1355   :  { %8815 = vtanh.f32 %v4997_v51 }
0x1356   :  { %v6191_v25 = vpop.f32.mrf.mxu3 }
0x1357   :  { %v6237_v30 = vadd.f32 %v6191_v25, %v6106_v21 }
0x1358   :  { %v5931_v17 = vpop.f32.mrf.mxu1 }
0x1359   :  { %v6253_v46 = vmax.f32 %v6237_v30, 0.0  ;;  %v5976_v47 = vadd.f32 %v12543_v54, %v5931_v17 }
0x135b   :  { %v8816_v28 = vpop.eup %8815  ;;  %8171 = vmatmul.msk.f32.gmra.mxu3 %vm1214_vm5, %v6253_v46  ;;  %v6107_v62 = vadd.f32 %v6063_v53, %v5976_v47  ;;  %v6066_v46 = vpop.f32.mrf.mxu2 }
0x135c   :  { %5056 = vrot.lane.b32.xlu2 %v8816_v28, %s8848_s29  ;;  %8140 = vmatmul.msk.f32.gmra.mxu1 %vm5859_vm6, %v13425_v56 }
0x135e   :  { %v6194_v51 = vpop.f32.mrf.mxu3 }
0x135f   :  { %v6238_v63 = vadd.f32 %v6194_v51, %v6107_v62 }
0x1360   :  { %v5934_v60 = vpop.f32.mrf.mxu1 }
0x1361   :  { %v6254_v21 = vmax.f32 %v6238_v63, 0.0  ;;  %v5977_v30 = vadd.f32 %v12543_v54, %v5934_v60 }
0x1362   :  { %v4959_v44 = vpop.permute.xlu1 %4958 }
0x1363   :  { %v4996_v25 = vadd.f32 %v4959_v44, %v4836_v13  ;;  %8172 = vmatmul.msk.f32.gmra.mxu3 %vm1214_vm5, %v6254_v21  ;;  %v6108_v28 = vadd.f32 %v6066_v46, %v5977_v30  ;;  %v6069_v0 = vpop.f32.mrf.mxu2 }
0x1364   :  { %8141 = vmatmul.msk.f32.gmra.mxu1 %vm5859_vm6, %v13426_v58 }
0x1365   :  { %8817 = vtanh.f32 %v4996_v25 }
0x1366   :  { %v6197_v17 = vpop.f32.mrf.mxu3 }
0x1367   :  { %v6239_v47 = vadd.f32 %v6197_v17, %v6108_v28 }
0x1368   :  { %v5937_v13 = vpop.f32.mrf.mxu1 }
0x1369   :  { %v6255_v62 = vmax.f32 %v6239_v47, 0.0  ;;  %v5978_v21 = vadd.f32 %v12543_v54, %v5937_v13 }
0x136a   :  { %v5045_v53 = vpop.permute.xlu1 %5044 }
0x136b   :  { %v8818_v51 = vpop.eup %8817  ;;  %v5087_v56 = vmul.f32 %v5045_v53, %v11899_v41  ;;  %v4963_v63 = vpop.permute.xlu0 %4962  ;;  %8173 = vmatmul.msk.f32.gmra.mxu3 %vm1214_vm5, %v6255_v62  ;;  %v6109_v25 = vadd.f32 %v6069_v0, %v5978_v21 }
0x136c   :  { %v4998_v44 = vadd.f32 %v4963_v63, %v4838_v29  ;;  %5054 = vrot.lane.b32.xlu0 %v8818_v51, %s8848_s29  ;;  %8142 = vmatmul.msk.f32.gmra.mxu1 %vm5859_vm6, %v13427_v4  ;;  %v4839_v29 = vmul.f32 %v12102_v23, %v11803_v27 }
0x136d   :  { %5130 = vrot.lane.b32.xlu1 %v5087_v56, %s8849_s4 }
0x136e   :  { %8819 = vtanh.f32 %v4998_v44  ;;  %v6200_v60 = vpop.f32.mrf.mxu3 }
0x136f   :  { %v5121_v41 = vpop.permute.xlu2 %5120  ;;  %v6240_v30 = vadd.f32 %v6200_v60, %v6109_v25  ;;  %v6072_v32 = vpop.f32.mrf.mxu2  ;;  %v13429_v60 = vmax.f32 %v12359_v40, 0.0  ;;  %v13430_v40 = vmax.f32 %v12377_v26, 0.0 }
0x1370   :  { %7926 = vmatmul.msk.f32.vlgmr.msra.gmra.mxu0 %vm1214_vm5, %v5121_v41  ;;  %v5940_v58 = vpop.f32.mrf.mxu1 }
0x1371   :  { %v6256_v28 = vmax.f32 %v6240_v30, 0.0  ;;  %6282 = vmatpush.msra.mxu0 %v12233_v11  ;;  %v5979_v53 = vadd.f32 %v12543_v54, %v5940_v58 }
0x1372   :  { %v5047_v46 = vpop.permute.xlu1 %5046 }
0x1373   :  { %v5088_v17 = vmul.f32 %v5047_v46, %v11905_v14  ;;  %8174 = vmatmul.msk.f32.gmra.mxu3 %vm1214_vm5, %v6256_v28  ;;  %6283 = vmatpush.msra.mxu0 %v12250_v10  ;;  %v6110_v62 = vadd.f32 %v6072_v32, %v5979_v53  ;;  %v13428_v14 = vmax.f32 %v12338_v52, 0.0 }
0x1374   :  { %v8820_v47 = vpop.eup %8819 }
0x1375   :  { %5058 = vrot.lane.b32.xlu1 %v8820_v47, %s8848_s29  ;;  %5132 = vrot.lane.b32.xlu0 %v5088_v17, %s8849_s4 }
0x1376   :  { %v6203_v51 = vpop.f32.mrf.mxu3  ;;  %8143 = vmatmul.msk.f32.gmra.mxu1 %vm5859_vm6, %v13428_v14  ;;  %v13431_v14 = vmax.f32 %v12395_v34, 0.0 }
0x1377   :  { %v4965_v11 = vpop.permute.xlu0 %4964  ;;  %v5123_v63 = vpop.permute.xlu2 %5122  ;;  %v6241_v13 = vadd.f32 %v6203_v51, %v6110_v62 }
0x1378   :  { %v4999_v56 = vadd.f32 %v4965_v11, %v4839_v29  ;;  %7927 = vmatmul.msk.f32.gmra.mxu0 %vm1214_vm5, %v5123_v63  ;;  %v5943_v44 = vpop.f32.mrf.mxu1  ;;  %v6075_v27 = vpop.f32.mrf.mxu2 }
0x1379   :  { %v6257_v10 = vmax.f32 %v6241_v13, 0.0  ;;  %v5980_v21 = vadd.f32 %v12543_v54, %v5943_v44 }
0x137a   :  { %8821 = vtanh.f32 %v4999_v56 }
0x137b   :  { %8175 = vmatmul.msk.f32.gmra.mxu3 %vm1214_vm5, %v6257_v10  ;;  %v6111_v0 = vadd.f32 %v6075_v27, %v5980_v21  ;;  %v13432_v27 = vmax.f32 %v12411_v7, 0.0 }
0x137e   :  { %v6206_v25 = vpop.f32.mrf.mxu3  ;;  %8144 = vmatmul.msk.f32.gmra.mxu1 %vm5859_vm6, %v13429_v60 }
0x137f   :  { %v5125_v4 = vpop.permute.xlu2 %5124  ;;  %v6242_v41 = vadd.f32 %v6206_v25, %v6111_v0 }
0x1380   :  { %v8822_v52 = vpop.eup %8821  ;;  %7928 = vmatmul.msk.f32.gmra.mxu0 %vm1214_vm5, %v5125_v4  ;;  %v5946_v46 = vpop.f32.mrf.mxu1 }
0x1381   :  { %5060 = vrot.lane.b32.xlu0 %v8822_v52, %s8848_s29  ;;  %v6258_v30 = vmax.f32 %v6242_v41, 0.0  ;;  %v5981_v28 = vadd.f32 %v12543_v54, %v5946_v46  ;;  %v6078_v17 = vpop.f32.mrf.mxu2 }
0x1383   :  { %8176 = vmatmul.msk.f32.gmra.mxu3 %vm1214_vm5, %v6258_v30  ;;  %v6112_v58 = vadd.f32 %v6078_v17, %v5981_v28  ;;  %v13433_v30 = vmax.f32 %v12429_v12, 0.0 }
0x1386   :  { %v6209_v47 = vpop.f32.mrf.mxu3  ;;  %8145 = vmatmul.msk.f32.gmra.mxu1 %vm5859_vm6, %v13430_v40 }
0x1387   :  { %v6243_v53 = vadd.f32 %v6209_v47, %v6112_v58  ;;  %v4840_v47 = vmul.f32 %v12149_v8, %v11812_v57 }
0x1388   :  { %v5949_v29 = vpop.f32.mrf.mxu1 }
0x1389   :  { %v6259_v32 = vmax.f32 %v6243_v53, 0.0  ;;  %v5982_v62 = vadd.f32 %v12543_v54, %v5949_v29  ;;  %v6081_v11 = vpop.f32.mrf.mxu2 }
0x138b   :  { %8177 = vmatmul.msk.f32.gmra.mxu3 %vm1214_vm5, %v6259_v32  ;;  %v6113_v51 = vadd.f32 %v6081_v11, %v5982_v62  ;;  %v13434_v11 = vmax.f32 %v12449_v3, 0.0 }
0x138e   :  { %8146 = vmatmul.msk.f32.gmra.mxu1 %vm5859_vm6, %v13431_v14  ;;  %v6212_v56 = vpop.f32.mrf.mxu3 }
0x138f   :  { %v6244_v63 = vadd.f32 %v6212_v56, %v6113_v51 }
0x1390   :  { %v5952_v10 = vpop.f32.mrf.mxu1  ;;  %v4967_v7 = vpop.permute.xlu0 %4966 }
0x1391   :  { %v6260_v13 = vmax.f32 %v6244_v63, 0.0  ;;  %v5983_v26 = vadd.f32 %v12543_v54, %v5952_v10  ;;  %v6084_v44 = vpop.f32.mrf.mxu2  ;;  %v5000_v29 = vadd.f32 %v4967_v7, %v4840_v47 }
0x1393   :  { %8178 = vmatmul.msk.f32.gmra.mxu3 %vm1214_vm5, %v6260_v13  ;;  %v6114_v21 = vadd.f32 %v6084_v44, %v5983_v26  ;;  %8823 = vtanh.f32 %v5000_v29  ;;  %v4841_v44 = vmul.f32 %v12217_v18, %v11820_v19 }
0x1396   :  { %8147 = vmatmul.msk.f32.gmra.mxu1 %vm5859_vm6, %v13432_v27  ;;  %v6215_v0 = vpop.f32.mrf.mxu3 }
0x1397   :  { %v6245_v25 = vadd.f32 %v6215_v0, %v6114_v21  ;;  %v13435_v21 = vmax.f32 %v12467_v33, 0.0 }
0x1398   :  { %v5955_v34 = vpop.f32.mrf.mxu1 }
0x1399   :  { %v6261_v60 = vmax.f32 %v6245_v25, 0.0  ;;  %v5984_v52 = vadd.f32 %v12543_v54, %v5955_v34  ;;  %v6087_v4 = vpop.f32.mrf.mxu2 }
0x139b   :  { %8179 = vmatmul.msk.f32.gmra.mxu3 %vm1214_vm5, %v6261_v60  ;;  %v6115_v41 = vadd.f32 %v6087_v4, %v5984_v52  ;;  %v8824_v60 = vpop.eup %8823 }
0x139e   :  { %8148 = vmatmul.msk.f32.gmra.mxu1 %vm5859_vm6, %v13433_v30  ;;  %v6218_v46 = vpop.f32.mrf.mxu3 }
0x139f   :  { %v6246_v28 = vadd.f32 %v6218_v46, %v6115_v41 }
0x13a0   :  { %v5958_v58 = vpop.f32.mrf.mxu1 }
0x13a1   :  { %v6262_v17 = vmax.f32 %v6246_v28, 0.0  ;;  %v5985_v40 = vadd.f32 %v12543_v54, %v5958_v58  ;;  %v6090_v53 = vpop.f32.mrf.mxu2 }
0x13a3   :  { %8180 = vmatmul.msk.f32.gmra.mxu3 %vm1214_vm5, %v6262_v17  ;;  %v6116_v62 = vadd.f32 %v6090_v53, %v5985_v40 }
0x13a6   :  { %v5127_v32 = vpop.permute.xlu2 %5126  ;;  %8149 = vmatmul.msk.f32.gmra.mxu1 %vm5859_vm6, %v13434_v11  ;;  %v6221_v14 = vpop.f32.mrf.mxu3  ;;  %v7024_v11 = vld [vmem:[%s13288_s1 + $0x180] sm:$0xff] }
0x13a7   :  { %7929 = vmatmul.msk.f32.gmra.mxu0 %vm1214_vm5, %v5127_v32  ;;  %v5049_v12 = vpop.permute.xlu1 %5048  ;;  %v6247_v56 = vadd.f32 %v6221_v14, %v6116_v62 }
0x13a8   :  { %v5089_v51 = vmul.f32 %v5049_v12, %v11934_v42  ;;  %v5961_v63 = vpop.f32.mrf.mxu1  ;;  %v7025_v12 = vld [vmem:[%s13288_s1 + $0x188] sm:$0xff] }
0x13a9   :  { %v6263_v57 = vmax.f32 %v6247_v56, 0.0  ;;  %v5986_v13 = vadd.f32 %v12543_v54, %v5961_v63  ;;  %v6093_v10 = vpop.f32.mrf.mxu2  ;;  %7200 = vmatpush.msra.mxu3 %v7025_v12  ;;  %v7023_v56 = vld [vmem:[%s13288_s1 + $0x178] sm:$0xff] }
0x13aa   :  { %5134 = vrot.lane.b32.xlu2 %v5089_v51, %s8849_s4 }
0x13ab   :  { %8181 = vmatmul.msk.f32.gmra.mxu3 %vm1214_vm5, %v6263_v57  ;;  %v6117_v42 = vadd.f32 %v6093_v10, %v5986_v13  ;;  %v7021_v10 = vld [vmem:[%s13288_s1 + $0x168] sm:$0xff] }
0x13ac   :  { %7201 = vmatpush.msra.mxu3 %v7024_v11 }
0x13ae   :  { %v5129_v26 = vpop.permute.xlu2 %5128  ;;  %8150 = vmatmul.msk.f32.gmra.mxu1 %vm5859_vm6, %v13435_v21  ;;  %v6224_v25 = vpop.f32.mrf.mxu3  ;;  %7202 = vmatpush.msra.mxu3 %v7023_v56 }
0x13af   :  { %7930 = vmatmul.msk.f32.gmra.mxu0 %vm1214_vm5, %v5129_v26  ;;  %v5051_v3 = vpop.permute.xlu1 %5050  ;;  %v6248_v52 = vadd.f32 %v6224_v25, %v6117_v42  ;;  %v7020_v42 = vld [vmem:[%s13288_s1 + $0x160] sm:$0xff]  ;;  %v7017_v25 = vld [vmem:[%s13288_s1 + $0x148] sm:$0xff] }
0x13b0   :  { %v5090_v27 = vmul.f32 %v5051_v3, %v11957_v38  ;;  %v4969_v0 = vpop.permute.xlu0 %4968  ;;  %v5964_v41 = vpop.f32.mrf.mxu1  ;;  %v13436_v38 = vmax.f32 %v12485_v15, 0.0  ;;  %v13438_v3 = vmax.f32 %v12525_v31, 0.0  ;;  %v7018_v31 = vld [vmem:[%s13288_s1 + $0x150] sm:$0xff] }
0x13b1   :  { %v5001_v34 = vadd.f32 %v4969_v0, %v4841_v44  ;;  %v6264_v4 = vmax.f32 %v6248_v52, 0.0  ;;  %v5987_v19 = vadd.f32 %v12543_v54, %v5964_v41  ;;  %v6096_v33 = vpop.f32.mrf.mxu2 }
0x13b2   :  { %5062 = vrot.lane.b32.xlu2 %v8824_v60, %s8848_s29  ;;  %5136 = vrot.lane.b32.xlu1 %v5090_v27, %s8849_s4  ;;  %v7019_v27 = vld [vmem:[%s13288_s1 + $0x158] sm:$0xff]  ;;  %v7016_v60 = vld [vmem:[%s13288_s1 + $0x140] sm:$0xff] }
0x13b3   :  { %8825 = vtanh.f32 %v5001_v34  ;;  %8182 = vmatmul.msk.f32.gmra.mxu3 %vm1214_vm5, %v6264_v4  ;;  %v6118_v30 = vadd.f32 %v6096_v33, %v5987_v19 }
0x13b6   :  { %8151 = vmatmul.msk.f32.gmra.mxu1 %vm5859_vm6, %v13436_v38  ;;  %v6227_v28 = vpop.f32.mrf.mxu3  ;;  %v5057_v15 = vpop.permute.xlu2 %5056 }
0x13b7   :  { %v5053_v46 = vpop.permute.xlu1 %5052  ;;  %v6249_v58 = vadd.f32 %v6227_v28, %v6118_v30  ;;  %v5093_v51 = vmul.f32 %v5057_v15, %v12017_v55  ;;  %v12733_v30 = vld [vmem:[%s13288_s1 + $0x58] ss:$0 sm:$0xff] }
0x13b8   :  { %v5091_v7 = vmul.f32 %v5053_v46, %v11982_v9  ;;  %v5967_v40 = vpop.f32.mrf.mxu1  ;;  %v13437_v9 = vmax.f32 %v12504_v2, 0.0  ;;  %v7022_v2 = vld [vmem:[%s13288_s1 + $0x170] sm:$0xff] }
0x13b9   :  { %v8826_v17 = vpop.eup %8825  ;;  %v6265_v47 = vmax.f32 %v6249_v58, 0.0  ;;  %v5988_v53 = vadd.f32 %v12543_v54, %v5967_v40  ;;  %v6099_v32 = vpop.f32.mrf.mxu2  ;;  %7203 = vmatpush.msra.mxu3 %v7022_v2 }
0x13ba   :  { %5064 = vrot.lane.b32.xlu1 %v8826_v17, %s8848_s29  ;;  %5138 = vrot.lane.b32.xlu0 %v5091_v7, %s8849_s4 }
0x13bb   :  { %8183 = vmatmul.msk.f32.gmra.mxu3 %vm1214_vm5, %v6265_v47  ;;  %v6119_v29 = vadd.f32 %v6099_v32, %v5988_v53 }
0x13bc   :  { %7204 = vmatpush.msra.mxu3 %v7021_v10 }
0x13be   :  { %8152 = vmatmul.msk.f32.gmra.mxu1 %vm5859_vm6, %v13437_v9  ;;  %v6230_v62 = vpop.f32.mrf.mxu3  ;;  %7205 = vmatpush.msra.mxu3 %v7020_v42 }
0x13bf   :  { %v6250_v14 = vadd.f32 %v6230_v62, %v6119_v29 }
0x13c0   :  { %v5970_v63 = vpop.f32.mrf.mxu1  ;;  %7206 = vmatpush.msra.mxu3 %v7019_v27 }
0x13c1   :  { %v6266_v57 = vmax.f32 %v6250_v14, 0.0  ;;  %v5989_v13 = vadd.f32 %v12543_v54, %v5970_v63  ;;  %v6102_v55 = vpop.f32.mrf.mxu2 }
0x13c2   :  { %5142 = vrot.lane.b32.xlu0 %v5093_v51, %s8849_s4  ;;  %7207 = vmatpush.msra.mxu3 %v7018_v31 }
0x13c3   :  { %8184 = vmatmul.msk.f32.gmra.mxu3 %vm1214_vm5, %v6266_v57  ;;  %v6120_v26 = vadd.f32 %v6102_v55, %v5989_v13 }
0x13c4   :  { %7208 = vmatpush.msra.mxu3 %v7017_v25 }
0x13c6   :  { %8153 = vmatmul.msk.f32.gmra.mxu1 %vm5859_vm6, %v13438_v3  ;;  %v6233_v44 = vpop.f32.mrf.mxu3  ;;  %7209 = vmatpush.msra.mxu3 %v7016_v60 }
0x13c7   :  { %v6251_v21 = vadd.f32 %v6233_v44, %v6120_v26 }
0x13c9   :  { %v6267_v0 = vmax.f32 %v6251_v21, 0.0 }
0x13cb   :  { %8185 = vmatmul.msk.f32.gmra.mxu3 %vm1214_vm5, %v6267_v0 }
0x13de   :  { %v5055_v34 = vpop.permute.xlu0 %5054 }
0x13df   :  { %v5092_v52 = vmul.f32 %v5055_v34, %v12054_v43  ;;  %v5131_v4 = vpop.permute.xlu1 %5130 }
0x13e0   :  { %7931 = vmatmul.msk.f32.gmra.mxu0 %vm1214_vm5, %v5131_v4  ;;  %v12767_v4 = vpop.f32.mrf.mxu3 }
0x13e1   :  { %5140 = vrot.lane.b32.xlu2 %v5092_v52, %s8849_s4 }
0x13e7   :  { %v5133_v41 = vpop.permute.xlu0 %5132  ;;  %v5059_v19 = vpop.permute.xlu1 %5058 }
0x13e8   :  { %v5094_v33 = vmul.f32 %v5059_v19, %v12074_v35  ;;  %7932 = vmatmul.msk.f32.gmra.mxu0 %vm1214_vm5, %v5133_v41  ;;  %v8041_v41 = vld [vmem:[%s13289_s0 + $0x580] sm:$0xff] }
0x13ea   :  { %5144 = vrot.lane.b32.xlu1 %v5094_v33, %s8849_s4 }
0x13ed   :  { %v5201_v38 = vpop.f32.mrf.mxu0 }
0x13ee   :  { %v5202_v43 = vadd.f32 %v12733_v30, %v5201_v38 }
0x13f0   :  { %v5249_v46 = vmax.f32 %v5202_v43, 0.0  ;;  %v8042_v43 = vld [vmem:[%s13289_s0 + $0x588] sm:$0xff] }
0x13f2   :  { %8250 = vmatmul.msk.f32.vlgmr.msra.gmra.mxu3 %vm7145_vm7, %v5249_v46  ;;  %v12778_v46 = vpop.f32.mrf.mxu3 }
0x13f3   :  { %v5061_v28 = vpop.permute.xlu0 %5060 }
0x13f4   :  { %v5095_v17 = vmul.f32 %v5061_v28, %v12102_v23  ;;  %v8043_v28 = vld [vmem:[%s13289_s0 + $0x590] sm:$0xff] }
0x13f5   :  { %v5204_v35 = vpop.f32.mrf.mxu0 }
0x13f6   :  { %5146 = vrot.lane.b32.xlu2 %v5095_v17, %s8849_s4  ;;  %v5205_v7 = vadd.f32 %v12733_v30, %v5204_v35 }
0x13f8   :  { %v5250_v58 = vmax.f32 %v5205_v7, 0.0 }
0x13fa   :  { %8251 = vmatmul.msk.f32.gmra.mxu3 %vm7145_vm7, %v5250_v58  ;;  %v12787_v7 = vpop.f32.mrf.mxu3 }
0x13fd   :  { %v5207_v47 = vpop.f32.mrf.mxu0 }
0x13fe   :  { %v5208_v40 = vadd.f32 %v12733_v30, %v5207_v47  ;;  %v8044_v47 = vld [vmem:[%s13289_s0 + $0x598] sm:$0xff] }
0x1400   :  { %v5251_v53 = vmax.f32 %v5208_v40, 0.0 }
0x1402   :  { %8252 = vmatmul.msk.f32.gmra.mxu3 %vm7145_vm7, %v5251_v53 }
0x1404   :  { %v5135_v32 = vpop.permute.xlu2 %5134 }
0x1405   :  { %7933 = vmatmul.msk.f32.gmra.mxu0 %vm1214_vm5, %v5135_v32 }
0x140c   :  { %v5063_v15 = vpop.permute.xlu2 %5062 }
0x140d   :  { %v5096_v23 = vmul.f32 %v5063_v15, %v12149_v8  ;;  %v12795_v15 = vpop.f32.mrf.mxu3 }
0x140f   :  { %5148 = vrot.lane.b32.xlu0 %v5096_v23, %s8849_s4  ;;  %v8045_v23 = vld [vmem:[%s13289_s0 + $0x5a0] sm:$0xff] }
0x1424   :  { %v5210_v29 = vpop.f32.mrf.mxu0  ;;  %v5137_v12 = vpop.permute.xlu1 %5136 }
0x1425   :  { %v5211_v9 = vadd.f32 %v12733_v30, %v5210_v29  ;;  %7934 = vmatmul.msk.f32.gmra.mxu0 %vm1214_vm5, %v5137_v12  ;;  %v8046_v29 = vld [vmem:[%s13289_s0 + $0x5a8] sm:$0xff]  ;;  %v8047_v12 = vld [vmem:[%s13289_s0 + $0x5b0] sm:$0xff] }
0x1427   :  { %v5252_v62 = vmax.f32 %v5211_v9, 0.0 }
0x1429   :  { %8253 = vmatmul.msk.f32.gmra.mxu3 %vm7145_vm7, %v5252_v62 }
0x142c   :  { %v5213_v11 = vpop.f32.mrf.mxu0  ;;  %v5065_v51 = vpop.permute.xlu1 %5064 }
0x142d   :  { %v5214_v14 = vadd.f32 %v12733_v30, %v5213_v11  ;;  %v5139_v56 = vpop.permute.xlu0 %5138  ;;  %v5097_v57 = vmul.f32 %v5065_v51, %v12217_v18  ;;  %v12811_v11 = vpop.f32.mrf.mxu3 }
0x142e   :  { %7935 = vmatmul.msk.f32.gmra.mxu0 %vm1214_vm5, %v5139_v56 }
0x142f   :  { %v5253_v8 = vmax.f32 %v5214_v14, 0.0  ;;  %5150 = vrot.lane.b32.xlu1 %v5097_v57, %s8849_s4  ;;  %v8048_v14 = vld [vmem:[%s13289_s0 + $0x5b8] sm:$0xff] }
0x1431   :  { %8254 = vmatmul.msk.f32.gmra.mxu3 %vm7145_vm7, %v5253_v8 }
0x1435   :  { %v5143_v63 = vpop.permute.xlu0 %5142 }
0x143b   :  { %v5141_v2 = vpop.permute.xlu2 %5140 }
0x143c   :  { %7936 = vmatmul.msk.f32.gmra.mxu0 %vm1214_vm5, %v5141_v2  ;;  %v12819_v2 = vpop.f32.mrf.mxu3 }
0x1444   :  { %7937 = vmatmul.msk.f32.gmra.mxu0 %vm1214_vm5, %v5143_v63  ;;  %v8049_v63 = vld [vmem:[%s13289_s0 + $0x5c0] sm:$0xff] }
0x1450   :  { %v5147_v26 = vpop.permute.xlu2 %5146 }
0x145c   :  { %v5145_v13 = vpop.permute.xlu1 %5144 }
0x145d   :  { %v5216_v55 = vpop.f32.mrf.mxu0  ;;  %7938 = vmatmul.msk.f32.gmra.mxu0 %vm1214_vm5, %v5145_v13  ;;  %v8050_v13 = vld [vmem:[%s13289_s0 + $0x5c8] sm:$0xff] }
0x145e   :  { %v5217_v10 = vadd.f32 %v12733_v30, %v5216_v55  ;;  %v8051_v55 = vld [vmem:[%s13289_s0 + $0x5d0] sm:$0xff] }
0x1460   :  { %v5254_v18 = vmax.f32 %v5217_v10, 0.0 }
0x1462   :  { %8255 = vmatmul.msk.f32.gmra.mxu3 %vm7145_vm7, %v5254_v18  ;;  %v8052_v18 = vld [vmem:[%s13289_s0 + $0x5d8] sm:$0xff] }
0x1465   :  { %v5219_v3 = vpop.f32.mrf.mxu0  ;;  %7939 = vmatmul.msk.f32.gmra.mxu0 %vm1214_vm5, %v5147_v26 }
0x1466   :  { %v5220_v44 = vadd.f32 %v12733_v30, %v5219_v3 }
0x1468   :  { %v5255_v42 = vmax.f32 %v5220_v44, 0.0  ;;  %v12839_v44 = vpop.f32.mrf.mxu3 }
0x146a   :  { %8256 = vmatmul.msk.f32.gmra.mxu3 %vm7145_vm7, %v5255_v42  ;;  %v8053_v42 = vld [vmem:[%s13289_s0 + $0x5e0] sm:$0xff] }
0x1481   :  { %v5149_v21 = vpop.permute.xlu0 %5148 }
0x1482   :  { %v5222_v27 = vpop.f32.mrf.mxu0  ;;  %7940 = vmatmul.msk.f32.gmra.mxu0 %vm1214_vm5, %v5149_v21  ;;  %v8054_v21 = vld [vmem:[%s13289_s0 + $0x5e8] sm:$0xff] }
0x1483   :  { %v5223_v0 = vadd.f32 %v12733_v30, %v5222_v27  ;;  %v6713_v27 = vld [vmem:[%s13288_s1 + $0xe8] sm:$0xff] }
0x1485   :  { %v5256_v31 = vmax.f32 %v5223_v0, 0.0  ;;  %v8055_v0 = vld [vmem:[%s13289_s0 + $0x5f0] sm:$0xff] }
0x1487   :  { %8257 = vmatmul.msk.f32.gmra.mxu3 %vm7145_vm7, %v5256_v31 }
0x14a1   :  { %v5151_v25 = vpop.permute.xlu1 %5150 }
0x14a2   :  { %v5225_v60 = vpop.f32.mrf.mxu0  ;;  %7941 = vmatmul.msk.f32.gmra.mxu0 %vm1214_vm5, %v5151_v25  ;;  %v8056_v25 = vld [vmem:[%s13289_s0 + $0x5f8] sm:$0xff] }
0x14a3   :  { %v5226_v34 = vadd.f32 %v12733_v30, %v5225_v60 }
0x14a5   :  { %v5257_v52 = vmax.f32 %v5226_v34, 0.0 }
0x14a7   :  { %8258 = vmatmul.msk.f32.gmra.mxu3 %vm7145_vm7, %v5257_v52  ;;  %v12862_v52 = vpop.f32.mrf.mxu3 }
0x14aa   :  { %8058 = vmatmul.msk.f32.vlgmr.msrb.gmra.mxu0 %vm31_vm1, %v8041_v41 }
0x14ab   :  { %v5228_v19 = vpop.f32.mrf.mxu0  ;;  %6774 = vmatpush.msrb.mxu0 %v6713_v27 }
0x14ac   :  { %v5229_v33 = vadd.f32 %v12733_v30, %v5228_v19  ;;  %v12868_v19 = vld [vmem:[%s13288_s1 + $0x70] ss:$0 sm:$0xff] }
0x14ae   :  { %v5258_v38 = vmax.f32 %v5229_v33, 0.0 }
0x14b0   :  { %8259 = vmatmul.msk.f32.gmra.mxu3 %vm7145_vm7, %v5258_v38 }
0x14b2   :  { %8059 = vmatmul.msk.f32.gmra.mxu0 %vm31_vm1, %v8042_v43  ;;  %v13439_v43 = vmax.f32 %v12214_v20, 0.0 }
0x14b9   :  { %v5231_v17 = vpop.f32.mrf.mxu0 }
0x14ba   :  { %v5232_v35 = vadd.f32 %v12733_v30, %v5231_v17  ;;  %8060 = vmatmul.msk.f32.gmra.mxu0 %vm31_vm1, %v8043_v28 }
0x14bc   :  { %v5259_v58 = vmax.f32 %v5232_v35, 0.0  ;;  %v13440_v35 = vmax.f32 %v12257_v59, 0.0 }
0x14be   :  { %8260 = vmatmul.msk.f32.gmra.mxu3 %vm7145_vm7, %v5259_v58  ;;  %v6712_v58 = vld [vmem:[%s13288_s1 + $0xe0] sm:$0xff] }
0x14bf   :  { %6775 = vmatpush.msrb.mxu0 %v6712_v58 }
0x14c1   :  { %v5234_v40 = vpop.f32.mrf.mxu0 }
0x14c2   :  { %v5235_v53 = vadd.f32 %v12733_v30, %v5234_v40  ;;  %8061 = vmatmul.msk.f32.gmra.mxu0 %vm31_vm1, %v8044_v47 }
0x14c4   :  { %v5260_v32 = vmax.f32 %v5235_v53, 0.0  ;;  %v13441_v53 = vmax.f32 %v12274_v1, 0.0  ;;  %v13443_v1 = vmax.f32 %v12310_v24, 0.0 }
0x14c6   :  { %8261 = vmatmul.msk.f32.gmra.mxu3 %vm7145_vm7, %v5260_v32 }
0x14ca   :  { %8062 = vmatmul.msk.f32.gmra.mxu0 %vm31_vm1, %v8045_v23 }
0x14d2   :  { %8063 = vmatmul.msk.f32.gmra.mxu0 %vm31_vm1, %v8046_v29  ;;  %v13442_v29 = vmax.f32 %v12290_v5, 0.0  ;;  %v13444_v5 = vmax.f32 %v12330_v16, 0.0 }
0x14da   :  { %v5237_v9 = vpop.f32.mrf.mxu0  ;;  %8064 = vmatmul.msk.f32.gmra.mxu0 %vm31_vm1, %v8047_v12 }
0x14db   :  { %v5238_v62 = vadd.f32 %v12733_v30, %v5237_v9 }
0x14dd   :  { %v5261_v51 = vmax.f32 %v5238_v62, 0.0 }
0x14df   :  { %8262 = vmatmul.msk.f32.gmra.mxu3 %vm7145_vm7, %v5261_v51 }
0x14e2   :  { %v5240_v56 = vpop.f32.mrf.mxu0  ;;  %8065 = vmatmul.msk.f32.gmra.mxu0 %vm31_vm1, %v8048_v14 }
0x14e3   :  { %v5241_v57 = vadd.f32 %v12733_v30, %v5240_v56 }
0x14e5   :  { %v5262_v8 = vmax.f32 %v5241_v57, 0.0  ;;  %v6711_v57 = vld [vmem:[%s13288_s1 + $0xd8] sm:$0xff] }
0x14e6   :  { %6776 = vmatpush.msrb.mxu0 %v6711_v57 }
0x14e7   :  { %8263 = vmatmul.msk.f32.gmra.mxu3 %vm7145_vm7, %v5262_v8 }
0x14ea   :  { %8066 = vmatmul.msk.f32.gmra.mxu0 %vm31_vm1, %v8049_v63 }
0x14f2   :  { %8067 = vmatmul.msk.f32.gmra.mxu0 %vm31_vm1, %v8050_v13  ;;  %v13445_v13 = vmax.f32 %v12351_v6, 0.0  ;;  %v13447_v6 = vmax.f32 %v12390_v36, 0.0 }
0x14fa   :  { %8068 = vmatmul.msk.f32.gmra.mxu0 %vm31_vm1, %v8051_v55 }
0x14ff   :  { %v5243_v10 = vpop.f32.mrf.mxu0 }
0x1500   :  { %v5244_v26 = vadd.f32 %v12733_v30, %v5243_v10 }
0x1502   :  { %v5263_v3 = vmax.f32 %v5244_v26, 0.0  ;;  %8069 = vmatmul.msk.f32.gmra.mxu0 %vm31_vm1, %v8052_v18  ;;  %v13446_v18 = vmax.f32 %v12371_v45, 0.0  ;;  %v13448_v45 = vmax.f32 %v12406_v61, 0.0 }
0x1504   :  { %8264 = vmatmul.msk.f32.gmra.mxu3 %vm7145_vm7, %v5263_v3 }
0x150a   :  { %8070 = vmatmul.msk.f32.gmra.mxu0 %vm31_vm1, %v8053_v42 }
0x1512   :  { %8071 = vmatmul.msk.f32.gmra.mxu0 %vm31_vm1, %v8054_v21 }
0x151a   :  { %8072 = vmatmul.msk.f32.gmra.mxu0 %vm31_vm1, %v8055_v0 }
0x151f   :  { %v5246_v31 = vpop.f32.mrf.mxu0 }
0x1520   :  { %v5247_v60 = vadd.f32 %v12733_v30, %v5246_v31  ;;  %v6710_v31 = vld [vmem:[%s13288_s1 + $0xd0] sm:$0xff] }
0x1521   :  { %6777 = vmatpush.msrb.mxu0 %v6710_v31 }
0x1522   :  { %v5264_v34 = vmax.f32 %v5247_v60, 0.0  ;;  %8073 = vmatmul.msk.f32.gmra.mxu0 %vm31_vm1, %v8056_v25 }
0x1524   :  { %8265 = vmatmul.msk.f32.gmra.mxu3 %vm7145_vm7, %v5264_v34  ;;  %v13449_v34 = vmax.f32 %v12423_v49, 0.0  ;;  %v13451_v49 = vmax.f32 %v12461_v22, 0.0 }
0x1527   :  { %v5792_v41 = vpop.f32.mrf.mxu0 }
0x1528   :  { %v5793_v33 = vadd.f32 %v12868_v19, %v5792_v41 }
0x152a   :  { %v5840_v38 = vmax.f32 %v5793_v33, 0.0  ;;  %8122 = vmatmul.msk.f32.vlgmr.msra.gmra.mxu0 %vm5859_vm6, %v13439_v43 }
0x152c   :  { %8154 = vmatmul.msk.f32.vlgmr.msrb.gmra.mxu2 %vm5859_vm6, %v5840_v38  ;;  %v13450_v38 = vmax.f32 %v12442_v50, 0.0  ;;  %v13452_v50 = vmax.f32 %v12480_v48, 0.0 }
0x152f   :  { %v5795_v30 = vpop.f32.mrf.mxu0 }
0x1530   :  { %v5796_v28 = vadd.f32 %v12868_v19, %v5795_v30 }
0x1532   :  { %v5841_v17 = vmax.f32 %v5796_v28, 0.0  ;;  %8123 = vmatmul.msk.f32.gmra.mxu0 %vm5859_vm6, %v13440_v35 }
0x1534   :  { %8155 = vmatmul.msk.f32.gmra.mxu2 %vm5859_vm6, %v5841_v17  ;;  %v6366_v17 = vpop.f32.mrf.mxu1 }
0x1537   :  { %v5798_v20 = vpop.f32.mrf.mxu0 }
0x1538   :  { %v5799_v47 = vadd.f32 %v12868_v19, %v5798_v20 }
0x153a   :  { %v5842_v40 = vmax.f32 %v5799_v47, 0.0  ;;  %8124 = vmatmul.msk.f32.gmra.mxu0 %vm5859_vm6, %v13441_v53  ;;  %v6866_v47 = vld [vmem:[%s13288_s1 + $0x130] sm:$0xff] }
0x153b   :  { %6926 = vmatpush.msrb.mxu1 %v6866_v47 }
0x153c   :  { %8156 = vmatmul.msk.f32.gmra.mxu2 %vm5859_vm6, %v5842_v40  ;;  %v6369_v53 = vpop.f32.mrf.mxu1 }
0x153f   :  { %v5801_v59 = vpop.f32.mrf.mxu0 }
0x1540   :  { %v5802_v32 = vadd.f32 %v12868_v19, %v5801_v59 }
0x1542   :  { %v5843_v23 = vmax.f32 %v5802_v32, 0.0  ;;  %8125 = vmatmul.msk.f32.gmra.mxu0 %vm5859_vm6, %v13442_v29  ;;  %v13453_v32 = vmax.f32 %v12499_v39, 0.0 }
0x1544   :  { %8157 = vmatmul.msk.f32.gmra.mxu2 %vm5859_vm6, %v5843_v23 }
0x1547   :  { %v5804_v12 = vpop.f32.mrf.mxu0 }
0x1548   :  { %v5805_v9 = vadd.f32 %v12868_v19, %v5804_v12  ;;  %v13454_v12 = vmax.f32 %v12520_v37, 0.0 }
0x154a   :  { %v5844_v62 = vmax.f32 %v5805_v9, 0.0  ;;  %8126 = vmatmul.msk.f32.gmra.mxu0 %vm5859_vm6, %v13443_v1  ;;  %v6372_v9 = vpop.f32.mrf.mxu1 }
0x154c   :  { %8158 = vmatmul.msk.f32.gmra.mxu2 %vm5859_vm6, %v5844_v62  ;;  %v6865_v62 = vld [vmem:[%s13288_s1 + $0x128] sm:$0xff] }
0x154d   :  { %6927 = vmatpush.msrb.mxu1 %v6865_v62 }
0x154f   :  { %v5807_v51 = vpop.f32.mrf.mxu0 }
0x1550   :  { %v5808_v14 = vadd.f32 %v12868_v19, %v5807_v51 }
0x1552   :  { %v5845_v56 = vmax.f32 %v5808_v14, 0.0  ;;  %8127 = vmatmul.msk.f32.gmra.mxu0 %vm5859_vm6, %v13444_v5  ;;  %v6375_v51 = vpop.f32.mrf.mxu1 }
0x1554   :  { %8159 = vmatmul.msk.f32.gmra.mxu2 %vm5859_vm6, %v5845_v56 }
0x1557   :  { %v5810_v24 = vpop.f32.mrf.mxu0 }
0x1558   :  { %v5811_v8 = vadd.f32 %v12868_v19, %v5810_v24  ;;  %v6864_v24 = vld [vmem:[%s13288_s1 + $0x120] sm:$0xff] }
0x1559   :  { %6928 = vmatpush.msrb.mxu1 %v6864_v24 }
0x155a   :  { %v5846_v63 = vmax.f32 %v5811_v8, 0.0  ;;  %8128 = vmatmul.msk.f32.gmra.mxu0 %vm5859_vm6, %v13445_v13 }
0x155c   :  { %8160 = vmatmul.msk.f32.gmra.mxu2 %vm5859_vm6, %v5846_v63  ;;  %v6378_v63 = vpop.f32.mrf.mxu1 }
0x155f   :  { %v5813_v16 = vpop.f32.mrf.mxu0 }
0x1560   :  { %v5814_v55 = vadd.f32 %v12868_v19, %v5813_v16 }
0x1562   :  { %v5847_v10 = vmax.f32 %v5814_v55, 0.0  ;;  %8129 = vmatmul.msk.f32.gmra.mxu0 %vm5859_vm6, %v13446_v18 }
0x1564   :  { %8161 = vmatmul.msk.f32.gmra.mxu2 %vm5859_vm6, %v5847_v10 }
0x1567   :  { %v5816_v26 = vpop.f32.mrf.mxu0 }
0x1568   :  { %v5817_v3 = vadd.f32 %v12868_v19, %v5816_v26 }
0x156a   :  { %v5848_v42 = vmax.f32 %v5817_v3, 0.0  ;;  %8130 = vmatmul.msk.f32.gmra.mxu0 %vm5859_vm6, %v13447_v6 }
0x156c   :  { %8162 = vmatmul.msk.f32.gmra.mxu2 %vm5859_vm6, %v5848_v42 }
0x156f   :  { %v5819_v21 = vpop.f32.mrf.mxu0 }
0x1570   :  { %v5820_v27 = vadd.f32 %v12868_v19, %v5819_v21  ;;  %v6381_v21 = vpop.f32.mrf.mxu1 }
0x1572   :  { %v5849_v0 = vmax.f32 %v5820_v27, 0.0  ;;  %8131 = vmatmul.msk.f32.gmra.mxu0 %vm5859_vm6, %v13448_v45  ;;  %v12976_v27 = vld [vmem:[%s13288_s1 + $0xa8] ss:$0 sm:$0xff] }
0x1574   :  { %8163 = vmatmul.msk.f32.gmra.mxu2 %vm5859_vm6, %v5849_v0 }
0x1577   :  { %v5822_v36 = vpop.f32.mrf.mxu0 }
0x1578   :  { %v5823_v25 = vadd.f32 %v12868_v19, %v5822_v36 }
0x157a   :  { %v5850_v60 = vmax.f32 %v5823_v25, 0.0  ;;  %8132 = vmatmul.msk.f32.gmra.mxu0 %vm5859_vm6, %v13449_v34 }
0x157c   :  { %8164 = vmatmul.msk.f32.gmra.mxu2 %vm5859_vm6, %v5850_v60 }
0x157f   :  { %v5825_v61 = vpop.f32.mrf.mxu0 }
0x1580   :  { %v5826_v41 = vadd.f32 %v12868_v19, %v5825_v61 }
0x1582   :  { %v5851_v33 = vmax.f32 %v5826_v41, 0.0  ;;  %8133 = vmatmul.msk.f32.gmra.mxu0 %vm5859_vm6, %v13450_v38  ;;  %v6384_v41 = vpop.f32.mrf.mxu1 }
0x1584   :  { %8165 = vmatmul.msk.f32.gmra.mxu2 %vm5859_vm6, %v5851_v33 }
0x1587   :  { %v5828_v43 = vpop.f32.mrf.mxu0 }
0x1588   :  { %v5829_v30 = vadd.f32 %v12868_v19, %v5828_v43 }
0x158a   :  { %v5852_v28 = vmax.f32 %v5829_v30, 0.0  ;;  %8134 = vmatmul.msk.f32.gmra.mxu0 %vm5859_vm6, %v13451_v49 }
0x158c   :  { %8166 = vmatmul.msk.f32.gmra.mxu2 %vm5859_vm6, %v5852_v28 }
0x158f   :  { %v5831_v35 = vpop.f32.mrf.mxu0 }
0x1590   :  { %v5832_v58 = vadd.f32 %v12868_v19, %v5831_v35  ;;  %v6862_v35 = vld [vmem:[%s13288_s1 + $0x110] sm:$0xff] }
0x1592   :  { %v5853_v20 = vmax.f32 %v5832_v58, 0.0  ;;  %8135 = vmatmul.msk.f32.gmra.mxu0 %vm5859_vm6, %v13452_v50 }
0x1594   :  { %8167 = vmatmul.msk.f32.gmra.mxu2 %vm5859_vm6, %v5853_v20 }
0x1597   :  { %v5834_v22 = vpop.f32.mrf.mxu0 }
0x1598   :  { %v5835_v40 = vadd.f32 %v12868_v19, %v5834_v22 }
0x159a   :  { %v5854_v59 = vmax.f32 %v5835_v40, 0.0  ;;  %8136 = vmatmul.msk.f32.gmra.mxu0 %vm5859_vm6, %v13453_v32 }
0x159c   :  { %8168 = vmatmul.msk.f32.gmra.mxu2 %vm5859_vm6, %v5854_v59 }
0x159f   :  { %v5837_v48 = vpop.f32.mrf.mxu0 }
0x15a0   :  { %v5838_v23 = vadd.f32 %v12868_v19, %v5837_v48 }
0x15a2   :  { %v5855_v29 = vmax.f32 %v5838_v23, 0.0  ;;  %8137 = vmatmul.msk.f32.gmra.mxu0 %vm5859_vm6, %v13454_v12 }
0x15a4   :  { %8169 = vmatmul.msk.f32.gmra.mxu2 %vm5859_vm6, %v5855_v29 }
0x15a7   :  { %v6285_v39 = vpop.f32.mrf.mxu0 }
0x15a8   :  { %v6333_v1 = vadd.f32 %v12543_v54, %v6285_v39 }
0x15aa   :  { %v6414_v14 = vadd.f32 %v6366_v17, %v6333_v1  ;;  %v6387_v17 = vpop.f32.mrf.mxu1 }
0x15af   :  { %v6288_v56 = vpop.f32.mrf.mxu0  ;;  %v6495_v19 = vpop.f32.mrf.mxu2 }
0x15b0   :  { %v6543_v5 = vadd.f32 %v6495_v19, %v6414_v14  ;;  %v6334_v37 = vadd.f32 %v12543_v54, %v6288_v56 }
0x15b2   :  { %v6559_v57 = vmax.f32 %v6543_v5, 0.0  ;;  %v6415_v8 = vadd.f32 %v6369_v53, %v6334_v37  ;;  %v6390_v59 = vpop.f32.mrf.mxu1 }
0x15b4   :  { %8186 = vmatmul.msk.f32.vlgmr.msrb.gmra.mxu0 %vm1214_vm5, %v6559_v57 }
0x15b7   :  { %v6291_v13 = vpop.f32.mrf.mxu0  ;;  %v6498_v16 = vpop.f32.mrf.mxu2 }
0x15b8   :  { %v6544_v55 = vadd.f32 %v6498_v16, %v6415_v8  ;;  %v6335_v10 = vadd.f32 %v12543_v54, %v6291_v13  ;;  %v6863_v54 = vld [vmem:[%s13288_s1 + $0x118] sm:$0xff]  ;;  %v6860_v16 = vld [vmem:[%s13288_s1 + $0x100] sm:$0xff] }
0x15b9   :  { %6929 = vmatpush.msrb.mxu1 %v6863_v54 }
0x15ba   :  { %v6560_v18 = vmax.f32 %v6544_v55, 0.0  ;;  %v6416_v26 = vadd.f32 %v6372_v9, %v6335_v10  ;;  %v6861_v9 = vld [vmem:[%s13288_s1 + $0x108] sm:$0xff]  ;;  %v6393_v14 = vpop.f32.mrf.mxu1 }
0x15bb   :  { %6930 = vmatpush.msrb.mxu1 %v6862_v35 }
0x15bc   :  { %8187 = vmatmul.msk.f32.gmra.mxu0 %vm1214_vm5, %v6560_v18 }
0x15bd   :  { %6931 = vmatpush.msrb.mxu1 %v6861_v9 }
0x15bf   :  { %v6294_v3 = vpop.f32.mrf.mxu0  ;;  %v6501_v42 = vpop.f32.mrf.mxu2  ;;  %6932 = vmatpush.msrb.mxu1 %v6860_v16 }
0x15c0   :  { %v6545_v6 = vadd.f32 %v6501_v42, %v6416_v26  ;;  %v6336_v0 = vadd.f32 %v12976_v27, %v6294_v3 }
0x15c2   :  { %v6561_v45 = vmax.f32 %v6545_v6, 0.0  ;;  %v6417_v31 = vadd.f32 %v6375_v51, %v6336_v0  ;;  %v6396_v13 = vpop.f32.mrf.mxu1 }
0x15c4   :  { %8188 = vmatmul.msk.f32.gmra.mxu0 %vm1214_vm5, %v6561_v45 }
0x15c7   :  { %v6297_v36 = vpop.f32.mrf.mxu0  ;;  %v6504_v25 = vpop.f32.mrf.mxu2 }
0x15c8   :  { %v6546_v60 = vadd.f32 %v6504_v25, %v6417_v31  ;;  %v6337_v34 = vadd.f32 %v12976_v27, %v6297_v36  ;;  %v6859_v25 = vld [vmem:[%s13288_s1 + $0xf8] sm:$0xff] }
0x15c9   :  { %6933 = vmatpush.msrb.mxu1 %v6859_v25 }
0x15ca   :  { %v6562_v61 = vmax.f32 %v6546_v60, 0.0  ;;  %v6418_v33 = vadd.f32 %v6378_v63, %v6337_v34  ;;  %v6399_v6 = vpop.f32.mrf.mxu1 }
0x15cc   :  { %8189 = vmatmul.msk.f32.gmra.mxu0 %vm1214_vm5, %v6562_v61 }
0x15cf   :  { %v6300_v38 = vpop.f32.mrf.mxu0  ;;  %v6507_v43 = vpop.f32.mrf.mxu2 }
0x15d0   :  { %v6547_v30 = vadd.f32 %v6507_v43, %v6418_v33  ;;  %v6338_v28 = vadd.f32 %v12976_v27, %v6300_v38 }
0x15d2   :  { %v6563_v49 = vmax.f32 %v6547_v30, 0.0  ;;  %v6419_v58 = vadd.f32 %v6381_v21, %v6338_v28  ;;  %v6402_v60 = vpop.f32.mrf.mxu1 }
0x15d4   :  { %8190 = vmatmul.msk.f32.gmra.mxu0 %vm1214_vm5, %v6563_v49 }
0x15d7   :  { %v6303_v20 = vpop.f32.mrf.mxu0  ;;  %v6510_v50 = vpop.f32.mrf.mxu2 }
0x15d8   :  { %v6548_v47 = vadd.f32 %v6510_v50, %v6419_v58  ;;  %v6339_v22 = vadd.f32 %v12976_v27, %v6303_v20 }
0x15da   :  { %v6564_v40 = vmax.f32 %v6548_v47, 0.0  ;;  %v6420_v53 = vadd.f32 %v6384_v41, %v6339_v22  ;;  %v6405_v35 = vpop.f32.mrf.mxu1  ;;  %v7030_v47 = vld [vmem:[%s13288_s1 + $0x1b0] sm:$0xff] }
0x15db   :  { %7091 = vmatpush.msra.mxu2 %v7030_v47 }
0x15dc   :  { %8191 = vmatmul.msk.f32.gmra.mxu0 %vm1214_vm5, %v6564_v40 }
0x15df   :  { %v6306_v32 = vpop.f32.mrf.mxu0  ;;  %v6513_v48 = vpop.f32.mrf.mxu2 }
0x15e0   :  { %v6549_v23 = vadd.f32 %v6513_v48, %v6420_v53  ;;  %v6340_v29 = vadd.f32 %v12976_v27, %v6306_v32 }
0x15e2   :  { %v6565_v12 = vmax.f32 %v6549_v23, 0.0  ;;  %v6421_v62 = vadd.f32 %v6387_v17, %v6340_v29  ;;  %v6408_v48 = vpop.f32.mrf.mxu1  ;;  %v7260_v29 = vld [vmem:[%s13288_s1 + $0x1c0] sm:$0xf] }
0x15e3   :  { %8266 = vmatpush.msk.msra.mxu0 %vm80_vm0, %v7260_v29 }
0x15e4   :  { %8192 = vmatmul.msk.f32.gmra.mxu0 %vm1214_vm5, %v6565_v12 }
0x15e7   :  { %v6309_v39 = vpop.f32.mrf.mxu0  ;;  %v6516_v1 = vpop.f32.mrf.mxu2 }
0x15e8   :  { %v6550_v51 = vadd.f32 %v6516_v1, %v6421_v62  ;;  %v6341_v56 = vadd.f32 %v12976_v27, %v6309_v39 }
0x15ea   :  { %v6566_v19 = vmax.f32 %v6550_v51, 0.0  ;;  %v6422_v5 = vadd.f32 %v6390_v59, %v6341_v56  ;;  %v6411_v51 = vpop.f32.mrf.mxu1 }
0x15ec   :  { %8193 = vmatmul.msk.f32.gmra.mxu0 %vm1214_vm5, %v6566_v19 }
0x15ef   :  { %v6312_v37 = vpop.f32.mrf.mxu0  ;;  %v6519_v57 = vpop.f32.mrf.mxu2 }
0x15f0   :  { %v6551_v24 = vadd.f32 %v6519_v57, %v6422_v5  ;;  %v6342_v8 = vadd.f32 %v12976_v27, %v6312_v37  ;;  %v13029_v37 = vld [vmem:[%s13288_s1 + $0xf0] ss:$0 sm:$0xff] }
0x15f1   :  { %v6694_v57 = vadd.f32 %v13029_v37, %v12767_v4  ;;  %v6696_v4 = vadd.f32 %v13029_v37, %v12787_v7  ;;  %v6698_v7 = vadd.f32 %v13029_v37, %v12811_v11  ;;  %v6700_v11 = vadd.f32 %v13029_v37, %v12839_v44 }
0x15f2   :  { %v6567_v63 = vmax.f32 %v6551_v24, 0.0  ;;  %v6423_v55 = vadd.f32 %v6393_v14, %v6342_v8 }
0x15f4   :  { %8194 = vmatmul.msk.f32.gmra.mxu0 %vm1214_vm5, %v6567_v63  ;;  %v7029_v63 = vld [vmem:[%s13288_s1 + $0x1a8] sm:$0xff] }
0x15f5   :  { %7092 = vmatpush.msra.mxu2 %v7029_v63 }
0x15f7   :  { %v6315_v10 = vpop.f32.mrf.mxu0  ;;  %v6522_v18 = vpop.f32.mrf.mxu2 }
0x15f8   :  { %v6552_v26 = vadd.f32 %v6522_v18, %v6423_v55  ;;  %v6343_v3 = vadd.f32 %v12976_v27, %v6315_v10 }
0x15fa   :  { %v6568_v42 = vmax.f32 %v6552_v26, 0.0  ;;  %v6424_v21 = vadd.f32 %v6396_v13, %v6343_v3  ;;  %v6695_v13 = vadd.f32 %v13029_v37, %v12778_v46  ;;  %v7028_v46 = vld [vmem:[%s13288_s1 + $0x1a0] sm:$0xff] }
0x15fb   :  { %7093 = vmatpush.msra.mxu2 %v7028_v46  ;;  %v13101_v46 = vld [vmem:[%s13288_s1 + $0x138] ss:$0 sm:$0xff] }
0x15fc   :  { %8195 = vmatmul.msk.f32.gmra.mxu0 %vm1214_vm5, %v6568_v42  ;;  %v6697_v42 = vadd.f32 %v13029_v37, %v12795_v15  ;;  %v6699_v15 = vadd.f32 %v13029_v37, %v12819_v2  ;;  %v7027_v2 = vld [vmem:[%s13288_s1 + $0x198] sm:$0xff] }
0x15fd   :  { %7094 = vmatpush.msra.mxu2 %v7027_v2 }
0x15ff   :  { %v6318_v0 = vpop.f32.mrf.mxu0  ;;  %v6525_v45 = vpop.f32.mrf.mxu2 }
0x1600   :  { %v6553_v54 = vadd.f32 %v6525_v45, %v6424_v21  ;;  %v6344_v31 = vadd.f32 %v12976_v27, %v6318_v0 }
0x1602   :  { %v6569_v36 = vmax.f32 %v6553_v54, 0.0  ;;  %v6425_v34 = vadd.f32 %v6399_v6, %v6344_v31 }
0x1604   :  { %8196 = vmatmul.msk.f32.gmra.mxu0 %vm1214_vm5, %v6569_v36 }
0x1607   :  { %v6321_v61 = vpop.f32.mrf.mxu0  ;;  %v6528_v41 = vpop.f32.mrf.mxu2 }
0x1608   :  { %v6554_v33 = vadd.f32 %v6528_v41, %v6425_v34  ;;  %v6345_v38 = vadd.f32 %v12976_v27, %v6321_v61  ;;  %v7259_v34 = vld [vmem:[%s13288_s1 + $0x1b8] sm:$0xff]  ;;  %v6669_v61 = vpop.f32.mrf.mxu3 }
0x1609   :  { %7327 = vmatpush.msra.mxu0 %v7259_v34  ;;  %v6702_v44 = vadd.f32 %v13029_v37, %v6669_v61 }
0x160a   :  { %v6570_v43 = vmax.f32 %v6554_v33, 0.0  ;;  %v6426_v30 = vadd.f32 %v6402_v60, %v6345_v38 }
0x160c   :  { %8197 = vmatmul.msk.f32.gmra.mxu0 %vm1214_vm5, %v6570_v43  ;;  %v6701_v43 = vadd.f32 %v13029_v37, %v12862_v52  ;;  %v7026_v52 = vld [vmem:[%s13288_s1 + $0x190] sm:$0xff] }
0x160d   :  { %7095 = vmatpush.msra.mxu2 %v7026_v52  ;;  %v8227_v52 = vld [vmem:[%s13289_s0 + $0x648] sm:$0xff] }
0x160f   :  { %v6324_v28 = vpop.f32.mrf.mxu0  ;;  %v6531_v49 = vpop.f32.mrf.mxu2 }
0x1610   :  { %v6555_v17 = vadd.f32 %v6531_v49, %v6426_v30  ;;  %v6346_v58 = vadd.f32 %v12976_v27, %v6324_v28  ;;  %v6672_v49 = vpop.f32.mrf.mxu3 }
0x1611   :  { %v6703_v47 = vadd.f32 %v13029_v37, %v6672_v49 }
0x1612   :  { %v6571_v20 = vmax.f32 %v6555_v17, 0.0  ;;  %v6427_v50 = vadd.f32 %v6405_v35, %v6346_v58 }
0x1614   :  { %8198 = vmatmul.msk.f32.gmra.mxu0 %vm1214_vm5, %v6571_v20 }
0x1617   :  { %v6327_v22 = vpop.f32.mrf.mxu0  ;;  %v6534_v40 = vpop.f32.mrf.mxu2 }
0x1618   :  { %v6556_v53 = vadd.f32 %v6534_v40, %v6427_v50  ;;  %v6347_v59 = vadd.f32 %v12976_v27, %v6327_v22  ;;  %v6675_v50 = vpop.f32.mrf.mxu3 }
0x161a   :  { %v6572_v32 = vmax.f32 %v6556_v53, 0.0  ;;  %v6428_v23 = vadd.f32 %v6408_v48, %v6347_v59 }
0x161c   :  { %8199 = vmatmul.msk.f32.gmra.mxu0 %vm1214_vm5, %v6572_v32  ;;  %v6704_v32 = vadd.f32 %v13029_v37, %v6675_v50  ;;  %v8226_v50 = vld [vmem:[%s13289_s0 + $0x640] sm:$0xff] }
0x161f   :  { %v6330_v12 = vpop.f32.mrf.mxu0  ;;  %v6537_v9 = vpop.f32.mrf.mxu2 }
0x1620   :  { %v6557_v62 = vadd.f32 %v6537_v9, %v6428_v23  ;;  %v6348_v39 = vadd.f32 %v12976_v27, %v6330_v12  ;;  %v6678_v59 = vpop.f32.mrf.mxu3 }
0x1621   :  { %v6705_v12 = vadd.f32 %v13029_v37, %v6678_v59 }
0x1622   :  { %v6573_v1 = vmax.f32 %v6557_v62, 0.0  ;;  %v6429_v14 = vadd.f32 %v6411_v51, %v6348_v39 }
0x1624   :  { %8200 = vmatmul.msk.f32.gmra.mxu0 %vm1214_vm5, %v6573_v1 }
0x1627   :  { %v6540_v56 = vpop.f32.mrf.mxu2 }
0x1628   :  { %v6558_v19 = vadd.f32 %v6540_v56, %v6429_v14  ;;  %v6681_v9 = vpop.f32.mrf.mxu3 }
0x1629   :  { %v6706_v51 = vadd.f32 %v13029_v37, %v6681_v9 }
0x162a   :  { %v6574_v5 = vmax.f32 %v6558_v19, 0.0 }
0x162c   :  { %8201 = vmatmul.msk.f32.gmra.mxu0 %vm1214_vm5, %v6574_v5 }
0x1630   :  { %v6684_v19 = vpop.f32.mrf.mxu3 }
0x1631   :  { %v6779_v24 = vpop.f32.mrf.mxu0 }
0x1632   :  { %v6827_v27 = vadd.f32 %v6779_v24, %v6694_v57  ;;  %v6707_v57 = vadd.f32 %v13029_v37, %v6684_v19 }
0x1634   :  { %v6843_v8 = vmax.f32 %v6827_v27, 0.0 }
0x1636   :  { %8202 = vmatmul.msk.f32.vlgmr.msrb.gmra.mxu1 %vm6869_vm8, %v6843_v8 }
0x1638   :  { %v6687_v63 = vpop.f32.mrf.mxu3 }
0x1639   :  { %v6782_v16 = vpop.f32.mrf.mxu0 }
0x163a   :  { %v6828_v55 = vadd.f32 %v6782_v16, %v6695_v13  ;;  %v6708_v13 = vadd.f32 %v13029_v37, %v6687_v63  ;;  %v8218_v16 = vld [vmem:[%s13289_s0 + $0x600] sm:$0xff] }
0x163b   :  { %8267 = vmatmul.msk.f32.vlgmr.msra.gmra.mxu0 %vm31_vm1, %v8218_v16 }
0x163c   :  { %v6844_v10 = vmax.f32 %v6828_v55, 0.0 }
0x163e   :  { %8203 = vmatmul.msk.f32.gmra.mxu1 %vm6869_vm8, %v6844_v10 }
0x1641   :  { %v6785_v18 = vpop.f32.mrf.mxu0 }
0x1642   :  { %v6829_v26 = vadd.f32 %v6785_v18, %v6696_v4  ;;  %v7430_v18 = vld [vmem:[%s13288_s1 + $0x1e8] sm:$0xff] }
0x1643   :  { %7493 = vmatpush.msra.mxu1 %v7430_v18 }
0x1644   :  { %v6845_v3 = vmax.f32 %v6829_v26, 0.0  ;;  %v6690_v26 = vpop.f32.mrf.mxu3 }
0x1646   :  { %8204 = vmatmul.msk.f32.gmra.mxu1 %vm6869_vm8, %v6845_v3  ;;  %v6709_v3 = vadd.f32 %v13029_v37, %v6690_v26  ;;  %v8220_v37 = vld [vmem:[%s13289_s0 + $0x610] sm:$0xff] }
0x1649   :  { %v6788_v6 = vpop.f32.mrf.mxu0 }
0x164a   :  { %v6830_v21 = vadd.f32 %v6788_v6, %v6697_v42  ;;  %v8219_v42 = vld [vmem:[%s13289_s0 + $0x608] sm:$0xff] }
0x164b   :  { %8268 = vmatmul.msk.f32.gmra.mxu0 %vm31_vm1, %v8219_v42 }
0x164c   :  { %v6846_v0 = vmax.f32 %v6830_v21, 0.0 }
0x164e   :  { %8205 = vmatmul.msk.f32.gmra.mxu1 %vm6869_vm8, %v6846_v0 }
0x1651   :  { %v6791_v45 = vpop.f32.mrf.mxu0 }
0x1652   :  { %v6831_v54 = vadd.f32 %v6791_v45, %v6698_v7 }
0x1653   :  { %8269 = vmatmul.msk.f32.gmra.mxu0 %vm31_vm1, %v8220_v37 }
0x1654   :  { %v6847_v31 = vmax.f32 %v6831_v54, 0.0 }
0x1656   :  { %8206 = vmatmul.msk.f32.gmra.mxu1 %vm6869_vm8, %v6847_v31  ;;  %v8221_v31 = vld [vmem:[%s13289_s0 + $0x618] sm:$0xff] }
0x1659   :  { %v6794_v36 = vpop.f32.mrf.mxu0 }
0x165a   :  { %v6832_v25 = vadd.f32 %v6794_v36, %v6699_v15 }
0x165b   :  { %8270 = vmatmul.msk.f32.gmra.mxu0 %vm31_vm1, %v8221_v31 }
0x165c   :  { %v6848_v60 = vmax.f32 %v6832_v25, 0.0 }
0x165e   :  { %8207 = vmatmul.msk.f32.gmra.mxu1 %vm6869_vm8, %v6848_v60  ;;  %v8222_v60 = vld [vmem:[%s13289_s0 + $0x620] sm:$0xff] }
0x1661   :  { %v6797_v41 = vpop.f32.mrf.mxu0 }
0x1662   :  { %v6833_v33 = vadd.f32 %v6797_v41, %v6700_v11  ;;  %v7429_v41 = vld [vmem:[%s13288_s1 + $0x1e0] sm:$0xff] }
0x1663   :  { %8271 = vmatmul.msk.f32.gmra.mxu0 %vm31_vm1, %v8222_v60  ;;  %7494 = vmatpush.msra.mxu1 %v7429_v41 }
0x1664   :  { %v6849_v38 = vmax.f32 %v6833_v33, 0.0  ;;  %v8223_v33 = vld [vmem:[%s13289_s0 + $0x628] sm:$0xff] }
0x1666   :  { %8208 = vmatmul.msk.f32.gmra.mxu1 %vm6869_vm8, %v6849_v38 }
0x1669   :  { %v6800_v30 = vpop.f32.mrf.mxu0 }
0x166a   :  { %v6834_v28 = vadd.f32 %v6800_v30, %v6701_v43  ;;  %v8224_v30 = vld [vmem:[%s13289_s0 + $0x630] sm:$0xff] }
0x166b   :  { %8272 = vmatmul.msk.f32.gmra.mxu0 %vm31_vm1, %v8223_v33 }
0x166c   :  { %v6850_v17 = vmax.f32 %v6834_v28, 0.0 }
0x166e   :  { %8209 = vmatmul.msk.f32.gmra.mxu1 %vm6869_vm8, %v6850_v17 }
0x1671   :  { %v6803_v35 = vpop.f32.mrf.mxu0 }
0x1672   :  { %v6835_v58 = vadd.f32 %v6803_v35, %v6702_v44  ;;  %v8225_v44 = vld [vmem:[%s13289_s0 + $0x638] sm:$0xff] }
0x1673   :  { %8273 = vmatmul.msk.f32.gmra.mxu0 %vm31_vm1, %v8224_v30 }
0x1674   :  { %v6851_v20 = vmax.f32 %v6835_v58, 0.0 }
0x1676   :  { %8210 = vmatmul.msk.f32.gmra.mxu1 %vm6869_vm8, %v6851_v20 }
0x1679   :  { %v6806_v22 = vpop.f32.mrf.mxu0 }
0x167a   :  { %v6836_v40 = vadd.f32 %v6806_v22, %v6703_v47 }
0x167b   :  { %8274 = vmatmul.msk.f32.gmra.mxu0 %vm31_vm1, %v8225_v44 }
0x167c   :  { %v6852_v53 = vmax.f32 %v6836_v40, 0.0 }
0x167e   :  { %8211 = vmatmul.msk.f32.gmra.mxu1 %vm6869_vm8, %v6852_v53  ;;  %v7428_v53 = vld [vmem:[%s13288_s1 + $0x1d8] sm:$0xff] }
0x167f   :  { %7495 = vmatpush.msra.mxu1 %v7428_v53 }
0x1681   :  { %v6809_v48 = vpop.f32.mrf.mxu0 }
0x1682   :  { %v6837_v23 = vadd.f32 %v6809_v48, %v6704_v32 }
0x1683   :  { %8275 = vmatmul.msk.f32.gmra.mxu0 %vm31_vm1, %v8226_v50 }
0x1684   :  { %v6853_v29 = vmax.f32 %v6837_v23, 0.0  ;;  %v8228_v23 = vld [vmem:[%s13289_s0 + $0x650] sm:$0xff] }
0x1686   :  { %8212 = vmatmul.msk.f32.gmra.mxu1 %vm6869_vm8, %v6853_v29 }
0x1689   :  { %v6812_v62 = vpop.f32.mrf.mxu0 }
0x168a   :  { %v6838_v39 = vadd.f32 %v6812_v62, %v6705_v12  ;;  %v8229_v62 = vld [vmem:[%s13289_s0 + $0x658] sm:$0xff] }
0x168b   :  { %8276 = vmatmul.msk.f32.gmra.mxu0 %vm31_vm1, %v8227_v52 }
0x168c   :  { %v6854_v1 = vmax.f32 %v6838_v39, 0.0 }
0x168e   :  { %8213 = vmatmul.msk.f32.gmra.mxu1 %vm6869_vm8, %v6854_v1 }
0x1691   :  { %v6815_v14 = vpop.f32.mrf.mxu0 }
0x1692   :  { %v6839_v56 = vadd.f32 %v6815_v14, %v6706_v51  ;;  %v8230_v14 = vld [vmem:[%s13289_s0 + $0x660] sm:$0xff] }
0x1693   :  { %8277 = vmatmul.msk.f32.gmra.mxu0 %vm31_vm1, %v8228_v23 }
0x1694   :  { %v6855_v5 = vmax.f32 %v6839_v56, 0.0 }
0x1696   :  { %8214 = vmatmul.msk.f32.gmra.mxu1 %vm6869_vm8, %v6855_v5 }
0x1699   :  { %v6818_v24 = vpop.f32.mrf.mxu0 }
0x169a   :  { %v6840_v27 = vadd.f32 %v6818_v24, %v6707_v57  ;;  %v7427_v57 = vld [vmem:[%s13288_s1 + $0x1d0] sm:$0xff]  ;;  %v8231_v24 = vld [vmem:[%s13289_s0 + $0x668] sm:$0xff] }
0x169b   :  { %8278 = vmatmul.msk.f32.gmra.mxu0 %vm31_vm1, %v8229_v62  ;;  %7496 = vmatpush.msra.mxu1 %v7427_v57 }
0x169c   :  { %v6856_v8 = vmax.f32 %v6840_v27, 0.0 }
0x169e   :  { %8215 = vmatmul.msk.f32.gmra.mxu1 %vm6869_vm8, %v6856_v8 }
0x16a1   :  { %v6821_v55 = vpop.f32.mrf.mxu0 }
0x16a2   :  { %v6841_v10 = vadd.f32 %v6821_v55, %v6708_v13  ;;  %v8232_v13 = vld [vmem:[%s13289_s0 + $0x670] sm:$0xff] }
0x16a3   :  { %8279 = vmatmul.msk.f32.gmra.mxu0 %vm31_vm1, %v8230_v14 }
0x16a4   :  { %v6857_v4 = vmax.f32 %v6841_v10, 0.0 }
0x16a6   :  { %8216 = vmatmul.msk.f32.gmra.mxu1 %vm6869_vm8, %v6857_v4  ;;  %v8233_v4 = vld [vmem:[%s13289_s0 + $0x678] sm:$0xff] }
0x16a9   :  { %v6824_v6 = vpop.f32.mrf.mxu0 }
0x16aa   :  { %v6842_v21 = vadd.f32 %v6824_v6, %v6709_v3 }
0x16ab   :  { %8280 = vmatmul.msk.f32.gmra.mxu0 %vm31_vm1, %v8231_v24 }
0x16ac   :  { %v6858_v0 = vmax.f32 %v6842_v21, 0.0 }
0x16ae   :  { %8217 = vmatmul.msk.f32.gmra.mxu1 %vm6869_vm8, %v6858_v0 }
0x16b3   :  { %v6935_v7 = vpop.f32.mrf.mxu1  ;;  %8281 = vmatmul.msk.f32.gmra.mxu0 %vm31_vm1, %v8232_v13 }
0x16b4   :  { %v6936_v45 = vadd.f32 %v13101_v46, %v6935_v7 }
0x16b6   :  { %v6983_v54 = vmax.f32 %v6936_v45, 0.0  ;;  %v7211_v45 = vpop.f32.mrf.mxu3 }
0x16b8   :  { %8234 = vmatmul.msk.f32.vlgmr.msra.gmra.mxu2 %vm7031_vm9, %v6983_v54  ;;  %v7329_v42 = vpop.f32.mrf.mxu0 }
0x16bb   :  { %v6938_v15 = vpop.f32.mrf.mxu1  ;;  %8282 = vmatmul.msk.f32.gmra.mxu0 %vm31_vm1, %v8233_v4 }
0x16bc   :  { %v6939_v36 = vadd.f32 %v13101_v46, %v6938_v15 }
0x16be   :  { %v6984_v25 = vmax.f32 %v6939_v36, 0.0  ;;  %v7214_v36 = vpop.f32.mrf.mxu3 }
0x16c0   :  { %8235 = vmatmul.msk.f32.gmra.mxu2 %vm7031_vm9, %v6984_v25 }
0x16c3   :  { %v6941_v34 = vpop.f32.mrf.mxu1 }
0x16c4   :  { %v6942_v11 = vadd.f32 %v13101_v46, %v6941_v34 }
0x16c6   :  { %v6985_v61 = vmax.f32 %v6942_v11, 0.0  ;;  %v13203_v11 = vld [vmem:[%s13288_s1 + $0x1c8] ss:$0 sm:$0xff]  ;;  %v7217_v41 = vpop.f32.mrf.mxu3 }
0x16c8   :  { %8236 = vmatmul.msk.f32.gmra.mxu2 %vm7031_vm9, %v6985_v61  ;;  %v7332_v37 = vpop.f32.mrf.mxu0 }
0x16cb   :  { %v6944_v38 = vpop.f32.mrf.mxu1 }
0x16cc   :  { %v6945_v2 = vadd.f32 %v13101_v46, %v6944_v38 }
0x16ce   :  { %v6986_v43 = vmax.f32 %v6945_v2, 0.0 }
0x16d0   :  { %8237 = vmatmul.msk.f32.gmra.mxu2 %vm7031_vm9, %v6986_v43  ;;  %v7335_v15 = vpop.f32.mrf.mxu0 }
0x16d3   :  { %v6947_v28 = vpop.f32.mrf.mxu1 }
0x16d4   :  { %v6948_v49 = vadd.f32 %v13101_v46, %v6947_v28  ;;  %v7220_v28 = vpop.f32.mrf.mxu3 }
0x16d6   :  { %v6987_v17 = vmax.f32 %v6948_v49, 0.0 }
0x16d8   :  { %8238 = vmatmul.msk.f32.gmra.mxu2 %vm7031_vm9, %v6987_v17  ;;  %v7338_v60 = vpop.f32.mrf.mxu0 }
0x16db   :  { %v6950_v35 = vpop.f32.mrf.mxu1 }
0x16dc   :  { %v6951_v58 = vadd.f32 %v13101_v46, %v6950_v35 }
0x16de   :  { %v6988_v20 = vmax.f32 %v6951_v58, 0.0 }
0x16e0   :  { %8239 = vmatmul.msk.f32.gmra.mxu2 %vm7031_vm9, %v6988_v20  ;;  %v7341_v43 = vpop.f32.mrf.mxu0 }
0x16e3   :  { %v6953_v47 = vpop.f32.mrf.mxu1 }
0x16e4   :  { %v6954_v22 = vadd.f32 %v13101_v46, %v6953_v47  ;;  %v7223_v47 = vpop.f32.mrf.mxu3 }
0x16e6   :  { %v6989_v40 = vmax.f32 %v6954_v22, 0.0 }
0x16e8   :  { %8240 = vmatmul.msk.f32.gmra.mxu2 %vm7031_vm9, %v6989_v40  ;;  %v7344_v20 = vpop.f32.mrf.mxu0 }
0x16eb   :  { %v6956_v59 = vpop.f32.mrf.mxu1 }
0x16ec   :  { %v6957_v32 = vadd.f32 %v13101_v46, %v6956_v59 }
0x16ee   :  { %v6990_v48 = vmax.f32 %v6957_v32, 0.0 }
0x16f0   :  { %8241 = vmatmul.msk.f32.gmra.mxu2 %vm7031_vm9, %v6990_v48  ;;  %v7347_v32 = vpop.f32.mrf.mxu0  ;;  %v7226_v48 = vpop.f32.mrf.mxu3 }
0x16f3   :  { %v6959_v29 = vpop.f32.mrf.mxu1 }
0x16f4   :  { %v6960_v12 = vadd.f32 %v13101_v46, %v6959_v29 }
0x16f6   :  { %v6991_v9 = vmax.f32 %v6960_v12, 0.0 }
0x16f8   :  { %8242 = vmatmul.msk.f32.gmra.mxu2 %vm7031_vm9, %v6991_v9  ;;  %v7229_v14 = vpop.f32.mrf.mxu3 }
0x16fb   :  { %v6962_v39 = vpop.f32.mrf.mxu1 }
0x16fc   :  { %v6963_v1 = vadd.f32 %v13101_v46, %v6962_v39 }
0x16fe   :  { %v6992_v51 = vmax.f32 %v6963_v1, 0.0 }
0x1700   :  { %8243 = vmatmul.msk.f32.gmra.mxu2 %vm7031_vm9, %v6992_v51  ;;  %v7350_v51 = vpop.f32.mrf.mxu0 }
0x1703   :  { %v6965_v56 = vpop.f32.mrf.mxu1 }
0x1704   :  { %v6966_v19 = vadd.f32 %v13101_v46, %v6965_v56 }
0x1706   :  { %v6993_v5 = vmax.f32 %v6966_v19, 0.0 }
0x1708   :  { %8244 = vmatmul.msk.f32.gmra.mxu2 %vm7031_vm9, %v6993_v5 }
0x170b   :  { %v6968_v27 = vpop.f32.mrf.mxu1 }
0x170c   :  { %v6969_v8 = vadd.f32 %v13101_v46, %v6968_v27  ;;  %v7232_v27 = vpop.f32.mrf.mxu3 }
0x170e   :  { %v6994_v63 = vmax.f32 %v6969_v8, 0.0 }
0x1710   :  { %8245 = vmatmul.msk.f32.gmra.mxu2 %vm7031_vm9, %v6994_v63  ;;  %v7353_v63 = vpop.f32.mrf.mxu0 }
0x1713   :  { %v6971_v16 = vpop.f32.mrf.mxu1 }
0x1714   :  { %v6972_v55 = vadd.f32 %v13101_v46, %v6971_v16  ;;  %v7235_v4 = vpop.f32.mrf.mxu3 }
0x1716   :  { %v6995_v10 = vmax.f32 %v6972_v55, 0.0 }
0x1718   :  { %8246 = vmatmul.msk.f32.gmra.mxu2 %vm7031_vm9, %v6995_v10 }
0x171b   :  { %v6974_v18 = vpop.f32.mrf.mxu1 }
0x171c   :  { %v6975_v26 = vadd.f32 %v13101_v46, %v6974_v18 }
0x171e   :  { %v6996_v3 = vmax.f32 %v6975_v26, 0.0 }
0x1720   :  { %8247 = vmatmul.msk.f32.gmra.mxu2 %vm7031_vm9, %v6996_v3  ;;  %v7356_v3 = vpop.f32.mrf.mxu0 }
0x1723   :  { %v6977_v6 = vpop.f32.mrf.mxu1 }
0x1724   :  { %v6978_v21 = vadd.f32 %v13101_v46, %v6977_v6 }
0x1726   :  { %v6997_v0 = vmax.f32 %v6978_v21, 0.0 }
0x1728   :  { %8248 = vmatmul.msk.f32.gmra.mxu2 %vm7031_vm9, %v6997_v0 }
0x172b   :  { %v6980_v7 = vpop.f32.mrf.mxu1 }
0x172c   :  { %v6981_v54 = vadd.f32 %v13101_v46, %v6980_v7 }
0x172e   :  { %v6998_v31 = vmax.f32 %v6981_v54, 0.0  ;;  %v7359_v54 = vpop.f32.mrf.mxu0 }
0x1730   :  { %8249 = vmatmul.msk.f32.gmra.mxu2 %vm7031_vm9, %v6998_v31 }
0x173b   :  { %v7097_v25 = vpop.f32.mrf.mxu2 }
0x173c   :  { %v7212_v34 = vadd.f32 %v7211_v45, %v7097_v25 }
0x173e   :  { %v7377_v61 = vadd.f32 %v7329_v42, %v7212_v34 }
0x1740   :  { %v7395_v33 = vadd.f32 %v13203_v11, %v7377_v61 }
0x1742   :  { %v7411_v38 = vmax.f32 %v7395_v33, 0.0  ;;  %v7362_v33 = vpop.f32.mrf.mxu0 }
0x1743   :  { %v7100_v2 = vpop.f32.mrf.mxu2 }
0x1744   :  { %v7215_v46 = vadd.f32 %v7214_v36, %v7100_v2  ;;  %8283 = vmatmul.msk.f32.vlgmr.msra.gmra.mxu1 %vm1214_vm5, %v7411_v38 }
0x1746   :  { %v7378_v30 = vadd.f32 %v7332_v37, %v7215_v46  ;;  %v7238_v37 = vpop.f32.mrf.mxu3 }
0x1748   :  { %v7396_v49 = vadd.f32 %v13203_v11, %v7378_v30 }
0x174a   :  { %v7412_v17 = vmax.f32 %v7396_v49, 0.0 }
0x174b   :  { %v7103_v44 = vpop.f32.mrf.mxu2 }
0x174c   :  { %v7218_v35 = vadd.f32 %v7217_v41, %v7103_v44  ;;  %8284 = vmatmul.msk.f32.gmra.mxu1 %vm1214_vm5, %v7412_v17  ;;  %v7365_v17 = vpop.f32.mrf.mxu0 }
0x174e   :  { %v7379_v58 = vadd.f32 %v7335_v15, %v7218_v35  ;;  %v7241_v25 = vpop.f32.mrf.mxu3 }
0x1750   :  { %v7397_v50 = vadd.f32 %v13203_v11, %v7379_v58 }
0x1752   :  { %v7413_v22 = vmax.f32 %v7397_v50, 0.0 }
0x1753   :  { %v7106_v40 = vpop.f32.mrf.mxu2 }
0x1754   :  { %v7221_v53 = vadd.f32 %v7220_v28, %v7106_v40  ;;  %8285 = vmatmul.msk.f32.gmra.mxu1 %vm1214_vm5, %v7413_v22  ;;  %v7368_v40 = vpop.f32.mrf.mxu0 }
0x1756   :  { %v7380_v52 = vadd.f32 %v7338_v60, %v7221_v53  ;;  %v7244_v46 = vpop.f32.mrf.mxu3 }
0x1758   :  { %v7398_v59 = vadd.f32 %v13203_v11, %v7380_v52 }
0x175a   :  { %v7414_v23 = vmax.f32 %v7398_v59, 0.0 }
0x175b   :  { %v7109_v29 = vpop.f32.mrf.mxu2 }
0x175c   :  { %v7224_v12 = vadd.f32 %v7223_v47, %v7109_v29  ;;  %8286 = vmatmul.msk.f32.gmra.mxu1 %vm1214_vm5, %v7414_v23 }
0x175e   :  { %v7381_v9 = vadd.f32 %v7341_v43, %v7224_v12  ;;  %v7247_v35 = vpop.f32.mrf.mxu3  ;;  %v7371_v12 = vpop.f32.mrf.mxu0 }
0x1760   :  { %v7399_v62 = vadd.f32 %v13203_v11, %v7381_v9 }
0x1762   :  { %v7415_v39 = vmax.f32 %v7399_v62, 0.0 }
0x1763   :  { %v7112_v1 = vpop.f32.mrf.mxu2 }
0x1764   :  { %v7227_v56 = vadd.f32 %v7226_v48, %v7112_v1  ;;  %8287 = vmatmul.msk.f32.gmra.mxu1 %vm1214_vm5, %v7415_v39 }
0x1766   :  { %v7382_v19 = vadd.f32 %v7344_v20, %v7227_v56  ;;  %v7250_v52 = vpop.f32.mrf.mxu3 }
0x1768   :  { %v7400_v5 = vadd.f32 %v13203_v11, %v7382_v19 }
0x176a   :  { %v7416_v57 = vmax.f32 %v7400_v5, 0.0 }
0x176b   :  { %v7115_v24 = vpop.f32.mrf.mxu2 }
0x176c   :  { %v7230_v8 = vadd.f32 %v7229_v14, %v7115_v24  ;;  %8288 = vmatmul.msk.f32.gmra.mxu1 %vm1214_vm5, %v7416_v57  ;;  %v7374_v57 = vpop.f32.mrf.mxu0 }
0x176e   :  { %v7383_v13 = vadd.f32 %v7347_v32, %v7230_v8  ;;  %v7253_v9 = vpop.f32.mrf.mxu3 }
0x1770   :  { %v7401_v16 = vadd.f32 %v13203_v11, %v7383_v13  ;;  %v8314_v13 = vld [vmem:[%s13288_s1 + $0x1f0] ss:$0 sm:$0xff] }
0x1772   :  { %v7417_v55 = vmax.f32 %v7401_v16, 0.0 }
0x1773   :  { %v7118_v10 = vpop.f32.mrf.mxu2 }
0x1774   :  { %v7233_v18 = vadd.f32 %v7232_v27, %v7118_v10  ;;  %8289 = vmatmul.msk.f32.gmra.mxu1 %vm1214_vm5, %v7417_v55 }
0x1776   :  { %v7384_v26 = vadd.f32 %v7350_v51, %v7233_v18  ;;  %v7256_v56 = vpop.f32.mrf.mxu3 }
0x1778   :  { %v7402_v42 = vadd.f32 %v13203_v11, %v7384_v26 }
0x177a   :  { %v7418_v6 = vmax.f32 %v7402_v42, 0.0 }
0x177b   :  { %v7121_v21 = vpop.f32.mrf.mxu2 }
0x177c   :  { %v7236_v0 = vadd.f32 %v7235_v4, %v7121_v21  ;;  %8290 = vmatmul.msk.f32.gmra.mxu1 %vm1214_vm5, %v7418_v6 }
0x177e   :  { %v7385_v7 = vadd.f32 %v7353_v63, %v7236_v0 }
0x1780   :  { %v7403_v45 = vadd.f32 %v13203_v11, %v7385_v7 }
0x1782   :  { %v7419_v31 = vmax.f32 %v7403_v45, 0.0 }
0x1783   :  { %v7124_v15 = vpop.f32.mrf.mxu2 }
0x1784   :  { %v7239_v36 = vadd.f32 %v7238_v37, %v7124_v15  ;;  %8291 = vmatmul.msk.f32.gmra.mxu1 %vm1214_vm5, %v7419_v31 }
0x1786   :  { %v7386_v60 = vadd.f32 %v7356_v3, %v7239_v36 }
0x1788   :  { %v7404_v34 = vadd.f32 %v13203_v11, %v7386_v60 }
0x178a   :  { %v7420_v61 = vmax.f32 %v7404_v34, 0.0 }
0x178b   :  { %v7127_v41 = vpop.f32.mrf.mxu2 }
0x178c   :  { %v7242_v38 = vadd.f32 %v7241_v25, %v7127_v41  ;;  %8292 = vmatmul.msk.f32.gmra.mxu1 %vm1214_vm5, %v7420_v61 }
0x178e   :  { %v7387_v2 = vadd.f32 %v7359_v54, %v7242_v38 }
0x1790   :  { %v7405_v43 = vadd.f32 %v13203_v11, %v7387_v2 }
0x1792   :  { %v7421_v30 = vmax.f32 %v7405_v43, 0.0 }
0x1793   :  { %v7130_v28 = vpop.f32.mrf.mxu2 }
0x1794   :  { %v7245_v49 = vadd.f32 %v7244_v46, %v7130_v28  ;;  %8293 = vmatmul.msk.f32.gmra.mxu1 %vm1214_vm5, %v7421_v30 }
0x1796   :  { %v7388_v44 = vadd.f32 %v7362_v33, %v7245_v49 }
0x1798   :  { %v7406_v58 = vadd.f32 %v13203_v11, %v7388_v44 }
0x179a   :  { %v7422_v20 = vmax.f32 %v7406_v58, 0.0 }
0x179b   :  { %v7133_v50 = vpop.f32.mrf.mxu2 }
0x179c   :  { %v7248_v47 = vadd.f32 %v7247_v35, %v7133_v50  ;;  %8294 = vmatmul.msk.f32.gmra.mxu1 %vm1214_vm5, %v7422_v20 }
0x179e   :  { %v7389_v22 = vadd.f32 %v7365_v17, %v7248_v47 }
0x17a0   :  { %v7407_v53 = vadd.f32 %v13203_v11, %v7389_v22 }
0x17a2   :  { %v7423_v59 = vmax.f32 %v7407_v53, 0.0 }
0x17a3   :  { %v7136_v32 = vpop.f32.mrf.mxu2 }
0x17a4   :  { %v7251_v48 = vadd.f32 %v7250_v52, %v7136_v32  ;;  %8295 = vmatmul.msk.f32.gmra.mxu1 %vm1214_vm5, %v7423_v59 }
0x17a6   :  { %v7390_v23 = vadd.f32 %v7368_v40, %v7251_v48 }
0x17a8   :  { %v7408_v29 = vadd.f32 %v13203_v11, %v7390_v23 }
0x17aa   :  { %v7424_v62 = vmax.f32 %v7408_v29, 0.0 }
0x17ab   :  { %v7139_v39 = vpop.f32.mrf.mxu2 }
0x17ac   :  { %v7254_v1 = vadd.f32 %v7253_v9, %v7139_v39  ;;  %8296 = vmatmul.msk.f32.gmra.mxu1 %vm1214_vm5, %v7424_v62 }
0x17ae   :  { %v7391_v51 = vadd.f32 %v7371_v12, %v7254_v1 }
0x17b0   :  { %v7409_v14 = vadd.f32 %v13203_v11, %v7391_v51 }
0x17b2   :  { %v7425_v19 = vmax.f32 %v7409_v14, 0.0 }
0x17b3   :  { %v7142_v5 = vpop.f32.mrf.mxu2 }
0x17b4   :  { %v7257_v24 = vadd.f32 %v7256_v56, %v7142_v5  ;;  %8297 = vmatmul.msk.f32.gmra.mxu1 %vm1214_vm5, %v7425_v19 }
0x17b6   :  { %v7392_v27 = vadd.f32 %v7374_v57, %v7257_v24 }
0x17b8   :  { %v7410_v8 = vadd.f32 %v13203_v11, %v7392_v27 }
0x17ba   :  { %v7426_v63 = vmax.f32 %v7410_v8, 0.0 }
0x17bc   :  { %8298 = vmatmul.msk.f32.gmra.mxu1 %vm1214_vm5, %v7426_v63 }
0x17c1   :  { %v7498_v16 = vpop.f32.mrf.mxu1 }
0x17c2   :  { %v7499_v55 = vadd.f32 %v8314_v13, %v7498_v16 }
0x17c4   :  { %7546 = vst [vmem:[%s13290_s2] sm:$0xff] %v7499_v55 }
0x17c9   :  { %v7501_v10 = vpop.f32.mrf.mxu1 }
0x17ca   :  { %v7502_v4 = vadd.f32 %v8314_v13, %v7501_v10 }
0x17cc   :  { %7547 = vst [vmem:[%s13290_s2 + $0x8] sm:$0xff] %v7502_v4 }
0x17d1   :  { %v7504_v11 = vpop.f32.mrf.mxu1 }
0x17d2   :  { %v7505_v18 = vadd.f32 %v8314_v13, %v7504_v11 }
0x17d4   :  { %7548 = vst [vmem:[%s13290_s2 + $0x10] sm:$0xff] %v7505_v18 }
0x17d9   :  { %v7507_v26 = vpop.f32.mrf.mxu1 }
0x17da   :  { %v7508_v3 = vadd.f32 %v8314_v13, %v7507_v26 }
0x17dc   :  { %7549 = vst [vmem:[%s13290_s2 + $0x18] sm:$0xff] %v7508_v3 }
0x17e1   :  { %v7510_v42 = vpop.f32.mrf.mxu1 }
0x17e2   :  { %v7511_v6 = vadd.f32 %v8314_v13, %v7510_v42 }
0x17e4   :  { %7550 = vst [vmem:[%s13290_s2 + $0x20] sm:$0xff] %v7511_v6 }
0x17e9   :  { %v7513_v21 = vpop.f32.mrf.mxu1 }
0x17ea   :  { %v7514_v0 = vadd.f32 %v8314_v13, %v7513_v21 }
0x17ec   :  { %7551 = vst [vmem:[%s13290_s2 + $0x28] sm:$0xff] %v7514_v0 }
0x17f1   :  { %v7516_v37 = vpop.f32.mrf.mxu1 }
0x17f2   :  { %v7517_v7 = vadd.f32 %v8314_v13, %v7516_v37 }
0x17f4   :  { %7552 = vst [vmem:[%s13290_s2 + $0x30] sm:$0xff] %v7517_v7 }
0x17f9   :  { %v7519_v45 = vpop.f32.mrf.mxu1 }
0x17fa   :  { %v7520_v54 = vadd.f32 %v8314_v13, %v7519_v45 }
0x17fc   :  { %7553 = vst [vmem:[%s13290_s2 + $0x38] sm:$0xff] %v7520_v54 }
0x1801   :  { %v7522_v31 = vpop.f32.mrf.mxu1 }
0x1802   :  { %v7523_v15 = vadd.f32 %v8314_v13, %v7522_v31 }
0x1804   :  { %7554 = vst [vmem:[%s13290_s2 + $0x40] sm:$0xff] %v7523_v15 }
0x1809   :  { %v7525_v36 = vpop.f32.mrf.mxu1 }
0x180a   :  { %v7526_v25 = vadd.f32 %v8314_v13, %v7525_v36 }
0x180c   :  { %7555 = vst [vmem:[%s13290_s2 + $0x48] sm:$0xff] %v7526_v25 }
0x1811   :  { %v7528_v60 = vpop.f32.mrf.mxu1 }
0x1812   :  { %v7529_v34 = vadd.f32 %v8314_v13, %v7528_v60 }
0x1814   :  { %7556 = vst [vmem:[%s13290_s2 + $0x50] sm:$0xff] %v7529_v34 }
0x1819   :  { %v7531_v61 = vpop.f32.mrf.mxu1 }
0x181a   :  { %v7532_v41 = vadd.f32 %v8314_v13, %v7531_v61 }
0x181c   :  { %7557 = vst [vmem:[%s13290_s2 + $0x58] sm:$0xff] %v7532_v41 }
0x1821   :  { %v7534_v33 = vpop.f32.mrf.mxu1 }
0x1822   :  { %v7535_v38 = vadd.f32 %v8314_v13, %v7534_v33 }
0x1824   :  { %7558 = vst [vmem:[%s13290_s2 + $0x60] sm:$0xff] %v7535_v38 }
0x1829   :  { %v7537_v2 = vpop.f32.mrf.mxu1 }
0x182a   :  { %v7538_v46 = vadd.f32 %v8314_v13, %v7537_v2 }
0x182c   :  { %7559 = vst [vmem:[%s13290_s2 + $0x68] sm:$0xff] %v7538_v46 }
0x1831   :  { %v7540_v43 = vpop.f32.mrf.mxu1 }
0x1832   :  { %v7541_v30 = vadd.f32 %v8314_v13, %v7540_v43 }
0x1834   :  { %7560 = vst [vmem:[%s13290_s2 + $0x70] sm:$0xff] %v7541_v30 }
0x1839   :  { %v7543_v28 = vpop.f32.mrf.mxu1 }
0x183a   :  { %v7544_v49 = vadd.f32 %v8314_v13, %v7543_v28 }
0x183c   :  { %7561 = vst [vmem:[%s13290_s2 + $0x78] sm:$0xff] %v7544_v49 }

</bundles_post_ra>
